<compile_context>
chip_gen: v5e
topology: v5e:2x2
jax: 0.10.0
libtpu: 0.0.40
codegen_flags: <defaults>
</compile_context>

<pallas_src>
import numpy as np
import jax
import jax.numpy as jnp
from jax.experimental import pallas as pl
from jax.experimental.pallas import tpu as pltpu

WIDTH = 128   # all layer widths padded to 128 lanes
N_SUB = 2     # 2-way batch sub-tile interleave inside the kernel

# 16 relaxed logic gates, each as (c0, c_a, c_b, c_ab) of c0 + ca*a + cb*b + cab*a*b
GATE_COEFFS = np.array(
    [
        [0, 0, 0, 0],    # FALSE
        [0, 0, 0, 1],    # a AND b
        [0, 1, 0, -1],   # a AND NOT b
        [0, 1, 0, 0],    # a
        [0, 0, 1, -1],   # NOT a AND b
        [0, 0, 1, 0],    # b
        [0, 1, 1, -2],   # XOR
        [0, 1, 1, -1],   # OR
        [1, -1, -1, 1],  # NOR
        [1, -1, -1, 2],  # XNOR
        [1, 0, -1, 0],   # NOT b
        [1, 0, -1, 1],   # a OR NOT b
        [1, -1, 0, 0],   # NOT a
        [1, -1, 0, 1],   # NOT a OR b
        [1, 0, 0, -1],   # NAND
        [1, 0, 0, 0],    # TRUE
    ],
    dtype=np.float32,
)

LAYER_SIZES = [128] * 16 + [64, 32, 16, 8, 4, 2, 1]


def init_logic_layers(key, input_size):
    """Deterministic synthetic parameters matching the module's __init__ shapes."""
    layers = []
    cur = input_size
    for out in LAYER_SIZES:
        key, k_logits, k_a, k_b = jax.random.split(key, 4)
        logits = jax.random.normal(k_logits, (out, 16), dtype=jnp.float32)
        a_idx = jax.random.randint(k_a, (out,), 0, cur)
        b_idx = jax.random.randint(k_b, (out,), 0, cur)
        layers.append((logits, a_idx, b_idx, cur, out))
        cur = out
    return layers


def build_kernel_params(layers, temperature):
    """Fold connections + gate softmax into padded selection / coefficient tensors (glue).

    Returns:
      sel: (L, 128, 256) bfloat16, fused [SelA | SelB] one-hot gather matrices (exact 0/1).
      cf:  (L, 4, 128) float32, per-unit (c0, c1, c2, c3), zero-padded beyond out_size.
    """
    L = len(layers)
    sel = np.zeros((L, WIDTH, 2 * WIDTH), np.float32)
    cf = np.zeros((L, 4, WIDTH), np.float32)
    for l, (logits, a_idx, b_idx, in_size, out_size) in enumerate(layers):
        assert in_size <= WIDTH and out_size <= WIDTH
        probs = jax.nn.softmax(logits / temperature, axis=-1)          # (out, 16)
        coeffs = np.asarray(probs @ jnp.asarray(GATE_COEFFS))          # (out, 4)
        a_np = np.asarray(a_idx)
        b_np = np.asarray(b_idx)
        # Invariant: wiring never points into padded lanes; padded cf lanes stay 0.
        assert a_np.max() < in_size and b_np.max() < in_size
        cols = np.arange(out_size)
        sel[l, a_np, cols] = 1.0
        sel[l, b_np, WIDTH + cols] = 1.0
        cf[l, :, :out_size] = coeffs.T
    sel_bf16 = jnp.asarray(sel).astype(jnp.bfloat16)   # 0/1 -> lossless in bf16
    return sel_bf16, jnp.asarray(cf)


def make_update_net_kernel(n_layers, in_features, epi_dtype):
    """Kernel closure: 23-layer chain, 2-way interleaved batch sub-tiles."""

    def kernel(x_ref, sel_ref, cf_ref, o_ref):
        # x_ref: (Bt, F) f32   sel_ref: (L, 128, 256) bf16   cf_ref: (L, 4, 128) epi_dtype
        bt = x_ref.shape[0]
        sub = bt // N_SUB
        # Two independent row sub-tiles: their layer chains have no data
        # dependencies on each other, so the scheduler can hide one sub-tile's
        # MXU-result pop + Horner epilogue under the other's matmul.
        xs = [x_ref[pl.ds(s * sub, sub), :] for s in range(N_SUB)]
        for l in range(n_layers):            # static unroll over the 23 layers
            sel_l = sel_ref[l]               # (128, 256) bf16, VMEM resident
            if l == 0:
                # Layer 0 contracts only the real input features (K = F); no
                # zero padding of x to 128 lanes needed anywhere.
                sel_l = sel_l[:in_features, :]
            c = cf_ref[l]                    # (4, 128), loaded once per layer
            c0, c1 = c[0:1, :], c[1:2, :]
            c2, c3 = c[2:3, :], c[3:4, :]
            new_xs = []
            for s in range(N_SUB):
                # One fused one-hot-gather matmul per layer per sub-tile.
                y = jnp.dot(xs[s].astype(jnp.bfloat16), sel_l,
                            preferred_element_type=epi_dtype)   # (sub, 256)
                a = y[:, :WIDTH]                                 # lane-aligned split
                b = y[:, WIDTH:]
                # Horner form: 3 mul + 3 add on the VPU (in epi_dtype).
                new_xs.append((c1 + c3 * b) * a + (c2 * b + c0))
            xs = new_xs
        for s in range(N_SUB):
            o_ref[pl.ds(s * sub, sub), :] = xs[s].astype(o_ref.dtype)

    return kernel


def _pick_block_b(n_cells, device_kind, bf16_epilogue):
    """Per-chip batch tile size.

    vreg budget: with the 2-way interleave, an f32 epilogue at 256-row tiles
    keeps ~2x32 f32 vregs of matmul results alive (spill risk), so cap at 128
    there; the bf16 epilogue halves that and allows 256.  On v7x keep the grid
    a multiple of 2 so both TensorCores get work.
    """
    kind = device_kind.lower()
    cap = 256 if bf16_epilogue else 128
    cores = 2 if ("v7" in kind or "7x" in kind) else 1
    bb = 128
    while bb * 2 <= cap and bb * 2 * cores <= n_cells:
        bb *= 2
    return bb


def update_network_forward(x, sel, cf, *, block_b=None, epilogue_dtype=None):
    B, F = x.shape
    L = sel.shape[0]
    device_kind = jax.devices()[0].device_kind
    kl = device_kind.lower()

    if epilogue_dtype is None:
        # bf16 epilogue on v6e/v7x (bf16 VPU: half the result pops and vreg
        # pressure); keep f32 on v5e and unknown parts (no bf16 VALU there).
        bf16_ok = any(t in kl for t in ("v6", "v7", "7x"))
        epilogue_dtype = jnp.bfloat16 if bf16_ok else jnp.float32
    if block_b is None:
        block_b = _pick_block_b(B, device_kind, epilogue_dtype == jnp.bfloat16)
    assert block_b % (8 * N_SUB) == 0

    # Pad the batch (cells) dim so arbitrary CA grid sizes work (no hard-fail).
    b_pad = pl.cdiv(B, block_b) * block_b
    x_in = x.astype(jnp.float32)
    if b_pad != B:
        x_in = jnp.pad(x_in, ((0, b_pad - B), (0, 0)))

    cf_k = cf.astype(epilogue_dtype)
    kernel = make_update_net_kernel(L, F, epilogue_dtype)

    out = pl.pallas_call(
        kernel,
        out_shape=jax.ShapeDtypeStruct((b_pad, WIDTH), jnp.float32),
        grid_spec=pltpu.PrefetchScalarGridSpec(
            num_scalar_prefetch=0,
            grid=(b_pad // block_b,),
            in_specs=[
                # x stays (B, F): last dim equals the full array dim, so the
                # (8,128) rule is satisfied and no host-side 128-lane zero pad
                # (and its (B,128) f32 HBM round trip) is needed.
                pl.BlockSpec((block_b, F), lambda i: (i, 0)),
                # Constant index maps: ~1.5 MiB bf16 of weights fetched once,
                # resident in VMEM across all grid steps.  (The default second
                # pipeline buffer wastes ~1.6 MiB; VMEM is not binding here.)
                pl.BlockSpec((L, WIDTH, 2 * WIDTH), lambda i: (0, 0, 0)),
                pl.BlockSpec((L, 4, WIDTH), lambda i: (0, 0, 0)),
            ],
            out_specs=pl.BlockSpec((block_b, WIDTH), lambda i: (i, 0)),
        ),
        compiler_params=pltpu.CompilerParams(dimension_semantics=("parallel",)),
    )(x_in, sel, cf_k)
    return out[:B, :1]  # final layer has 1 unit -> (B, 1), matching PyTorch output


def reference_forward(x, layers, temperature,
                      gather_dtype=jnp.float32, epilogue_dtype=jnp.float32):
    """Pure-JAX reference of the same diff-logic forward.

    gather_dtype=bf16 replicates the kernel's bf16 one-hot-matmul gather (the
    matmul accumulates in f32, so it is an exact gather of bf16 operands);
    epilogue_dtype=bf16 additionally replicates the v6e/v7x bf16 Horner.
    """
    gate = jnp.asarray(GATE_COEFFS)
    for logits, a_idx, b_idx, _, _ in layers:
        probs = jax.nn.softmax(logits / temperature, axis=-1)
        coeffs = (probs @ gate).astype(epilogue_dtype)        # (out, 4)
        a = x[:, a_idx].astype(gather_dtype).astype(epilogue_dtype)
        b = x[:, b_idx].astype(gather_dtype).astype(epilogue_dtype)
        c0, c1, c2, c3 = coeffs[:, 0], coeffs[:, 1], coeffs[:, 2], coeffs[:, 3]
        x = (c1 + c3 * b) * a + (c2 * b + c0)
    x = x.astype(jnp.float32)
    return x[:, None] if x.ndim == 1 else x


if __name__ == "__main__":
    key = jax.random.PRNGKey(0)
    k_param, k_x = jax.random.split(key)

    input_size = 16          # perception features per CA cell
    n_cells = 256            # e.g. a 16x16 CA grid flattened -> batch dim
    temperature = 1.0

    layers = init_logic_layers(k_param, input_size)
    sel, cf = build_kernel_params(layers, temperature)
    x = jax.random.uniform(k_x, (n_cells, input_size), dtype=jnp.float32)

    kind = jax.devices()[0].device_kind.lower()
    bf16_epi = any(t in kind for t in ("v6", "v7", "7x"))
    epi_dtype = jnp.bfloat16 if bf16_epi else jnp.float32

    out = jax.block_until_ready(
        update_network_forward(x, sel, cf, epilogue_dtype=epi_dtype))
    assert out.shape == (n_cells, 1), out.shape

    # Reference with matching precision semantics (tight in f32-epilogue mode),
    # plus a loose bound against the pure-f32 PyTorch-equivalent forward so
    # the accumulated bf16 drift across 23 layers is actually capped by a test.
    ref_match = jax.block_until_ready(
        reference_forward(x, layers, temperature,
                          gather_dtype=jnp.bfloat16, epilogue_dtype=epi_dtype))
    ref_f32 = jax.block_until_ready(reference_forward(x, layers, temperature))

    out_np = np.asarray(out)
    if bf16_epi:
        # bf16 Horner in the kernel vs XLA bf16 elementwise: allow per-op
        # rounding/fusion differences accumulated over 23 layers.
        np.testing.assert_allclose(out_np, np.asarray(ref_match), atol=1e-1)
        np.testing.assert_allclose(out_np, np.asarray(ref_f32), atol=2e-1)
    else:
        np.testing.assert_allclose(out_np, np.asarray(ref_match), rtol=1e-4, atol=1e-4)
        np.testing.assert_allclose(out_np, np.asarray(ref_f32), atol=1e-1)
    print("KERNEL_OK")
</pallas_src>

<mosaic_0001>
module attributes {stable_mosaic.version = 11 : i64} {
  func.func @kernel(%arg0: i32, %arg1: memref<128x16xf32, #tpu.memory_space<vmem>>, %arg2: memref<23x128x256xbf16, #tpu.memory_space<vmem>>, %arg3: memref<23x4x128xf32, #tpu.memory_space<vmem>>, %arg4: memref<128x128xf32, #tpu.memory_space<vmem>>) attributes {dimension_semantics = [#tpu.dimension_semantics<parallel>], iteration_bounds = array<i64: 2>, scalar_prefetch = 0 : i64, scratch_operands = 0 : i64, tpu.core_type = #tpu.core_type<tc>, window_params = [{transform_indices = @transform_0, window_bounds = array<i64: 128, 16>}, {pipeline_mode = #tpu.pipeline_mode<synchronous>, transform_indices = @transform_1, window_bounds = array<i64: 23, 128, 256>}, {pipeline_mode = #tpu.pipeline_mode<synchronous>, transform_indices = @transform_2, window_bounds = array<i64: 23, 4, 128>}, {transform_indices = @transform_3, window_bounds = array<i64: 128, 128>}]} {
    %c0 = arith.constant 0 : index
    %c0_0 = arith.constant 0 : index
    %0 = vector.load %arg1[%c0, %c0_0] : memref<128x16xf32, #tpu.memory_space<vmem>>, vector<64x16xf32>
    %c64 = arith.constant 64 : index
    %c0_1 = arith.constant 0 : index
    %1 = vector.load %arg1[%c64, %c0_1] : memref<128x16xf32, #tpu.memory_space<vmem>>, vector<64x16xf32>
    %c0_2 = arith.constant 0 : index
    %c0_3 = arith.constant 0 : index
    %c0_4 = arith.constant 0 : index
    %2 = vector.load %arg2[%c0_2, %c0_3, %c0_4] : memref<23x128x256xbf16, #tpu.memory_space<vmem>>, vector<1x128x256xbf16>
    %3 = vector.shape_cast %2 : vector<1x128x256xbf16> to vector<128x256xbf16>
    %4 = vector.extract_strided_slice %3 {offsets = [0, 0], sizes = [16, 256], strides = [1, 1]} : vector<128x256xbf16> to vector<16x256xbf16>
    %c0_5 = arith.constant 0 : index
    %c0_6 = arith.constant 0 : index
    %c0_7 = arith.constant 0 : index
    %5 = vector.load %arg3[%c0_5, %c0_6, %c0_7] : memref<23x4x128xf32, #tpu.memory_space<vmem>>, vector<1x4x128xf32>
    %6 = vector.shape_cast %5 : vector<1x4x128xf32> to vector<4x128xf32>
    %7 = vector.extract_strided_slice %6 {offsets = [0, 0], sizes = [1, 128], strides = [1, 1]} : vector<4x128xf32> to vector<1x128xf32>
    %8 = vector.extract_strided_slice %6 {offsets = [1, 0], sizes = [1, 128], strides = [1, 1]} : vector<4x128xf32> to vector<1x128xf32>
    %9 = vector.extract_strided_slice %6 {offsets = [2, 0], sizes = [1, 128], strides = [1, 1]} : vector<4x128xf32> to vector<1x128xf32>
    %10 = vector.extract_strided_slice %6 {offsets = [3, 0], sizes = [1, 128], strides = [1, 1]} : vector<4x128xf32> to vector<1x128xf32>
    %11 = arith.truncf %0 : vector<64x16xf32> to vector<64x16xbf16>
    %cst = arith.constant dense<0.000000e+00> : vector<64x256xf32>
    %12 = tpu.matmul %11, %4, %cst {dimension_numbers = #tpu.dot_dimension_numbers<[1], [0], [0], [1], [0, 0, 1, 1], [], []>} : vector<64x16xbf16>, vector<16x256xbf16>, vector<64x256xf32> -> vector<64x256xf32>
    %13 = vector.extract_strided_slice %12 {offsets = [0, 0], sizes = [64, 128], strides = [1, 1]} : vector<64x256xf32> to vector<64x128xf32>
    %14 = vector.extract_strided_slice %12 {offsets = [0, 128], sizes = [64, 128], strides = [1, 1]} : vector<64x256xf32> to vector<64x128xf32>
    %15 = vector.broadcast %10 : vector<1x128xf32> to vector<64x128xf32>
    %16 = arith.mulf %15, %14 : vector<64x128xf32>
    %17 = vector.broadcast %8 : vector<1x128xf32> to vector<64x128xf32>
    %18 = arith.addf %17, %16 : vector<64x128xf32>
    %19 = arith.mulf %18, %13 : vector<64x128xf32>
    %20 = vector.broadcast %9 : vector<1x128xf32> to vector<64x128xf32>
    %21 = arith.mulf %20, %14 : vector<64x128xf32>
    %22 = vector.broadcast %7 : vector<1x128xf32> to vector<64x128xf32>
    %23 = arith.addf %21, %22 : vector<64x128xf32>
    %24 = arith.addf %19, %23 : vector<64x128xf32>
    %25 = arith.truncf %1 : vector<64x16xf32> to vector<64x16xbf16>
    %cst_8 = arith.constant dense<0.000000e+00> : vector<64x256xf32>
    %26 = tpu.matmul %25, %4, %cst_8 {dimension_numbers = #tpu.dot_dimension_numbers<[1], [0], [0], [1], [0, 0, 1, 1], [], []>} : vector<64x16xbf16>, vector<16x256xbf16>, vector<64x256xf32> -> vector<64x256xf32>
    %27 = vector.extract_strided_slice %26 {offsets = [0, 0], sizes = [64, 128], strides = [1, 1]} : vector<64x256xf32> to vector<64x128xf32>
    %28 = vector.extract_strided_slice %26 {offsets = [0, 128], sizes = [64, 128], strides = [1, 1]} : vector<64x256xf32> to vector<64x128xf32>
    %29 = vector.broadcast %10 : vector<1x128xf32> to vector<64x128xf32>
    %30 = arith.mulf %29, %28 : vector<64x128xf32>
    %31 = vector.broadcast %8 : vector<1x128xf32> to vector<64x128xf32>
    %32 = arith.addf %31, %30 : vector<64x128xf32>
    %33 = arith.mulf %32, %27 : vector<64x128xf32>
    %34 = vector.broadcast %9 : vector<1x128xf32> to vector<64x128xf32>
    %35 = arith.mulf %34, %28 : vector<64x128xf32>
    %36 = vector.broadcast %7 : vector<1x128xf32> to vector<64x128xf32>
    %37 = arith.addf %35, %36 : vector<64x128xf32>
    %38 = arith.addf %33, %37 : vector<64x128xf32>
    %c1 = arith.constant 1 : index
    %c0_9 = arith.constant 0 : index
    %c0_10 = arith.constant 0 : index
    %39 = vector.load %arg2[%c1, %c0_9, %c0_10] : memref<23x128x256xbf16, #tpu.memory_space<vmem>>, vector<1x128x256xbf16>
    %40 = vector.shape_cast %39 : vector<1x128x256xbf16> to vector<128x256xbf16>
    %c1_11 = arith.constant 1 : index
    %c0_12 = arith.constant 0 : index
    %c0_13 = arith.constant 0 : index
    %41 = vector.load %arg3[%c1_11, %c0_12, %c0_13] : memref<23x4x128xf32, #tpu.memory_space<vmem>>, vector<1x4x128xf32>
    %42 = vector.shape_cast %41 : vector<1x4x128xf32> to vector<4x128xf32>
    %43 = vector.extract_strided_slice %42 {offsets = [0, 0], sizes = [1, 128], strides = [1, 1]} : vector<4x128xf32> to vector<1x128xf32>
    %44 = vector.extract_strided_slice %42 {offsets = [1, 0], sizes = [1, 128], strides = [1, 1]} : vector<4x128xf32> to vector<1x128xf32>
    %45 = vector.extract_strided_slice %42 {offsets = [2, 0], sizes = [1, 128], strides = [1, 1]} : vector<4x128xf32> to vector<1x128xf32>
    %46 = vector.extract_strided_slice %42 {offsets = [3, 0], sizes = [1, 128], strides = [1, 1]} : vector<4x128xf32> to vector<1x128xf32>
    %47 = arith.truncf %24 : vector<64x128xf32> to vector<64x128xbf16>
    %cst_14 = arith.constant dense<0.000000e+00> : vector<64x256xf32>
    %48 = tpu.matmul %47, %40, %cst_14 {dimension_numbers = #tpu.dot_dimension_numbers<[1], [0], [0], [1], [0, 0, 1, 1], [], []>} : vector<64x128xbf16>, vector<128x256xbf16>, vector<64x256xf32> -> vector<64x256xf32>
    %49 = vector.extract_strided_slice %48 {offsets = [0, 0], sizes = [64, 128], strides = [1, 1]} : vector<64x256xf32> to vector<64x128xf32>
    %50 = vector.extract_strided_slice %48 {offsets = [0, 128], sizes = [64, 128], strides = [1, 1]} : vector<64x256xf32> to vector<64x128xf32>
    %51 = vector.broadcast %46 : vector<1x128xf32> to vector<64x128xf32>
    %52 = arith.mulf %51, %50 : vector<64x128xf32>
    %53 = vector.broadcast %44 : vector<1x128xf32> to vector<64x128xf32>
    %54 = arith.addf %53, %52 : vector<64x128xf32>
    %55 = arith.mulf %54, %49 : vector<64x128xf32>
    %56 = vector.broadcast %45 : vector<1x128xf32> to vector<64x128xf32>
    %57 = arith.mulf %56, %50 : vector<64x128xf32>
    %58 = vector.broadcast %43 : vector<1x128xf32> to vector<64x128xf32>
    %59 = arith.addf %57, %58 : vector<64x128xf32>
    %60 = arith.addf %55, %59 : vector<64x128xf32>
    %61 = arith.truncf %38 : vector<64x128xf32> to vector<64x128xbf16>
    %cst_15 = arith.constant dense<0.000000e+00> : vector<64x256xf32>
    %62 = tpu.matmul %61, %40, %cst_15 {dimension_numbers = #tpu.dot_dimension_numbers<[1], [0], [0], [1], [0, 0, 1, 1], [], []>} : vector<64x128xbf16>, vector<128x256xbf16>, vector<64x256xf32> -> vector<64x256xf32>
    %63 = vector.extract_strided_slice %62 {offsets = [0, 0], sizes = [64, 128], strides = [1, 1]} : vector<64x256xf32> to vector<64x128xf32>
    %64 = vector.extract_strided_slice %62 {offsets = [0, 128], sizes = [64, 128], strides = [1, 1]} : vector<64x256xf32> to vector<64x128xf32>
    %65 = vector.broadcast %46 : vector<1x128xf32> to vector<64x128xf32>
    %66 = arith.mulf %65, %64 : vector<64x128xf32>
    %67 = vector.broadcast %44 : vector<1x128xf32> to vector<64x128xf32>
    %68 = arith.addf %67, %66 : vector<64x128xf32>
    %69 = arith.mulf %68, %63 : vector<64x128xf32>
    %70 = vector.broadcast %45 : vector<1x128xf32> to vector<64x128xf32>
    %71 = arith.mulf %70, %64 : vector<64x128xf32>
    %72 = vector.broadcast %43 : vector<1x128xf32> to vector<64x128xf32>
    %73 = arith.addf %71, %72 : vector<64x128xf32>
    %74 = arith.addf %69, %73 : vector<64x128xf32>
    %c2 = arith.constant 2 : index
    %c0_16 = arith.constant 0 : index
    %c0_17 = arith.constant 0 : index
    %75 = vector.load %arg2[%c2, %c0_16, %c0_17] : memref<23x128x256xbf16, #tpu.memory_space<vmem>>, vector<1x128x256xbf16>
    %76 = vector.shape_cast %75 : vector<1x128x256xbf16> to vector<128x256xbf16>
    %c2_18 = arith.constant 2 : index
    %c0_19 = arith.constant 0 : index
    %c0_20 = arith.constant 0 : index
    %77 = vector.load %arg3[%c2_18, %c0_19, %c0_20] : memref<23x4x128xf32, #tpu.memory_space<vmem>>, vector<1x4x128xf32>
    %78 = vector.shape_cast %77 : vector<1x4x128xf32> to vector<4x128xf32>
    %79 = vector.extract_strided_slice %78 {offsets = [0, 0], sizes = [1, 128], strides = [1, 1]} : vector<4x128xf32> to vector<1x128xf32>
    %80 = vector.extract_strided_slice %78 {offsets = [1, 0], sizes = [1, 128], strides = [1, 1]} : vector<4x128xf32> to vector<1x128xf32>
    %81 = vector.extract_strided_slice %78 {offsets = [2, 0], sizes = [1, 128], strides = [1, 1]} : vector<4x128xf32> to vector<1x128xf32>
    %82 = vector.extract_strided_slice %78 {offsets = [3, 0], sizes = [1, 128], strides = [1, 1]} : vector<4x128xf32> to vector<1x128xf32>
    %83 = arith.truncf %60 : vector<64x128xf32> to vector<64x128xbf16>
    %cst_21 = arith.constant dense<0.000000e+00> : vector<64x256xf32>
    %84 = tpu.matmul %83, %76, %cst_21 {dimension_numbers = #tpu.dot_dimension_numbers<[1], [0], [0], [1], [0, 0, 1, 1], [], []>} : vector<64x128xbf16>, vector<128x256xbf16>, vector<64x256xf32> -> vector<64x256xf32>
    %85 = vector.extract_strided_slice %84 {offsets = [0, 0], sizes = [64, 128], strides = [1, 1]} : vector<64x256xf32> to vector<64x128xf32>
    %86 = vector.extract_strided_slice %84 {offsets = [0, 128], sizes = [64, 128], strides = [1, 1]} : vector<64x256xf32> to vector<64x128xf32>
    %87 = vector.broadcast %82 : vector<1x128xf32> to vector<64x128xf32>
    %88 = arith.mulf %87, %86 : vector<64x128xf32>
    %89 = vector.broadcast %80 : vector<1x128xf32> to vector<64x128xf32>
    %90 = arith.addf %89, %88 : vector<64x128xf32>
    %91 = arith.mulf %90, %85 : vector<64x128xf32>
    %92 = vector.broadcast %81 : vector<1x128xf32> to vector<64x128xf32>
    %93 = arith.mulf %92, %86 : vector<64x128xf32>
    %94 = vector.broadcast %79 : vector<1x128xf32> to vector<64x128xf32>
    %95 = arith.addf %93, %94 : vector<64x128xf32>
    %96 = arith.addf %91, %95 : vector<64x128xf32>
    %97 = arith.truncf %74 : vector<64x128xf32> to vector<64x128xbf16>
    %cst_22 = arith.constant dense<0.000000e+00> : vector<64x256xf32>
    %98 = tpu.matmul %97, %76, %cst_22 {dimension_numbers = #tpu.dot_dimension_numbers<[1], [0], [0], [1], [0, 0, 1, 1], [], []>} : vector<64x128xbf16>, vector<128x256xbf16>, vector<64x256xf32> -> vector<64x256xf32>
    %99 = vector.extract_strided_slice %98 {offsets = [0, 0], sizes = [64, 128], strides = [1, 1]} : vector<64x256xf32> to vector<64x128xf32>
    %100 = vector.extract_strided_slice %98 {offsets = [0, 128], sizes = [64, 128], strides = [1, 1]} : vector<64x256xf32> to vector<64x128xf32>
    %101 = vector.broadcast %82 : vector<1x128xf32> to vector<64x128xf32>
    %102 = arith.mulf %101, %100 : vector<64x128xf32>
    %103 = vector.broadcast %80 : vector<1x128xf32> to vector<64x128xf32>
    %104 = arith.addf %103, %102 : vector<64x128xf32>
    %105 = arith.mulf %104, %99 : vector<64x128xf32>
    %106 = vector.broadcast %81 : vector<1x128xf32> to vector<64x128xf32>
    %107 = arith.mulf %106, %100 : vector<64x128xf32>
    %108 = vector.broadcast %79 : vector<1x128xf32> to vector<64x128xf32>
    %109 = arith.addf %107, %108 : vector<64x128xf32>
    %110 = arith.addf %105, %109 : vector<64x128xf32>
    %c3 = arith.constant 3 : index
    %c0_23 = arith.constant 0 : index
    %c0_24 = arith.constant 0 : index
    %111 = vector.load %arg2[%c3, %c0_23, %c0_24] : memref<23x128x256xbf16, #tpu.memory_space<vmem>>, vector<1x128x256xbf16>
    %112 = vector.shape_cast %111 : vector<1x128x256xbf16> to vector<128x256xbf16>
    %c3_25 = arith.constant 3 : index
    %c0_26 = arith.constant 0 : index
    %c0_27 = arith.constant 0 : index
    %113 = vector.load %arg3[%c3_25, %c0_26, %c0_27] : memref<23x4x128xf32, #tpu.memory_space<vmem>>, vector<1x4x128xf32>
    %114 = vector.shape_cast %113 : vector<1x4x128xf32> to vector<4x128xf32>
    %115 = vector.extract_strided_slice %114 {offsets = [0, 0], sizes = [1, 128], strides = [1, 1]} : vector<4x128xf32> to vector<1x128xf32>
    %116 = vector.extract_strided_slice %114 {offsets = [1, 0], sizes = [1, 128], strides = [1, 1]} : vector<4x128xf32> to vector<1x128xf32>
    %117 = vector.extract_strided_slice %114 {offsets = [2, 0], sizes = [1, 128], strides = [1, 1]} : vector<4x128xf32> to vector<1x128xf32>
    %118 = vector.extract_strided_slice %114 {offsets = [3, 0], sizes = [1, 128], strides = [1, 1]} : vector<4x128xf32> to vector<1x128xf32>
    %119 = arith.truncf %96 : vector<64x128xf32> to vector<64x128xbf16>
    %cst_28 = arith.constant dense<0.000000e+00> : vector<64x256xf32>
    %120 = tpu.matmul %119, %112, %cst_28 {dimension_numbers = #tpu.dot_dimension_numbers<[1], [0], [0], [1], [0, 0, 1, 1], [], []>} : vector<64x128xbf16>, vector<128x256xbf16>, vector<64x256xf32> -> vector<64x256xf32>
    %121 = vector.extract_strided_slice %120 {offsets = [0, 0], sizes = [64, 128], strides = [1, 1]} : vector<64x256xf32> to vector<64x128xf32>
    %122 = vector.extract_strided_slice %120 {offsets = [0, 128], sizes = [64, 128], strides = [1, 1]} : vector<64x256xf32> to vector<64x128xf32>
    %123 = vector.broadcast %118 : vector<1x128xf32> to vector<64x128xf32>
    %124 = arith.mulf %123, %122 : vector<64x128xf32>
    %125 = vector.broadcast %116 : vector<1x128xf32> to vector<64x128xf32>
    %126 = arith.addf %125, %124 : vector<64x128xf32>
    %127 = arith.mulf %126, %121 : vector<64x128xf32>
    %128 = vector.broadcast %117 : vector<1x128xf32> to vector<64x128xf32>
    %129 = arith.mulf %128, %122 : vector<64x128xf32>
    %130 = vector.broadcast %115 : vector<1x128xf32> to vector<64x128xf32>
    %131 = arith.addf %129, %130 : vector<64x128xf32>
    %132 = arith.addf %127, %131 : vector<64x128xf32>
    %133 = arith.truncf %110 : vector<64x128xf32> to vector<64x128xbf16>
    %cst_29 = arith.constant dense<0.000000e+00> : vector<64x256xf32>
    %134 = tpu.matmul %133, %112, %cst_29 {dimension_numbers = #tpu.dot_dimension_numbers<[1], [0], [0], [1], [0, 0, 1, 1], [], []>} : vector<64x128xbf16>, vector<128x256xbf16>, vector<64x256xf32> -> vector<64x256xf32>
    %135 = vector.extract_strided_slice %134 {offsets = [0, 0], sizes = [64, 128], strides = [1, 1]} : vector<64x256xf32> to vector<64x128xf32>
    %136 = vector.extract_strided_slice %134 {offsets = [0, 128], sizes = [64, 128], strides = [1, 1]} : vector<64x256xf32> to vector<64x128xf32>
    %137 = vector.broadcast %118 : vector<1x128xf32> to vector<64x128xf32>
    %138 = arith.mulf %137, %136 : vector<64x128xf32>
    %139 = vector.broadcast %116 : vector<1x128xf32> to vector<64x128xf32>
    %140 = arith.addf %139, %138 : vector<64x128xf32>
    %141 = arith.mulf %140, %135 : vector<64x128xf32>
    %142 = vector.broadcast %117 : vector<1x128xf32> to vector<64x128xf32>
    %143 = arith.mulf %142, %136 : vector<64x128xf32>
    %144 = vector.broadcast %115 : vector<1x128xf32> to vector<64x128xf32>
    %145 = arith.addf %143, %144 : vector<64x128xf32>
    %146 = arith.addf %141, %145 : vector<64x128xf32>
    %c4 = arith.constant 4 : index
    %c0_30 = arith.constant 0 : index
    %c0_31 = arith.constant 0 : index
    %147 = vector.load %arg2[%c4, %c0_30, %c0_31] : memref<23x128x256xbf16, #tpu.memory_space<vmem>>, vector<1x128x256xbf16>
    %148 = vector.shape_cast %147 : vector<1x128x256xbf16> to vector<128x256xbf16>
    %c4_32 = arith.constant 4 : index
    %c0_33 = arith.constant 0 : index
    %c0_34 = arith.constant 0 : index
    %149 = vector.load %arg3[%c4_32, %c0_33, %c0_34] : memref<23x4x128xf32, #tpu.memory_space<vmem>>, vector<1x4x128xf32>
    %150 = vector.shape_cast %149 : vector<1x4x128xf32> to vector<4x128xf32>
    %151 = vector.extract_strided_slice %150 {offsets = [0, 0], sizes = [1, 128], strides = [1, 1]} : vector<4x128xf32> to vector<1x128xf32>
    %152 = vector.extract_strided_slice %150 {offsets = [1, 0], sizes = [1, 128], strides = [1, 1]} : vector<4x128xf32> to vector<1x128xf32>
    %153 = vector.extract_strided_slice %150 {offsets = [2, 0], sizes = [1, 128], strides = [1, 1]} : vector<4x128xf32> to vector<1x128xf32>
    %154 = vector.extract_strided_slice %150 {offsets = [3, 0], sizes = [1, 128], strides = [1, 1]} : vector<4x128xf32> to vector<1x128xf32>
    %155 = arith.truncf %132 : vector<64x128xf32> to vector<64x128xbf16>
    %cst_35 = arith.constant dense<0.000000e+00> : vector<64x256xf32>
    %156 = tpu.matmul %155, %148, %cst_35 {dimension_numbers = #tpu.dot_dimension_numbers<[1], [0], [0], [1], [0, 0, 1, 1], [], []>} : vector<64x128xbf16>, vector<128x256xbf16>, vector<64x256xf32> -> vector<64x256xf32>
    %157 = vector.extract_strided_slice %156 {offsets = [0, 0], sizes = [64, 128], strides = [1, 1]} : vector<64x256xf32> to vector<64x128xf32>
    %158 = vector.extract_strided_slice %156 {offsets = [0, 128], sizes = [64, 128], strides = [1, 1]} : vector<64x256xf32> to vector<64x128xf32>
    %159 = vector.broadcast %154 : vector<1x128xf32> to vector<64x128xf32>
    %160 = arith.mulf %159, %158 : vector<64x128xf32>
    %161 = vector.broadcast %152 : vector<1x128xf32> to vector<64x128xf32>
    %162 = arith.addf %161, %160 : vector<64x128xf32>
    %163 = arith.mulf %162, %157 : vector<64x128xf32>
    %164 = vector.broadcast %153 : vector<1x128xf32> to vector<64x128xf32>
    %165 = arith.mulf %164, %158 : vector<64x128xf32>
    %166 = vector.broadcast %151 : vector<1x128xf32> to vector<64x128xf32>
    %167 = arith.addf %165, %166 : vector<64x128xf32>
    %168 = arith.addf %163, %167 : vector<64x128xf32>
    %169 = arith.truncf %146 : vector<64x128xf32> to vector<64x128xbf16>
    %cst_36 = arith.constant dense<0.000000e+00> : vector<64x256xf32>
    %170 = tpu.matmul %169, %148, %cst_36 {dimension_numbers = #tpu.dot_dimension_numbers<[1], [0], [0], [1], [0, 0, 1, 1], [], []>} : vector<64x128xbf16>, vector<128x256xbf16>, vector<64x256xf32> -> vector<64x256xf32>
    %171 = vector.extract_strided_slice %170 {offsets = [0, 0], sizes = [64, 128], strides = [1, 1]} : vector<64x256xf32> to vector<64x128xf32>
    %172 = vector.extract_strided_slice %170 {offsets = [0, 128], sizes = [64, 128], strides = [1, 1]} : vector<64x256xf32> to vector<64x128xf32>
    %173 = vector.broadcast %154 : vector<1x128xf32> to vector<64x128xf32>
    %174 = arith.mulf %173, %172 : vector<64x128xf32>
    %175 = vector.broadcast %152 : vector<1x128xf32> to vector<64x128xf32>
    %176 = arith.addf %175, %174 : vector<64x128xf32>
    %177 = arith.mulf %176, %171 : vector<64x128xf32>
    %178 = vector.broadcast %153 : vector<1x128xf32> to vector<64x128xf32>
    %179 = arith.mulf %178, %172 : vector<64x128xf32>
    %180 = vector.broadcast %151 : vector<1x128xf32> to vector<64x128xf32>
    %181 = arith.addf %179, %180 : vector<64x128xf32>
    %182 = arith.addf %177, %181 : vector<64x128xf32>
    %c5 = arith.constant 5 : index
    %c0_37 = arith.constant 0 : index
    %c0_38 = arith.constant 0 : index
    %183 = vector.load %arg2[%c5, %c0_37, %c0_38] : memref<23x128x256xbf16, #tpu.memory_space<vmem>>, vector<1x128x256xbf16>
    %184 = vector.shape_cast %183 : vector<1x128x256xbf16> to vector<128x256xbf16>
    %c5_39 = arith.constant 5 : index
    %c0_40 = arith.constant 0 : index
    %c0_41 = arith.constant 0 : index
    %185 = vector.load %arg3[%c5_39, %c0_40, %c0_41] : memref<23x4x128xf32, #tpu.memory_space<vmem>>, vector<1x4x128xf32>
    %186 = vector.shape_cast %185 : vector<1x4x128xf32> to vector<4x128xf32>
    %187 = vector.extract_strided_slice %186 {offsets = [0, 0], sizes = [1, 128], strides = [1, 1]} : vector<4x128xf32> to vector<1x128xf32>
    %188 = vector.extract_strided_slice %186 {offsets = [1, 0], sizes = [1, 128], strides = [1, 1]} : vector<4x128xf32> to vector<1x128xf32>
    %189 = vector.extract_strided_slice %186 {offsets = [2, 0], sizes = [1, 128], strides = [1, 1]} : vector<4x128xf32> to vector<1x128xf32>
    %190 = vector.extract_strided_slice %186 {offsets = [3, 0], sizes = [1, 128], strides = [1, 1]} : vector<4x128xf32> to vector<1x128xf32>
    %191 = arith.truncf %168 : vector<64x128xf32> to vector<64x128xbf16>
    %cst_42 = arith.constant dense<0.000000e+00> : vector<64x256xf32>
    %192 = tpu.matmul %191, %184, %cst_42 {dimension_numbers = #tpu.dot_dimension_numbers<[1], [0], [0], [1], [0, 0, 1, 1], [], []>} : vector<64x128xbf16>, vector<128x256xbf16>, vector<64x256xf32> -> vector<64x256xf32>
    %193 = vector.extract_strided_slice %192 {offsets = [0, 0], sizes = [64, 128], strides = [1, 1]} : vector<64x256xf32> to vector<64x128xf32>
    %194 = vector.extract_strided_slice %192 {offsets = [0, 128], sizes = [64, 128], strides = [1, 1]} : vector<64x256xf32> to vector<64x128xf32>
    %195 = vector.broadcast %190 : vector<1x128xf32> to vector<64x128xf32>
    %196 = arith.mulf %195, %194 : vector<64x128xf32>
    %197 = vector.broadcast %188 : vector<1x128xf32> to vector<64x128xf32>
    %198 = arith.addf %197, %196 : vector<64x128xf32>
    %199 = arith.mulf %198, %193 : vector<64x128xf32>
    %200 = vector.broadcast %189 : vector<1x128xf32> to vector<64x128xf32>
    %201 = arith.mulf %200, %194 : vector<64x128xf32>
    %202 = vector.broadcast %187 : vector<1x128xf32> to vector<64x128xf32>
    %203 = arith.addf %201, %202 : vector<64x128xf32>
    %204 = arith.addf %199, %203 : vector<64x128xf32>
    %205 = arith.truncf %182 : vector<64x128xf32> to vector<64x128xbf16>
    %cst_43 = arith.constant dense<0.000000e+00> : vector<64x256xf32>
    %206 = tpu.matmul %205, %184, %cst_43 {dimension_numbers = #tpu.dot_dimension_numbers<[1], [0], [0], [1], [0, 0, 1, 1], [], []>} : vector<64x128xbf16>, vector<128x256xbf16>, vector<64x256xf32> -> vector<64x256xf32>
    %207 = vector.extract_strided_slice %206 {offsets = [0, 0], sizes = [64, 128], strides = [1, 1]} : vector<64x256xf32> to vector<64x128xf32>
    %208 = vector.extract_strided_slice %206 {offsets = [0, 128], sizes = [64, 128], strides = [1, 1]} : vector<64x256xf32> to vector<64x128xf32>
    %209 = vector.broadcast %190 : vector<1x128xf32> to vector<64x128xf32>
    %210 = arith.mulf %209, %208 : vector<64x128xf32>
    %211 = vector.broadcast %188 : vector<1x128xf32> to vector<64x128xf32>
    %212 = arith.addf %211, %210 : vector<64x128xf32>
    %213 = arith.mulf %212, %207 : vector<64x128xf32>
    %214 = vector.broadcast %189 : vector<1x128xf32> to vector<64x128xf32>
    %215 = arith.mulf %214, %208 : vector<64x128xf32>
    %216 = vector.broadcast %187 : vector<1x128xf32> to vector<64x128xf32>
    %217 = arith.addf %215, %216 : vector<64x128xf32>
    %218 = arith.addf %213, %217 : vector<64x128xf32>
    %c6 = arith.constant 6 : index
    %c0_44 = arith.constant 0 : index
    %c0_45 = arith.constant 0 : index
    %219 = vector.load %arg2[%c6, %c0_44, %c0_45] : memref<23x128x256xbf16, #tpu.memory_space<vmem>>, vector<1x128x256xbf16>
    %220 = vector.shape_cast %219 : vector<1x128x256xbf16> to vector<128x256xbf16>
    %c6_46 = arith.constant 6 : index
    %c0_47 = arith.constant 0 : index
    %c0_48 = arith.constant 0 : index
    %221 = vector.load %arg3[%c6_46, %c0_47, %c0_48] : memref<23x4x128xf32, #tpu.memory_space<vmem>>, vector<1x4x128xf32>
    %222 = vector.shape_cast %221 : vector<1x4x128xf32> to vector<4x128xf32>
    %223 = vector.extract_strided_slice %222 {offsets = [0, 0], sizes = [1, 128], strides = [1, 1]} : vector<4x128xf32> to vector<1x128xf32>
    %224 = vector.extract_strided_slice %222 {offsets = [1, 0], sizes = [1, 128], strides = [1, 1]} : vector<4x128xf32> to vector<1x128xf32>
    %225 = vector.extract_strided_slice %222 {offsets = [2, 0], sizes = [1, 128], strides = [1, 1]} : vector<4x128xf32> to vector<1x128xf32>
    %226 = vector.extract_strided_slice %222 {offsets = [3, 0], sizes = [1, 128], strides = [1, 1]} : vector<4x128xf32> to vector<1x128xf32>
    %227 = arith.truncf %204 : vector<64x128xf32> to vector<64x128xbf16>
    %cst_49 = arith.constant dense<0.000000e+00> : vector<64x256xf32>
    %228 = tpu.matmul %227, %220, %cst_49 {dimension_numbers = #tpu.dot_dimension_numbers<[1], [0], [0], [1], [0, 0, 1, 1], [], []>} : vector<64x128xbf16>, vector<128x256xbf16>, vector<64x256xf32> -> vector<64x256xf32>
    %229 = vector.extract_strided_slice %228 {offsets = [0, 0], sizes = [64, 128], strides = [1, 1]} : vector<64x256xf32> to vector<64x128xf32>
    %230 = vector.extract_strided_slice %228 {offsets = [0, 128], sizes = [64, 128], strides = [1, 1]} : vector<64x256xf32> to vector<64x128xf32>
    %231 = vector.broadcast %226 : vector<1x128xf32> to vector<64x128xf32>
    %232 = arith.mulf %231, %230 : vector<64x128xf32>
    %233 = vector.broadcast %224 : vector<1x128xf32> to vector<64x128xf32>
    %234 = arith.addf %233, %232 : vector<64x128xf32>
    %235 = arith.mulf %234, %229 : vector<64x128xf32>
    %236 = vector.broadcast %225 : vector<1x128xf32> to vector<64x128xf32>
    %237 = arith.mulf %236, %230 : vector<64x128xf32>
    %238 = vector.broadcast %223 : vector<1x128xf32> to vector<64x128xf32>
    %239 = arith.addf %237, %238 : vector<64x128xf32>
    %240 = arith.addf %235, %239 : vector<64x128xf32>
    %241 = arith.truncf %218 : vector<64x128xf32> to vector<64x128xbf16>
    %cst_50 = arith.constant dense<0.000000e+00> : vector<64x256xf32>
    %242 = tpu.matmul %241, %220, %cst_50 {dimension_numbers = #tpu.dot_dimension_numbers<[1], [0], [0], [1], [0, 0, 1, 1], [], []>} : vector<64x128xbf16>, vector<128x256xbf16>, vector<64x256xf32> -> vector<64x256xf32>
    %243 = vector.extract_strided_slice %242 {offsets = [0, 0], sizes = [64, 128], strides = [1, 1]} : vector<64x256xf32> to vector<64x128xf32>
    %244 = vector.extract_strided_slice %242 {offsets = [0, 128], sizes = [64, 128], strides = [1, 1]} : vector<64x256xf32> to vector<64x128xf32>
    %245 = vector.broadcast %226 : vector<1x128xf32> to vector<64x128xf32>
    %246 = arith.mulf %245, %244 : vector<64x128xf32>
    %247 = vector.broadcast %224 : vector<1x128xf32> to vector<64x128xf32>
    %248 = arith.addf %247, %246 : vector<64x128xf32>
    %249 = arith.mulf %248, %243 : vector<64x128xf32>
    %250 = vector.broadcast %225 : vector<1x128xf32> to vector<64x128xf32>
    %251 = arith.mulf %250, %244 : vector<64x128xf32>
    %252 = vector.broadcast %223 : vector<1x128xf32> to vector<64x128xf32>
    %253 = arith.addf %251, %252 : vector<64x128xf32>
    %254 = arith.addf %249, %253 : vector<64x128xf32>
    %c7 = arith.constant 7 : index
    %c0_51 = arith.constant 0 : index
    %c0_52 = arith.constant 0 : index
    %255 = vector.load %arg2[%c7, %c0_51, %c0_52] : memref<23x128x256xbf16, #tpu.memory_space<vmem>>, vector<1x128x256xbf16>
    %256 = vector.shape_cast %255 : vector<1x128x256xbf16> to vector<128x256xbf16>
    %c7_53 = arith.constant 7 : index
    %c0_54 = arith.constant 0 : index
    %c0_55 = arith.constant 0 : index
    %257 = vector.load %arg3[%c7_53, %c0_54, %c0_55] : memref<23x4x128xf32, #tpu.memory_space<vmem>>, vector<1x4x128xf32>
    %258 = vector.shape_cast %257 : vector<1x4x128xf32> to vector<4x128xf32>
    %259 = vector.extract_strided_slice %258 {offsets = [0, 0], sizes = [1, 128], strides = [1, 1]} : vector<4x128xf32> to vector<1x128xf32>
    %260 = vector.extract_strided_slice %258 {offsets = [1, 0], sizes = [1, 128], strides = [1, 1]} : vector<4x128xf32> to vector<1x128xf32>
    %261 = vector.extract_strided_slice %258 {offsets = [2, 0], sizes = [1, 128], strides = [1, 1]} : vector<4x128xf32> to vector<1x128xf32>
    %262 = vector.extract_strided_slice %258 {offsets = [3, 0], sizes = [1, 128], strides = [1, 1]} : vector<4x128xf32> to vector<1x128xf32>
    %263 = arith.truncf %240 : vector<64x128xf32> to vector<64x128xbf16>
    %cst_56 = arith.constant dense<0.000000e+00> : vector<64x256xf32>
    %264 = tpu.matmul %263, %256, %cst_56 {dimension_numbers = #tpu.dot_dimension_numbers<[1], [0], [0], [1], [0, 0, 1, 1], [], []>} : vector<64x128xbf16>, vector<128x256xbf16>, vector<64x256xf32> -> vector<64x256xf32>
    %265 = vector.extract_strided_slice %264 {offsets = [0, 0], sizes = [64, 128], strides = [1, 1]} : vector<64x256xf32> to vector<64x128xf32>
    %266 = vector.extract_strided_slice %264 {offsets = [0, 128], sizes = [64, 128], strides = [1, 1]} : vector<64x256xf32> to vector<64x128xf32>
    %267 = vector.broadcast %262 : vector<1x128xf32> to vector<64x128xf32>
    %268 = arith.mulf %267, %266 : vector<64x128xf32>
    %269 = vector.broadcast %260 : vector<1x128xf32> to vector<64x128xf32>
    %270 = arith.addf %269, %268 : vector<64x128xf32>
    %271 = arith.mulf %270, %265 : vector<64x128xf32>
    %272 = vector.broadcast %261 : vector<1x128xf32> to vector<64x128xf32>
    %273 = arith.mulf %272, %266 : vector<64x128xf32>
    %274 = vector.broadcast %259 : vector<1x128xf32> to vector<64x128xf32>
    %275 = arith.addf %273, %274 : vector<64x128xf32>
    %276 = arith.addf %271, %275 : vector<64x128xf32>
    %277 = arith.truncf %254 : vector<64x128xf32> to vector<64x128xbf16>
    %cst_57 = arith.constant dense<0.000000e+00> : vector<64x256xf32>
    %278 = tpu.matmul %277, %256, %cst_57 {dimension_numbers = #tpu.dot_dimension_numbers<[1], [0], [0], [1], [0, 0, 1, 1], [], []>} : vector<64x128xbf16>, vector<128x256xbf16>, vector<64x256xf32> -> vector<64x256xf32>
    %279 = vector.extract_strided_slice %278 {offsets = [0, 0], sizes = [64, 128], strides = [1, 1]} : vector<64x256xf32> to vector<64x128xf32>
    %280 = vector.extract_strided_slice %278 {offsets = [0, 128], sizes = [64, 128], strides = [1, 1]} : vector<64x256xf32> to vector<64x128xf32>
    %281 = vector.broadcast %262 : vector<1x128xf32> to vector<64x128xf32>
    %282 = arith.mulf %281, %280 : vector<64x128xf32>
    %283 = vector.broadcast %260 : vector<1x128xf32> to vector<64x128xf32>
    %284 = arith.addf %283, %282 : vector<64x128xf32>
    %285 = arith.mulf %284, %279 : vector<64x128xf32>
    %286 = vector.broadcast %261 : vector<1x128xf32> to vector<64x128xf32>
    %287 = arith.mulf %286, %280 : vector<64x128xf32>
    %288 = vector.broadcast %259 : vector<1x128xf32> to vector<64x128xf32>
    %289 = arith.addf %287, %288 : vector<64x128xf32>
    %290 = arith.addf %285, %289 : vector<64x128xf32>
    %c8 = arith.constant 8 : index
    %c0_58 = arith.constant 0 : index
    %c0_59 = arith.constant 0 : index
    %291 = vector.load %arg2[%c8, %c0_58, %c0_59] : memref<23x128x256xbf16, #tpu.memory_space<vmem>>, vector<1x128x256xbf16>
    %292 = vector.shape_cast %291 : vector<1x128x256xbf16> to vector<128x256xbf16>
    %c8_60 = arith.constant 8 : index
    %c0_61 = arith.constant 0 : index
    %c0_62 = arith.constant 0 : index
    %293 = vector.load %arg3[%c8_60, %c0_61, %c0_62] : memref<23x4x128xf32, #tpu.memory_space<vmem>>, vector<1x4x128xf32>
    %294 = vector.shape_cast %293 : vector<1x4x128xf32> to vector<4x128xf32>
    %295 = vector.extract_strided_slice %294 {offsets = [0, 0], sizes = [1, 128], strides = [1, 1]} : vector<4x128xf32> to vector<1x128xf32>
    %296 = vector.extract_strided_slice %294 {offsets = [1, 0], sizes = [1, 128], strides = [1, 1]} : vector<4x128xf32> to vector<1x128xf32>
    %297 = vector.extract_strided_slice %294 {offsets = [2, 0], sizes = [1, 128], strides = [1, 1]} : vector<4x128xf32> to vector<1x128xf32>
    %298 = vector.extract_strided_slice %294 {offsets = [3, 0], sizes = [1, 128], strides = [1, 1]} : vector<4x128xf32> to vector<1x128xf32>
    %299 = arith.truncf %276 : vector<64x128xf32> to vector<64x128xbf16>
    %cst_63 = arith.constant dense<0.000000e+00> : vector<64x256xf32>
    %300 = tpu.matmul %299, %292, %cst_63 {dimension_numbers = #tpu.dot_dimension_numbers<[1], [0], [0], [1], [0, 0, 1, 1], [], []>} : vector<64x128xbf16>, vector<128x256xbf16>, vector<64x256xf32> -> vector<64x256xf32>
    %301 = vector.extract_strided_slice %300 {offsets = [0, 0], sizes = [64, 128], strides = [1, 1]} : vector<64x256xf32> to vector<64x128xf32>
    %302 = vector.extract_strided_slice %300 {offsets = [0, 128], sizes = [64, 128], strides = [1, 1]} : vector<64x256xf32> to vector<64x128xf32>
    %303 = vector.broadcast %298 : vector<1x128xf32> to vector<64x128xf32>
    %304 = arith.mulf %303, %302 : vector<64x128xf32>
    %305 = vector.broadcast %296 : vector<1x128xf32> to vector<64x128xf32>
    %306 = arith.addf %305, %304 : vector<64x128xf32>
    %307 = arith.mulf %306, %301 : vector<64x128xf32>
    %308 = vector.broadcast %297 : vector<1x128xf32> to vector<64x128xf32>
    %309 = arith.mulf %308, %302 : vector<64x128xf32>
    %310 = vector.broadcast %295 : vector<1x128xf32> to vector<64x128xf32>
    %311 = arith.addf %309, %310 : vector<64x128xf32>
    %312 = arith.addf %307, %311 : vector<64x128xf32>
    %313 = arith.truncf %290 : vector<64x128xf32> to vector<64x128xbf16>
    %cst_64 = arith.constant dense<0.000000e+00> : vector<64x256xf32>
    %314 = tpu.matmul %313, %292, %cst_64 {dimension_numbers = #tpu.dot_dimension_numbers<[1], [0], [0], [1], [0, 0, 1, 1], [], []>} : vector<64x128xbf16>, vector<128x256xbf16>, vector<64x256xf32> -> vector<64x256xf32>
    %315 = vector.extract_strided_slice %314 {offsets = [0, 0], sizes = [64, 128], strides = [1, 1]} : vector<64x256xf32> to vector<64x128xf32>
    %316 = vector.extract_strided_slice %314 {offsets = [0, 128], sizes = [64, 128], strides = [1, 1]} : vector<64x256xf32> to vector<64x128xf32>
    %317 = vector.broadcast %298 : vector<1x128xf32> to vector<64x128xf32>
    %318 = arith.mulf %317, %316 : vector<64x128xf32>
    %319 = vector.broadcast %296 : vector<1x128xf32> to vector<64x128xf32>
    %320 = arith.addf %319, %318 : vector<64x128xf32>
    %321 = arith.mulf %320, %315 : vector<64x128xf32>
    %322 = vector.broadcast %297 : vector<1x128xf32> to vector<64x128xf32>
    %323 = arith.mulf %322, %316 : vector<64x128xf32>
    %324 = vector.broadcast %295 : vector<1x128xf32> to vector<64x128xf32>
    %325 = arith.addf %323, %324 : vector<64x128xf32>
    %326 = arith.addf %321, %325 : vector<64x128xf32>
    %c9 = arith.constant 9 : index
    %c0_65 = arith.constant 0 : index
    %c0_66 = arith.constant 0 : index
    %327 = vector.load %arg2[%c9, %c0_65, %c0_66] : memref<23x128x256xbf16, #tpu.memory_space<vmem>>, vector<1x128x256xbf16>
    %328 = vector.shape_cast %327 : vector<1x128x256xbf16> to vector<128x256xbf16>
    %c9_67 = arith.constant 9 : index
    %c0_68 = arith.constant 0 : index
    %c0_69 = arith.constant 0 : index
    %329 = vector.load %arg3[%c9_67, %c0_68, %c0_69] : memref<23x4x128xf32, #tpu.memory_space<vmem>>, vector<1x4x128xf32>
    %330 = vector.shape_cast %329 : vector<1x4x128xf32> to vector<4x128xf32>
    %331 = vector.extract_strided_slice %330 {offsets = [0, 0], sizes = [1, 128], strides = [1, 1]} : vector<4x128xf32> to vector<1x128xf32>
    %332 = vector.extract_strided_slice %330 {offsets = [1, 0], sizes = [1, 128], strides = [1, 1]} : vector<4x128xf32> to vector<1x128xf32>
    %333 = vector.extract_strided_slice %330 {offsets = [2, 0], sizes = [1, 128], strides = [1, 1]} : vector<4x128xf32> to vector<1x128xf32>
    %334 = vector.extract_strided_slice %330 {offsets = [3, 0], sizes = [1, 128], strides = [1, 1]} : vector<4x128xf32> to vector<1x128xf32>
    %335 = arith.truncf %312 : vector<64x128xf32> to vector<64x128xbf16>
    %cst_70 = arith.constant dense<0.000000e+00> : vector<64x256xf32>
    %336 = tpu.matmul %335, %328, %cst_70 {dimension_numbers = #tpu.dot_dimension_numbers<[1], [0], [0], [1], [0, 0, 1, 1], [], []>} : vector<64x128xbf16>, vector<128x256xbf16>, vector<64x256xf32> -> vector<64x256xf32>
    %337 = vector.extract_strided_slice %336 {offsets = [0, 0], sizes = [64, 128], strides = [1, 1]} : vector<64x256xf32> to vector<64x128xf32>
    %338 = vector.extract_strided_slice %336 {offsets = [0, 128], sizes = [64, 128], strides = [1, 1]} : vector<64x256xf32> to vector<64x128xf32>
    %339 = vector.broadcast %334 : vector<1x128xf32> to vector<64x128xf32>
    %340 = arith.mulf %339, %338 : vector<64x128xf32>
    %341 = vector.broadcast %332 : vector<1x128xf32> to vector<64x128xf32>
    %342 = arith.addf %341, %340 : vector<64x128xf32>
    %343 = arith.mulf %342, %337 : vector<64x128xf32>
    %344 = vector.broadcast %333 : vector<1x128xf32> to vector<64x128xf32>
    %345 = arith.mulf %344, %338 : vector<64x128xf32>
    %346 = vector.broadcast %331 : vector<1x128xf32> to vector<64x128xf32>
    %347 = arith.addf %345, %346 : vector<64x128xf32>
    %348 = arith.addf %343, %347 : vector<64x128xf32>
    %349 = arith.truncf %326 : vector<64x128xf32> to vector<64x128xbf16>
    %cst_71 = arith.constant dense<0.000000e+00> : vector<64x256xf32>
    %350 = tpu.matmul %349, %328, %cst_71 {dimension_numbers = #tpu.dot_dimension_numbers<[1], [0], [0], [1], [0, 0, 1, 1], [], []>} : vector<64x128xbf16>, vector<128x256xbf16>, vector<64x256xf32> -> vector<64x256xf32>
    %351 = vector.extract_strided_slice %350 {offsets = [0, 0], sizes = [64, 128], strides = [1, 1]} : vector<64x256xf32> to vector<64x128xf32>
    %352 = vector.extract_strided_slice %350 {offsets = [0, 128], sizes = [64, 128], strides = [1, 1]} : vector<64x256xf32> to vector<64x128xf32>
    %353 = vector.broadcast %334 : vector<1x128xf32> to vector<64x128xf32>
    %354 = arith.mulf %353, %352 : vector<64x128xf32>
    %355 = vector.broadcast %332 : vector<1x128xf32> to vector<64x128xf32>
    %356 = arith.addf %355, %354 : vector<64x128xf32>
    %357 = arith.mulf %356, %351 : vector<64x128xf32>
    %358 = vector.broadcast %333 : vector<1x128xf32> to vector<64x128xf32>
    %359 = arith.mulf %358, %352 : vector<64x128xf32>
    %360 = vector.broadcast %331 : vector<1x128xf32> to vector<64x128xf32>
    %361 = arith.addf %359, %360 : vector<64x128xf32>
    %362 = arith.addf %357, %361 : vector<64x128xf32>
    %c10 = arith.constant 10 : index
    %c0_72 = arith.constant 0 : index
    %c0_73 = arith.constant 0 : index
    %363 = vector.load %arg2[%c10, %c0_72, %c0_73] : memref<23x128x256xbf16, #tpu.memory_space<vmem>>, vector<1x128x256xbf16>
    %364 = vector.shape_cast %363 : vector<1x128x256xbf16> to vector<128x256xbf16>
    %c10_74 = arith.constant 10 : index
    %c0_75 = arith.constant 0 : index
    %c0_76 = arith.constant 0 : index
    %365 = vector.load %arg3[%c10_74, %c0_75, %c0_76] : memref<23x4x128xf32, #tpu.memory_space<vmem>>, vector<1x4x128xf32>
    %366 = vector.shape_cast %365 : vector<1x4x128xf32> to vector<4x128xf32>
    %367 = vector.extract_strided_slice %366 {offsets = [0, 0], sizes = [1, 128], strides = [1, 1]} : vector<4x128xf32> to vector<1x128xf32>
    %368 = vector.extract_strided_slice %366 {offsets = [1, 0], sizes = [1, 128], strides = [1, 1]} : vector<4x128xf32> to vector<1x128xf32>
    %369 = vector.extract_strided_slice %366 {offsets = [2, 0], sizes = [1, 128], strides = [1, 1]} : vector<4x128xf32> to vector<1x128xf32>
    %370 = vector.extract_strided_slice %366 {offsets = [3, 0], sizes = [1, 128], strides = [1, 1]} : vector<4x128xf32> to vector<1x128xf32>
    %371 = arith.truncf %348 : vector<64x128xf32> to vector<64x128xbf16>
    %cst_77 = arith.constant dense<0.000000e+00> : vector<64x256xf32>
    %372 = tpu.matmul %371, %364, %cst_77 {dimension_numbers = #tpu.dot_dimension_numbers<[1], [0], [0], [1], [0, 0, 1, 1], [], []>} : vector<64x128xbf16>, vector<128x256xbf16>, vector<64x256xf32> -> vector<64x256xf32>
    %373 = vector.extract_strided_slice %372 {offsets = [0, 0], sizes = [64, 128], strides = [1, 1]} : vector<64x256xf32> to vector<64x128xf32>
    %374 = vector.extract_strided_slice %372 {offsets = [0, 128], sizes = [64, 128], strides = [1, 1]} : vector<64x256xf32> to vector<64x128xf32>
    %375 = vector.broadcast %370 : vector<1x128xf32> to vector<64x128xf32>
    %376 = arith.mulf %375, %374 : vector<64x128xf32>
    %377 = vector.broadcast %368 : vector<1x128xf32> to vector<64x128xf32>
    %378 = arith.addf %377, %376 : vector<64x128xf32>
    %379 = arith.mulf %378, %373 : vector<64x128xf32>
    %380 = vector.broadcast %369 : vector<1x128xf32> to vector<64x128xf32>
    %381 = arith.mulf %380, %374 : vector<64x128xf32>
    %382 = vector.broadcast %367 : vector<1x128xf32> to vector<64x128xf32>
    %383 = arith.addf %381, %382 : vector<64x128xf32>
    %384 = arith.addf %379, %383 : vector<64x128xf32>
    %385 = arith.truncf %362 : vector<64x128xf32> to vector<64x128xbf16>
    %cst_78 = arith.constant dense<0.000000e+00> : vector<64x256xf32>
    %386 = tpu.matmul %385, %364, %cst_78 {dimension_numbers = #tpu.dot_dimension_numbers<[1], [0], [0], [1], [0, 0, 1, 1], [], []>} : vector<64x128xbf16>, vector<128x256xbf16>, vector<64x256xf32> -> vector<64x256xf32>
    %387 = vector.extract_strided_slice %386 {offsets = [0, 0], sizes = [64, 128], strides = [1, 1]} : vector<64x256xf32> to vector<64x128xf32>
    %388 = vector.extract_strided_slice %386 {offsets = [0, 128], sizes = [64, 128], strides = [1, 1]} : vector<64x256xf32> to vector<64x128xf32>
    %389 = vector.broadcast %370 : vector<1x128xf32> to vector<64x128xf32>
    %390 = arith.mulf %389, %388 : vector<64x128xf32>
    %391 = vector.broadcast %368 : vector<1x128xf32> to vector<64x128xf32>
    %392 = arith.addf %391, %390 : vector<64x128xf32>
    %393 = arith.mulf %392, %387 : vector<64x128xf32>
    %394 = vector.broadcast %369 : vector<1x128xf32> to vector<64x128xf32>
    %395 = arith.mulf %394, %388 : vector<64x128xf32>
    %396 = vector.broadcast %367 : vector<1x128xf32> to vector<64x128xf32>
    %397 = arith.addf %395, %396 : vector<64x128xf32>
    %398 = arith.addf %393, %397 : vector<64x128xf32>
    %c11 = arith.constant 11 : index
    %c0_79 = arith.constant 0 : index
    %c0_80 = arith.constant 0 : index
    %399 = vector.load %arg2[%c11, %c0_79, %c0_80] : memref<23x128x256xbf16, #tpu.memory_space<vmem>>, vector<1x128x256xbf16>
    %400 = vector.shape_cast %399 : vector<1x128x256xbf16> to vector<128x256xbf16>
    %c11_81 = arith.constant 11 : index
    %c0_82 = arith.constant 0 : index
    %c0_83 = arith.constant 0 : index
    %401 = vector.load %arg3[%c11_81, %c0_82, %c0_83] : memref<23x4x128xf32, #tpu.memory_space<vmem>>, vector<1x4x128xf32>
    %402 = vector.shape_cast %401 : vector<1x4x128xf32> to vector<4x128xf32>
    %403 = vector.extract_strided_slice %402 {offsets = [0, 0], sizes = [1, 128], strides = [1, 1]} : vector<4x128xf32> to vector<1x128xf32>
    %404 = vector.extract_strided_slice %402 {offsets = [1, 0], sizes = [1, 128], strides = [1, 1]} : vector<4x128xf32> to vector<1x128xf32>
    %405 = vector.extract_strided_slice %402 {offsets = [2, 0], sizes = [1, 128], strides = [1, 1]} : vector<4x128xf32> to vector<1x128xf32>
    %406 = vector.extract_strided_slice %402 {offsets = [3, 0], sizes = [1, 128], strides = [1, 1]} : vector<4x128xf32> to vector<1x128xf32>
    %407 = arith.truncf %384 : vector<64x128xf32> to vector<64x128xbf16>
    %cst_84 = arith.constant dense<0.000000e+00> : vector<64x256xf32>
    %408 = tpu.matmul %407, %400, %cst_84 {dimension_numbers = #tpu.dot_dimension_numbers<[1], [0], [0], [1], [0, 0, 1, 1], [], []>} : vector<64x128xbf16>, vector<128x256xbf16>, vector<64x256xf32> -> vector<64x256xf32>
    %409 = vector.extract_strided_slice %408 {offsets = [0, 0], sizes = [64, 128], strides = [1, 1]} : vector<64x256xf32> to vector<64x128xf32>
    %410 = vector.extract_strided_slice %408 {offsets = [0, 128], sizes = [64, 128], strides = [1, 1]} : vector<64x256xf32> to vector<64x128xf32>
    %411 = vector.broadcast %406 : vector<1x128xf32> to vector<64x128xf32>
    %412 = arith.mulf %411, %410 : vector<64x128xf32>
    %413 = vector.broadcast %404 : vector<1x128xf32> to vector<64x128xf32>
    %414 = arith.addf %413, %412 : vector<64x128xf32>
    %415 = arith.mulf %414, %409 : vector<64x128xf32>
    %416 = vector.broadcast %405 : vector<1x128xf32> to vector<64x128xf32>
    %417 = arith.mulf %416, %410 : vector<64x128xf32>
    %418 = vector.broadcast %403 : vector<1x128xf32> to vector<64x128xf32>
    %419 = arith.addf %417, %418 : vector<64x128xf32>
    %420 = arith.addf %415, %419 : vector<64x128xf32>
    %421 = arith.truncf %398 : vector<64x128xf32> to vector<64x128xbf16>
    %cst_85 = arith.constant dense<0.000000e+00> : vector<64x256xf32>
    %422 = tpu.matmul %421, %400, %cst_85 {dimension_numbers = #tpu.dot_dimension_numbers<[1], [0], [0], [1], [0, 0, 1, 1], [], []>} : vector<64x128xbf16>, vector<128x256xbf16>, vector<64x256xf32> -> vector<64x256xf32>
    %423 = vector.extract_strided_slice %422 {offsets = [0, 0], sizes = [64, 128], strides = [1, 1]} : vector<64x256xf32> to vector<64x128xf32>
    %424 = vector.extract_strided_slice %422 {offsets = [0, 128], sizes = [64, 128], strides = [1, 1]} : vector<64x256xf32> to vector<64x128xf32>
    %425 = vector.broadcast %406 : vector<1x128xf32> to vector<64x128xf32>
    %426 = arith.mulf %425, %424 : vector<64x128xf32>
    %427 = vector.broadcast %404 : vector<1x128xf32> to vector<64x128xf32>
    %428 = arith.addf %427, %426 : vector<64x128xf32>
    %429 = arith.mulf %428, %423 : vector<64x128xf32>
    %430 = vector.broadcast %405 : vector<1x128xf32> to vector<64x128xf32>
    %431 = arith.mulf %430, %424 : vector<64x128xf32>
    %432 = vector.broadcast %403 : vector<1x128xf32> to vector<64x128xf32>
    %433 = arith.addf %431, %432 : vector<64x128xf32>
    %434 = arith.addf %429, %433 : vector<64x128xf32>
    %c12 = arith.constant 12 : index
    %c0_86 = arith.constant 0 : index
    %c0_87 = arith.constant 0 : index
    %435 = vector.load %arg2[%c12, %c0_86, %c0_87] : memref<23x128x256xbf16, #tpu.memory_space<vmem>>, vector<1x128x256xbf16>
    %436 = vector.shape_cast %435 : vector<1x128x256xbf16> to vector<128x256xbf16>
    %c12_88 = arith.constant 12 : index
    %c0_89 = arith.constant 0 : index
    %c0_90 = arith.constant 0 : index
    %437 = vector.load %arg3[%c12_88, %c0_89, %c0_90] : memref<23x4x128xf32, #tpu.memory_space<vmem>>, vector<1x4x128xf32>
    %438 = vector.shape_cast %437 : vector<1x4x128xf32> to vector<4x128xf32>
    %439 = vector.extract_strided_slice %438 {offsets = [0, 0], sizes = [1, 128], strides = [1, 1]} : vector<4x128xf32> to vector<1x128xf32>
    %440 = vector.extract_strided_slice %438 {offsets = [1, 0], sizes = [1, 128], strides = [1, 1]} : vector<4x128xf32> to vector<1x128xf32>
    %441 = vector.extract_strided_slice %438 {offsets = [2, 0], sizes = [1, 128], strides = [1, 1]} : vector<4x128xf32> to vector<1x128xf32>
    %442 = vector.extract_strided_slice %438 {offsets = [3, 0], sizes = [1, 128], strides = [1, 1]} : vector<4x128xf32> to vector<1x128xf32>
    %443 = arith.truncf %420 : vector<64x128xf32> to vector<64x128xbf16>
    %cst_91 = arith.constant dense<0.000000e+00> : vector<64x256xf32>
    %444 = tpu.matmul %443, %436, %cst_91 {dimension_numbers = #tpu.dot_dimension_numbers<[1], [0], [0], [1], [0, 0, 1, 1], [], []>} : vector<64x128xbf16>, vector<128x256xbf16>, vector<64x256xf32> -> vector<64x256xf32>
    %445 = vector.extract_strided_slice %444 {offsets = [0, 0], sizes = [64, 128], strides = [1, 1]} : vector<64x256xf32> to vector<64x128xf32>
    %446 = vector.extract_strided_slice %444 {offsets = [0, 128], sizes = [64, 128], strides = [1, 1]} : vector<64x256xf32> to vector<64x128xf32>
    %447 = vector.broadcast %442 : vector<1x128xf32> to vector<64x128xf32>
    %448 = arith.mulf %447, %446 : vector<64x128xf32>
    %449 = vector.broadcast %440 : vector<1x128xf32> to vector<64x128xf32>
    %450 = arith.addf %449, %448 : vector<64x128xf32>
    %451 = arith.mulf %450, %445 : vector<64x128xf32>
    %452 = vector.broadcast %441 : vector<1x128xf32> to vector<64x128xf32>
    %453 = arith.mulf %452, %446 : vector<64x128xf32>
    %454 = vector.broadcast %439 : vector<1x128xf32> to vector<64x128xf32>
    %455 = arith.addf %453, %454 : vector<64x128xf32>
    %456 = arith.addf %451, %455 : vector<64x128xf32>
    %457 = arith.truncf %434 : vector<64x128xf32> to vector<64x128xbf16>
    %cst_92 = arith.constant dense<0.000000e+00> : vector<64x256xf32>
    %458 = tpu.matmul %457, %436, %cst_92 {dimension_numbers = #tpu.dot_dimension_numbers<[1], [0], [0], [1], [0, 0, 1, 1], [], []>} : vector<64x128xbf16>, vector<128x256xbf16>, vector<64x256xf32> -> vector<64x256xf32>
    %459 = vector.extract_strided_slice %458 {offsets = [0, 0], sizes = [64, 128], strides = [1, 1]} : vector<64x256xf32> to vector<64x128xf32>
    %460 = vector.extract_strided_slice %458 {offsets = [0, 128], sizes = [64, 128], strides = [1, 1]} : vector<64x256xf32> to vector<64x128xf32>
    %461 = vector.broadcast %442 : vector<1x128xf32> to vector<64x128xf32>
    %462 = arith.mulf %461, %460 : vector<64x128xf32>
    %463 = vector.broadcast %440 : vector<1x128xf32> to vector<64x128xf32>
    %464 = arith.addf %463, %462 : vector<64x128xf32>
    %465 = arith.mulf %464, %459 : vector<64x128xf32>
    %466 = vector.broadcast %441 : vector<1x128xf32> to vector<64x128xf32>
    %467 = arith.mulf %466, %460 : vector<64x128xf32>
    %468 = vector.broadcast %439 : vector<1x128xf32> to vector<64x128xf32>
    %469 = arith.addf %467, %468 : vector<64x128xf32>
    %470 = arith.addf %465, %469 : vector<64x128xf32>
    %c13 = arith.constant 13 : index
    %c0_93 = arith.constant 0 : index
    %c0_94 = arith.constant 0 : index
    %471 = vector.load %arg2[%c13, %c0_93, %c0_94] : memref<23x128x256xbf16, #tpu.memory_space<vmem>>, vector<1x128x256xbf16>
    %472 = vector.shape_cast %471 : vector<1x128x256xbf16> to vector<128x256xbf16>
    %c13_95 = arith.constant 13 : index
    %c0_96 = arith.constant 0 : index
    %c0_97 = arith.constant 0 : index
    %473 = vector.load %arg3[%c13_95, %c0_96, %c0_97] : memref<23x4x128xf32, #tpu.memory_space<vmem>>, vector<1x4x128xf32>
    %474 = vector.shape_cast %473 : vector<1x4x128xf32> to vector<4x128xf32>
    %475 = vector.extract_strided_slice %474 {offsets = [0, 0], sizes = [1, 128], strides = [1, 1]} : vector<4x128xf32> to vector<1x128xf32>
    %476 = vector.extract_strided_slice %474 {offsets = [1, 0], sizes = [1, 128], strides = [1, 1]} : vector<4x128xf32> to vector<1x128xf32>
    %477 = vector.extract_strided_slice %474 {offsets = [2, 0], sizes = [1, 128], strides = [1, 1]} : vector<4x128xf32> to vector<1x128xf32>
    %478 = vector.extract_strided_slice %474 {offsets = [3, 0], sizes = [1, 128], strides = [1, 1]} : vector<4x128xf32> to vector<1x128xf32>
    %479 = arith.truncf %456 : vector<64x128xf32> to vector<64x128xbf16>
    %cst_98 = arith.constant dense<0.000000e+00> : vector<64x256xf32>
    %480 = tpu.matmul %479, %472, %cst_98 {dimension_numbers = #tpu.dot_dimension_numbers<[1], [0], [0], [1], [0, 0, 1, 1], [], []>} : vector<64x128xbf16>, vector<128x256xbf16>, vector<64x256xf32> -> vector<64x256xf32>
    %481 = vector.extract_strided_slice %480 {offsets = [0, 0], sizes = [64, 128], strides = [1, 1]} : vector<64x256xf32> to vector<64x128xf32>
    %482 = vector.extract_strided_slice %480 {offsets = [0, 128], sizes = [64, 128], strides = [1, 1]} : vector<64x256xf32> to vector<64x128xf32>
    %483 = vector.broadcast %478 : vector<1x128xf32> to vector<64x128xf32>
    %484 = arith.mulf %483, %482 : vector<64x128xf32>
    %485 = vector.broadcast %476 : vector<1x128xf32> to vector<64x128xf32>
    %486 = arith.addf %485, %484 : vector<64x128xf32>
    %487 = arith.mulf %486, %481 : vector<64x128xf32>
    %488 = vector.broadcast %477 : vector<1x128xf32> to vector<64x128xf32>
    %489 = arith.mulf %488, %482 : vector<64x128xf32>
    %490 = vector.broadcast %475 : vector<1x128xf32> to vector<64x128xf32>
    %491 = arith.addf %489, %490 : vector<64x128xf32>
    %492 = arith.addf %487, %491 : vector<64x128xf32>
    %493 = arith.truncf %470 : vector<64x128xf32> to vector<64x128xbf16>
    %cst_99 = arith.constant dense<0.000000e+00> : vector<64x256xf32>
    %494 = tpu.matmul %493, %472, %cst_99 {dimension_numbers = #tpu.dot_dimension_numbers<[1], [0], [0], [1], [0, 0, 1, 1], [], []>} : vector<64x128xbf16>, vector<128x256xbf16>, vector<64x256xf32> -> vector<64x256xf32>
    %495 = vector.extract_strided_slice %494 {offsets = [0, 0], sizes = [64, 128], strides = [1, 1]} : vector<64x256xf32> to vector<64x128xf32>
    %496 = vector.extract_strided_slice %494 {offsets = [0, 128], sizes = [64, 128], strides = [1, 1]} : vector<64x256xf32> to vector<64x128xf32>
    %497 = vector.broadcast %478 : vector<1x128xf32> to vector<64x128xf32>
    %498 = arith.mulf %497, %496 : vector<64x128xf32>
    %499 = vector.broadcast %476 : vector<1x128xf32> to vector<64x128xf32>
    %500 = arith.addf %499, %498 : vector<64x128xf32>
    %501 = arith.mulf %500, %495 : vector<64x128xf32>
    %502 = vector.broadcast %477 : vector<1x128xf32> to vector<64x128xf32>
    %503 = arith.mulf %502, %496 : vector<64x128xf32>
    %504 = vector.broadcast %475 : vector<1x128xf32> to vector<64x128xf32>
    %505 = arith.addf %503, %504 : vector<64x128xf32>
    %506 = arith.addf %501, %505 : vector<64x128xf32>
    %c14 = arith.constant 14 : index
    %c0_100 = arith.constant 0 : index
    %c0_101 = arith.constant 0 : index
    %507 = vector.load %arg2[%c14, %c0_100, %c0_101] : memref<23x128x256xbf16, #tpu.memory_space<vmem>>, vector<1x128x256xbf16>
    %508 = vector.shape_cast %507 : vector<1x128x256xbf16> to vector<128x256xbf16>
    %c14_102 = arith.constant 14 : index
    %c0_103 = arith.constant 0 : index
    %c0_104 = arith.constant 0 : index
    %509 = vector.load %arg3[%c14_102, %c0_103, %c0_104] : memref<23x4x128xf32, #tpu.memory_space<vmem>>, vector<1x4x128xf32>
    %510 = vector.shape_cast %509 : vector<1x4x128xf32> to vector<4x128xf32>
    %511 = vector.extract_strided_slice %510 {offsets = [0, 0], sizes = [1, 128], strides = [1, 1]} : vector<4x128xf32> to vector<1x128xf32>
    %512 = vector.extract_strided_slice %510 {offsets = [1, 0], sizes = [1, 128], strides = [1, 1]} : vector<4x128xf32> to vector<1x128xf32>
    %513 = vector.extract_strided_slice %510 {offsets = [2, 0], sizes = [1, 128], strides = [1, 1]} : vector<4x128xf32> to vector<1x128xf32>
    %514 = vector.extract_strided_slice %510 {offsets = [3, 0], sizes = [1, 128], strides = [1, 1]} : vector<4x128xf32> to vector<1x128xf32>
    %515 = arith.truncf %492 : vector<64x128xf32> to vector<64x128xbf16>
    %cst_105 = arith.constant dense<0.000000e+00> : vector<64x256xf32>
    %516 = tpu.matmul %515, %508, %cst_105 {dimension_numbers = #tpu.dot_dimension_numbers<[1], [0], [0], [1], [0, 0, 1, 1], [], []>} : vector<64x128xbf16>, vector<128x256xbf16>, vector<64x256xf32> -> vector<64x256xf32>
    %517 = vector.extract_strided_slice %516 {offsets = [0, 0], sizes = [64, 128], strides = [1, 1]} : vector<64x256xf32> to vector<64x128xf32>
    %518 = vector.extract_strided_slice %516 {offsets = [0, 128], sizes = [64, 128], strides = [1, 1]} : vector<64x256xf32> to vector<64x128xf32>
    %519 = vector.broadcast %514 : vector<1x128xf32> to vector<64x128xf32>
    %520 = arith.mulf %519, %518 : vector<64x128xf32>
    %521 = vector.broadcast %512 : vector<1x128xf32> to vector<64x128xf32>
    %522 = arith.addf %521, %520 : vector<64x128xf32>
    %523 = arith.mulf %522, %517 : vector<64x128xf32>
    %524 = vector.broadcast %513 : vector<1x128xf32> to vector<64x128xf32>
    %525 = arith.mulf %524, %518 : vector<64x128xf32>
    %526 = vector.broadcast %511 : vector<1x128xf32> to vector<64x128xf32>
    %527 = arith.addf %525, %526 : vector<64x128xf32>
    %528 = arith.addf %523, %527 : vector<64x128xf32>
    %529 = arith.truncf %506 : vector<64x128xf32> to vector<64x128xbf16>
    %cst_106 = arith.constant dense<0.000000e+00> : vector<64x256xf32>
    %530 = tpu.matmul %529, %508, %cst_106 {dimension_numbers = #tpu.dot_dimension_numbers<[1], [0], [0], [1], [0, 0, 1, 1], [], []>} : vector<64x128xbf16>, vector<128x256xbf16>, vector<64x256xf32> -> vector<64x256xf32>
    %531 = vector.extract_strided_slice %530 {offsets = [0, 0], sizes = [64, 128], strides = [1, 1]} : vector<64x256xf32> to vector<64x128xf32>
    %532 = vector.extract_strided_slice %530 {offsets = [0, 128], sizes = [64, 128], strides = [1, 1]} : vector<64x256xf32> to vector<64x128xf32>
    %533 = vector.broadcast %514 : vector<1x128xf32> to vector<64x128xf32>
    %534 = arith.mulf %533, %532 : vector<64x128xf32>
    %535 = vector.broadcast %512 : vector<1x128xf32> to vector<64x128xf32>
    %536 = arith.addf %535, %534 : vector<64x128xf32>
    %537 = arith.mulf %536, %531 : vector<64x128xf32>
    %538 = vector.broadcast %513 : vector<1x128xf32> to vector<64x128xf32>
    %539 = arith.mulf %538, %532 : vector<64x128xf32>
    %540 = vector.broadcast %511 : vector<1x128xf32> to vector<64x128xf32>
    %541 = arith.addf %539, %540 : vector<64x128xf32>
    %542 = arith.addf %537, %541 : vector<64x128xf32>
    %c15 = arith.constant 15 : index
    %c0_107 = arith.constant 0 : index
    %c0_108 = arith.constant 0 : index
    %543 = vector.load %arg2[%c15, %c0_107, %c0_108] : memref<23x128x256xbf16, #tpu.memory_space<vmem>>, vector<1x128x256xbf16>
    %544 = vector.shape_cast %543 : vector<1x128x256xbf16> to vector<128x256xbf16>
    %c15_109 = arith.constant 15 : index
    %c0_110 = arith.constant 0 : index
    %c0_111 = arith.constant 0 : index
    %545 = vector.load %arg3[%c15_109, %c0_110, %c0_111] : memref<23x4x128xf32, #tpu.memory_space<vmem>>, vector<1x4x128xf32>
    %546 = vector.shape_cast %545 : vector<1x4x128xf32> to vector<4x128xf32>
    %547 = vector.extract_strided_slice %546 {offsets = [0, 0], sizes = [1, 128], strides = [1, 1]} : vector<4x128xf32> to vector<1x128xf32>
    %548 = vector.extract_strided_slice %546 {offsets = [1, 0], sizes = [1, 128], strides = [1, 1]} : vector<4x128xf32> to vector<1x128xf32>
    %549 = vector.extract_strided_slice %546 {offsets = [2, 0], sizes = [1, 128], strides = [1, 1]} : vector<4x128xf32> to vector<1x128xf32>
    %550 = vector.extract_strided_slice %546 {offsets = [3, 0], sizes = [1, 128], strides = [1, 1]} : vector<4x128xf32> to vector<1x128xf32>
    %551 = arith.truncf %528 : vector<64x128xf32> to vector<64x128xbf16>
    %cst_112 = arith.constant dense<0.000000e+00> : vector<64x256xf32>
    %552 = tpu.matmul %551, %544, %cst_112 {dimension_numbers = #tpu.dot_dimension_numbers<[1], [0], [0], [1], [0, 0, 1, 1], [], []>} : vector<64x128xbf16>, vector<128x256xbf16>, vector<64x256xf32> -> vector<64x256xf32>
    %553 = vector.extract_strided_slice %552 {offsets = [0, 0], sizes = [64, 128], strides = [1, 1]} : vector<64x256xf32> to vector<64x128xf32>
    %554 = vector.extract_strided_slice %552 {offsets = [0, 128], sizes = [64, 128], strides = [1, 1]} : vector<64x256xf32> to vector<64x128xf32>
    %555 = vector.broadcast %550 : vector<1x128xf32> to vector<64x128xf32>
    %556 = arith.mulf %555, %554 : vector<64x128xf32>
    %557 = vector.broadcast %548 : vector<1x128xf32> to vector<64x128xf32>
    %558 = arith.addf %557, %556 : vector<64x128xf32>
    %559 = arith.mulf %558, %553 : vector<64x128xf32>
    %560 = vector.broadcast %549 : vector<1x128xf32> to vector<64x128xf32>
    %561 = arith.mulf %560, %554 : vector<64x128xf32>
    %562 = vector.broadcast %547 : vector<1x128xf32> to vector<64x128xf32>
    %563 = arith.addf %561, %562 : vector<64x128xf32>
    %564 = arith.addf %559, %563 : vector<64x128xf32>
    %565 = arith.truncf %542 : vector<64x128xf32> to vector<64x128xbf16>
    %cst_113 = arith.constant dense<0.000000e+00> : vector<64x256xf32>
    %566 = tpu.matmul %565, %544, %cst_113 {dimension_numbers = #tpu.dot_dimension_numbers<[1], [0], [0], [1], [0, 0, 1, 1], [], []>} : vector<64x128xbf16>, vector<128x256xbf16>, vector<64x256xf32> -> vector<64x256xf32>
    %567 = vector.extract_strided_slice %566 {offsets = [0, 0], sizes = [64, 128], strides = [1, 1]} : vector<64x256xf32> to vector<64x128xf32>
    %568 = vector.extract_strided_slice %566 {offsets = [0, 128], sizes = [64, 128], strides = [1, 1]} : vector<64x256xf32> to vector<64x128xf32>
    %569 = vector.broadcast %550 : vector<1x128xf32> to vector<64x128xf32>
    %570 = arith.mulf %569, %568 : vector<64x128xf32>
    %571 = vector.broadcast %548 : vector<1x128xf32> to vector<64x128xf32>
    %572 = arith.addf %571, %570 : vector<64x128xf32>
    %573 = arith.mulf %572, %567 : vector<64x128xf32>
    %574 = vector.broadcast %549 : vector<1x128xf32> to vector<64x128xf32>
    %575 = arith.mulf %574, %568 : vector<64x128xf32>
    %576 = vector.broadcast %547 : vector<1x128xf32> to vector<64x128xf32>
    %577 = arith.addf %575, %576 : vector<64x128xf32>
    %578 = arith.addf %573, %577 : vector<64x128xf32>
    %c16 = arith.constant 16 : index
    %c0_114 = arith.constant 0 : index
    %c0_115 = arith.constant 0 : index
    %579 = vector.load %arg2[%c16, %c0_114, %c0_115] : memref<23x128x256xbf16, #tpu.memory_space<vmem>>, vector<1x128x256xbf16>
    %580 = vector.shape_cast %579 : vector<1x128x256xbf16> to vector<128x256xbf16>
    %c16_116 = arith.constant 16 : index
    %c0_117 = arith.constant 0 : index
    %c0_118 = arith.constant 0 : index
    %581 = vector.load %arg3[%c16_116, %c0_117, %c0_118] : memref<23x4x128xf32, #tpu.memory_space<vmem>>, vector<1x4x128xf32>
    %582 = vector.shape_cast %581 : vector<1x4x128xf32> to vector<4x128xf32>
    %583 = vector.extract_strided_slice %582 {offsets = [0, 0], sizes = [1, 128], strides = [1, 1]} : vector<4x128xf32> to vector<1x128xf32>
    %584 = vector.extract_strided_slice %582 {offsets = [1, 0], sizes = [1, 128], strides = [1, 1]} : vector<4x128xf32> to vector<1x128xf32>
    %585 = vector.extract_strided_slice %582 {offsets = [2, 0], sizes = [1, 128], strides = [1, 1]} : vector<4x128xf32> to vector<1x128xf32>
    %586 = vector.extract_strided_slice %582 {offsets = [3, 0], sizes = [1, 128], strides = [1, 1]} : vector<4x128xf32> to vector<1x128xf32>
    %587 = arith.truncf %564 : vector<64x128xf32> to vector<64x128xbf16>
    %cst_119 = arith.constant dense<0.000000e+00> : vector<64x256xf32>
    %588 = tpu.matmul %587, %580, %cst_119 {dimension_numbers = #tpu.dot_dimension_numbers<[1], [0], [0], [1], [0, 0, 1, 1], [], []>} : vector<64x128xbf16>, vector<128x256xbf16>, vector<64x256xf32> -> vector<64x256xf32>
    %589 = vector.extract_strided_slice %588 {offsets = [0, 0], sizes = [64, 128], strides = [1, 1]} : vector<64x256xf32> to vector<64x128xf32>
    %590 = vector.extract_strided_slice %588 {offsets = [0, 128], sizes = [64, 128], strides = [1, 1]} : vector<64x256xf32> to vector<64x128xf32>
    %591 = vector.broadcast %586 : vector<1x128xf32> to vector<64x128xf32>
    %592 = arith.mulf %591, %590 : vector<64x128xf32>
    %593 = vector.broadcast %584 : vector<1x128xf32> to vector<64x128xf32>
    %594 = arith.addf %593, %592 : vector<64x128xf32>
    %595 = arith.mulf %594, %589 : vector<64x128xf32>
    %596 = vector.broadcast %585 : vector<1x128xf32> to vector<64x128xf32>
    %597 = arith.mulf %596, %590 : vector<64x128xf32>
    %598 = vector.broadcast %583 : vector<1x128xf32> to vector<64x128xf32>
    %599 = arith.addf %597, %598 : vector<64x128xf32>
    %600 = arith.addf %595, %599 : vector<64x128xf32>
    %601 = arith.truncf %578 : vector<64x128xf32> to vector<64x128xbf16>
    %cst_120 = arith.constant dense<0.000000e+00> : vector<64x256xf32>
    %602 = tpu.matmul %601, %580, %cst_120 {dimension_numbers = #tpu.dot_dimension_numbers<[1], [0], [0], [1], [0, 0, 1, 1], [], []>} : vector<64x128xbf16>, vector<128x256xbf16>, vector<64x256xf32> -> vector<64x256xf32>
    %603 = vector.extract_strided_slice %602 {offsets = [0, 0], sizes = [64, 128], strides = [1, 1]} : vector<64x256xf32> to vector<64x128xf32>
    %604 = vector.extract_strided_slice %602 {offsets = [0, 128], sizes = [64, 128], strides = [1, 1]} : vector<64x256xf32> to vector<64x128xf32>
    %605 = vector.broadcast %586 : vector<1x128xf32> to vector<64x128xf32>
    %606 = arith.mulf %605, %604 : vector<64x128xf32>
    %607 = vector.broadcast %584 : vector<1x128xf32> to vector<64x128xf32>
    %608 = arith.addf %607, %606 : vector<64x128xf32>
    %609 = arith.mulf %608, %603 : vector<64x128xf32>
    %610 = vector.broadcast %585 : vector<1x128xf32> to vector<64x128xf32>
    %611 = arith.mulf %610, %604 : vector<64x128xf32>
    %612 = vector.broadcast %583 : vector<1x128xf32> to vector<64x128xf32>
    %613 = arith.addf %611, %612 : vector<64x128xf32>
    %614 = arith.addf %609, %613 : vector<64x128xf32>
    %c17 = arith.constant 17 : index
    %c0_121 = arith.constant 0 : index
    %c0_122 = arith.constant 0 : index
    %615 = vector.load %arg2[%c17, %c0_121, %c0_122] : memref<23x128x256xbf16, #tpu.memory_space<vmem>>, vector<1x128x256xbf16>
    %616 = vector.shape_cast %615 : vector<1x128x256xbf16> to vector<128x256xbf16>
    %c17_123 = arith.constant 17 : index
    %c0_124 = arith.constant 0 : index
    %c0_125 = arith.constant 0 : index
    %617 = vector.load %arg3[%c17_123, %c0_124, %c0_125] : memref<23x4x128xf32, #tpu.memory_space<vmem>>, vector<1x4x128xf32>
    %618 = vector.shape_cast %617 : vector<1x4x128xf32> to vector<4x128xf32>
    %619 = vector.extract_strided_slice %618 {offsets = [0, 0], sizes = [1, 128], strides = [1, 1]} : vector<4x128xf32> to vector<1x128xf32>
    %620 = vector.extract_strided_slice %618 {offsets = [1, 0], sizes = [1, 128], strides = [1, 1]} : vector<4x128xf32> to vector<1x128xf32>
    %621 = vector.extract_strided_slice %618 {offsets = [2, 0], sizes = [1, 128], strides = [1, 1]} : vector<4x128xf32> to vector<1x128xf32>
    %622 = vector.extract_strided_slice %618 {offsets = [3, 0], sizes = [1, 128], strides = [1, 1]} : vector<4x128xf32> to vector<1x128xf32>
    %623 = arith.truncf %600 : vector<64x128xf32> to vector<64x128xbf16>
    %cst_126 = arith.constant dense<0.000000e+00> : vector<64x256xf32>
    %624 = tpu.matmul %623, %616, %cst_126 {dimension_numbers = #tpu.dot_dimension_numbers<[1], [0], [0], [1], [0, 0, 1, 1], [], []>} : vector<64x128xbf16>, vector<128x256xbf16>, vector<64x256xf32> -> vector<64x256xf32>
    %625 = vector.extract_strided_slice %624 {offsets = [0, 0], sizes = [64, 128], strides = [1, 1]} : vector<64x256xf32> to vector<64x128xf32>
    %626 = vector.extract_strided_slice %624 {offsets = [0, 128], sizes = [64, 128], strides = [1, 1]} : vector<64x256xf32> to vector<64x128xf32>
    %627 = vector.broadcast %622 : vector<1x128xf32> to vector<64x128xf32>
    %628 = arith.mulf %627, %626 : vector<64x128xf32>
    %629 = vector.broadcast %620 : vector<1x128xf32> to vector<64x128xf32>
    %630 = arith.addf %629, %628 : vector<64x128xf32>
    %631 = arith.mulf %630, %625 : vector<64x128xf32>
    %632 = vector.broadcast %621 : vector<1x128xf32> to vector<64x128xf32>
    %633 = arith.mulf %632, %626 : vector<64x128xf32>
    %634 = vector.broadcast %619 : vector<1x128xf32> to vector<64x128xf32>
    %635 = arith.addf %633, %634 : vector<64x128xf32>
    %636 = arith.addf %631, %635 : vector<64x128xf32>
    %637 = arith.truncf %614 : vector<64x128xf32> to vector<64x128xbf16>
    %cst_127 = arith.constant dense<0.000000e+00> : vector<64x256xf32>
    %638 = tpu.matmul %637, %616, %cst_127 {dimension_numbers = #tpu.dot_dimension_numbers<[1], [0], [0], [1], [0, 0, 1, 1], [], []>} : vector<64x128xbf16>, vector<128x256xbf16>, vector<64x256xf32> -> vector<64x256xf32>
    %639 = vector.extract_strided_slice %638 {offsets = [0, 0], sizes = [64, 128], strides = [1, 1]} : vector<64x256xf32> to vector<64x128xf32>
    %640 = vector.extract_strided_slice %638 {offsets = [0, 128], sizes = [64, 128], strides = [1, 1]} : vector<64x256xf32> to vector<64x128xf32>
    %641 = vector.broadcast %622 : vector<1x128xf32> to vector<64x128xf32>
    %642 = arith.mulf %641, %640 : vector<64x128xf32>
    %643 = vector.broadcast %620 : vector<1x128xf32> to vector<64x128xf32>
    %644 = arith.addf %643, %642 : vector<64x128xf32>
    %645 = arith.mulf %644, %639 : vector<64x128xf32>
    %646 = vector.broadcast %621 : vector<1x128xf32> to vector<64x128xf32>
    %647 = arith.mulf %646, %640 : vector<64x128xf32>
    %648 = vector.broadcast %619 : vector<1x128xf32> to vector<64x128xf32>
    %649 = arith.addf %647, %648 : vector<64x128xf32>
    %650 = arith.addf %645, %649 : vector<64x128xf32>
    %c18 = arith.constant 18 : index
    %c0_128 = arith.constant 0 : index
    %c0_129 = arith.constant 0 : index
    %651 = vector.load %arg2[%c18, %c0_128, %c0_129] : memref<23x128x256xbf16, #tpu.memory_space<vmem>>, vector<1x128x256xbf16>
    %652 = vector.shape_cast %651 : vector<1x128x256xbf16> to vector<128x256xbf16>
    %c18_130 = arith.constant 18 : index
    %c0_131 = arith.constant 0 : index
    %c0_132 = arith.constant 0 : index
    %653 = vector.load %arg3[%c18_130, %c0_131, %c0_132] : memref<23x4x128xf32, #tpu.memory_space<vmem>>, vector<1x4x128xf32>
    %654 = vector.shape_cast %653 : vector<1x4x128xf32> to vector<4x128xf32>
    %655 = vector.extract_strided_slice %654 {offsets = [0, 0], sizes = [1, 128], strides = [1, 1]} : vector<4x128xf32> to vector<1x128xf32>
    %656 = vector.extract_strided_slice %654 {offsets = [1, 0], sizes = [1, 128], strides = [1, 1]} : vector<4x128xf32> to vector<1x128xf32>
    %657 = vector.extract_strided_slice %654 {offsets = [2, 0], sizes = [1, 128], strides = [1, 1]} : vector<4x128xf32> to vector<1x128xf32>
    %658 = vector.extract_strided_slice %654 {offsets = [3, 0], sizes = [1, 128], strides = [1, 1]} : vector<4x128xf32> to vector<1x128xf32>
    %659 = arith.truncf %636 : vector<64x128xf32> to vector<64x128xbf16>
    %cst_133 = arith.constant dense<0.000000e+00> : vector<64x256xf32>
    %660 = tpu.matmul %659, %652, %cst_133 {dimension_numbers = #tpu.dot_dimension_numbers<[1], [0], [0], [1], [0, 0, 1, 1], [], []>} : vector<64x128xbf16>, vector<128x256xbf16>, vector<64x256xf32> -> vector<64x256xf32>
    %661 = vector.extract_strided_slice %660 {offsets = [0, 0], sizes = [64, 128], strides = [1, 1]} : vector<64x256xf32> to vector<64x128xf32>
    %662 = vector.extract_strided_slice %660 {offsets = [0, 128], sizes = [64, 128], strides = [1, 1]} : vector<64x256xf32> to vector<64x128xf32>
    %663 = vector.broadcast %658 : vector<1x128xf32> to vector<64x128xf32>
    %664 = arith.mulf %663, %662 : vector<64x128xf32>
    %665 = vector.broadcast %656 : vector<1x128xf32> to vector<64x128xf32>
    %666 = arith.addf %665, %664 : vector<64x128xf32>
    %667 = arith.mulf %666, %661 : vector<64x128xf32>
    %668 = vector.broadcast %657 : vector<1x128xf32> to vector<64x128xf32>
    %669 = arith.mulf %668, %662 : vector<64x128xf32>
    %670 = vector.broadcast %655 : vector<1x128xf32> to vector<64x128xf32>
    %671 = arith.addf %669, %670 : vector<64x128xf32>
    %672 = arith.addf %667, %671 : vector<64x128xf32>
    %673 = arith.truncf %650 : vector<64x128xf32> to vector<64x128xbf16>
    %cst_134 = arith.constant dense<0.000000e+00> : vector<64x256xf32>
    %674 = tpu.matmul %673, %652, %cst_134 {dimension_numbers = #tpu.dot_dimension_numbers<[1], [0], [0], [1], [0, 0, 1, 1], [], []>} : vector<64x128xbf16>, vector<128x256xbf16>, vector<64x256xf32> -> vector<64x256xf32>
    %675 = vector.extract_strided_slice %674 {offsets = [0, 0], sizes = [64, 128], strides = [1, 1]} : vector<64x256xf32> to vector<64x128xf32>
    %676 = vector.extract_strided_slice %674 {offsets = [0, 128], sizes = [64, 128], strides = [1, 1]} : vector<64x256xf32> to vector<64x128xf32>
    %677 = vector.broadcast %658 : vector<1x128xf32> to vector<64x128xf32>
    %678 = arith.mulf %677, %676 : vector<64x128xf32>
    %679 = vector.broadcast %656 : vector<1x128xf32> to vector<64x128xf32>
    %680 = arith.addf %679, %678 : vector<64x128xf32>
    %681 = arith.mulf %680, %675 : vector<64x128xf32>
    %682 = vector.broadcast %657 : vector<1x128xf32> to vector<64x128xf32>
    %683 = arith.mulf %682, %676 : vector<64x128xf32>
    %684 = vector.broadcast %655 : vector<1x128xf32> to vector<64x128xf32>
    %685 = arith.addf %683, %684 : vector<64x128xf32>
    %686 = arith.addf %681, %685 : vector<64x128xf32>
    %c19 = arith.constant 19 : index
    %c0_135 = arith.constant 0 : index
    %c0_136 = arith.constant 0 : index
    %687 = vector.load %arg2[%c19, %c0_135, %c0_136] : memref<23x128x256xbf16, #tpu.memory_space<vmem>>, vector<1x128x256xbf16>
    %688 = vector.shape_cast %687 : vector<1x128x256xbf16> to vector<128x256xbf16>
    %c19_137 = arith.constant 19 : index
    %c0_138 = arith.constant 0 : index
    %c0_139 = arith.constant 0 : index
    %689 = vector.load %arg3[%c19_137, %c0_138, %c0_139] : memref<23x4x128xf32, #tpu.memory_space<vmem>>, vector<1x4x128xf32>
    %690 = vector.shape_cast %689 : vector<1x4x128xf32> to vector<4x128xf32>
    %691 = vector.extract_strided_slice %690 {offsets = [0, 0], sizes = [1, 128], strides = [1, 1]} : vector<4x128xf32> to vector<1x128xf32>
    %692 = vector.extract_strided_slice %690 {offsets = [1, 0], sizes = [1, 128], strides = [1, 1]} : vector<4x128xf32> to vector<1x128xf32>
    %693 = vector.extract_strided_slice %690 {offsets = [2, 0], sizes = [1, 128], strides = [1, 1]} : vector<4x128xf32> to vector<1x128xf32>
    %694 = vector.extract_strided_slice %690 {offsets = [3, 0], sizes = [1, 128], strides = [1, 1]} : vector<4x128xf32> to vector<1x128xf32>
    %695 = arith.truncf %672 : vector<64x128xf32> to vector<64x128xbf16>
    %cst_140 = arith.constant dense<0.000000e+00> : vector<64x256xf32>
    %696 = tpu.matmul %695, %688, %cst_140 {dimension_numbers = #tpu.dot_dimension_numbers<[1], [0], [0], [1], [0, 0, 1, 1], [], []>} : vector<64x128xbf16>, vector<128x256xbf16>, vector<64x256xf32> -> vector<64x256xf32>
    %697 = vector.extract_strided_slice %696 {offsets = [0, 0], sizes = [64, 128], strides = [1, 1]} : vector<64x256xf32> to vector<64x128xf32>
    %698 = vector.extract_strided_slice %696 {offsets = [0, 128], sizes = [64, 128], strides = [1, 1]} : vector<64x256xf32> to vector<64x128xf32>
    %699 = vector.broadcast %694 : vector<1x128xf32> to vector<64x128xf32>
    %700 = arith.mulf %699, %698 : vector<64x128xf32>
    %701 = vector.broadcast %692 : vector<1x128xf32> to vector<64x128xf32>
    %702 = arith.addf %701, %700 : vector<64x128xf32>
    %703 = arith.mulf %702, %697 : vector<64x128xf32>
    %704 = vector.broadcast %693 : vector<1x128xf32> to vector<64x128xf32>
    %705 = arith.mulf %704, %698 : vector<64x128xf32>
    %706 = vector.broadcast %691 : vector<1x128xf32> to vector<64x128xf32>
    %707 = arith.addf %705, %706 : vector<64x128xf32>
    %708 = arith.addf %703, %707 : vector<64x128xf32>
    %709 = arith.truncf %686 : vector<64x128xf32> to vector<64x128xbf16>
    %cst_141 = arith.constant dense<0.000000e+00> : vector<64x256xf32>
    %710 = tpu.matmul %709, %688, %cst_141 {dimension_numbers = #tpu.dot_dimension_numbers<[1], [0], [0], [1], [0, 0, 1, 1], [], []>} : vector<64x128xbf16>, vector<128x256xbf16>, vector<64x256xf32> -> vector<64x256xf32>
    %711 = vector.extract_strided_slice %710 {offsets = [0, 0], sizes = [64, 128], strides = [1, 1]} : vector<64x256xf32> to vector<64x128xf32>
    %712 = vector.extract_strided_slice %710 {offsets = [0, 128], sizes = [64, 128], strides = [1, 1]} : vector<64x256xf32> to vector<64x128xf32>
    %713 = vector.broadcast %694 : vector<1x128xf32> to vector<64x128xf32>
    %714 = arith.mulf %713, %712 : vector<64x128xf32>
    %715 = vector.broadcast %692 : vector<1x128xf32> to vector<64x128xf32>
    %716 = arith.addf %715, %714 : vector<64x128xf32>
    %717 = arith.mulf %716, %711 : vector<64x128xf32>
    %718 = vector.broadcast %693 : vector<1x128xf32> to vector<64x128xf32>
    %719 = arith.mulf %718, %712 : vector<64x128xf32>
    %720 = vector.broadcast %691 : vector<1x128xf32> to vector<64x128xf32>
    %721 = arith.addf %719, %720 : vector<64x128xf32>
    %722 = arith.addf %717, %721 : vector<64x128xf32>
    %c20 = arith.constant 20 : index
    %c0_142 = arith.constant 0 : index
    %c0_143 = arith.constant 0 : index
    %723 = vector.load %arg2[%c20, %c0_142, %c0_143] : memref<23x128x256xbf16, #tpu.memory_space<vmem>>, vector<1x128x256xbf16>
    %724 = vector.shape_cast %723 : vector<1x128x256xbf16> to vector<128x256xbf16>
    %c20_144 = arith.constant 20 : index
    %c0_145 = arith.constant 0 : index
    %c0_146 = arith.constant 0 : index
    %725 = vector.load %arg3[%c20_144, %c0_145, %c0_146] : memref<23x4x128xf32, #tpu.memory_space<vmem>>, vector<1x4x128xf32>
    %726 = vector.shape_cast %725 : vector<1x4x128xf32> to vector<4x128xf32>
    %727 = vector.extract_strided_slice %726 {offsets = [0, 0], sizes = [1, 128], strides = [1, 1]} : vector<4x128xf32> to vector<1x128xf32>
    %728 = vector.extract_strided_slice %726 {offsets = [1, 0], sizes = [1, 128], strides = [1, 1]} : vector<4x128xf32> to vector<1x128xf32>
    %729 = vector.extract_strided_slice %726 {offsets = [2, 0], sizes = [1, 128], strides = [1, 1]} : vector<4x128xf32> to vector<1x128xf32>
    %730 = vector.extract_strided_slice %726 {offsets = [3, 0], sizes = [1, 128], strides = [1, 1]} : vector<4x128xf32> to vector<1x128xf32>
    %731 = arith.truncf %708 : vector<64x128xf32> to vector<64x128xbf16>
    %cst_147 = arith.constant dense<0.000000e+00> : vector<64x256xf32>
    %732 = tpu.matmul %731, %724, %cst_147 {dimension_numbers = #tpu.dot_dimension_numbers<[1], [0], [0], [1], [0, 0, 1, 1], [], []>} : vector<64x128xbf16>, vector<128x256xbf16>, vector<64x256xf32> -> vector<64x256xf32>
    %733 = vector.extract_strided_slice %732 {offsets = [0, 0], sizes = [64, 128], strides = [1, 1]} : vector<64x256xf32> to vector<64x128xf32>
    %734 = vector.extract_strided_slice %732 {offsets = [0, 128], sizes = [64, 128], strides = [1, 1]} : vector<64x256xf32> to vector<64x128xf32>
    %735 = vector.broadcast %730 : vector<1x128xf32> to vector<64x128xf32>
    %736 = arith.mulf %735, %734 : vector<64x128xf32>
    %737 = vector.broadcast %728 : vector<1x128xf32> to vector<64x128xf32>
    %738 = arith.addf %737, %736 : vector<64x128xf32>
    %739 = arith.mulf %738, %733 : vector<64x128xf32>
    %740 = vector.broadcast %729 : vector<1x128xf32> to vector<64x128xf32>
    %741 = arith.mulf %740, %734 : vector<64x128xf32>
    %742 = vector.broadcast %727 : vector<1x128xf32> to vector<64x128xf32>
    %743 = arith.addf %741, %742 : vector<64x128xf32>
    %744 = arith.addf %739, %743 : vector<64x128xf32>
    %745 = arith.truncf %722 : vector<64x128xf32> to vector<64x128xbf16>
    %cst_148 = arith.constant dense<0.000000e+00> : vector<64x256xf32>
    %746 = tpu.matmul %745, %724, %cst_148 {dimension_numbers = #tpu.dot_dimension_numbers<[1], [0], [0], [1], [0, 0, 1, 1], [], []>} : vector<64x128xbf16>, vector<128x256xbf16>, vector<64x256xf32> -> vector<64x256xf32>
    %747 = vector.extract_strided_slice %746 {offsets = [0, 0], sizes = [64, 128], strides = [1, 1]} : vector<64x256xf32> to vector<64x128xf32>
    %748 = vector.extract_strided_slice %746 {offsets = [0, 128], sizes = [64, 128], strides = [1, 1]} : vector<64x256xf32> to vector<64x128xf32>
    %749 = vector.broadcast %730 : vector<1x128xf32> to vector<64x128xf32>
    %750 = arith.mulf %749, %748 : vector<64x128xf32>
    %751 = vector.broadcast %728 : vector<1x128xf32> to vector<64x128xf32>
    %752 = arith.addf %751, %750 : vector<64x128xf32>
    %753 = arith.mulf %752, %747 : vector<64x128xf32>
    %754 = vector.broadcast %729 : vector<1x128xf32> to vector<64x128xf32>
    %755 = arith.mulf %754, %748 : vector<64x128xf32>
    %756 = vector.broadcast %727 : vector<1x128xf32> to vector<64x128xf32>
    %757 = arith.addf %755, %756 : vector<64x128xf32>
    %758 = arith.addf %753, %757 : vector<64x128xf32>
    %c21 = arith.constant 21 : index
    %c0_149 = arith.constant 0 : index
    %c0_150 = arith.constant 0 : index
    %759 = vector.load %arg2[%c21, %c0_149, %c0_150] : memref<23x128x256xbf16, #tpu.memory_space<vmem>>, vector<1x128x256xbf16>
    %760 = vector.shape_cast %759 : vector<1x128x256xbf16> to vector<128x256xbf16>
    %c21_151 = arith.constant 21 : index
    %c0_152 = arith.constant 0 : index
    %c0_153 = arith.constant 0 : index
    %761 = vector.load %arg3[%c21_151, %c0_152, %c0_153] : memref<23x4x128xf32, #tpu.memory_space<vmem>>, vector<1x4x128xf32>
    %762 = vector.shape_cast %761 : vector<1x4x128xf32> to vector<4x128xf32>
    %763 = vector.extract_strided_slice %762 {offsets = [0, 0], sizes = [1, 128], strides = [1, 1]} : vector<4x128xf32> to vector<1x128xf32>
    %764 = vector.extract_strided_slice %762 {offsets = [1, 0], sizes = [1, 128], strides = [1, 1]} : vector<4x128xf32> to vector<1x128xf32>
    %765 = vector.extract_strided_slice %762 {offsets = [2, 0], sizes = [1, 128], strides = [1, 1]} : vector<4x128xf32> to vector<1x128xf32>
    %766 = vector.extract_strided_slice %762 {offsets = [3, 0], sizes = [1, 128], strides = [1, 1]} : vector<4x128xf32> to vector<1x128xf32>
    %767 = arith.truncf %744 : vector<64x128xf32> to vector<64x128xbf16>
    %cst_154 = arith.constant dense<0.000000e+00> : vector<64x256xf32>
    %768 = tpu.matmul %767, %760, %cst_154 {dimension_numbers = #tpu.dot_dimension_numbers<[1], [0], [0], [1], [0, 0, 1, 1], [], []>} : vector<64x128xbf16>, vector<128x256xbf16>, vector<64x256xf32> -> vector<64x256xf32>
    %769 = vector.extract_strided_slice %768 {offsets = [0, 0], sizes = [64, 128], strides = [1, 1]} : vector<64x256xf32> to vector<64x128xf32>
    %770 = vector.extract_strided_slice %768 {offsets = [0, 128], sizes = [64, 128], strides = [1, 1]} : vector<64x256xf32> to vector<64x128xf32>
    %771 = vector.broadcast %766 : vector<1x128xf32> to vector<64x128xf32>
    %772 = arith.mulf %771, %770 : vector<64x128xf32>
    %773 = vector.broadcast %764 : vector<1x128xf32> to vector<64x128xf32>
    %774 = arith.addf %773, %772 : vector<64x128xf32>
    %775 = arith.mulf %774, %769 : vector<64x128xf32>
    %776 = vector.broadcast %765 : vector<1x128xf32> to vector<64x128xf32>
    %777 = arith.mulf %776, %770 : vector<64x128xf32>
    %778 = vector.broadcast %763 : vector<1x128xf32> to vector<64x128xf32>
    %779 = arith.addf %777, %778 : vector<64x128xf32>
    %780 = arith.addf %775, %779 : vector<64x128xf32>
    %781 = arith.truncf %758 : vector<64x128xf32> to vector<64x128xbf16>
    %cst_155 = arith.constant dense<0.000000e+00> : vector<64x256xf32>
    %782 = tpu.matmul %781, %760, %cst_155 {dimension_numbers = #tpu.dot_dimension_numbers<[1], [0], [0], [1], [0, 0, 1, 1], [], []>} : vector<64x128xbf16>, vector<128x256xbf16>, vector<64x256xf32> -> vector<64x256xf32>
    %783 = vector.extract_strided_slice %782 {offsets = [0, 0], sizes = [64, 128], strides = [1, 1]} : vector<64x256xf32> to vector<64x128xf32>
    %784 = vector.extract_strided_slice %782 {offsets = [0, 128], sizes = [64, 128], strides = [1, 1]} : vector<64x256xf32> to vector<64x128xf32>
    %785 = vector.broadcast %766 : vector<1x128xf32> to vector<64x128xf32>
    %786 = arith.mulf %785, %784 : vector<64x128xf32>
    %787 = vector.broadcast %764 : vector<1x128xf32> to vector<64x128xf32>
    %788 = arith.addf %787, %786 : vector<64x128xf32>
    %789 = arith.mulf %788, %783 : vector<64x128xf32>
    %790 = vector.broadcast %765 : vector<1x128xf32> to vector<64x128xf32>
    %791 = arith.mulf %790, %784 : vector<64x128xf32>
    %792 = vector.broadcast %763 : vector<1x128xf32> to vector<64x128xf32>
    %793 = arith.addf %791, %792 : vector<64x128xf32>
    %794 = arith.addf %789, %793 : vector<64x128xf32>
    %c22 = arith.constant 22 : index
    %c0_156 = arith.constant 0 : index
    %c0_157 = arith.constant 0 : index
    %795 = vector.load %arg2[%c22, %c0_156, %c0_157] : memref<23x128x256xbf16, #tpu.memory_space<vmem>>, vector<1x128x256xbf16>
    %796 = vector.shape_cast %795 : vector<1x128x256xbf16> to vector<128x256xbf16>
    %c22_158 = arith.constant 22 : index
    %c0_159 = arith.constant 0 : index
    %c0_160 = arith.constant 0 : index
    %797 = vector.load %arg3[%c22_158, %c0_159, %c0_160] : memref<23x4x128xf32, #tpu.memory_space<vmem>>, vector<1x4x128xf32>
    %798 = vector.shape_cast %797 : vector<1x4x128xf32> to vector<4x128xf32>
    %799 = vector.extract_strided_slice %798 {offsets = [0, 0], sizes = [1, 128], strides = [1, 1]} : vector<4x128xf32> to vector<1x128xf32>
    %800 = vector.extract_strided_slice %798 {offsets = [1, 0], sizes = [1, 128], strides = [1, 1]} : vector<4x128xf32> to vector<1x128xf32>
    %801 = vector.extract_strided_slice %798 {offsets = [2, 0], sizes = [1, 128], strides = [1, 1]} : vector<4x128xf32> to vector<1x128xf32>
    %802 = vector.extract_strided_slice %798 {offsets = [3, 0], sizes = [1, 128], strides = [1, 1]} : vector<4x128xf32> to vector<1x128xf32>
    %803 = arith.truncf %780 : vector<64x128xf32> to vector<64x128xbf16>
    %cst_161 = arith.constant dense<0.000000e+00> : vector<64x256xf32>
    %804 = tpu.matmul %803, %796, %cst_161 {dimension_numbers = #tpu.dot_dimension_numbers<[1], [0], [0], [1], [0, 0, 1, 1], [], []>} : vector<64x128xbf16>, vector<128x256xbf16>, vector<64x256xf32> -> vector<64x256xf32>
    %805 = vector.extract_strided_slice %804 {offsets = [0, 0], sizes = [64, 128], strides = [1, 1]} : vector<64x256xf32> to vector<64x128xf32>
    %806 = vector.extract_strided_slice %804 {offsets = [0, 128], sizes = [64, 128], strides = [1, 1]} : vector<64x256xf32> to vector<64x128xf32>
    %807 = vector.broadcast %802 : vector<1x128xf32> to vector<64x128xf32>
    %808 = arith.mulf %807, %806 : vector<64x128xf32>
    %809 = vector.broadcast %800 : vector<1x128xf32> to vector<64x128xf32>
    %810 = arith.addf %809, %808 : vector<64x128xf32>
    %811 = arith.mulf %810, %805 : vector<64x128xf32>
    %812 = vector.broadcast %801 : vector<1x128xf32> to vector<64x128xf32>
    %813 = arith.mulf %812, %806 : vector<64x128xf32>
    %814 = vector.broadcast %799 : vector<1x128xf32> to vector<64x128xf32>
    %815 = arith.addf %813, %814 : vector<64x128xf32>
    %816 = arith.addf %811, %815 : vector<64x128xf32>
    %817 = arith.truncf %794 : vector<64x128xf32> to vector<64x128xbf16>
    %cst_162 = arith.constant dense<0.000000e+00> : vector<64x256xf32>
    %818 = tpu.matmul %817, %796, %cst_162 {dimension_numbers = #tpu.dot_dimension_numbers<[1], [0], [0], [1], [0, 0, 1, 1], [], []>} : vector<64x128xbf16>, vector<128x256xbf16>, vector<64x256xf32> -> vector<64x256xf32>
    %819 = vector.extract_strided_slice %818 {offsets = [0, 0], sizes = [64, 128], strides = [1, 1]} : vector<64x256xf32> to vector<64x128xf32>
    %820 = vector.extract_strided_slice %818 {offsets = [0, 128], sizes = [64, 128], strides = [1, 1]} : vector<64x256xf32> to vector<64x128xf32>
    %821 = vector.broadcast %802 : vector<1x128xf32> to vector<64x128xf32>
    %822 = arith.mulf %821, %820 : vector<64x128xf32>
    %823 = vector.broadcast %800 : vector<1x128xf32> to vector<64x128xf32>
    %824 = arith.addf %823, %822 : vector<64x128xf32>
    %825 = arith.mulf %824, %819 : vector<64x128xf32>
    %826 = vector.broadcast %801 : vector<1x128xf32> to vector<64x128xf32>
    %827 = arith.mulf %826, %820 : vector<64x128xf32>
    %828 = vector.broadcast %799 : vector<1x128xf32> to vector<64x128xf32>
    %829 = arith.addf %827, %828 : vector<64x128xf32>
    %830 = arith.addf %825, %829 : vector<64x128xf32>
    %c0_163 = arith.constant 0 : index
    %c0_164 = arith.constant 0 : index
    %831 = vector.load %arg4[%c0_163, %c0_164] : memref<128x128xf32, #tpu.memory_space<vmem>>, vector<64x128xf32>
    tpu.vector_store %arg4[%c0_163, %c0_164], %816 {strides = array<i32>} : memref<128x128xf32, #tpu.memory_space<vmem>>, vector<64x128xf32>,
    %c64_165 = arith.constant 64 : index
    %c0_166 = arith.constant 0 : index
    %832 = vector.load %arg4[%c64_165, %c0_166] : memref<128x128xf32, #tpu.memory_space<vmem>>, vector<64x128xf32>
    tpu.vector_store %arg4[%c64_165, %c0_166], %830 {strides = array<i32>} : memref<128x128xf32, #tpu.memory_space<vmem>>, vector<64x128xf32>,
    return
  }
  func.func @transform_0(%arg0: i32) -> (i32, i32) {
    %c0_i32 = arith.constant 0 : i32
    %c0_i32_0 = arith.constant 0 : i32
    return %arg0, %c0_i32 : i32, i32
  }
  func.func @transform_1(%arg0: i32) -> (i32, i32, i32) {
    %c0_i32 = arith.constant 0 : i32
    %c0_i32_0 = arith.constant 0 : i32
    %c0_i32_1 = arith.constant 0 : i32
    %c0_i32_2 = arith.constant 0 : i32
    return %c0_i32, %c0_i32_0, %c0_i32_1 : i32, i32, i32
  }
  func.func @transform_2(%arg0: i32) -> (i32, i32, i32) {
    %c0_i32 = arith.constant 0 : i32
    %c0_i32_0 = arith.constant 0 : i32
    %c0_i32_1 = arith.constant 0 : i32
    %c0_i32_2 = arith.constant 0 : i32
    return %c0_i32, %c0_i32_0, %c0_i32_1 : i32, i32, i32
  }
  func.func @transform_3(%arg0: i32) -> (i32, i32) {
    %c0_i32 = arith.constant 0 : i32
    %c0_i32_0 = arith.constant 0 : i32
    return %arg0, %c0_i32 : i32, i32
  }
}

</mosaic_0001>

<bundles_post_ra>
// kernel: tpu_custom_call.1
= control target key start
LH: loop header
LB: loop body
LE: loop exit
PB: predicated region body
PF: predicated region fallthrough
CT: control target
= control target key end

     0   :  { %8 = vsyncpa [#allocation3], 0  ;;  %s11558_s0 = inlined_call_operand.vmem [shape: f32[256,16], index: 0, kind: input, shape index: {}]   ;;  %s11559_s1 = inlined_call_operand.hbm [shape: bf16[23,128,256], index: 1, kind: input, shape index: {}]   ;;  %s11560_s2 = inlined_call_operand.hbm [shape: f32[23,4,128], index: 2, kind: input, shape index: {}]   ;;  %s11561_s3 = inlined_call_operand.hbm [shape: f32[256,128], index: 3, kind: output, shape index: {}]  }
   0x1   :  { %9 = vsyncpa [#allocation6], 0 }
   0x2   :  { %10 = vsyncpa [#allocation4], 0 }
   0x3   :  { %12 = vsyncpa [#allocation4 + $0x1], 0  ;;  %s9736_s12 = smov 0   ;;  %s9738_s13 = smov 0  }
   0x4   :  { %s9740_s14 = smov 0   ;;  %s9742_s15 = smov 0  }
   0x5 LB: > { %s9757_s16 = sadd.s32 4294967295, %s9706_s15   ;;  %s7707_s17 = sadd.s32 4294967294, %s9706_s15   ;;  %s9706_s15 = sphi %s9742_s15, %s11568_s15   ;;  %s9702_s14 = sphi %s9740_s14, %s11567_s14   ;;  %s9698_s13 = sphi %s9738_s13, %s11566_s13   ;;  %s9694_s12 = sphi %s9736_s12, %s11565_s12  }
   0x6   : > { %s9761_s18 = sadd.s32 1, %s9706_s15   ;;  %s93_s19 = sadd.s32 1, %s9702_s14 }
   0x7   : > { %s90_s20 = ssub.s32 %s9706_s15, %s9761_s18  ;;  %p103_p0 = scmp.ne.s32.totalorder %s9702_s14, %s9698_s13 }
   0x8   : > { %p91_p1 = scmp.eq.s32.totalorder %s90_s20, 0  ;;  %p104_p2 = scmp.eq.s32.totalorder %s9757_s16, 1 }
   0x9   : > { %p109_p3 = scmp.ne.s32.totalorder %s9698_s13, %s9694_s12  ;;  %p110_p4 = scmp.eq.s32.totalorder %s7707_s17, 1 }
   0xa   : > { %s9772_s21 = scalar_select %p91_p1, %s9702_s14, %s93_s19  }
   0xb   : > { %p9774_p5 = por %p104_p2, %p103_p0  ;;  %p9778_p6 = por %p110_p4, %p109_p3 }
   0xc   : > { %p7708_p7 = scmp.ge.s32.totalorder %s9706_s15, 1  ;;  %p117_p8 = scmp.lt.s32.totalorder %s9706_s15, 3 }
   0xd   : > { %p9531_p9 = scmp.eq.s32.totalorder %s9757_s16, 0  ;;  %s128_s27 = sshll.u32 %s11559_s1, 4  ;;  %s129_s27 = int_to_ptr.hbm [resolvable:$true] %s128_s27 }
   0xe   : > { %p9785_p10 = pnand %p7708_p7, %p117_p8  ;;  %s9708_s28 = smov [#allocation2]  }
   0xf   : > { %s130_s29 = sshll.u32 %s9708_s28, 4  ;;  %s142_s5 = sshll.u32 %s11560_s2, 4  ;;  %s131_s29 = int_to_ptr.vmem [resolvable:$true] %s130_s29  ;;  %s143_s5 = int_to_ptr.hbm [resolvable:$true] %s142_s5 }
  0x10   : > { %p9520_p11 = pneg %p9785_p10  ;;  %s9709_s6 = smov 128  }
  0x11   : > { %s9710_s7 = smov 8   ;;  %s9711_s8 = smov [#allocation5]  }
  0x12   : > { %p9521_p12 = pnand %p9531_p9, %p9520_p11  ;;  %s144_s9 = sshll.u32 %s9711_s8, 4  ;;  %s145_s9 = int_to_ptr.vmem [resolvable:$true] %s144_s9 }
  0x13   : > { %s9712_s10 = smov 64   ;;  %s9713_s11 = smov 4  }
  0x14   : > { %9523 = dma.hbm_to_vmem [thread:$0]  (!%p9521_p12), %s129_s27, 47104, %s131_s29, [#allocation3], %s9709_s6, %s9709_s6, %s9710_s7  }
  0x15   : > { %9526 = dma.hbm_to_vmem [thread:$0]  (!%p9521_p12), %s143_s5, 1472, %s145_s9, [#allocation6], %s9712_s10, %s9712_s10, %s9713_s11  }
  0x16   : > { %169 = sbr.rel (%p9785_p10) target bundleno = 3540 (0xdd4), region = 32 }
  0x1b   : > { %9681 = dma.done.wait (%p9531_p9), [#allocation3], 47104  }
  0x1c   : > { %9683 = vsyncadd (%p9531_p9), [#allocation3], 4294920192 }
  0x1d   : > { %9685 = dma.done.wait (%p9531_p9), [#allocation6], 1472  }
  0x1e   : > { %9687 = vsyncadd (%p9531_p9), [#allocation6], 4294965824  ;;  %s7716_s17 = sshll.u32 %s9757_s16, 4  ;;  %v9155_v0 = vld [vmem:[#allocation2 + $0x4] sm:$0xf]  ;;  %vm240_vm0 = vcmask 130048  }
  0x1f   : > { %p200_p13 = scmp.lt.s32.totalorder %s7716_s17, 31  ;;  %v7722_v1 = vld [vmem:[#allocation2 + $0x8] sm:$0xf0]  ;;  %v7720_v2 = vld [vmem:[#allocation2] sm:$0xf]  ;;  %s196_s26 = sand.u32 1, %s9698_s13  }
  0x20   : > { %v7725_v3 = vor.u32 %v9155_v0, %v7722_v1  ;;  %v9156_v4 = vld [vmem:[#allocation2 + $0x4] sm:$0xf0]  ;;  %v9171_v18 = vld [vmem:[#allocation2 + $0xf4] sm:$0xf]  ;;  %v7802_v19 = vld [vmem:[#allocation2 + $0xf8] sm:$0xf0] }
  0x21   : > { %s11570_s17 = smov (!%p200_p13, %s7716_s17), 31  ;;  %v7721_v7 = vor.u32 %v9156_v4, %v7720_v2  ;;  %v7800_v20 = vld [vmem:[#allocation2 + $0xf0] sm:$0xf]  ;;  %v7805_v21 = vor.u32 %v9171_v18, %v7802_v19  ;;  %v9172_v22 = vld [vmem:[#allocation2 + $0xf4] sm:$0xf0]  ;;  %s7715_s27 = sshll.u32 %s196_s26, 7 }
  0x22   : > { %s7717_s19 = sshll.u32 %s11570_s17, 3  ;;  %289 = vmatpush.bf16.msra.mxu1 %v7725_v3  ;;  %415 = vmatpush.bf16.msra.mxu3 %v7725_v3  ;;  %v9169_v23 = vld [vmem:[#allocation2 + $0xe4] sm:$0xf]  ;;  %v7794_v24 = vld [vmem:[#allocation2 + $0xe8] sm:$0xf0]  ;;  %v7801_v25 = vor.u32 %v9172_v22, %v7800_v20  ;;  %s11423_s28 = scalar_lea.vmem [#allocation7], %s7715_s27 }
  0x23   : > { %s9813_s25 = scalar_lea.vmem %s11558_s0, %s7717_s19  ;;  %386 = vmatpush.bf16.msra.mxu2 %v7721_v7  ;;  %260 = vmatpush.bf16.msra.mxu0 %v7721_v7  ;;  %v7792_v26 = vld [vmem:[#allocation2 + $0xe0] sm:$0xf]  ;;  %v9170_v27 = vld [vmem:[#allocation2 + $0xe4] sm:$0xf0]  ;;  %v7797_v28 = vor.u32 %v9169_v23, %v7794_v24  ;;  %v9167_v30 = vld [vmem:[#allocation2 + $0xd4] sm:$0xf] }
  0x24   : > { %v207_v5 = vld [vmem:[%s9813_s25] sm:$0xff]  ;;  %v208_v6 = vld [vmem:[%s9813_s25 + $0x8] sm:$0xff]  ;;  %v209_v12 = vld [vmem:[%s9813_s25 + $0x10] sm:$0xff]  ;;  %v7793_v29 = vor.u32 %v9170_v27, %v7792_v26  ;;  %s9509_s29 = sshll.u32 %s9757_s16, 7  ;;  %s7620_s6 = sshll.u32 %s11423_s28, 4  ;;  %s7621_s6 = int_to_ptr.vmem [resolvable:$true] %s7620_s6 }
  0x25   : > { %v226_v8 = vpack.c.bf16 %v208_v6, %v207_v5  ;;  %v215_v9 = vld [vmem:[%s9813_s25 + $0x40] sm:$0xff]  ;;  %v216_v10 = vld [vmem:[%s9813_s25 + $0x48] sm:$0xff]  ;;  %v210_v13 = vld [vmem:[%s9813_s25 + $0x18] sm:$0xff]  ;;  %s7619_s5 = scalar_lea.hbm %s11561_s3, %s9509_s29  ;;  %s7608_s16 = scalar_lea.sflag [#allocation4], %s196_s26 }
  0x26   : > { %v363_v11 = vpack.c.bf16 %v216_v10, %v215_v9  ;;  %v217_v14 = vld [vmem:[%s9813_s25 + $0x50] sm:$0xff]  ;;  %v218_v15 = vld [vmem:[%s9813_s25 + $0x58] sm:$0xff]  ;;  %v227_v16 = vpack.c.bf16 %v210_v13, %v209_v12  ;;  %731 = vmatpush.bf16.msrb.mxu3 %v7805_v21  ;;  %617 = vmatpush.bf16.msrb.mxu1 %v7805_v21  ;;  %v211_v34 = vld [vmem:[%s9813_s25 + $0x20] sm:$0xff]  ;;  %s7622_s7 = sshll.u32 %s7619_s5, 4  ;;  %s9656_s17 = scalar_lea.hbm %s11561_s3, 256  ;;  %s7623_s7 = int_to_ptr.hbm [resolvable:$true] %s7622_s7 }
  0x27   : > { %7730 = vmatmul.msk.bf16.vlgmr.msra.gmra.mxu1 %vm240_vm0, %v226_v8  ;;  %7726 = vmatmul.msk.bf16.vlgmr.msra.gmra.mxu0 %vm240_vm0, %v226_v8  ;;  %v364_v17 = vpack.c.bf16 %v218_v15, %v217_v14  ;;  %v7786_v31 = vld [vmem:[#allocation2 + $0xd8] sm:$0xf0]  ;;  %v7784_v32 = vld [vmem:[#allocation2 + $0xd0] sm:$0xf]  ;;  %v9168_v33 = vld [vmem:[#allocation2 + $0xd4] sm:$0xf0] }
  0x28   : > { %7738 = vmatmul.msk.bf16.vlgmr.msra.gmra.mxu3 %vm240_vm0, %v363_v11  ;;  %7734 = vmatmul.msk.bf16.vlgmr.msra.gmra.mxu2 %vm240_vm0, %v363_v11  ;;  %v7789_v35 = vor.u32 %v9167_v30, %v7786_v31  ;;  %v212_v36 = vld [vmem:[%s9813_s25 + $0x28] sm:$0xff]  ;;  %v219_v37 = vld [vmem:[%s9813_s25 + $0x60] sm:$0xff]  ;;  %v7785_v39 = vor.u32 %v9168_v33, %v7784_v32  ;;  %v9163_v48 = vld [vmem:[#allocation2 + $0xb4] sm:$0xf]  ;;  %s9650_s8 = sshra.s32 %s7623_s7, 4  ;;  %s9651_s8 = int_to_ptr.hbm [resolvable:$true] %s9650_s8 }
  0x29   : > { %702 = vmatpush.bf16.msrb.mxu2 %v7801_v25  ;;  %588 = vmatpush.bf16.msrb.mxu0 %v7801_v25  ;;  %v220_v38 = vld [vmem:[%s9813_s25 + $0x68] sm:$0xff]  ;;  %v9165_v40 = vld [vmem:[#allocation2 + $0xc4] sm:$0xf]  ;;  %v228_v41 = vpack.c.bf16 %v212_v36, %v211_v34  ;;  %v7776_v44 = vld [vmem:[#allocation2 + $0xc0] sm:$0xf]  ;;  %s9652_s9 = scalar_lea.hbm %s9651_s8, 128  ;;  %p9657_p3 = scmp.lt.s32.totalorder %s9651_s8, %s11561_s3 }
  0x2a   : > { %732 = vmatpush.bf16.msrb.mxu3 %v7797_v28  ;;  %618 = vmatpush.bf16.msrb.mxu1 %v7797_v28  ;;  %v365_v42 = vpack.c.bf16 %v220_v38, %v219_v37  ;;  %v7778_v43 = vld [vmem:[#allocation2 + $0xc8] sm:$0xf0]  ;;  %v9166_v45 = vld [vmem:[#allocation2 + $0xc4] sm:$0xf0]  ;;  %v7770_v49 = vld [vmem:[#allocation2 + $0xb8] sm:$0xf0]  ;;  %p9653_p0 = scmp.ne.s32.totalorder %s9651_s8, %s9652_s9  ;;  %p9658_p4 = scmp.lt.s32.totalorder %s9656_s17, %s9652_s9 }
  0x2b   : > { %v7781_v46 = vor.u32 %v9165_v40, %v7778_v43  ;;  %v7777_v47 = vor.u32 %v9166_v45, %v7776_v44  ;;  %v7768_v50 = vld [vmem:[#allocation2 + $0xb0] sm:$0xf]  ;;  %v9164_v51 = vld [vmem:[#allocation2 + $0xb4] sm:$0xf0]  ;;  %v7773_v52 = vor.u32 %v9163_v48, %v7770_v49  ;;  %v9161_v60 = vld [vmem:[#allocation2 + $0xa4] sm:$0xf] }
  0x2c   : > { %v7769_v53 = vor.u32 %v9164_v51, %v7768_v50  ;;  %v213_v54 = vld [vmem:[%s9813_s25 + $0x30] sm:$0xff]  ;;  %v214_v55 = vld [vmem:[%s9813_s25 + $0x38] sm:$0xff]  ;;  %v7762_v61 = vld [vmem:[#allocation2 + $0xa8] sm:$0xf0]  ;;  %p9654_p1 = pnand %p9653_p0, %p9774_p5  ;;  %p9659_p7 = por %p9658_p4, %p9657_p3 }
  0x2d   : > { %703 = vmatpush.bf16.msrb.mxu2 %v7793_v29  ;;  %589 = vmatpush.bf16.msrb.mxu0 %v7793_v29  ;;  %v221_v56 = vld [vmem:[%s9813_s25 + $0x70] sm:$0xff]  ;;  %v222_v57 = vld [vmem:[%s9813_s25 + $0x78] sm:$0xff]  ;;  %v229_v58 = vpack.c.bf16 %v214_v55, %v213_v54  ;;  %v7765_v62 = vor.u32 %v9161_v60, %v7762_v61  ;;  %v7760_v63 = vld [vmem:[#allocation2 + $0xa0] sm:$0xf] }
  0x2e   : > { %733 = vmatpush.bf16.msrb.mxu3 %v7789_v35  ;;  %619 = vmatpush.bf16.msrb.mxu1 %v7789_v35  ;;  %v366_v59 = vpack.c.bf16 %v222_v57, %v221_v56  ;;  %v9162_v0 = vld [vmem:[#allocation2 + $0xa4] sm:$0xf0]  ;;  %v9159_v2 = vld [vmem:[#allocation2 + $0x94] sm:$0xf]  ;;  %v7754_v3 = vld [vmem:[#allocation2 + $0x98] sm:$0xf0]  ;;  %p9655_p2 = pneg %p9654_p1 }
  0x2f   : > { %v7761_v1 = vor.u32 %v9162_v0, %v7760_v63  ;;  %v7757_v4 = vor.u32 %v9159_v2, %v7754_v3  ;;  %v7752_v5 = vld [vmem:[#allocation2 + $0x90] sm:$0xf]  ;;  %v9160_v6 = vld [vmem:[#allocation2 + $0x94] sm:$0xf0]  ;;  %v9157_v7 = vld [vmem:[#allocation2 + $0x84] sm:$0xf] }
  0x30   : > { %v7753_v8 = vor.u32 %v9160_v6, %v7752_v5  ;;  %v7746_v9 = vld [vmem:[#allocation2 + $0x88] sm:$0xf0]  ;;  %v7744_v11 = vld [vmem:[#allocation2 + $0x80] sm:$0xf]  ;;  %v9158_v12 = vld [vmem:[#allocation2 + $0x84] sm:$0xf0]  ;;  %p9660_p8 = pnand %p9659_p7, %p9655_p2 }
  0x31   : > { %704 = vmatpush.bf16.msrb.mxu2 %v7785_v39  ;;  %590 = vmatpush.bf16.msrb.mxu0 %v7785_v39  ;;  %v7749_v10 = vor.u32 %v9157_v7, %v7746_v9  ;;  %v7745_v13 = vor.u32 %v9158_v12, %v7744_v11  ;;  %v225_v14 = vld [vmem:[#allocation5] sm:$0xf] }
  0x32   : > { %734 = vmatpush.bf16.msrb.mxu3 %v7781_v46  ;;  %620 = vmatpush.bf16.msrb.mxu1 %v7781_v46  ;;  %v9850_v19 = vperm.slane %v225_v14, 2  ;;  %v9852_v20 = vperm.slane %v225_v14, 1  ;;  %v9856_v25 = vperm.slane %v225_v14, 0 }
  0x35   : > { %705 = vmatpush.bf16.msrb.mxu2 %v7777_v47  ;;  %591 = vmatpush.bf16.msrb.mxu0 %v7777_v47 }
  0x36   : > { %735 = vmatpush.bf16.msrb.mxu3 %v7773_v52  ;;  %621 = vmatpush.bf16.msrb.mxu1 %v7773_v52 }
  0x37   : > { %7731 = vmatmul.msk.bf16.gmra.mxu1 %vm240_vm0, %v227_v16  ;;  %7727 = vmatmul.msk.bf16.gmra.mxu0 %vm240_vm0, %v227_v16  ;;  %v9847_v16 = vperm.slane %v225_v14, 3 }
  0x38   : > { %7739 = vmatmul.msk.bf16.gmra.mxu3 %vm240_vm0, %v364_v17  ;;  %7735 = vmatmul.msk.bf16.gmra.mxu2 %vm240_vm0, %v364_v17 }
  0x39   : > { %706 = vmatpush.bf16.msrb.mxu2 %v7769_v53  ;;  %592 = vmatpush.bf16.msrb.mxu0 %v7769_v53 }
  0x3a   : > { %736 = vmatpush.bf16.msrb.mxu3 %v7765_v62  ;;  %622 = vmatpush.bf16.msrb.mxu1 %v7765_v62 }
  0x3d   : > { %707 = vmatpush.bf16.msrb.mxu2 %v7761_v1  ;;  %593 = vmatpush.bf16.msrb.mxu0 %v7761_v1 }
  0x3e   : > { %737 = vmatpush.bf16.msrb.mxu3 %v7757_v4  ;;  %623 = vmatpush.bf16.msrb.mxu1 %v7757_v4 }
  0x41   : > { %708 = vmatpush.bf16.msrb.mxu2 %v7753_v8  ;;  %594 = vmatpush.bf16.msrb.mxu0 %v7753_v8 }
  0x42   : > { %624 = vmatpush.bf16.msrb.mxu1 %v7749_v10  ;;  %738 = vmatpush.bf16.msrb.mxu3 %v7749_v10 }
  0x45   : > { %595 = vmatpush.bf16.msrb.mxu0 %v7745_v13  ;;  %709 = vmatpush.bf16.msrb.mxu2 %v7745_v13 }
  0x47   : > { %7732 = vmatmul.msk.bf16.gmra.mxu1 %vm240_vm0, %v228_v41  ;;  %7728 = vmatmul.msk.bf16.gmra.mxu0 %vm240_vm0, %v228_v41 }
  0x48   : > { %7740 = vmatmul.msk.bf16.gmra.mxu3 %vm240_vm0, %v365_v42  ;;  %7736 = vmatmul.msk.bf16.gmra.mxu2 %vm240_vm0, %v365_v42 }
  0x57   : > { %7733 = vmatmul.msk.bf16.gmra.mxu1 %vm240_vm0, %v229_v58  ;;  %7729 = vmatmul.msk.bf16.gmra.mxu0 %vm240_vm0, %v229_v58 }
  0x58   : > { %7741 = vmatmul.msk.bf16.gmra.mxu3 %vm240_vm0, %v366_v59  ;;  %7737 = vmatmul.msk.bf16.gmra.mxu2 %vm240_vm0, %v366_v59 }
  0xa4   : > { %v291_v15 = vpop.f32.mrf.mxu1  ;;  %v262_v17 = vpop.f32.mrf.mxu0 }
  0xa5   : > { %v312_v18 = vmul.f32 %v9847_v16, %v291_v15  ;;  %v338_v21 = vmul.f32 %v9850_v19, %v291_v15 }
  0xa7   : > { %v321_v22 = vadd.f32 %v9852_v20, %v312_v18  ;;  %v347_v31 = vadd.f32 %v9856_v25, %v338_v21 }
  0xa9   : > { %v329_v32 = vmul.f32 %v321_v22, %v262_v17 }
  0xab   : > { %v417_v23 = vpop.f32.mrf.mxu3  ;;  %v388_v24 = vpop.f32.mrf.mxu2  ;;  %v355_v37 = vadd.f32 %v347_v31, %v329_v32 }
  0xac   : > { %v293_v26 = vpop.f32.mrf.mxu1  ;;  %v437_v27 = vmul.f32 %v417_v23, %v9847_v16  ;;  %v264_v30 = vpop.f32.mrf.mxu0  ;;  %v461_v39 = vmul.f32 %v417_v23, %v9850_v19 }
  0xad   : > { %v313_v28 = vmul.f32 %v9847_v16, %v293_v26  ;;  %v339_v29 = vmul.f32 %v9850_v19, %v293_v26 }
  0xae   : > { %v445_v35 = vadd.f32 %v437_v27, %v9852_v20  ;;  %v469_v50 = vadd.f32 %v461_v39, %v9856_v25 }
  0xaf   : > { %v348_v33 = vadd.f32 %v9856_v25, %v339_v29  ;;  %v322_v34 = vadd.f32 %v9852_v20, %v313_v28 }
  0xb0   : > { %v453_v45 = vmul.f32 %v445_v35, %v388_v24 }
  0xb1   : > { %v330_v36 = vmul.f32 %v322_v34, %v264_v30 }
  0xb2   : > { %v477_v54 = vadd.f32 %v469_v50, %v453_v45 }
  0xb3   : > { %v419_v38 = vpop.f32.mrf.mxu3  ;;  %v356_v40 = vadd.f32 %v348_v33, %v330_v36  ;;  %v390_v41 = vpop.f32.mrf.mxu2 }
  0xb4   : > { %v438_v42 = vmul.f32 %v419_v38, %v9847_v16  ;;  %v462_v43 = vmul.f32 %v419_v38, %v9850_v19  ;;  %v296_v44 = vpop.f32.mrf.mxu1  ;;  %v267_v48 = vpop.f32.mrf.mxu0 }
  0xb5   : > { %v314_v47 = vmul.f32 %v9847_v16, %v296_v44  ;;  %v504_v49 = vpack.c.bf16 %v356_v40, %v355_v37  ;;  %v340_v53 = vmul.f32 %v9850_v19, %v296_v44 }
  0xb6   : > { %v446_v46 = vadd.f32 %v438_v42, %v9852_v20  ;;  %v470_v52 = vadd.f32 %v462_v43, %v9856_v25  ;;  %v7866_v42 = vld [vmem:[#allocation2 + $0x178] sm:$0xf0]  ;;  %v7864_v43 = vld [vmem:[#allocation2 + $0x170] sm:$0xf] }
  0xb7   : > { %625 = vmatmul.bf16.vlgmr.msrb.gmra.mxu1 %v504_v49  ;;  %596 = vmatmul.bf16.vlgmr.msrb.gmra.mxu0 %v504_v49  ;;  %v323_v55 = vadd.f32 %v9852_v20, %v314_v47  ;;  %v349_v60 = vadd.f32 %v9856_v25, %v340_v53  ;;  %v9188_v47 = vld [vmem:[#allocation2 + $0x174] sm:$0xf0]  ;;  %v7858_v49 = vld [vmem:[#allocation2 + $0x168] sm:$0xf0] }
  0xb8   : > { %v454_v51 = vmul.f32 %v446_v46, %v390_v41  ;;  %v9187_v41 = vld [vmem:[#allocation2 + $0x174] sm:$0xf]  ;;  %v7865_v50 = vor.u32 %v9188_v47, %v7864_v43 }
  0xb9   : > { %v331_v62 = vmul.f32 %v323_v55, %v267_v48  ;;  %v7869_v46 = vor.u32 %v9187_v41, %v7866_v42  ;;  %v9185_v48 = vld [vmem:[#allocation2 + $0x164] sm:$0xf] }
  0xba   : > { %v478_v56 = vadd.f32 %v470_v52, %v454_v51  ;;  %v7856_v51 = vld [vmem:[#allocation2 + $0x160] sm:$0xf]  ;;  %v9186_v52 = vld [vmem:[#allocation2 + $0x164] sm:$0xf0]  ;;  %1025 = vmatpush.bf16.msra.mxu2 %v7865_v50  ;;  %911 = vmatpush.bf16.msra.mxu0 %v7865_v50 }
  0xbb   : > { %v422_v57 = vpop.f32.mrf.mxu3  ;;  %v393_v58 = vpop.f32.mrf.mxu2  ;;  %v357_v5 = vadd.f32 %v349_v60, %v331_v62  ;;  %1054 = vmatpush.bf16.msra.mxu3 %v7869_v46  ;;  %940 = vmatpush.bf16.msra.mxu1 %v7869_v46 }
  0xbc   : > { %v698_v59 = vpack.c.bf16 %v478_v56, %v477_v54  ;;  %v298_v61 = vpop.f32.mrf.mxu1  ;;  %v439_v63 = vmul.f32 %v422_v57, %v9847_v16  ;;  %v269_v2 = vpop.f32.mrf.mxu0  ;;  %v463_v9 = vmul.f32 %v422_v57, %v9850_v19 }
  0xbd   : > { %v315_v0 = vmul.f32 %v9847_v16, %v298_v61  ;;  %v341_v1 = vmul.f32 %v9850_v19, %v298_v61 }
  0xbe   : > { %710 = vmatmul.bf16.vlgmr.msrb.gmra.mxu2 %v698_v59  ;;  %739 = vmatmul.bf16.vlgmr.msrb.gmra.mxu3 %v698_v59  ;;  %v447_v6 = vadd.f32 %v439_v63, %v9852_v20  ;;  %v471_v23 = vadd.f32 %v463_v9, %v9856_v25  ;;  %v7857_v63 = vor.u32 %v9186_v52, %v7856_v51 }
  0xbf   : > { %v324_v3 = vadd.f32 %v9852_v20, %v315_v0  ;;  %v350_v4 = vadd.f32 %v9856_v25, %v341_v1  ;;  %v9183_v0 = vld [vmem:[#allocation2 + $0x154] sm:$0xf]  ;;  %v7850_v1 = vld [vmem:[#allocation2 + $0x158] sm:$0xf0] }
  0xc0   : > { %v455_v22 = vmul.f32 %v447_v6, %v393_v58  ;;  %v7861_v58 = vor.u32 %v9185_v48, %v7858_v49  ;;  %1026 = vmatpush.bf16.msra.mxu2 %v7857_v63  ;;  %912 = vmatpush.bf16.msra.mxu0 %v7857_v63  ;;  %v9177_v63 = vld [vmem:[#allocation2 + $0x124] sm:$0xf] }
  0xc1   : > { %v332_v7 = vmul.f32 %v324_v3, %v269_v2  ;;  %v7848_v3 = vld [vmem:[#allocation2 + $0x150] sm:$0xf] }
  0xc2   : > { %v479_v29 = vadd.f32 %v471_v23, %v455_v22  ;;  %1055 = vmatpush.bf16.msra.mxu3 %v7861_v58  ;;  %941 = vmatpush.bf16.msra.mxu1 %v7861_v58 }
  0xc3   : > { %v424_v8 = vpop.f32.mrf.mxu3  ;;  %v395_v10 = vpop.f32.mrf.mxu2  ;;  %v358_v13 = vadd.f32 %v350_v4, %v332_v7  ;;  %v9184_v4 = vld [vmem:[#allocation2 + $0x154] sm:$0xf0] }
  0xc4   : > { %v440_v11 = vmul.f32 %v424_v8, %v9847_v16  ;;  %v464_v12 = vmul.f32 %v424_v8, %v9850_v19  ;;  %v301_v14 = vpop.f32.mrf.mxu1  ;;  %v272_v21 = vpop.f32.mrf.mxu0 }
  0xc5   : > { %v316_v17 = vmul.f32 %v9847_v16, %v301_v14  ;;  %v505_v18 = vpack.c.bf16 %v358_v13, %v357_v5  ;;  %v342_v27 = vmul.f32 %v9850_v19, %v301_v14  ;;  %v7849_v14 = vor.u32 %v9184_v4, %v7848_v3  ;;  %v7818_v4 = vld [vmem:[#allocation2 + $0x118] sm:$0xf0] }
  0xc6   : > { %v448_v15 = vadd.f32 %v440_v11, %v9852_v20  ;;  %v472_v26 = vadd.f32 %v464_v12, %v9856_v25 }
  0xc7   : > { %630 = vmatmul.bf16.gmra.mxu1 %v505_v18  ;;  %601 = vmatmul.bf16.gmra.mxu0 %v505_v18  ;;  %v325_v28 = vadd.f32 %v9852_v20, %v316_v17  ;;  %v351_v34 = vadd.f32 %v9856_v25, %v342_v27  ;;  %v9181_v17 = vld [vmem:[#allocation2 + $0x144] sm:$0xf]  ;;  %v7842_v18 = vld [vmem:[#allocation2 + $0x148] sm:$0xf0] }
  0xc8   : > { %v456_v24 = vmul.f32 %v448_v15, %v395_v10  ;;  %v7853_v10 = vor.u32 %v9183_v0, %v7850_v1  ;;  %1027 = vmatpush.bf16.msra.mxu2 %v7849_v14  ;;  %913 = vmatpush.bf16.msra.mxu0 %v7849_v14  ;;  %v7824_v1 = vld [vmem:[#allocation2 + $0x120] sm:$0xf] }
  0xc9   : > { %v333_v36 = vmul.f32 %v325_v28, %v272_v21 }
  0xca   : > { %v480_v30 = vadd.f32 %v472_v26, %v456_v24  ;;  %1056 = vmatpush.bf16.msra.mxu3 %v7853_v10  ;;  %v7840_v24 = vld [vmem:[#allocation2 + $0x140] sm:$0xf]  ;;  %v9182_v26 = vld [vmem:[#allocation2 + $0x144] sm:$0xf0]  ;;  %942 = vmatpush.bf16.msra.mxu1 %v7853_v10  ;;  %v7810_v10 = vld [vmem:[#allocation2 + $0x108] sm:$0xf0] }
  0xcb   : > { %v427_v31 = vpop.f32.mrf.mxu3  ;;  %v398_v32 = vpop.f32.mrf.mxu2  ;;  %v359_v53 = vadd.f32 %v351_v34, %v333_v36  ;;  %v9179_v34 = vld [vmem:[#allocation2 + $0x134] sm:$0xf] }
  0xcc   : > { %v699_v33 = vpack.c.bf16 %v480_v30, %v479_v29  ;;  %v303_v35 = vpop.f32.mrf.mxu1  ;;  %v441_v37 = vmul.f32 %v427_v31, %v9847_v16  ;;  %v274_v40 = vpop.f32.mrf.mxu0  ;;  %v465_v56 = vmul.f32 %v427_v31, %v9850_v19  ;;  %v7845_v29 = vor.u32 %v9181_v17, %v7842_v18 }
  0xcd   : > { %v317_v38 = vmul.f32 %v9847_v16, %v303_v35  ;;  %v343_v39 = vmul.f32 %v9850_v19, %v303_v35  ;;  %v7834_v35 = vld [vmem:[#allocation2 + $0x138] sm:$0xf0] }
  0xce   : > { %715 = vmatmul.bf16.gmra.mxu2 %v699_v33  ;;  %744 = vmatmul.bf16.gmra.mxu3 %v699_v33  ;;  %v449_v54 = vadd.f32 %v441_v37, %v9852_v20  ;;  %v473_v11 = vadd.f32 %v465_v56, %v9856_v25  ;;  %v7841_v33 = vor.u32 %v9182_v26, %v7840_v24 }
  0xcf   : > { %v326_v44 = vadd.f32 %v9852_v20, %v317_v38  ;;  %v352_v45 = vadd.f32 %v9856_v25, %v343_v39  ;;  %1057 = vmatpush.bf16.msra.mxu3 %v7845_v29  ;;  %v7837_v43 = vor.u32 %v9179_v34, %v7834_v35  ;;  %943 = vmatpush.bf16.msra.mxu1 %v7845_v29 }
  0xd0   : > { %v457_v9 = vmul.f32 %v449_v54, %v398_v32  ;;  %1028 = vmatpush.bf16.msra.mxu2 %v7841_v33  ;;  %914 = vmatpush.bf16.msra.mxu0 %v7841_v33 }
  0xd1   : > { %v334_v55 = vmul.f32 %v326_v44, %v274_v40 }
  0xd2   : > { %v481_v22 = vadd.f32 %v473_v11, %v457_v9 }
  0xd3   : > { %v429_v57 = vpop.f32.mrf.mxu3  ;;  %v400_v59 = vpop.f32.mrf.mxu2  ;;  %v360_v62 = vadd.f32 %v352_v45, %v334_v55  ;;  %1058 = vmatpush.bf16.msra.mxu3 %v7837_v43  ;;  %944 = vmatpush.bf16.msra.mxu1 %v7837_v43 }
  0xd4   : > { %v442_v60 = vmul.f32 %v429_v57, %v9847_v16  ;;  %v466_v61 = vmul.f32 %v429_v57, %v9850_v19  ;;  %v306_v2 = vpop.f32.mrf.mxu1  ;;  %v277_v8 = vpop.f32.mrf.mxu0 }
  0xd5   : > { %v318_v6 = vmul.f32 %v9847_v16, %v306_v2  ;;  %v506_v7 = vpack.c.bf16 %v360_v62, %v359_v53  ;;  %v344_v15 = vmul.f32 %v9850_v19, %v306_v2  ;;  %v9178_v2 = vld [vmem:[#allocation2 + $0x124] sm:$0xf0] }
  0xd6   : > { %v450_v5 = vadd.f32 %v442_v60, %v9852_v20  ;;  %v474_v13 = vadd.f32 %v466_v61, %v9856_v25  ;;  %v9180_v61 = vld [vmem:[#allocation2 + $0x134] sm:$0xf0]  ;;  %v7825_v3 = vor.u32 %v9178_v2, %v7824_v1 }
  0xd7   : > { %635 = vmatmul.bf16.gmra.mxu1 %v506_v7  ;;  %606 = vmatmul.bf16.gmra.mxu0 %v506_v7  ;;  %v327_v21 = vadd.f32 %v9852_v20, %v318_v6  ;;  %v353_v30 = vadd.f32 %v9856_v25, %v344_v15  ;;  %v7816_v6 = vld [vmem:[#allocation2 + $0x110] sm:$0xf]  ;;  %v9176_v7 = vld [vmem:[#allocation2 + $0x114] sm:$0xf0]  ;;  %v503_v15 = vld [vmem:[#allocation5 + $0x4] sm:$0xf] }
  0xd8   : > { %v458_v12 = vmul.f32 %v450_v5, %v400_v59  ;;  %v7817_v9 = vor.u32 %v9176_v7, %v7816_v6  ;;  %v9919_v17 = vperm.slane %v503_v15, 3  ;;  %v9924_v24 = vperm.slane %v503_v15, 1 }
  0xd9   : > { %v335_v36 = vmul.f32 %v327_v21, %v277_v8  ;;  %v9173_v8 = vld [vmem:[#allocation2 + $0x104] sm:$0xf] }
  0xda   : > { %v482_v23 = vadd.f32 %v474_v13, %v458_v12  ;;  %v7813_v11 = vor.u32 %v9173_v8, %v7810_v10  ;;  %v7808_v12 = vld [vmem:[#allocation2 + $0x100] sm:$0xf]  ;;  %v9174_v13 = vld [vmem:[#allocation2 + $0x104] sm:$0xf0] }
  0xdb   : > { %v432_v27 = vpop.f32.mrf.mxu3  ;;  %v403_v31 = vpop.f32.mrf.mxu2  ;;  %v361_v44 = vadd.f32 %v353_v30, %v335_v36  ;;  %v7809_v14 = vor.u32 %v9174_v13, %v7808_v12 }
  0xdc   : > { %v700_v28 = vpack.c.bf16 %v482_v23, %v481_v22  ;;  %v308_v32 = vpop.f32.mrf.mxu1  ;;  %v443_v37 = vmul.f32 %v432_v27, %v9847_v16  ;;  %v279_v40 = vpop.f32.mrf.mxu0  ;;  %v467_v47 = vmul.f32 %v432_v27, %v9850_v19  ;;  %v9922_v23 = vperm.slane %v503_v15, 2 }
  0xdd   : > { %v319_v38 = vmul.f32 %v9847_v16, %v308_v32  ;;  %v345_v39 = vmul.f32 %v9850_v19, %v308_v32  ;;  %v9927_v27 = vperm.slane %v503_v15, 0 }
  0xde   : > { %720 = vmatmul.bf16.gmra.mxu2 %v700_v28  ;;  %749 = vmatmul.bf16.gmra.mxu3 %v700_v28  ;;  %v451_v45 = vadd.f32 %v443_v37, %v9852_v20  ;;  %v475_v56 = vadd.f32 %v467_v47, %v9856_v25 }
  0xdf   : > { %v328_v41 = vadd.f32 %v9852_v20, %v319_v38  ;;  %v354_v42 = vadd.f32 %v9856_v25, %v345_v39 }
  0xe0   : > { %v459_v54 = vmul.f32 %v451_v45, %v403_v31 }
  0xe1   : > { %v336_v46 = vmul.f32 %v328_v41, %v279_v40 }
  0xe2   : > { %v483_v59 = vadd.f32 %v475_v56, %v459_v54 }
  0xe3   : > { %v434_v48 = vpop.f32.mrf.mxu3  ;;  %v362_v51 = vadd.f32 %v354_v42, %v336_v46  ;;  %v405_v55 = vpop.f32.mrf.mxu2 }
  0xe4   : > { %v444_v49 = vmul.f32 %v434_v48, %v9847_v16  ;;  %v468_v50 = vmul.f32 %v434_v48, %v9850_v19  ;;  %v7832_v19 = vld [vmem:[#allocation2 + $0x130] sm:$0xf] }
  0xe5   : > { %v507_v53 = vpack.c.bf16 %v362_v51, %v361_v44  ;;  %v7833_v62 = vor.u32 %v9180_v61, %v7832_v19 }
  0xe6   : > { %v452_v52 = vadd.f32 %v444_v49, %v9852_v20  ;;  %v476_v58 = vadd.f32 %v468_v50, %v9856_v25  ;;  %v7826_v20 = vld [vmem:[#allocation2 + $0x128] sm:$0xf0]  ;;  %v9175_v25 = vld [vmem:[#allocation2 + $0x114] sm:$0xf] }
  0xe7   : > { %640 = vmatmul.bf16.gmra.mxu1 %v507_v53  ;;  %611 = vmatmul.bf16.gmra.mxu0 %v507_v53  ;;  %v7829_v0 = vor.u32 %v9177_v63, %v7826_v20  ;;  %v7821_v5 = vor.u32 %v9175_v25, %v7818_v4 }
  0xe8   : > { %v460_v57 = vmul.f32 %v452_v52, %v405_v55  ;;  %1029 = vmatpush.bf16.msra.mxu2 %v7833_v62  ;;  %915 = vmatpush.bf16.msra.mxu0 %v7833_v62 }
  0xe9   : > { %1059 = vmatpush.bf16.msra.mxu3 %v7829_v0  ;;  %945 = vmatpush.bf16.msra.mxu1 %v7829_v0 }
  0xea   : > { %v484_v60 = vadd.f32 %v476_v58, %v460_v57 }
  0xec   : > { %v701_v16 = vpack.c.bf16 %v484_v60, %v483_v59  ;;  %1030 = vmatpush.bf16.msra.mxu2 %v7825_v3  ;;  %916 = vmatpush.bf16.msra.mxu0 %v7825_v3 }
  0xed   : > { %946 = vmatpush.bf16.msra.mxu1 %v7821_v5  ;;  %1060 = vmatpush.bf16.msra.mxu3 %v7821_v5 }
  0xee   : > { %725 = vmatmul.bf16.gmra.mxu2 %v701_v16  ;;  %754 = vmatmul.bf16.gmra.mxu3 %v701_v16 }
  0xf0   : > { %917 = vmatpush.bf16.msra.mxu0 %v7817_v9  ;;  %1031 = vmatpush.bf16.msra.mxu2 %v7817_v9 }
  0xf1   : > { %947 = vmatpush.bf16.msra.mxu1 %v7813_v11  ;;  %1061 = vmatpush.bf16.msra.mxu3 %v7813_v11 }
  0xf4   : > { %918 = vmatpush.bf16.msra.mxu0 %v7809_v14  ;;  %1032 = vmatpush.bf16.msra.mxu2 %v7809_v14 }
 0x134   : > { %v626_v18 = vpop.f32.mrf.mxu1  ;;  %v597_v21 = vpop.f32.mrf.mxu0 }
 0x135   : > { %v647_v22 = vmul.f32 %v9919_v17, %v626_v18  ;;  %v673_v26 = vmul.f32 %v9922_v23, %v626_v18 }
 0x137   : > { %v656_v28 = vadd.f32 %v9924_v24, %v647_v22  ;;  %v682_v31 = vadd.f32 %v9927_v27, %v673_v26 }
 0x139   : > { %v664_v32 = vmul.f32 %v656_v28, %v597_v21 }
 0x13b   : > { %v690_v39 = vadd.f32 %v682_v31, %v664_v32 }
 0x13c   : > { %v628_v29 = vpop.f32.mrf.mxu1  ;;  %v599_v30 = vpop.f32.mrf.mxu0 }
 0x13d   : > { %v648_v33 = vmul.f32 %v9919_v17, %v628_v29  ;;  %v674_v34 = vmul.f32 %v9922_v23, %v628_v29 }
 0x13f   : > { %v683_v35 = vadd.f32 %v9927_v27, %v674_v34  ;;  %v657_v36 = vadd.f32 %v9924_v24, %v648_v33 }
 0x141   : > { %v711_v37 = vpop.f32.mrf.mxu2  ;;  %v740_v38 = vpop.f32.mrf.mxu3  ;;  %v665_v40 = vmul.f32 %v657_v36, %v599_v30 }
 0x142   : > { %v760_v42 = vmul.f32 %v740_v38, %v9919_v17  ;;  %v784_v49 = vmul.f32 %v740_v38, %v9922_v23 }
 0x143   : > { %v691_v41 = vadd.f32 %v683_v35, %v665_v40 }
 0x144   : > { %v631_v43 = vpop.f32.mrf.mxu1  ;;  %v602_v44 = vpop.f32.mrf.mxu0  ;;  %v768_v47 = vadd.f32 %v760_v42, %v9924_v24  ;;  %v792_v57 = vadd.f32 %v784_v49, %v9927_v27 }
 0x145   : > { %v827_v45 = vpack.c.bf16 %v691_v41, %v690_v39  ;;  %v649_v46 = vmul.f32 %v9919_v17, %v631_v43  ;;  %v675_v50 = vmul.f32 %v9922_v23, %v631_v43 }
 0x146   : > { %v776_v55 = vmul.f32 %v768_v47, %v711_v37 }
 0x147   : > { %948 = vmatmul.bf16.vlgmr.msra.gmra.mxu1 %v827_v45  ;;  %919 = vmatmul.bf16.vlgmr.msra.gmra.mxu0 %v827_v45  ;;  %v658_v51 = vadd.f32 %v9924_v24, %v649_v46  ;;  %v684_v58 = vadd.f32 %v9927_v27, %v675_v50 }
 0x148   : > { %v800_v20 = vadd.f32 %v792_v57, %v776_v55  ;;  %v9204_v57 = vld [vmem:[#allocation2 + $0x1f4] sm:$0xf0] }
 0x149   : > { %v713_v48 = vpop.f32.mrf.mxu2  ;;  %v742_v52 = vpop.f32.mrf.mxu3  ;;  %v666_v59 = vmul.f32 %v658_v51, %v602_v44  ;;  %v9203_v51 = vld [vmem:[#allocation2 + $0x1f4] sm:$0xf] }
 0x14a   : > { %v761_v53 = vmul.f32 %v742_v52, %v9919_v17  ;;  %v785_v54 = vmul.f32 %v742_v52, %v9922_v23  ;;  %v7930_v52 = vld [vmem:[#allocation2 + $0x1f8] sm:$0xf0] }
 0x14b   : > { %v692_v4 = vadd.f32 %v684_v58, %v666_v59  ;;  %v9201_v58 = vld [vmem:[#allocation2 + $0x1e4] sm:$0xf]  ;;  %v7922_v59 = vld [vmem:[#allocation2 + $0x1e8] sm:$0xf0] }
 0x14c   : > { %v769_v56 = vadd.f32 %v761_v53, %v9924_v24  ;;  %v633_v60 = vpop.f32.mrf.mxu1  ;;  %v604_v16 = vpop.f32.mrf.mxu0  ;;  %v793_v61 = vadd.f32 %v785_v54, %v9927_v27  ;;  %v7928_v53 = vld [vmem:[#allocation2 + $0x1f0] sm:$0xf] }
 0x14d   : > { %v650_v62 = vmul.f32 %v9919_v17, %v633_v60  ;;  %v676_v63 = vmul.f32 %v9922_v23, %v633_v60 }
 0x14e   : > { %v777_v19 = vmul.f32 %v769_v56, %v713_v48  ;;  %v7933_v56 = vor.u32 %v9203_v51, %v7930_v52 }
 0x14f   : > { %v659_v1 = vadd.f32 %v9924_v24, %v650_v62  ;;  %v685_v25 = vadd.f32 %v9927_v27, %v676_v63  ;;  %v7929_v62 = vor.u32 %v9204_v57, %v7928_v53  ;;  %v7925_v63 = vor.u32 %v9201_v58, %v7922_v59 }
 0x150   : > { %v801_v0 = vadd.f32 %v793_v61, %v777_v19  ;;  %v7920_v19 = vld [vmem:[#allocation2 + $0x1e0] sm:$0xf]  ;;  %v9202_v61 = vld [vmem:[#allocation2 + $0x1e4] sm:$0xf0]  ;;  %1377 = vmatpush.bf16.msrb.mxu3 %v7933_v56  ;;  %1263 = vmatpush.bf16.msrb.mxu1 %v7933_v56 }
 0x151   : > { %v716_v2 = vpop.f32.mrf.mxu2  ;;  %v745_v3 = vpop.f32.mrf.mxu3  ;;  %v667_v5 = vmul.f32 %v659_v1, %v604_v16  ;;  %v9199_v1 = vld [vmem:[#allocation2 + $0x1d4] sm:$0xf]  ;;  %1348 = vmatpush.bf16.msrb.mxu2 %v7929_v62  ;;  %1234 = vmatpush.bf16.msrb.mxu0 %v7929_v62  ;;  %v7898_v62 = vld [vmem:[#allocation2 + $0x1b8] sm:$0xf0] }
 0x152   : > { %v1021_v6 = vpack.c.bf16 %v801_v0, %v800_v20  ;;  %v762_v7 = vmul.f32 %v745_v3, %v9919_v17  ;;  %v786_v15 = vmul.f32 %v745_v3, %v9922_v23 }
 0x153   : > { %v693_v8 = vadd.f32 %v685_v25, %v667_v5 }
 0x154   : > { %1033 = vmatmul.bf16.vlgmr.msra.gmra.mxu2 %v1021_v6  ;;  %1062 = vmatmul.bf16.vlgmr.msra.gmra.mxu3 %v1021_v6  ;;  %v636_v9 = vpop.f32.mrf.mxu1  ;;  %v607_v10 = vpop.f32.mrf.mxu0  ;;  %v770_v13 = vadd.f32 %v762_v7, %v9924_v24  ;;  %v794_v31 = vadd.f32 %v786_v15, %v9927_v27  ;;  %v7921_v6 = vor.u32 %v9202_v61, %v7920_v19  ;;  %v9197_v15 = vld [vmem:[#allocation2 + $0x1c4] sm:$0xf]  ;;  %v9198_v19 = vld [vmem:[#allocation2 + $0x1c4] sm:$0xf0] }
 0x155   : > { %v651_v11 = vmul.f32 %v9919_v17, %v636_v9  ;;  %v828_v12 = vpack.c.bf16 %v693_v8, %v692_v4  ;;  %v677_v18 = vmul.f32 %v9922_v23, %v636_v9  ;;  %v7912_v9 = vld [vmem:[#allocation2 + $0x1d0] sm:$0xf]  ;;  %1378 = vmatpush.bf16.msrb.mxu3 %v7925_v63  ;;  %1264 = vmatpush.bf16.msrb.mxu1 %v7925_v63  ;;  %v9196_v63 = vld [vmem:[#allocation2 + $0x1b4] sm:$0xf0] }
 0x156   : > { %v778_v30 = vmul.f32 %v770_v13, %v716_v2  ;;  %v7914_v2 = vld [vmem:[#allocation2 + $0x1d8] sm:$0xf0]  ;;  %1349 = vmatpush.bf16.msrb.mxu2 %v7921_v6  ;;  %1235 = vmatpush.bf16.msrb.mxu0 %v7921_v6 }
 0x157   : > { %953 = vmatmul.bf16.gmra.mxu1 %v828_v12  ;;  %924 = vmatmul.bf16.gmra.mxu0 %v828_v12  ;;  %v660_v21 = vadd.f32 %v9924_v24, %v651_v11  ;;  %v686_v32 = vadd.f32 %v9927_v27, %v677_v18  ;;  %v7917_v11 = vor.u32 %v9199_v1, %v7914_v2  ;;  %v7906_v18 = vld [vmem:[#allocation2 + $0x1c8] sm:$0xf0]  ;;  %v7888_v2 = vld [vmem:[#allocation2 + $0x1a0] sm:$0xf] }
 0x158   : > { %v802_v42 = vadd.f32 %v794_v31, %v778_v30 }
 0x159   : > { %v718_v14 = vpop.f32.mrf.mxu2  ;;  %v747_v22 = vpop.f32.mrf.mxu3  ;;  %v668_v33 = vmul.f32 %v660_v21, %v607_v10  ;;  %v9200_v10 = vld [vmem:[#allocation2 + $0x1d4] sm:$0xf0]  ;;  %1379 = vmatpush.bf16.msrb.mxu3 %v7917_v11  ;;  %1265 = vmatpush.bf16.msrb.mxu1 %v7917_v11  ;;  %v7874_v11 = vld [vmem:[#allocation2 + $0x188] sm:$0xf0] }
 0x15a   : > { %v763_v26 = vmul.f32 %v747_v22, %v9919_v17  ;;  %v787_v28 = vmul.f32 %v747_v22, %v9922_v23 }
 0x15b   : > { %v694_v46 = vadd.f32 %v686_v32, %v668_v33 }
 0x15c   : > { %v771_v29 = vadd.f32 %v763_v26, %v9924_v24  ;;  %v638_v34 = vpop.f32.mrf.mxu1  ;;  %v609_v35 = vpop.f32.mrf.mxu0  ;;  %v795_v39 = vadd.f32 %v787_v28, %v9927_v27  ;;  %v7913_v28 = vor.u32 %v9200_v10, %v7912_v9  ;;  %v9189_v9 = vld [vmem:[#allocation2 + $0x184] sm:$0xf] }
 0x15d   : > { %v652_v36 = vmul.f32 %v9919_v17, %v638_v34  ;;  %v678_v37 = vmul.f32 %v9922_v23, %v638_v34  ;;  %v7909_v34 = vor.u32 %v9197_v15, %v7906_v18  ;;  %v826_v18 = vld [vmem:[#allocation5 + $0x8] sm:$0xf] }
 0x15e   : > { %v779_v38 = vmul.f32 %v771_v29, %v718_v14  ;;  %1350 = vmatpush.bf16.msrb.mxu2 %v7913_v28  ;;  %1236 = vmatpush.bf16.msrb.mxu0 %v7913_v28 }
 0x15f   : > { %v661_v40 = vadd.f32 %v9924_v24, %v652_v36  ;;  %v687_v44 = vadd.f32 %v9927_v27, %v678_v37  ;;  %1380 = vmatpush.bf16.msrb.mxu3 %v7909_v34  ;;  %1266 = vmatpush.bf16.msrb.mxu1 %v7909_v34 }
 0x160   : > { %v803_v43 = vadd.f32 %v795_v39, %v779_v38 }
 0x161   : > { %v721_v41 = vpop.f32.mrf.mxu2  ;;  %v750_v45 = vpop.f32.mrf.mxu3  ;;  %v669_v47 = vmul.f32 %v661_v40, %v609_v35 }
 0x162   : > { %v1022_v48 = vpack.c.bf16 %v803_v43, %v802_v42  ;;  %v764_v49 = vmul.f32 %v750_v45, %v9919_v17  ;;  %v788_v0 = vmul.f32 %v750_v45, %v9922_v23 }
 0x163   : > { %v695_v50 = vadd.f32 %v687_v44, %v669_v47 }
 0x164   : > { %1038 = vmatmul.bf16.gmra.mxu2 %v1022_v48  ;;  %1067 = vmatmul.bf16.gmra.mxu3 %v1022_v48  ;;  %v641_v54 = vpop.f32.mrf.mxu1  ;;  %v612_v55 = vpop.f32.mrf.mxu0  ;;  %v772_v20 = vadd.f32 %v764_v49, %v9924_v24  ;;  %v796_v12 = vadd.f32 %v788_v0, %v9927_v27 }
 0x165   : > { %v653_v60 = vmul.f32 %v9919_v17, %v641_v54  ;;  %v829_v16 = vpack.c.bf16 %v695_v50, %v694_v46  ;;  %v679_v25 = vmul.f32 %v9922_v23, %v641_v54 }
 0x166   : > { %v780_v14 = vmul.f32 %v772_v20, %v721_v41  ;;  %v9193_v20 = vld [vmem:[#allocation2 + $0x1a4] sm:$0xf] }
 0x167   : > { %958 = vmatmul.bf16.gmra.mxu1 %v829_v16  ;;  %929 = vmatmul.bf16.gmra.mxu0 %v829_v16  ;;  %v662_v3 = vadd.f32 %v9924_v24, %v653_v60  ;;  %v688_v21 = vadd.f32 %v9927_v27, %v679_v25  ;;  %v7904_v16 = vld [vmem:[#allocation2 + $0x1c0] sm:$0xf]  ;;  %v9194_v25 = vld [vmem:[#allocation2 + $0x1a4] sm:$0xf0] }
 0x168   : > { %v804_v36 = vadd.f32 %v796_v12, %v780_v14  ;;  %v7905_v61 = vor.u32 %v9198_v19, %v7904_v16  ;;  %v7877_v12 = vor.u32 %v9189_v9, %v7874_v11  ;;  %v9190_v14 = vld [vmem:[#allocation2 + $0x184] sm:$0xf0] }
 0x169   : > { %v723_v4 = vpop.f32.mrf.mxu2  ;;  %v752_v5 = vpop.f32.mrf.mxu3  ;;  %v670_v22 = vmul.f32 %v662_v3, %v612_v55  ;;  %v9191_v3 = vld [vmem:[#allocation2 + $0x194] sm:$0xf] }
 0x16a   : > { %v765_v7 = vmul.f32 %v752_v5, %v9919_v17  ;;  %v789_v8 = vmul.f32 %v752_v5, %v9922_v23  ;;  %1351 = vmatpush.bf16.msrb.mxu2 %v7905_v61  ;;  %1237 = vmatpush.bf16.msrb.mxu0 %v7905_v61  ;;  %v7882_v5 = vld [vmem:[#allocation2 + $0x198] sm:$0xf0] }
 0x16b   : > { %v696_v40 = vadd.f32 %v688_v21, %v670_v22  ;;  %v7885_v6 = vor.u32 %v9191_v3, %v7882_v5  ;;  %v9991_v21 = vperm.slane %v826_v18, 3 }
 0x16c   : > { %v773_v13 = vadd.f32 %v765_v7, %v9924_v24  ;;  %v643_v26 = vpop.f32.mrf.mxu1  ;;  %v797_v32 = vadd.f32 %v789_v8, %v9927_v27  ;;  %v614_v33 = vpop.f32.mrf.mxu0  ;;  %v7880_v7 = vld [vmem:[#allocation2 + $0x190] sm:$0xf]  ;;  %v9192_v8 = vld [vmem:[#allocation2 + $0x194] sm:$0xf0] }
 0x16d   : > { %v654_v29 = vmul.f32 %v9919_v17, %v643_v26  ;;  %v680_v30 = vmul.f32 %v9922_v23, %v643_v26  ;;  %v7881_v10 = vor.u32 %v9192_v8, %v7880_v7 }
 0x16e   : > { %v781_v31 = vmul.f32 %v773_v13, %v723_v4  ;;  %v7889_v4 = vor.u32 %v9194_v25, %v7888_v2  ;;  %v7872_v13 = vld [vmem:[#allocation2 + $0x180] sm:$0xf] }
 0x16f   : > { %v663_v35 = vadd.f32 %v9924_v24, %v654_v29  ;;  %v689_v38 = vadd.f32 %v9927_v27, %v680_v30  ;;  %v7873_v15 = vor.u32 %v9190_v14, %v7872_v13  ;;  %v9994_v29 = vperm.slane %v826_v18, 2 }
 0x170   : > { %v805_v37 = vadd.f32 %v797_v32, %v781_v31  ;;  %v9996_v30 = vperm.slane %v826_v18, 1  ;;  %v9999_v32 = vperm.slane %v826_v18, 0 }
 0x171   : > { %v755_v39 = vpop.f32.mrf.mxu3  ;;  %v671_v41 = vmul.f32 %v663_v35, %v614_v33  ;;  %v726_v43 = vpop.f32.mrf.mxu2 }
 0x172   : > { %v1023_v42 = vpack.c.bf16 %v805_v37, %v804_v36  ;;  %v766_v44 = vmul.f32 %v755_v39, %v9919_v17  ;;  %v790_v49 = vmul.f32 %v755_v39, %v9922_v23 }
 0x173   : > { %v697_v45 = vadd.f32 %v689_v38, %v671_v41 }
 0x174   : > { %1043 = vmatmul.bf16.gmra.mxu2 %v1023_v42  ;;  %1072 = vmatmul.bf16.gmra.mxu3 %v1023_v42  ;;  %v774_v47 = vadd.f32 %v766_v44, %v9924_v24  ;;  %v798_v55 = vadd.f32 %v790_v49, %v9927_v27 }
 0x175   : > { %v830_v46 = vpack.c.bf16 %v697_v45, %v696_v40 }
 0x176   : > { %v782_v53 = vmul.f32 %v774_v47, %v726_v43 }
 0x177   : > { %963 = vmatmul.bf16.gmra.mxu1 %v830_v46  ;;  %934 = vmatmul.bf16.gmra.mxu0 %v830_v46 }
 0x178   : > { %v806_v58 = vadd.f32 %v798_v55, %v782_v53 }
 0x179   : > { %v757_v48 = vpop.f32.mrf.mxu3  ;;  %v728_v54 = vpop.f32.mrf.mxu2 }
 0x17a   : > { %v767_v50 = vmul.f32 %v757_v48, %v9919_v17  ;;  %v791_v51 = vmul.f32 %v757_v48, %v9922_v23  ;;  %v9195_v17 = vld [vmem:[#allocation2 + $0x1b4] sm:$0xf] }
 0x17b   : > { %v7901_v23 = vor.u32 %v9195_v17, %v7898_v62 }
 0x17c   : > { %v775_v52 = vadd.f32 %v767_v50, %v9924_v24  ;;  %v799_v57 = vadd.f32 %v791_v51, %v9927_v27  ;;  %v7896_v24 = vld [vmem:[#allocation2 + $0x1b0] sm:$0xf]  ;;  %v7890_v27 = vld [vmem:[#allocation2 + $0x1a8] sm:$0xf0] }
 0x17d   : > { %1267 = vmatpush.bf16.msrb.mxu1 %v7901_v23  ;;  %1381 = vmatpush.bf16.msrb.mxu3 %v7901_v23  ;;  %v7897_v0 = vor.u32 %v9196_v63, %v7896_v24  ;;  %v7893_v1 = vor.u32 %v9193_v20, %v7890_v27 }
 0x17e   : > { %v783_v56 = vmul.f32 %v775_v52, %v728_v54 }
 0x17f   : > { %1238 = vmatpush.bf16.msrb.mxu0 %v7897_v0  ;;  %1352 = vmatpush.bf16.msrb.mxu2 %v7897_v0 }
 0x180   : > { %v807_v59 = vadd.f32 %v799_v57, %v783_v56 }
 0x181   : > { %1268 = vmatpush.bf16.msrb.mxu1 %v7893_v1  ;;  %1382 = vmatpush.bf16.msrb.mxu3 %v7893_v1 }
 0x182   : > { %v1024_v60 = vpack.c.bf16 %v807_v59, %v806_v58 }
 0x183   : > { %1239 = vmatpush.bf16.msrb.mxu0 %v7889_v4  ;;  %1353 = vmatpush.bf16.msrb.mxu2 %v7889_v4 }
 0x184   : > { %1048 = vmatmul.bf16.gmra.mxu2 %v1024_v60  ;;  %1077 = vmatmul.bf16.gmra.mxu3 %v1024_v60 }
 0x185   : > { %1269 = vmatpush.bf16.msrb.mxu1 %v7885_v6  ;;  %1383 = vmatpush.bf16.msrb.mxu3 %v7885_v6 }
 0x187   : > { %1240 = vmatpush.bf16.msrb.mxu0 %v7881_v10  ;;  %1354 = vmatpush.bf16.msrb.mxu2 %v7881_v10 }
 0x189   : > { %1270 = vmatpush.bf16.msrb.mxu1 %v7877_v12  ;;  %1384 = vmatpush.bf16.msrb.mxu3 %v7877_v12 }
 0x18b   : > { %1241 = vmatpush.bf16.msrb.mxu0 %v7873_v15  ;;  %1355 = vmatpush.bf16.msrb.mxu2 %v7873_v15 }
 0x1c4   : > { %v949_v22 = vpop.f32.mrf.mxu1  ;;  %v920_v26 = vpop.f32.mrf.mxu0 }
 0x1c5   : > { %v970_v28 = vmul.f32 %v9991_v21, %v949_v22  ;;  %v996_v31 = vmul.f32 %v9994_v29, %v949_v22 }
 0x1c7   : > { %v979_v33 = vadd.f32 %v9996_v30, %v970_v28  ;;  %v1005_v36 = vadd.f32 %v9999_v32, %v996_v31 }
 0x1c9   : > { %v987_v37 = vmul.f32 %v979_v33, %v920_v26 }
 0x1cb   : > { %v1013_v42 = vadd.f32 %v1005_v36, %v987_v37 }
 0x1cc   : > { %v951_v34 = vpop.f32.mrf.mxu1  ;;  %v922_v35 = vpop.f32.mrf.mxu0 }
 0x1cd   : > { %v971_v38 = vmul.f32 %v9991_v21, %v951_v34  ;;  %v997_v39 = vmul.f32 %v9994_v29, %v951_v34 }
 0x1cf   : > { %v1006_v40 = vadd.f32 %v9999_v32, %v997_v39  ;;  %v980_v41 = vadd.f32 %v9996_v30, %v971_v38 }
 0x1d1   : > { %v988_v43 = vmul.f32 %v980_v41, %v922_v35 }
 0x1d3   : > { %v1014_v44 = vadd.f32 %v1006_v40, %v988_v43 }
 0x1d4   : > { %v954_v45 = vpop.f32.mrf.mxu1  ;;  %v925_v46 = vpop.f32.mrf.mxu0 }
 0x1d5   : > { %v1150_v47 = vpack.c.bf16 %v1014_v44, %v1013_v42  ;;  %v972_v48 = vmul.f32 %v9991_v21, %v954_v45  ;;  %v998_v51 = vmul.f32 %v9994_v29, %v954_v45 }
 0x1d7   : > { %v1034_v49 = vpop.f32.mrf.mxu2  ;;  %v1063_v50 = vpop.f32.mrf.mxu3  ;;  %1271 = vmatmul.bf16.vlgmr.msrb.gmra.mxu1 %v1150_v47  ;;  %1242 = vmatmul.bf16.vlgmr.msrb.gmra.mxu0 %v1150_v47  ;;  %v981_v53 = vadd.f32 %v9996_v30, %v972_v48  ;;  %v1007_v54 = vadd.f32 %v9999_v32, %v998_v51 }
 0x1d8   : > { %v1083_v52 = vmul.f32 %v1063_v50, %v9991_v21  ;;  %v1107_v16 = vmul.f32 %v1063_v50, %v9994_v29 }
 0x1d9   : > { %v989_v58 = vmul.f32 %v981_v53, %v925_v46 }
 0x1da   : > { %v1091_v57 = vadd.f32 %v1083_v52, %v9996_v30  ;;  %v1115_v1 = vadd.f32 %v1107_v16, %v9999_v32 }
 0x1db   : > { %v1015_v20 = vadd.f32 %v1007_v54, %v989_v58 }
 0x1dc   : > { %v956_v55 = vpop.f32.mrf.mxu1  ;;  %v927_v56 = vpop.f32.mrf.mxu0  ;;  %v1099_v63 = vmul.f32 %v1091_v57, %v1034_v49 }
 0x1dd   : > { %v973_v59 = vmul.f32 %v9991_v21, %v956_v55  ;;  %v999_v60 = vmul.f32 %v9994_v29, %v956_v55 }
 0x1de   : > { %v1123_v6 = vadd.f32 %v1115_v1, %v1099_v63  ;;  %v7986_v63 = vld [vmem:[#allocation2 + $0x268] sm:$0xf0] }
 0x1df   : > { %v1036_v19 = vpop.f32.mrf.mxu2  ;;  %v1065_v61 = vpop.f32.mrf.mxu3  ;;  %v1008_v17 = vadd.f32 %v9999_v32, %v999_v60  ;;  %v982_v24 = vadd.f32 %v9996_v30, %v973_v59 }
 0x1e0   : > { %v1084_v62 = vmul.f32 %v1065_v61, %v9991_v21  ;;  %v1108_v23 = vmul.f32 %v1065_v61, %v9994_v29  ;;  %v7994_v61 = vld [vmem:[#allocation2 + $0x278] sm:$0xf0] }
 0x1e1   : > { %v990_v27 = vmul.f32 %v982_v24, %v927_v56  ;;  %v9217_v24 = vld [vmem:[#allocation2 + $0x264] sm:$0xf] }
 0x1e2   : > { %v1092_v0 = vadd.f32 %v1084_v62, %v9996_v30  ;;  %v1116_v25 = vadd.f32 %v1108_v23, %v9999_v32  ;;  %v9220_v23 = vld [vmem:[#allocation2 + $0x274] sm:$0xf0] }
 0x1e3   : > { %v1016_v3 = vadd.f32 %v1008_v17, %v990_v27  ;;  %v7992_v17 = vld [vmem:[#allocation2 + $0x270] sm:$0xf] }
 0x1e4   : > { %v1100_v2 = vmul.f32 %v1092_v0, %v1036_v19  ;;  %v959_v4 = vpop.f32.mrf.mxu1  ;;  %v930_v5 = vpop.f32.mrf.mxu0  ;;  %v9219_v19 = vld [vmem:[#allocation2 + $0x274] sm:$0xf] }
 0x1e5   : > { %v974_v8 = vmul.f32 %v9991_v21, %v959_v4  ;;  %v1151_v9 = vpack.c.bf16 %v1016_v3, %v1015_v20  ;;  %v1000_v13 = vmul.f32 %v9994_v29, %v959_v4  ;;  %v7997_v62 = vor.u32 %v9219_v19, %v7994_v61  ;;  %v9218_v3 = vld [vmem:[#allocation2 + $0x264] sm:$0xf0]  ;;  %v9213_v61 = vld [vmem:[#allocation2 + $0x244] sm:$0xf] }
 0x1e6   : > { %v1124_v7 = vadd.f32 %v1116_v25, %v1100_v2  ;;  %v7993_v2 = vor.u32 %v9220_v23, %v7992_v17  ;;  %v7984_v25 = vld [vmem:[#allocation2 + $0x260] sm:$0xf]  ;;  %v7970_v17 = vld [vmem:[#allocation2 + $0x248] sm:$0xf0]  ;;  %v9211_v23 = vld [vmem:[#allocation2 + $0x234] sm:$0xf] }
 0x1e7   : > { %v1039_v10 = vpop.f32.mrf.mxu2  ;;  %v1068_v11 = vpop.f32.mrf.mxu3  ;;  %1276 = vmatmul.bf16.gmra.mxu1 %v1151_v9  ;;  %1247 = vmatmul.bf16.gmra.mxu0 %v1151_v9  ;;  %v983_v14 = vadd.f32 %v9996_v30, %v974_v8  ;;  %v1009_v26 = vadd.f32 %v9999_v32, %v1000_v13  ;;  %v7978_v13 = vld [vmem:[#allocation2 + $0x258] sm:$0xf0] }
 0x1e8   : > { %v1344_v12 = vpack.c.bf16 %v1124_v7, %v1123_v6  ;;  %v1085_v15 = vmul.f32 %v1068_v11, %v9991_v21  ;;  %v1109_v41 = vmul.f32 %v1068_v11, %v9994_v29  ;;  %1700 = vmatpush.bf16.msra.mxu3 %v7997_v62  ;;  %v7989_v7 = vor.u32 %v9217_v24, %v7986_v63  ;;  %v7962_v24 = vld [vmem:[#allocation2 + $0x238] sm:$0xf0] }
 0x1e9   : > { %v991_v28 = vmul.f32 %v983_v14, %v930_v5  ;;  %1586 = vmatpush.bf16.msra.mxu1 %v7997_v62  ;;  %1671 = vmatpush.bf16.msra.mxu2 %v7993_v2  ;;  %v7985_v11 = vor.u32 %v9218_v3, %v7984_v25  ;;  %v7973_v62 = vor.u32 %v9213_v61, %v7970_v17  ;;  %v7952_v25 = vld [vmem:[#allocation2 + $0x220] sm:$0xf]  ;;  %v9210_v3 = vld [vmem:[#allocation2 + $0x224] sm:$0xf0] }
 0x1ea   : > { %1356 = vmatmul.bf16.vlgmr.msrb.gmra.mxu2 %v1344_v12  ;;  %1385 = vmatmul.bf16.vlgmr.msrb.gmra.mxu3 %v1344_v12  ;;  %v1093_v34 = vadd.f32 %v1085_v15, %v9996_v30  ;;  %v1117_v49 = vadd.f32 %v1109_v41, %v9999_v32  ;;  %v9215_v12 = vld [vmem:[#allocation2 + $0x254] sm:$0xf]  ;;  %v7965_v63 = vor.u32 %v9211_v23, %v7962_v24 }
 0x1eb   : > { %v1017_v42 = vadd.f32 %v1009_v26, %v991_v28  ;;  %1557 = vmatpush.bf16.msra.mxu0 %v7993_v2  ;;  %v7976_v26 = vld [vmem:[#allocation2 + $0x250] sm:$0xf]  ;;  %v9216_v28 = vld [vmem:[#allocation2 + $0x254] sm:$0xf0] }
 0x1ec   : > { %v961_v18 = vpop.f32.mrf.mxu1  ;;  %v932_v22 = vpop.f32.mrf.mxu0  ;;  %v1101_v45 = vmul.f32 %v1093_v34, %v1039_v10  ;;  %1701 = vmatpush.bf16.msra.mxu3 %v7989_v7 }
 0x1ed   : > { %v975_v31 = vmul.f32 %v9991_v21, %v961_v18  ;;  %v1001_v33 = vmul.f32 %v9994_v29, %v961_v18  ;;  %1587 = vmatpush.bf16.msra.mxu1 %v7989_v7  ;;  %1672 = vmatpush.bf16.msra.mxu2 %v7985_v11 }
 0x1ee   : > { %v1125_v55 = vadd.f32 %v1117_v49, %v1101_v45 }
 0x1ef   : > { %v1041_v35 = vpop.f32.mrf.mxu2  ;;  %v1070_v36 = vpop.f32.mrf.mxu3  ;;  %v1010_v37 = vadd.f32 %v9999_v32, %v1001_v33  ;;  %v984_v40 = vadd.f32 %v9996_v30, %v975_v31  ;;  %1558 = vmatpush.bf16.msra.mxu0 %v7985_v11 }
 0x1f0   : > { %v1086_v38 = vmul.f32 %v1070_v36, %v9991_v21  ;;  %v1110_v39 = vmul.f32 %v1070_v36, %v9994_v29  ;;  %v7981_v36 = vor.u32 %v9215_v12, %v7978_v13  ;;  %v7938_v12 = vld [vmem:[#allocation2 + $0x208] sm:$0xf0] }
 0x1f1   : > { %v992_v44 = vmul.f32 %v984_v40, %v932_v22 }
 0x1f2   : > { %v1094_v43 = vadd.f32 %v1086_v38, %v9996_v30  ;;  %v1118_v47 = vadd.f32 %v1110_v39, %v9999_v32  ;;  %1702 = vmatpush.bf16.msra.mxu3 %v7981_v36  ;;  %1588 = vmatpush.bf16.msra.mxu1 %v7981_v36 }
 0x1f3   : > { %v1018_v48 = vadd.f32 %v1010_v37, %v992_v44  ;;  %v7977_v37 = vor.u32 %v9216_v28, %v7976_v26 }
 0x1f4   : > { %v1102_v46 = vmul.f32 %v1094_v43, %v1041_v35  ;;  %v964_v50 = vpop.f32.mrf.mxu1  ;;  %v935_v51 = vpop.f32.mrf.mxu0 }
 0x1f5   : > { %v976_v52 = vmul.f32 %v9991_v21, %v964_v50  ;;  %v1152_v53 = vpack.c.bf16 %v1018_v48, %v1017_v42  ;;  %v1002_v58 = vmul.f32 %v9994_v29, %v964_v50  ;;  %1673 = vmatpush.bf16.msra.mxu2 %v7977_v37  ;;  %1559 = vmatpush.bf16.msra.mxu0 %v7977_v37 }
 0x1f6   : > { %v1126_v54 = vadd.f32 %v1118_v47, %v1102_v46  ;;  %1589 = vmatpush.bf16.msra.mxu1 %v7973_v62  ;;  %1703 = vmatpush.bf16.msra.mxu3 %v7973_v62 }
 0x1f7   : > { %v1044_v56 = vpop.f32.mrf.mxu2  ;;  %v1073_v57 = vpop.f32.mrf.mxu3  ;;  %1281 = vmatmul.bf16.gmra.mxu1 %v1152_v53  ;;  %v985_v60 = vadd.f32 %v9996_v30, %v976_v52  ;;  %1252 = vmatmul.bf16.gmra.mxu0 %v1152_v53  ;;  %v1011_v20 = vadd.f32 %v9999_v32, %v1002_v58 }
 0x1f8   : > { %v1087_v59 = vmul.f32 %v1073_v57, %v9991_v21  ;;  %v1345_v16 = vpack.c.bf16 %v1126_v54, %v1125_v55  ;;  %v1111_v8 = vmul.f32 %v1073_v57, %v9994_v29 }
 0x1f9   : > { %v993_v27 = vmul.f32 %v985_v60, %v935_v51 }
 0x1fa   : > { %1361 = vmatmul.bf16.gmra.mxu2 %v1345_v16  ;;  %1390 = vmatmul.bf16.gmra.mxu3 %v1345_v16  ;;  %v1095_v0 = vadd.f32 %v1087_v59, %v9996_v30  ;;  %v1119_v38 = vadd.f32 %v1111_v8, %v9999_v32  ;;  %v7944_v8 = vld [vmem:[#allocation2 + $0x210] sm:$0xf] }
 0x1fb   : > { %v1019_v33 = vadd.f32 %v1011_v20, %v993_v27  ;;  %1590 = vmatpush.bf16.msra.mxu1 %v7965_v63  ;;  %v9212_v20 = vld [vmem:[#allocation2 + $0x234] sm:$0xf0]  ;;  %1704 = vmatpush.bf16.msra.mxu3 %v7965_v63 }
 0x1fc   : > { %v966_v1 = vpop.f32.mrf.mxu1  ;;  %v937_v6 = vpop.f32.mrf.mxu0  ;;  %v1103_v31 = vmul.f32 %v1095_v0, %v1044_v56  ;;  %v9209_v0 = vld [vmem:[#allocation2 + $0x224] sm:$0xf] }
 0x1fd   : > { %v977_v4 = vmul.f32 %v9991_v21, %v966_v1  ;;  %v1003_v5 = vmul.f32 %v9994_v29, %v966_v1  ;;  %v7954_v1 = vld [vmem:[#allocation2 + $0x228] sm:$0xf0] }
 0x1fe   : > { %v1127_v42 = vadd.f32 %v1119_v38, %v1103_v31  ;;  %v7957_v2 = vor.u32 %v9209_v0, %v7954_v1 }
 0x1ff   : > { %v1046_v9 = vpop.f32.mrf.mxu2  ;;  %v1075_v10 = vpop.f32.mrf.mxu3  ;;  %v1012_v14 = vadd.f32 %v9999_v32, %v1003_v5  ;;  %v986_v22 = vadd.f32 %v9996_v30, %v977_v4  ;;  %v9207_v4 = vld [vmem:[#allocation2 + $0x214] sm:$0xf]  ;;  %v7953_v5 = vor.u32 %v9210_v3, %v7952_v25 }
 0x200   : > { %v1088_v15 = vmul.f32 %v1075_v10, %v9991_v21  ;;  %v1112_v18 = vmul.f32 %v1075_v10, %v9994_v29  ;;  %1591 = vmatpush.bf16.msra.mxu1 %v7957_v2  ;;  %1705 = vmatpush.bf16.msra.mxu3 %v7957_v2  ;;  %v9205_v10 = vld [vmem:[#allocation2 + $0x204] sm:$0xf] }
 0x201   : > { %v994_v35 = vmul.f32 %v986_v22, %v937_v6  ;;  %v7946_v6 = vld [vmem:[#allocation2 + $0x218] sm:$0xf0]  ;;  %v7941_v13 = vor.u32 %v9205_v10, %v7938_v12  ;;  %v1149_v22 = vld [vmem:[#allocation5 + $0xc] sm:$0xf] }
 0x202   : > { %v1096_v34 = vadd.f32 %v1088_v15, %v9996_v30  ;;  %v1120_v40 = vadd.f32 %v1112_v18, %v9999_v32  ;;  %v7949_v7 = vor.u32 %v9207_v4, %v7946_v6  ;;  %v9206_v15 = vld [vmem:[#allocation2 + $0x204] sm:$0xf0]  ;;  %v10063_v26 = vperm.slane %v1149_v22, 3 }
 0x203   : > { %v1020_v41 = vadd.f32 %v1012_v14, %v994_v35  ;;  %v7936_v14 = vld [vmem:[#allocation2 + $0x200] sm:$0xf]  ;;  %v10068_v35 = vperm.slane %v1149_v22, 1  ;;  %v10071_v37 = vperm.slane %v1149_v22, 0 }
 0x204   : > { %v1104_v39 = vmul.f32 %v1096_v34, %v1046_v9  ;;  %1592 = vmatpush.bf16.msra.mxu1 %v7949_v7  ;;  %v9208_v9 = vld [vmem:[#allocation2 + $0x214] sm:$0xf0]  ;;  %1706 = vmatpush.bf16.msra.mxu3 %v7949_v7  ;;  %v7937_v18 = vor.u32 %v9206_v15, %v7936_v14 }
 0x205   : > { %v1153_v43 = vpack.c.bf16 %v1020_v41, %v1019_v33  ;;  %v7945_v11 = vor.u32 %v9208_v9, %v7944_v8  ;;  %v10066_v33 = vperm.slane %v1149_v22, 2 }
 0x206   : > { %v1128_v44 = vadd.f32 %v1120_v40, %v1104_v39 }
 0x207   : > { %v1078_v45 = vpop.f32.mrf.mxu3  ;;  %1286 = vmatmul.bf16.gmra.mxu1 %v1153_v43  ;;  %v1049_v47 = vpop.f32.mrf.mxu2  ;;  %1257 = vmatmul.bf16.gmra.mxu0 %v1153_v43 }
 0x208   : > { %v1346_v46 = vpack.c.bf16 %v1128_v44, %v1127_v42  ;;  %v1089_v48 = vmul.f32 %v1078_v45, %v9991_v21  ;;  %v1113_v51 = vmul.f32 %v1078_v45, %v9994_v29  ;;  %1593 = vmatpush.bf16.msra.mxu1 %v7941_v13  ;;  %1707 = vmatpush.bf16.msra.mxu3 %v7941_v13 }
 0x20a   : > { %1366 = vmatmul.bf16.gmra.mxu2 %v1346_v46  ;;  %1395 = vmatmul.bf16.gmra.mxu3 %v1346_v46  ;;  %v1097_v49 = vadd.f32 %v1089_v48, %v9996_v30  ;;  %v1121_v57 = vadd.f32 %v1113_v51, %v9999_v32 }
 0x20c   : > { %v1105_v54 = vmul.f32 %v1097_v49, %v1049_v47 }
 0x20e   : > { %v1129_v60 = vadd.f32 %v1121_v57, %v1105_v54 }
 0x20f   : > { %v1080_v50 = vpop.f32.mrf.mxu3  ;;  %v1051_v56 = vpop.f32.mrf.mxu2 }
 0x210   : > { %v1090_v52 = vmul.f32 %v1080_v50, %v9991_v21  ;;  %v1114_v53 = vmul.f32 %v1080_v50, %v9994_v29  ;;  %v7968_v21 = vld [vmem:[#allocation2 + $0x240] sm:$0xf]  ;;  %v9214_v29 = vld [vmem:[#allocation2 + $0x244] sm:$0xf0] }
 0x212   : > { %v1098_v55 = vadd.f32 %v1090_v52, %v9996_v30  ;;  %v1122_v59 = vadd.f32 %v1114_v53, %v9999_v32  ;;  %v7969_v30 = vor.u32 %v9214_v29, %v7968_v21  ;;  %v7960_v32 = vld [vmem:[#allocation2 + $0x230] sm:$0xf] }
 0x213   : > { %v7961_v27 = vor.u32 %v9212_v20, %v7960_v32 }
 0x214   : > { %v1106_v58 = vmul.f32 %v1098_v55, %v1051_v56  ;;  %1560 = vmatpush.bf16.msra.mxu0 %v7969_v30  ;;  %1674 = vmatpush.bf16.msra.mxu2 %v7969_v30 }
 0x216   : > { %v1130_v16 = vadd.f32 %v1122_v59, %v1106_v58 }
 0x218   : > { %v1347_v19 = vpack.c.bf16 %v1130_v16, %v1129_v60  ;;  %1561 = vmatpush.bf16.msra.mxu0 %v7961_v27  ;;  %1675 = vmatpush.bf16.msra.mxu2 %v7961_v27 }
 0x21a   : > { %1371 = vmatmul.bf16.gmra.mxu2 %v1347_v19  ;;  %1400 = vmatmul.bf16.gmra.mxu3 %v1347_v19 }
 0x21c   : > { %1562 = vmatpush.bf16.msra.mxu0 %v7953_v5  ;;  %1676 = vmatpush.bf16.msra.mxu2 %v7953_v5 }
 0x220   : > { %1563 = vmatpush.bf16.msra.mxu0 %v7945_v11  ;;  %1677 = vmatpush.bf16.msra.mxu2 %v7945_v11 }
 0x224   : > { %1564 = vmatpush.bf16.msra.mxu0 %v7937_v18  ;;  %1678 = vmatpush.bf16.msra.mxu2 %v7937_v18 }
 0x254   : > { %v1272_v28 = vpop.f32.mrf.mxu1  ;;  %v1243_v34 = vpop.f32.mrf.mxu0 }
 0x255   : > { %v1293_v31 = vmul.f32 %v10063_v26, %v1272_v28  ;;  %v1319_v36 = vmul.f32 %v10066_v33, %v1272_v28 }
 0x257   : > { %v1302_v38 = vadd.f32 %v10068_v35, %v1293_v31  ;;  %v1328_v40 = vadd.f32 %v10071_v37, %v1319_v36 }
 0x259   : > { %v1310_v41 = vmul.f32 %v1302_v38, %v1243_v34 }
 0x25b   : > { %v1336_v47 = vadd.f32 %v1328_v40, %v1310_v41 }
 0x25c   : > { %v1274_v39 = vpop.f32.mrf.mxu1  ;;  %v1245_v44 = vpop.f32.mrf.mxu0 }
 0x25d   : > { %v1294_v42 = vmul.f32 %v10063_v26, %v1274_v39  ;;  %v1320_v43 = vmul.f32 %v10066_v33, %v1274_v39 }
 0x25f   : > { %v1329_v45 = vadd.f32 %v10071_v37, %v1320_v43  ;;  %v1303_v46 = vadd.f32 %v10068_v35, %v1294_v42 }
 0x261   : > { %v1311_v48 = vmul.f32 %v1303_v46, %v1245_v44 }
 0x263   : > { %v1337_v49 = vadd.f32 %v1329_v45, %v1311_v48 }
 0x264   : > { %v1277_v50 = vpop.f32.mrf.mxu1  ;;  %v1248_v53 = vpop.f32.mrf.mxu0 }
 0x265   : > { %v1473_v51 = vpack.c.bf16 %v1337_v49, %v1336_v47  ;;  %v1295_v52 = vmul.f32 %v10063_v26, %v1277_v50  ;;  %v1321_v54 = vmul.f32 %v10066_v33, %v1277_v50 }
 0x267   : > { %1594 = vmatmul.bf16.vlgmr.msra.gmra.mxu1 %v1473_v51  ;;  %1565 = vmatmul.bf16.vlgmr.msra.gmra.mxu0 %v1473_v51  ;;  %v1304_v55 = vadd.f32 %v10068_v35, %v1295_v52  ;;  %v1330_v58 = vadd.f32 %v10071_v37, %v1321_v54 }
 0x269   : > { %v1312_v59 = vmul.f32 %v1304_v55, %v1248_v53 }
 0x26b   : > { %v1338_v29 = vadd.f32 %v1330_v58, %v1312_v59 }
 0x26c   : > { %v1279_v56 = vpop.f32.mrf.mxu1  ;;  %v1250_v61 = vpop.f32.mrf.mxu0 }
 0x26d   : > { %v1357_v57 = vpop.f32.mrf.mxu2  ;;  %v1296_v60 = vmul.f32 %v10063_v26, %v1279_v56  ;;  %v1322_v16 = vmul.f32 %v10066_v33, %v1279_v56  ;;  %v1386_v19 = vpop.f32.mrf.mxu3 }
 0x26e   : > { %v1406_v21 = vmul.f32 %v1386_v19, %v10063_v26  ;;  %v1430_v2 = vmul.f32 %v1386_v19, %v10066_v33 }
 0x26f   : > { %v1331_v17 = vadd.f32 %v10071_v37, %v1322_v16  ;;  %v1305_v62 = vadd.f32 %v10068_v35, %v1296_v60 }
 0x270   : > { %v1414_v24 = vadd.f32 %v1406_v21, %v10068_v35  ;;  %v1438_v8 = vadd.f32 %v1430_v2, %v10071_v37  ;;  %v8056_v2 = vld [vmem:[#allocation2 + $0x2f0] sm:$0xf] }
 0x271   : > { %v1313_v23 = vmul.f32 %v1305_v62, %v1250_v61 }
 0x272   : > { %v1422_v4 = vmul.f32 %v1414_v24, %v1357_v57 }
 0x273   : > { %v1339_v30 = vadd.f32 %v1331_v17, %v1313_v23 }
 0x274   : > { %v1282_v63 = vpop.f32.mrf.mxu1  ;;  %v1253_v1 = vpop.f32.mrf.mxu0  ;;  %v1446_v11 = vadd.f32 %v1438_v8, %v1422_v4 }
 0x275   : > { %v1359_v32 = vpop.f32.mrf.mxu2  ;;  %v1297_v20 = vmul.f32 %v10063_v26, %v1282_v63  ;;  %v1388_v0 = vpop.f32.mrf.mxu3  ;;  %v1474_v27 = vpack.c.bf16 %v1339_v30, %v1338_v29  ;;  %v1323_v6 = vmul.f32 %v10066_v33, %v1282_v63 }
 0x276   : > { %v1407_v25 = vmul.f32 %v1388_v0, %v10063_v26  ;;  %v1431_v3 = vmul.f32 %v1388_v0, %v10066_v33 }
 0x277   : > { %1599 = vmatmul.bf16.gmra.mxu1 %v1474_v27  ;;  %1570 = vmatmul.bf16.gmra.mxu0 %v1474_v27  ;;  %v1306_v7 = vadd.f32 %v10068_v35, %v1297_v20  ;;  %v1332_v14 = vadd.f32 %v10071_v37, %v1323_v6  ;;  %v9235_v27 = vld [vmem:[#allocation2 + $0x2f4] sm:$0xf]  ;;  %v9233_v6 = vld [vmem:[#allocation2 + $0x2e4] sm:$0xf] }
 0x278   : > { %v1415_v5 = vadd.f32 %v1407_v25, %v10068_v35  ;;  %v1439_v10 = vadd.f32 %v1431_v3, %v10071_v37 }
 0x279   : > { %v1314_v15 = vmul.f32 %v1306_v7, %v1253_v1  ;;  %v8058_v1 = vld [vmem:[#allocation2 + $0x2f8] sm:$0xf0]  ;;  %v8050_v7 = vld [vmem:[#allocation2 + $0x2e8] sm:$0xf0] }
 0x27a   : > { %v1423_v9 = vmul.f32 %v1415_v5, %v1359_v32  ;;  %v8061_v4 = vor.u32 %v9235_v27, %v8058_v1  ;;  %v9236_v5 = vld [vmem:[#allocation2 + $0x2f4] sm:$0xf0]  ;;  %v9225_v27 = vld [vmem:[#allocation2 + $0x2a4] sm:$0xf] }
 0x27b   : > { %v1340_v41 = vadd.f32 %v1332_v14, %v1314_v15  ;;  %v8057_v8 = vor.u32 %v9236_v5, %v8056_v2  ;;  %v8018_v2 = vld [vmem:[#allocation2 + $0x2a8] sm:$0xf0]  ;;  %v9223_v5 = vld [vmem:[#allocation2 + $0x294] sm:$0xf] }
 0x27c   : > { %v1447_v12 = vadd.f32 %v1439_v10, %v1423_v9  ;;  %v1284_v13 = vpop.f32.mrf.mxu1  ;;  %v1255_v36 = vpop.f32.mrf.mxu0  ;;  %v8048_v9 = vld [vmem:[#allocation2 + $0x2e0] sm:$0xf]  ;;  %v9234_v10 = vld [vmem:[#allocation2 + $0x2e4] sm:$0xf0]  ;;  %2023 = vmatpush.bf16.msrb.mxu3 %v8061_v4  ;;  %1909 = vmatpush.bf16.msrb.mxu1 %v8061_v4 }
 0x27d   : > { %v1298_v18 = vmul.f32 %v10063_v26, %v1284_v13  ;;  %v1324_v22 = vmul.f32 %v10066_v33, %v1284_v13  ;;  %v1362_v28 = vpop.f32.mrf.mxu2  ;;  %v1391_v31 = vpop.f32.mrf.mxu3  ;;  %1994 = vmatpush.bf16.msrb.mxu2 %v8057_v8  ;;  %1880 = vmatpush.bf16.msrb.mxu0 %v8057_v8  ;;  %v8053_v13 = vor.u32 %v9233_v6, %v8050_v7  ;;  %v9226_v4 = vld [vmem:[#allocation2 + $0x2a4] sm:$0xf0]  ;;  %v8010_v7 = vld [vmem:[#allocation2 + $0x298] sm:$0xf0] }
 0x27e   : > { %v1667_v34 = vpack.c.bf16 %v1447_v12, %v1446_v11  ;;  %v1408_v40 = vmul.f32 %v1391_v31, %v10063_v26  ;;  %v1432_v50 = vmul.f32 %v1391_v31, %v10066_v33  ;;  %v8042_v31 = vld [vmem:[#allocation2 + $0x2d8] sm:$0xf0]  ;;  %v8013_v8 = vor.u32 %v9223_v5, %v8010_v7 }
 0x27f   : > { %v1333_v38 = vadd.f32 %v10071_v37, %v1324_v22  ;;  %v1307_v39 = vadd.f32 %v10068_v35, %v1298_v18  ;;  %v8049_v22 = vor.u32 %v9234_v10, %v8048_v9  ;;  %v8008_v9 = vld [vmem:[#allocation2 + $0x290] sm:$0xf]  ;;  %v9224_v10 = vld [vmem:[#allocation2 + $0x294] sm:$0xf0] }
 0x280   : > { %1679 = vmatmul.bf16.vlgmr.msra.gmra.mxu2 %v1667_v34  ;;  %1708 = vmatmul.bf16.vlgmr.msra.gmra.mxu3 %v1667_v34  ;;  %v1416_v44 = vadd.f32 %v1408_v40, %v10068_v35  ;;  %v1440_v58 = vadd.f32 %v1432_v50, %v10071_v37 }
 0x281   : > { %v1315_v42 = vmul.f32 %v1307_v39, %v1255_v36  ;;  %1910 = vmatpush.bf16.msrb.mxu1 %v8053_v13  ;;  %2024 = vmatpush.bf16.msrb.mxu3 %v8053_v13  ;;  %v8002_v13 = vld [vmem:[#allocation2 + $0x288] sm:$0xf0] }
 0x282   : > { %v1424_v54 = vmul.f32 %v1416_v44, %v1362_v28  ;;  %v9231_v28 = vld [vmem:[#allocation2 + $0x2d4] sm:$0xf]  ;;  %1881 = vmatpush.bf16.msrb.mxu0 %v8049_v22  ;;  %1995 = vmatpush.bf16.msrb.mxu2 %v8049_v22 }
 0x283   : > { %v1341_v43 = vadd.f32 %v1333_v38, %v1315_v42 }
 0x284   : > { %v1287_v45 = vpop.f32.mrf.mxu1  ;;  %v1258_v53 = vpop.f32.mrf.mxu0  ;;  %v1448_v16 = vadd.f32 %v1440_v58, %v1424_v54 }
 0x285   : > { %v1299_v46 = vmul.f32 %v10063_v26, %v1287_v45  ;;  %v1364_v47 = vpop.f32.mrf.mxu2  ;;  %v1393_v48 = vpop.f32.mrf.mxu3  ;;  %v1475_v49 = vpack.c.bf16 %v1341_v43, %v1340_v41  ;;  %v1325_v56 = vmul.f32 %v10066_v33, %v1287_v45  ;;  %v8045_v41 = vor.u32 %v9231_v28, %v8042_v31  ;;  %v1472_v28 = vld [vmem:[#allocation5 + $0x10] sm:$0xf] }
 0x286   : > { %v1409_v51 = vmul.f32 %v1393_v48, %v10063_v26  ;;  %v1433_v52 = vmul.f32 %v1393_v48, %v10066_v33  ;;  %v10135_v31 = vperm.slane %v1472_v28, 3 }
 0x287   : > { %1604 = vmatmul.bf16.gmra.mxu1 %v1475_v49  ;;  %1575 = vmatmul.bf16.gmra.mxu0 %v1475_v49  ;;  %v1308_v57 = vadd.f32 %v10068_v35, %v1299_v46  ;;  %v1334_v17 = vadd.f32 %v10071_v37, %v1325_v56 }
 0x288   : > { %v1417_v55 = vadd.f32 %v1409_v51, %v10068_v35  ;;  %v1441_v60 = vadd.f32 %v1433_v52, %v10071_v37  ;;  %1911 = vmatpush.bf16.msrb.mxu1 %v8045_v41  ;;  %2025 = vmatpush.bf16.msrb.mxu3 %v8045_v41 }
 0x289   : > { %v1316_v62 = vmul.f32 %v1308_v57, %v1258_v53 }
 0x28a   : > { %v1425_v59 = vmul.f32 %v1417_v55, %v1364_v47 }
 0x28b   : > { %v1342_v25 = vadd.f32 %v1334_v17, %v1316_v62  ;;  %v8040_v62 = vld [vmem:[#allocation2 + $0x2d0] sm:$0xf] }
 0x28c   : > { %v1289_v19 = vpop.f32.mrf.mxu1  ;;  %v1449_v61 = vadd.f32 %v1441_v60, %v1425_v59  ;;  %v1260_v63 = vpop.f32.mrf.mxu0 }
 0x28d   : > { %v1300_v21 = vmul.f32 %v10063_v26, %v1289_v19  ;;  %v1326_v29 = vmul.f32 %v10066_v33, %v1289_v19  ;;  %v1367_v23 = vpop.f32.mrf.mxu2  ;;  %v1396_v30 = vpop.f32.mrf.mxu3 }
 0x28e   : > { %v1668_v24 = vpack.c.bf16 %v1449_v61, %v1448_v16  ;;  %v1410_v0 = vmul.f32 %v1396_v30, %v10063_v26  ;;  %v1434_v34 = vmul.f32 %v1396_v30, %v10066_v33  ;;  %v9230_v30 = vld [vmem:[#allocation2 + $0x2c4] sm:$0xf0] }
 0x28f   : > { %v1335_v32 = vadd.f32 %v10071_v37, %v1326_v29  ;;  %v1309_v20 = vadd.f32 %v10068_v35, %v1300_v21  ;;  %v9232_v21 = vld [vmem:[#allocation2 + $0x2d4] sm:$0xf0]  ;;  %v9229_v29 = vld [vmem:[#allocation2 + $0x2c4] sm:$0xf] }
 0x290   : > { %1684 = vmatmul.bf16.gmra.mxu2 %v1668_v24  ;;  %1713 = vmatmul.bf16.gmra.mxu3 %v1668_v24  ;;  %v1418_v12 = vadd.f32 %v1410_v0, %v10068_v35  ;;  %v1442_v42 = vadd.f32 %v1434_v34, %v10071_v37  ;;  %v9227_v24 = vld [vmem:[#allocation2 + $0x2b4] sm:$0xf]  ;;  %v9228_v0 = vld [vmem:[#allocation2 + $0x2b4] sm:$0xf0] }
 0x291   : > { %v1317_v3 = vmul.f32 %v1309_v20, %v1260_v63  ;;  %v8024_v20 = vld [vmem:[#allocation2 + $0x2b0] sm:$0xf] }
 0x292   : > { %v1426_v39 = vmul.f32 %v1418_v12, %v1367_v23  ;;  %v8034_v23 = vld [vmem:[#allocation2 + $0x2c8] sm:$0xf0]  ;;  %v8025_v1 = vor.u32 %v9228_v0, %v8024_v20  ;;  %v8009_v12 = vor.u32 %v9224_v10, %v8008_v9 }
 0x293   : > { %v1343_v11 = vadd.f32 %v1335_v32, %v1317_v3  ;;  %v8016_v3 = vld [vmem:[#allocation2 + $0x2a0] sm:$0xf] }
 0x294   : > { %v1450_v45 = vadd.f32 %v1442_v42, %v1426_v39  ;;  %v8017_v6 = vor.u32 %v9226_v4, %v8016_v3  ;;  %v10138_v39 = vperm.slane %v1472_v28, 2  ;;  %v10143_v42 = vperm.slane %v1472_v28, 0 }
 0x295   : > { %v1369_v14 = vpop.f32.mrf.mxu2  ;;  %v1398_v15 = vpop.f32.mrf.mxu3  ;;  %v1476_v18 = vpack.c.bf16 %v1343_v11, %v1342_v25  ;;  %v8021_v25 = vor.u32 %v9225_v27, %v8018_v2  ;;  %v9221_v11 = vld [vmem:[#allocation2 + $0x284] sm:$0xf] }
 0x296   : > { %v1411_v36 = vmul.f32 %v1398_v15, %v10063_v26  ;;  %v1435_v38 = vmul.f32 %v1398_v15, %v10066_v33  ;;  %v8000_v15 = vld [vmem:[#allocation2 + $0x280] sm:$0xf] }
 0x297   : > { %1609 = vmatmul.bf16.gmra.mxu1 %v1476_v18  ;;  %1580 = vmatmul.bf16.gmra.mxu0 %v1476_v18  ;;  %v9222_v18 = vld [vmem:[#allocation2 + $0x284] sm:$0xf0] }
 0x298   : > { %v1419_v40 = vadd.f32 %v1411_v36, %v10068_v35  ;;  %v1443_v44 = vadd.f32 %v1435_v38, %v10071_v37  ;;  %v8001_v22 = vor.u32 %v9222_v18, %v8000_v15 }
 0x29a   : > { %v1427_v43 = vmul.f32 %v1419_v40, %v1369_v14  ;;  %v8005_v14 = vor.u32 %v9221_v11, %v8002_v13  ;;  %v10140_v40 = vperm.slane %v1472_v28, 1 }
 0x29c   : > { %v1451_v46 = vadd.f32 %v1443_v44, %v1427_v43 }
 0x29d   : > { %v1401_v47 = vpop.f32.mrf.mxu3  ;;  %v1372_v49 = vpop.f32.mrf.mxu2 }
 0x29e   : > { %v1669_v48 = vpack.c.bf16 %v1451_v46, %v1450_v45  ;;  %v1412_v50 = vmul.f32 %v1401_v47, %v10063_v26  ;;  %v1436_v53 = vmul.f32 %v1401_v47, %v10066_v33 }
 0x2a0   : > { %1689 = vmatmul.bf16.gmra.mxu2 %v1669_v48  ;;  %1718 = vmatmul.bf16.gmra.mxu3 %v1669_v48  ;;  %v1420_v51 = vadd.f32 %v1412_v50, %v10068_v35  ;;  %v1444_v59 = vadd.f32 %v1436_v53, %v10071_v37 }
 0x2a2   : > { %v1428_v56 = vmul.f32 %v1420_v51, %v1372_v49 }
 0x2a4   : > { %v1452_v19 = vadd.f32 %v1444_v59, %v1428_v56 }
 0x2a5   : > { %v1403_v52 = vpop.f32.mrf.mxu3  ;;  %v1374_v58 = vpop.f32.mrf.mxu2 }
 0x2a6   : > { %v1413_v54 = vmul.f32 %v1403_v52, %v10063_v26  ;;  %v1437_v55 = vmul.f32 %v1403_v52, %v10066_v33  ;;  %v8041_v26 = vor.u32 %v9232_v21, %v8040_v62  ;;  %v8037_v33 = vor.u32 %v9229_v29, %v8034_v23 }
 0x2a8   : > { %v1421_v57 = vadd.f32 %v1413_v54, %v10068_v35  ;;  %v1445_v16 = vadd.f32 %v1437_v55, %v10071_v37  ;;  %1882 = vmatpush.bf16.msrb.mxu0 %v8041_v26  ;;  %1996 = vmatpush.bf16.msrb.mxu2 %v8041_v26  ;;  %v8032_v35 = vld [vmem:[#allocation2 + $0x2c0] sm:$0xf]  ;;  %v8026_v37 = vld [vmem:[#allocation2 + $0x2b8] sm:$0xf0] }
 0x2a9   : > { %1912 = vmatpush.bf16.msrb.mxu1 %v8037_v33  ;;  %2026 = vmatpush.bf16.msrb.mxu3 %v8037_v33  ;;  %v8033_v63 = vor.u32 %v9230_v30, %v8032_v35  ;;  %v8029_v32 = vor.u32 %v9227_v24, %v8026_v37 }
 0x2aa   : > { %v1429_v60 = vmul.f32 %v1421_v57, %v1374_v58 }
 0x2ac   : > { %v1453_v61 = vadd.f32 %v1445_v16, %v1429_v60  ;;  %1883 = vmatpush.bf16.msrb.mxu0 %v8033_v63  ;;  %1997 = vmatpush.bf16.msrb.mxu2 %v8033_v63 }
 0x2ad   : > { %1913 = vmatpush.bf16.msrb.mxu1 %v8029_v32  ;;  %2027 = vmatpush.bf16.msrb.mxu3 %v8029_v32 }
 0x2ae   : > { %v1670_v17 = vpack.c.bf16 %v1453_v61, %v1452_v19 }
 0x2b0   : > { %1694 = vmatmul.bf16.gmra.mxu2 %v1670_v17  ;;  %1723 = vmatmul.bf16.gmra.mxu3 %v1670_v17 }
 0x2b1   : > { %1884 = vmatpush.bf16.msrb.mxu0 %v8025_v1  ;;  %1998 = vmatpush.bf16.msrb.mxu2 %v8025_v1 }
 0x2b2   : > { %1914 = vmatpush.bf16.msrb.mxu1 %v8021_v25  ;;  %2028 = vmatpush.bf16.msrb.mxu3 %v8021_v25 }
 0x2b5   : > { %1885 = vmatpush.bf16.msrb.mxu0 %v8017_v6  ;;  %1999 = vmatpush.bf16.msrb.mxu2 %v8017_v6 }
 0x2b6   : > { %1915 = vmatpush.bf16.msrb.mxu1 %v8013_v8  ;;  %2029 = vmatpush.bf16.msrb.mxu3 %v8013_v8 }
 0x2b9   : > { %1886 = vmatpush.bf16.msrb.mxu0 %v8009_v12  ;;  %2000 = vmatpush.bf16.msrb.mxu2 %v8009_v12 }
 0x2ba   : > { %1916 = vmatpush.bf16.msrb.mxu1 %v8005_v14  ;;  %2030 = vmatpush.bf16.msrb.mxu3 %v8005_v14 }
 0x2bd   : > { %1887 = vmatpush.bf16.msrb.mxu0 %v8001_v22  ;;  %2001 = vmatpush.bf16.msrb.mxu2 %v8001_v22 }
 0x2e4   : > { %v1595_v34 = vpop.f32.mrf.mxu1  ;;  %v1566_v36 = vpop.f32.mrf.mxu0 }
 0x2e5   : > { %v1616_v38 = vmul.f32 %v10135_v31, %v1595_v34  ;;  %v1642_v41 = vmul.f32 %v10138_v39, %v1595_v34 }
 0x2e7   : > { %v1625_v43 = vadd.f32 %v10140_v40, %v1616_v38  ;;  %v1651_v46 = vadd.f32 %v10143_v42, %v1642_v41 }
 0x2e9   : > { %v1633_v47 = vmul.f32 %v1625_v43, %v1566_v36 }
 0x2eb   : > { %v1659_v52 = vadd.f32 %v1651_v46, %v1633_v47 }
 0x2ec   : > { %v1597_v44 = vpop.f32.mrf.mxu1  ;;  %v1568_v45 = vpop.f32.mrf.mxu0 }
 0x2ed   : > { %v1617_v48 = vmul.f32 %v10135_v31, %v1597_v44  ;;  %v1643_v49 = vmul.f32 %v10138_v39, %v1597_v44 }
 0x2ef   : > { %v1652_v50 = vadd.f32 %v10143_v42, %v1643_v49  ;;  %v1626_v51 = vadd.f32 %v10140_v40, %v1617_v48 }
 0x2f1   : > { %v1634_v53 = vmul.f32 %v1626_v51, %v1568_v45 }
 0x2f3   : > { %v1660_v54 = vadd.f32 %v1652_v50, %v1634_v53 }
 0x2f4   : > { %v1600_v55 = vpop.f32.mrf.mxu1  ;;  %v1571_v56 = vpop.f32.mrf.mxu0 }
 0x2f5   : > { %v1796_v57 = vpack.c.bf16 %v1660_v54, %v1659_v52  ;;  %v1618_v58 = vmul.f32 %v10135_v31, %v1600_v55  ;;  %v1644_v59 = vmul.f32 %v10138_v39, %v1600_v55 }
 0x2f7   : > { %1917 = vmatmul.bf16.vlgmr.msrb.gmra.mxu1 %v1796_v57  ;;  %1888 = vmatmul.bf16.vlgmr.msrb.gmra.mxu0 %v1796_v57  ;;  %v1627_v60 = vadd.f32 %v10140_v40, %v1618_v58  ;;  %v1653_v61 = vadd.f32 %v10143_v42, %v1644_v59 }
 0x2f9   : > { %v1635_v17 = vmul.f32 %v1627_v60, %v1571_v56 }
 0x2fb   : > { %v1661_v23 = vadd.f32 %v1653_v61, %v1635_v17 }
 0x2fc   : > { %v1602_v16 = vpop.f32.mrf.mxu1  ;;  %v1573_v19 = vpop.f32.mrf.mxu0 }
 0x2fd   : > { %v1619_v62 = vmul.f32 %v10135_v31, %v1602_v16  ;;  %v1645_v21 = vmul.f32 %v10138_v39, %v1602_v16 }
 0x2ff   : > { %v1654_v29 = vadd.f32 %v10143_v42, %v1645_v21  ;;  %v1628_v26 = vadd.f32 %v10140_v40, %v1619_v62 }
 0x301   : > { %v1636_v33 = vmul.f32 %v1628_v26, %v1573_v19 }
 0x303   : > { %v1662_v35 = vadd.f32 %v1654_v29, %v1636_v33  ;;  %v1680_v30 = vpop.f32.mrf.mxu2  ;;  %v1709_v24 = vpop.f32.mrf.mxu3 }
 0x304   : > { %v1605_v63 = vpop.f32.mrf.mxu1  ;;  %v1576_v37 = vpop.f32.mrf.mxu0  ;;  %v1729_v0 = vmul.f32 %v1709_v24, %v10135_v31  ;;  %v1753_v4 = vmul.f32 %v1709_v24, %v10138_v39 }
 0x305   : > { %v1620_v32 = vmul.f32 %v10135_v31, %v1605_v63  ;;  %v1797_v20 = vpack.c.bf16 %v1662_v35, %v1661_v23  ;;  %v1646_v27 = vmul.f32 %v10138_v39, %v1605_v63 }
 0x306   : > { %v1737_v2 = vadd.f32 %v1729_v0, %v10140_v40  ;;  %v1761_v22 = vadd.f32 %v1753_v4, %v10143_v42  ;;  %v9251_v4 = vld [vmem:[#allocation2 + $0x374] sm:$0xf] }
 0x307   : > { %1922 = vmatmul.bf16.gmra.mxu1 %v1797_v20  ;;  %1893 = vmatmul.bf16.gmra.mxu0 %v1797_v20  ;;  %v1629_v1 = vadd.f32 %v10140_v40, %v1620_v32  ;;  %v1655_v9 = vadd.f32 %v10143_v42, %v1646_v27 }
 0x308   : > { %v1745_v13 = vmul.f32 %v1737_v2, %v1680_v30 }
 0x309   : > { %v1637_v10 = vmul.f32 %v1629_v1, %v1576_v37 }
 0x30a   : > { %v1769_v41 = vadd.f32 %v1761_v22, %v1745_v13  ;;  %v9250_v13 = vld [vmem:[#allocation2 + $0x364] sm:$0xf0]  ;;  %v9247_v22 = vld [vmem:[#allocation2 + $0x354] sm:$0xf] }
 0x30b   : > { %v1682_v25 = vpop.f32.mrf.mxu2  ;;  %v1711_v3 = vpop.f32.mrf.mxu3  ;;  %v1663_v36 = vadd.f32 %v1655_v9, %v1637_v10  ;;  %v9249_v9 = vld [vmem:[#allocation2 + $0x364] sm:$0xf]  ;;  %v8114_v10 = vld [vmem:[#allocation2 + $0x368] sm:$0xf0] }
 0x30c   : > { %v1730_v5 = vmul.f32 %v1711_v3, %v10135_v31  ;;  %v1754_v6 = vmul.f32 %v1711_v3, %v10138_v39  ;;  %v1607_v7 = vpop.f32.mrf.mxu1  ;;  %v1578_v8 = vpop.f32.mrf.mxu0 }
 0x30d   : > { %v1621_v11 = vmul.f32 %v10135_v31, %v1607_v7  ;;  %v1647_v12 = vmul.f32 %v10138_v39, %v1607_v7 }
 0x30e   : > { %v1738_v14 = vadd.f32 %v1730_v5, %v10140_v40  ;;  %v1762_v34 = vadd.f32 %v1754_v6, %v10143_v42  ;;  %v8122_v5 = vld [vmem:[#allocation2 + $0x378] sm:$0xf0]  ;;  %v8120_v6 = vld [vmem:[#allocation2 + $0x370] sm:$0xf] }
 0x30f   : > { %v1656_v15 = vadd.f32 %v10143_v42, %v1647_v12  ;;  %v1630_v18 = vadd.f32 %v10140_v40, %v1621_v11  ;;  %v8125_v7 = vor.u32 %v9251_v4, %v8122_v5  ;;  %v8112_v12 = vld [vmem:[#allocation2 + $0x360] sm:$0xf]  ;;  %v9242_v5 = vld [vmem:[#allocation2 + $0x324] sm:$0xf0] }
 0x310   : > { %v1746_v28 = vmul.f32 %v1738_v14, %v1682_v25  ;;  %v8117_v14 = vor.u32 %v9249_v9, %v8114_v10  ;;  %v8080_v4 = vld [vmem:[#allocation2 + $0x320] sm:$0xf]  ;;  %v8072_v10 = vld [vmem:[#allocation2 + $0x310] sm:$0xf] }
 0x311   : > { %v1638_v38 = vmul.f32 %v1630_v18, %v1578_v8  ;;  %v9252_v8 = vld [vmem:[#allocation2 + $0x374] sm:$0xf0]  ;;  %2232 = vmatpush.bf16.msra.mxu1 %v8125_v7  ;;  %2346 = vmatpush.bf16.msra.mxu3 %v8125_v7  ;;  %v8113_v18 = vor.u32 %v9250_v13, %v8112_v12  ;;  %v8081_v7 = vor.u32 %v9242_v5, %v8080_v4  ;;  %v9237_v12 = vld [vmem:[#allocation2 + $0x304] sm:$0xf] }
 0x312   : > { %v1770_v43 = vadd.f32 %v1762_v34, %v1746_v28  ;;  %v8121_v11 = vor.u32 %v9252_v8, %v8120_v6  ;;  %v8106_v28 = vld [vmem:[#allocation2 + $0x358] sm:$0xf0]  ;;  %v9239_v6 = vld [vmem:[#allocation2 + $0x314] sm:$0xf] }
 0x313   : > { %v1664_v44 = vadd.f32 %v1656_v15, %v1638_v38  ;;  %v1685_v45 = vpop.f32.mrf.mxu2  ;;  %v1714_v46 = vpop.f32.mrf.mxu3  ;;  %v8074_v8 = vld [vmem:[#allocation2 + $0x318] sm:$0xf0] }
 0x314   : > { %v1990_v47 = vpack.c.bf16 %v1770_v43, %v1769_v41  ;;  %v1610_v48 = vpop.f32.mrf.mxu1  ;;  %v1581_v49 = vpop.f32.mrf.mxu0  ;;  %v1731_v52 = vmul.f32 %v1714_v46, %v10135_v31  ;;  %v1755_v58 = vmul.f32 %v1714_v46, %v10138_v39  ;;  %2203 = vmatpush.bf16.msra.mxu0 %v8121_v11  ;;  %2317 = vmatpush.bf16.msra.mxu2 %v8121_v11  ;;  %v9240_v11 = vld [vmem:[#allocation2 + $0x314] sm:$0xf0] }
 0x315   : > { %v1622_v50 = vmul.f32 %v10135_v31, %v1610_v48  ;;  %v1798_v51 = vpack.c.bf16 %v1664_v44, %v1663_v36  ;;  %v1648_v53 = vmul.f32 %v10138_v39, %v1610_v48  ;;  %2233 = vmatpush.bf16.msra.mxu1 %v8117_v14  ;;  %v8109_v44 = vor.u32 %v9247_v22, %v8106_v28  ;;  %v9238_v22 = vld [vmem:[#allocation2 + $0x304] sm:$0xf0] }
 0x316   : > { %2002 = vmatmul.bf16.vlgmr.msrb.gmra.mxu2 %v1990_v47  ;;  %2031 = vmatmul.bf16.vlgmr.msrb.gmra.mxu3 %v1990_v47  ;;  %v1739_v55 = vadd.f32 %v1731_v52, %v10140_v40  ;;  %v1763_v35 = vadd.f32 %v1755_v58, %v10143_v42  ;;  %v8077_v9 = vor.u32 %v9239_v6, %v8074_v8 }
 0x317   : > { %1927 = vmatmul.bf16.gmra.mxu1 %v1798_v51  ;;  %1898 = vmatmul.bf16.gmra.mxu0 %v1798_v51  ;;  %v1631_v54 = vadd.f32 %v10140_v40, %v1622_v50  ;;  %v1657_v19 = vadd.f32 %v10143_v42, %v1648_v53  ;;  %v8073_v13 = vor.u32 %v9240_v11, %v8072_v10 }
 0x318   : > { %v1747_v21 = vmul.f32 %v1739_v55, %v1685_v45  ;;  %2347 = vmatpush.bf16.msra.mxu3 %v8117_v14  ;;  %2204 = vmatpush.bf16.msra.mxu0 %v8113_v18  ;;  %v8066_v14 = vld [vmem:[#allocation2 + $0x308] sm:$0xf0] }
 0x319   : > { %v1639_v61 = vmul.f32 %v1631_v54, %v1581_v49  ;;  %2318 = vmatpush.bf16.msra.mxu2 %v8113_v18  ;;  %2234 = vmatpush.bf16.msra.mxu1 %v8109_v44  ;;  %v8064_v18 = vld [vmem:[#allocation2 + $0x300] sm:$0xf] }
 0x31a   : > { %v1771_v32 = vadd.f32 %v1763_v35, %v1747_v21  ;;  %v9248_v35 = vld [vmem:[#allocation2 + $0x354] sm:$0xf0]  ;;  %v8065_v28 = vor.u32 %v9238_v22, %v8064_v18 }
 0x31b   : > { %v1687_v56 = vpop.f32.mrf.mxu2  ;;  %v1716_v57 = vpop.f32.mrf.mxu3  ;;  %v1665_v63 = vadd.f32 %v1657_v19, %v1639_v61 }
 0x31c   : > { %v1732_v59 = vmul.f32 %v1716_v57, %v10135_v31  ;;  %v1756_v60 = vmul.f32 %v1716_v57, %v10138_v39  ;;  %v1612_v16 = vpop.f32.mrf.mxu1  ;;  %v1583_v26 = vpop.f32.mrf.mxu0  ;;  %2348 = vmatpush.bf16.msra.mxu3 %v8109_v44 }
 0x31d   : > { %v1623_v17 = vmul.f32 %v10135_v31, %v1612_v16  ;;  %v1649_v62 = vmul.f32 %v10138_v39, %v1612_v16 }
 0x31e   : > { %v1740_v29 = vadd.f32 %v1732_v59, %v10140_v40  ;;  %v1764_v24 = vadd.f32 %v1756_v60, %v10143_v42 }
 0x31f   : > { %v1658_v23 = vadd.f32 %v10143_v42, %v1649_v62  ;;  %v1632_v33 = vadd.f32 %v10140_v40, %v1623_v17 }
 0x320   : > { %v1748_v30 = vmul.f32 %v1740_v29, %v1687_v56 }
 0x321   : > { %v1640_v37 = vmul.f32 %v1632_v33, %v1583_v26  ;;  %v8104_v33 = vld [vmem:[#allocation2 + $0x350] sm:$0xf] }
 0x322   : > { %v1772_v20 = vadd.f32 %v1764_v24, %v1748_v30  ;;  %v9245_v30 = vld [vmem:[#allocation2 + $0x344] sm:$0xf]  ;;  %v8098_v24 = vld [vmem:[#allocation2 + $0x348] sm:$0xf0] }
 0x323   : > { %v1666_v0 = vadd.f32 %v1658_v23, %v1640_v37  ;;  %v1690_v27 = vpop.f32.mrf.mxu2  ;;  %v1719_v1 = vpop.f32.mrf.mxu3  ;;  %v9243_v37 = vld [vmem:[#allocation2 + $0x334] sm:$0xf] }
 0x324   : > { %v1991_v2 = vpack.c.bf16 %v1772_v20, %v1771_v32  ;;  %v1733_v3 = vmul.f32 %v1719_v1, %v10135_v31  ;;  %v1757_v38 = vmul.f32 %v1719_v1, %v10138_v39  ;;  %v9241_v1 = vld [vmem:[#allocation2 + $0x324] sm:$0xf] }
 0x325   : > { %v1799_v25 = vpack.c.bf16 %v1666_v0, %v1665_v63  ;;  %v9246_v63 = vld [vmem:[#allocation2 + $0x344] sm:$0xf0]  ;;  %v8088_v0 = vld [vmem:[#allocation2 + $0x330] sm:$0xf] }
 0x326   : > { %2007 = vmatmul.bf16.gmra.mxu2 %v1991_v2  ;;  %2036 = vmatmul.bf16.gmra.mxu3 %v1991_v2  ;;  %v1741_v15 = vadd.f32 %v1733_v3, %v10140_v40  ;;  %v1765_v47 = vadd.f32 %v1757_v38, %v10143_v42 }
 0x327   : > { %1932 = vmatmul.bf16.gmra.mxu1 %v1799_v25  ;;  %1903 = vmatmul.bf16.gmra.mxu0 %v1799_v25  ;;  %v8082_v25 = vld [vmem:[#allocation2 + $0x328] sm:$0xf0] }
 0x328   : > { %v1749_v45 = vmul.f32 %v1741_v15, %v1690_v27  ;;  %v9244_v27 = vld [vmem:[#allocation2 + $0x334] sm:$0xf0]  ;;  %v8085_v3 = vor.u32 %v9241_v1, %v8082_v25  ;;  %v8069_v15 = vor.u32 %v9237_v12, %v8066_v14 }
 0x329   : > { %v8089_v2 = vor.u32 %v9244_v27, %v8088_v0 }
 0x32a   : > { %v1773_v50 = vadd.f32 %v1765_v47, %v1749_v45 }
 0x32b   : > { %v1692_v34 = vpop.f32.mrf.mxu2  ;;  %v1721_v36 = vpop.f32.mrf.mxu3 }
 0x32c   : > { %v1734_v41 = vmul.f32 %v1721_v36, %v10135_v31  ;;  %v1758_v43 = vmul.f32 %v1721_v36, %v10138_v39 }
 0x32e   : > { %v1742_v46 = vadd.f32 %v1734_v41, %v10140_v40  ;;  %v1766_v49 = vadd.f32 %v1758_v43, %v10143_v42 }
 0x330   : > { %v1750_v48 = vmul.f32 %v1742_v46, %v1692_v34  ;;  %v1795_v34 = vld [vmem:[#allocation5 + $0x14] sm:$0xf] }
 0x331   : > { %v10207_v36 = vperm.slane %v1795_v34, 3  ;;  %v10210_v44 = vperm.slane %v1795_v34, 2  ;;  %v10212_v45 = vperm.slane %v1795_v34, 1  ;;  %v10215_v47 = vperm.slane %v1795_v34, 0 }
 0x332   : > { %v1774_v51 = vadd.f32 %v1766_v49, %v1750_v48 }
 0x333   : > { %v1724_v52 = vpop.f32.mrf.mxu3  ;;  %v1695_v54 = vpop.f32.mrf.mxu2 }
 0x334   : > { %v1992_v53 = vpack.c.bf16 %v1774_v51, %v1773_v50  ;;  %v1735_v55 = vmul.f32 %v1724_v52, %v10135_v31  ;;  %v1759_v58 = vmul.f32 %v1724_v52, %v10138_v39 }
 0x336   : > { %2012 = vmatmul.bf16.gmra.mxu2 %v1992_v53  ;;  %2041 = vmatmul.bf16.gmra.mxu3 %v1992_v53  ;;  %v1743_v56 = vadd.f32 %v1735_v55, %v10140_v40  ;;  %v1767_v17 = vadd.f32 %v1759_v58, %v10143_v42 }
 0x338   : > { %v1751_v16 = vmul.f32 %v1743_v56, %v1695_v54 }
 0x33a   : > { %v1775_v29 = vadd.f32 %v1767_v17, %v1751_v16 }
 0x33b   : > { %v1726_v57 = vpop.f32.mrf.mxu3  ;;  %v1697_v61 = vpop.f32.mrf.mxu2 }
 0x33c   : > { %v1736_v59 = vmul.f32 %v1726_v57, %v10135_v31  ;;  %v1760_v60 = vmul.f32 %v1726_v57, %v10138_v39  ;;  %v8105_v31 = vor.u32 %v9248_v35, %v8104_v33  ;;  %v8101_v39 = vor.u32 %v9245_v30, %v8098_v24 }
 0x33e   : > { %v1744_v19 = vadd.f32 %v1736_v59, %v10140_v40  ;;  %v1768_v21 = vadd.f32 %v1760_v60, %v10143_v42  ;;  %2205 = vmatpush.bf16.msra.mxu0 %v8105_v31  ;;  %2319 = vmatpush.bf16.msra.mxu2 %v8105_v31  ;;  %v8096_v40 = vld [vmem:[#allocation2 + $0x340] sm:$0xf]  ;;  %v8090_v42 = vld [vmem:[#allocation2 + $0x338] sm:$0xf0] }
 0x33f   : > { %2235 = vmatpush.bf16.msra.mxu1 %v8101_v39  ;;  %2349 = vmatpush.bf16.msra.mxu3 %v8101_v39  ;;  %v8097_v32 = vor.u32 %v9246_v63, %v8096_v40  ;;  %v8093_v20 = vor.u32 %v9243_v37, %v8090_v42 }
 0x340   : > { %v1752_v62 = vmul.f32 %v1744_v19, %v1697_v61 }
 0x342   : > { %v1776_v26 = vadd.f32 %v1768_v21, %v1752_v62  ;;  %2206 = vmatpush.bf16.msra.mxu0 %v8097_v32  ;;  %2320 = vmatpush.bf16.msra.mxu2 %v8097_v32 }
 0x343   : > { %2236 = vmatpush.bf16.msra.mxu1 %v8093_v20  ;;  %2350 = vmatpush.bf16.msra.mxu3 %v8093_v20 }
 0x344   : > { %v1993_v23 = vpack.c.bf16 %v1776_v26, %v1775_v29 }
 0x346   : > { %2017 = vmatmul.bf16.gmra.mxu2 %v1993_v23  ;;  %2046 = vmatmul.bf16.gmra.mxu3 %v1993_v23 }
 0x347   : > { %2207 = vmatpush.bf16.msra.mxu0 %v8089_v2  ;;  %2321 = vmatpush.bf16.msra.mxu2 %v8089_v2 }
 0x348   : > { %2237 = vmatpush.bf16.msra.mxu1 %v8085_v3  ;;  %2351 = vmatpush.bf16.msra.mxu3 %v8085_v3 }
 0x34b   : > { %2208 = vmatpush.bf16.msra.mxu0 %v8081_v7  ;;  %2322 = vmatpush.bf16.msra.mxu2 %v8081_v7 }
 0x34c   : > { %2238 = vmatpush.bf16.msra.mxu1 %v8077_v9  ;;  %2352 = vmatpush.bf16.msra.mxu3 %v8077_v9 }
 0x34f   : > { %2209 = vmatpush.bf16.msra.mxu0 %v8073_v13  ;;  %2323 = vmatpush.bf16.msra.mxu2 %v8073_v13 }
 0x350   : > { %2239 = vmatpush.bf16.msra.mxu1 %v8069_v15  ;;  %2353 = vmatpush.bf16.msra.mxu3 %v8069_v15 }
 0x353   : > { %2210 = vmatpush.bf16.msra.mxu0 %v8065_v28  ;;  %2324 = vmatpush.bf16.msra.mxu2 %v8065_v28 }
 0x374   : > { %v1918_v38 = vpop.f32.mrf.mxu1  ;;  %v1889_v41 = vpop.f32.mrf.mxu0 }
 0x375   : > { %v1939_v43 = vmul.f32 %v10207_v36, %v1918_v38  ;;  %v1965_v46 = vmul.f32 %v10210_v44, %v1918_v38 }
 0x377   : > { %v1948_v48 = vadd.f32 %v10212_v45, %v1939_v43  ;;  %v1974_v51 = vadd.f32 %v10215_v47, %v1965_v46 }
 0x379   : > { %v1956_v52 = vmul.f32 %v1948_v48, %v1889_v41 }
 0x37b   : > { %v1982_v57 = vadd.f32 %v1974_v51, %v1956_v52 }
 0x37c   : > { %v1920_v49 = vpop.f32.mrf.mxu1  ;;  %v1891_v50 = vpop.f32.mrf.mxu0 }
 0x37d   : > { %v1940_v53 = vmul.f32 %v10207_v36, %v1920_v49  ;;  %v1966_v54 = vmul.f32 %v10210_v44, %v1920_v49 }
 0x37f   : > { %v1975_v55 = vadd.f32 %v10215_v47, %v1966_v54  ;;  %v1949_v56 = vadd.f32 %v10212_v45, %v1940_v53 }
 0x381   : > { %v1957_v58 = vmul.f32 %v1949_v56, %v1891_v50 }
 0x383   : > { %v1983_v59 = vadd.f32 %v1975_v55, %v1957_v58 }
 0x384   : > { %v1923_v60 = vpop.f32.mrf.mxu1  ;;  %v1894_v16 = vpop.f32.mrf.mxu0 }
 0x385   : > { %v2119_v19 = vpack.c.bf16 %v1983_v59, %v1982_v57  ;;  %v1941_v61 = vmul.f32 %v10207_v36, %v1923_v60  ;;  %v1967_v17 = vmul.f32 %v10210_v44, %v1923_v60 }
 0x387   : > { %2240 = vmatmul.bf16.vlgmr.msra.gmra.mxu1 %v2119_v19  ;;  %2211 = vmatmul.bf16.vlgmr.msra.gmra.mxu0 %v2119_v19  ;;  %v1950_v62 = vadd.f32 %v10212_v45, %v1941_v61  ;;  %v1976_v26 = vadd.f32 %v10215_v47, %v1967_v17 }
 0x389   : > { %v1958_v23 = vmul.f32 %v1950_v62, %v1894_v16 }
 0x38b   : > { %v1984_v24 = vadd.f32 %v1976_v26, %v1958_v23 }
 0x38c   : > { %v1925_v21 = vpop.f32.mrf.mxu1  ;;  %v1896_v29 = vpop.f32.mrf.mxu0 }
 0x38d   : > { %v1942_v33 = vmul.f32 %v10207_v36, %v1925_v21  ;;  %v1968_v35 = vmul.f32 %v10210_v44, %v1925_v21 }
 0x38f   : > { %v1977_v30 = vadd.f32 %v10215_v47, %v1968_v35  ;;  %v1951_v31 = vadd.f32 %v10212_v45, %v1942_v33 }
 0x391   : > { %v1959_v39 = vmul.f32 %v1951_v31, %v1896_v29 }
 0x393   : > { %v1985_v40 = vadd.f32 %v1977_v30, %v1959_v39 }
 0x394   : > { %v1928_v63 = vpop.f32.mrf.mxu1  ;;  %v1899_v37 = vpop.f32.mrf.mxu0 }
 0x395   : > { %v1943_v32 = vmul.f32 %v10207_v36, %v1928_v63  ;;  %v2120_v42 = vpack.c.bf16 %v1985_v40, %v1984_v24  ;;  %v1969_v20 = vmul.f32 %v10210_v44, %v1928_v63 }
 0x397   : > { %2245 = vmatmul.bf16.gmra.mxu1 %v2120_v42  ;;  %2216 = vmatmul.bf16.gmra.mxu0 %v2120_v42  ;;  %v1952_v0 = vadd.f32 %v10212_v45, %v1943_v32  ;;  %v1978_v4 = vadd.f32 %v10215_v47, %v1969_v20 }
 0x399   : > { %v2003_v27 = vpop.f32.mrf.mxu2  ;;  %v2032_v1 = vpop.f32.mrf.mxu3  ;;  %v1960_v5 = vmul.f32 %v1952_v0, %v1899_v37 }
 0x39a   : > { %v2052_v2 = vmul.f32 %v2032_v1, %v10207_v36  ;;  %v2076_v15 = vmul.f32 %v2032_v1, %v10210_v44 }
 0x39b   : > { %v1986_v11 = vadd.f32 %v1978_v4, %v1960_v5  ;;  %v9267_v5 = vld [vmem:[#allocation2 + $0x3f4] sm:$0xf] }
 0x39c   : > { %v1930_v25 = vpop.f32.mrf.mxu1  ;;  %v1901_v3 = vpop.f32.mrf.mxu0  ;;  %v2060_v10 = vadd.f32 %v2052_v2, %v10212_v45  ;;  %v2084_v49 = vadd.f32 %v2076_v15, %v10215_v47 }
 0x39d   : > { %v1944_v6 = vmul.f32 %v10207_v36, %v1930_v25  ;;  %v1970_v7 = vmul.f32 %v10210_v44, %v1930_v25 }
 0x39e   : > { %v2068_v34 = vmul.f32 %v2060_v10, %v2003_v27  ;;  %v9265_v10 = vld [vmem:[#allocation2 + $0x3e4] sm:$0xf] }
 0x39f   : > { %v1979_v8 = vadd.f32 %v10215_v47, %v1970_v7  ;;  %v1953_v9 = vadd.f32 %v10212_v45, %v1944_v6  ;;  %v8186_v6 = vld [vmem:[#allocation2 + $0x3f8] sm:$0xf0]  ;;  %v8184_v7 = vld [vmem:[#allocation2 + $0x3f0] sm:$0xf] }
 0x3a0   : > { %v2092_v52 = vadd.f32 %v2084_v49, %v2068_v34  ;;  %v8170_v34 = vld [vmem:[#allocation2 + $0x3d8] sm:$0xf0] }
 0x3a1   : > { %v1961_v12 = vmul.f32 %v1953_v9, %v1901_v3  ;;  %v2005_v13 = vpop.f32.mrf.mxu2  ;;  %v2034_v14 = vpop.f32.mrf.mxu3  ;;  %v9268_v9 = vld [vmem:[#allocation2 + $0x3f4] sm:$0xf0] }
 0x3a2   : > { %v2053_v18 = vmul.f32 %v2034_v14, %v10207_v36  ;;  %v2077_v22 = vmul.f32 %v2034_v14, %v10210_v44  ;;  %v9266_v14 = vld [vmem:[#allocation2 + $0x3e4] sm:$0xf0] }
 0x3a3   : > { %v1987_v28 = vadd.f32 %v1979_v8, %v1961_v12  ;;  %v8189_v8 = vor.u32 %v9267_v5, %v8186_v6  ;;  %v8185_v12 = vor.u32 %v9268_v9, %v8184_v7  ;;  %v8144_v5 = vld [vmem:[#allocation2 + $0x3a0] sm:$0xf]  ;;  %v9258_v6 = vld [vmem:[#allocation2 + $0x3a4] sm:$0xf0]  ;;  %v9255_v7 = vld [vmem:[#allocation2 + $0x394] sm:$0xf] }
 0x3a4   : > { %v2061_v38 = vadd.f32 %v2053_v18, %v10212_v45  ;;  %v1933_v41 = vpop.f32.mrf.mxu1  ;;  %v1904_v43 = vpop.f32.mrf.mxu0  ;;  %v2085_v51 = vadd.f32 %v2077_v22, %v10215_v47  ;;  %v8138_v9 = vld [vmem:[#allocation2 + $0x398] sm:$0xf0] }
 0x3a5   : > { %v1945_v46 = vmul.f32 %v10207_v36, %v1933_v41  ;;  %v2121_v48 = vpack.c.bf16 %v1987_v28, %v1986_v11  ;;  %v1971_v54 = vmul.f32 %v10210_v44, %v1933_v41  ;;  %v8178_v11 = vld [vmem:[#allocation2 + $0x3e8] sm:$0xf0]  ;;  %2555 = vmatpush.bf16.msrb.mxu1 %v8189_v8  ;;  %2669 = vmatpush.bf16.msrb.mxu3 %v8189_v8  ;;  %v9263_v28 = vld [vmem:[#allocation2 + $0x3d4] sm:$0xf] }
 0x3a6   : > { %v2069_v50 = vmul.f32 %v2061_v38, %v2005_v13  ;;  %v8176_v13 = vld [vmem:[#allocation2 + $0x3e0] sm:$0xf]  ;;  %v8181_v15 = vor.u32 %v9265_v10, %v8178_v11  ;;  %2526 = vmatpush.bf16.msrb.mxu0 %v8185_v12  ;;  %2640 = vmatpush.bf16.msrb.mxu2 %v8185_v12  ;;  %v8173_v49 = vor.u32 %v9263_v28, %v8170_v34  ;;  %v8136_v11 = vld [vmem:[#allocation2 + $0x390] sm:$0xf]  ;;  %v9256_v12 = vld [vmem:[#allocation2 + $0x394] sm:$0xf0] }
 0x3a7   : > { %2250 = vmatmul.bf16.gmra.mxu1 %v2121_v48  ;;  %2221 = vmatmul.bf16.gmra.mxu0 %v2121_v48  ;;  %v1954_v55 = vadd.f32 %v10212_v45, %v1945_v46  ;;  %v1980_v16 = vadd.f32 %v10215_v47, %v1971_v54  ;;  %v8177_v22 = vor.u32 %v9266_v14, %v8176_v13  ;;  %v9253_v13 = vld [vmem:[#allocation2 + $0x384] sm:$0xf]  ;;  %v9254_v28 = vld [vmem:[#allocation2 + $0x384] sm:$0xf0] }
 0x3a8   : > { %v2093_v53 = vadd.f32 %v2085_v51, %v2069_v50  ;;  %v8145_v8 = vor.u32 %v9258_v6, %v8144_v5  ;;  %v8141_v10 = vor.u32 %v9255_v7, %v8138_v9  ;;  %v8137_v14 = vor.u32 %v9256_v12, %v8136_v11 }
 0x3a9   : > { %v2008_v56 = vpop.f32.mrf.mxu2  ;;  %v2037_v57 = vpop.f32.mrf.mxu3  ;;  %v1962_v19 = vmul.f32 %v1954_v55, %v1904_v43  ;;  %2556 = vmatpush.bf16.msrb.mxu1 %v8181_v15  ;;  %2670 = vmatpush.bf16.msrb.mxu3 %v8181_v15  ;;  %v8130_v15 = vld [vmem:[#allocation2 + $0x388] sm:$0xf0] }
 0x3aa   : > { %v2313_v58 = vpack.c.bf16 %v2093_v53, %v2092_v52  ;;  %v2054_v59 = vmul.f32 %v2037_v57, %v10207_v36  ;;  %v2078_v31 = vmul.f32 %v2037_v57, %v10210_v44  ;;  %2527 = vmatpush.bf16.msrb.mxu0 %v8177_v22  ;;  %2641 = vmatpush.bf16.msrb.mxu2 %v8177_v22  ;;  %v8128_v22 = vld [vmem:[#allocation2 + $0x380] sm:$0xf] }
 0x3ab   : > { %v1988_v23 = vadd.f32 %v1980_v16, %v1962_v19  ;;  %v8129_v34 = vor.u32 %v9254_v28, %v8128_v22 }
 0x3ac   : > { %2325 = vmatmul.bf16.vlgmr.msra.gmra.mxu2 %v2313_v58  ;;  %2354 = vmatmul.bf16.vlgmr.msra.gmra.mxu3 %v2313_v58  ;;  %v1935_v60 = vpop.f32.mrf.mxu1  ;;  %v1906_v62 = vpop.f32.mrf.mxu0  ;;  %v2062_v26 = vadd.f32 %v2054_v59, %v10212_v45  ;;  %v2086_v42 = vadd.f32 %v2078_v31, %v10215_v47 }
 0x3ad   : > { %v1946_v61 = vmul.f32 %v10207_v36, %v1935_v60  ;;  %v1972_v17 = vmul.f32 %v10210_v44, %v1935_v60  ;;  %2557 = vmatpush.bf16.msrb.mxu1 %v8173_v49  ;;  %2671 = vmatpush.bf16.msrb.mxu3 %v8173_v49 }
 0x3ae   : > { %v2070_v63 = vmul.f32 %v2062_v26, %v2008_v56 }
 0x3af   : > { %v1981_v21 = vadd.f32 %v10215_v47, %v1972_v17  ;;  %v1955_v29 = vadd.f32 %v10212_v45, %v1946_v61 }
 0x3b0   : > { %v2094_v27 = vadd.f32 %v2086_v42, %v2070_v63  ;;  %v9261_v63 = vld [vmem:[#allocation2 + $0x3c4] sm:$0xf]  ;;  %v9259_v42 = vld [vmem:[#allocation2 + $0x3b4] sm:$0xf] }
 0x3b1   : > { %v1963_v33 = vmul.f32 %v1955_v29, %v1906_v62  ;;  %v2010_v35 = vpop.f32.mrf.mxu2  ;;  %v2039_v30 = vpop.f32.mrf.mxu3 }
 0x3b2   : > { %v2055_v24 = vmul.f32 %v2039_v30, %v10207_v36  ;;  %v2079_v39 = vmul.f32 %v2039_v30, %v10210_v44 }
 0x3b3   : > { %v1989_v40 = vadd.f32 %v1981_v21, %v1963_v33 }
 0x3b4   : > { %v2063_v37 = vadd.f32 %v2055_v24, %v10212_v45  ;;  %v2087_v0 = vadd.f32 %v2079_v39, %v10215_v47  ;;  %v8168_v39 = vld [vmem:[#allocation2 + $0x3d0] sm:$0xf] }
 0x3b5   : > { %v2122_v32 = vpack.c.bf16 %v1989_v40, %v1988_v23  ;;  %v9264_v40 = vld [vmem:[#allocation2 + $0x3d4] sm:$0xf0] }
 0x3b6   : > { %v2071_v20 = vmul.f32 %v2063_v37, %v2010_v35  ;;  %v8162_v37 = vld [vmem:[#allocation2 + $0x3c8] sm:$0xf0] }
 0x3b7   : > { %2255 = vmatmul.bf16.gmra.mxu1 %v2122_v32  ;;  %2226 = vmatmul.bf16.gmra.mxu0 %v2122_v32  ;;  %v9262_v32 = vld [vmem:[#allocation2 + $0x3c4] sm:$0xf0] }
 0x3b8   : > { %v2095_v1 = vadd.f32 %v2087_v0, %v2071_v20 }
 0x3b9   : > { %v2013_v2 = vpop.f32.mrf.mxu2  ;;  %v2042_v25 = vpop.f32.mrf.mxu3 }
 0x3ba   : > { %v2314_v3 = vpack.c.bf16 %v2095_v1, %v2094_v27  ;;  %v2056_v4 = vmul.f32 %v2042_v25, %v10207_v36  ;;  %v2080_v43 = vmul.f32 %v2042_v25, %v10210_v44  ;;  %v8152_v27 = vld [vmem:[#allocation2 + $0x3b0] sm:$0xf]  ;;  %v9260_v1 = vld [vmem:[#allocation2 + $0x3b4] sm:$0xf0] }
 0x3bb   : > { %v8153_v25 = vor.u32 %v9260_v1, %v8152_v27 }
 0x3bc   : > { %2330 = vmatmul.bf16.gmra.mxu2 %v2314_v3  ;;  %2359 = vmatmul.bf16.gmra.mxu3 %v2314_v3  ;;  %v2064_v18 = vadd.f32 %v2056_v4, %v10212_v45  ;;  %v2088_v52 = vadd.f32 %v2080_v43, %v10215_v47  ;;  %v8146_v3 = vld [vmem:[#allocation2 + $0x3a8] sm:$0xf0] }
 0x3be   : > { %v2072_v50 = vmul.f32 %v2064_v18, %v2013_v2  ;;  %v9257_v2 = vld [vmem:[#allocation2 + $0x3a4] sm:$0xf]  ;;  %v8133_v18 = vor.u32 %v9253_v13, %v8130_v15 }
 0x3bf   : > { %v8149_v4 = vor.u32 %v9257_v2, %v8146_v3 }
 0x3c0   : > { %v2096_v55 = vadd.f32 %v2088_v52, %v2072_v50 }
 0x3c1   : > { %v2015_v38 = vpop.f32.mrf.mxu2  ;;  %v2044_v41 = vpop.f32.mrf.mxu3 }
 0x3c2   : > { %v2057_v46 = vmul.f32 %v2044_v41, %v10207_v36  ;;  %v2081_v48 = vmul.f32 %v2044_v41, %v10210_v44 }
 0x3c4   : > { %v2065_v51 = vadd.f32 %v2057_v46, %v10212_v45  ;;  %v2089_v54 = vadd.f32 %v2081_v48, %v10215_v47 }
 0x3c6   : > { %v2073_v53 = vmul.f32 %v2065_v51, %v2015_v38  ;;  %v2118_v38 = vld [vmem:[#allocation5 + $0x18] sm:$0xf] }
 0x3c7   : > { %v10279_v41 = vperm.slane %v2118_v38, 3  ;;  %v10282_v49 = vperm.slane %v2118_v38, 2  ;;  %v10284_v50 = vperm.slane %v2118_v38, 1  ;;  %v10287_v52 = vperm.slane %v2118_v38, 0 }
 0x3c8   : > { %v2097_v56 = vadd.f32 %v2089_v54, %v2073_v53 }
 0x3c9   : > { %v2047_v57 = vpop.f32.mrf.mxu3  ;;  %v2018_v59 = vpop.f32.mrf.mxu2 }
 0x3ca   : > { %v2315_v58 = vpack.c.bf16 %v2097_v56, %v2096_v55  ;;  %v2058_v60 = vmul.f32 %v2047_v57, %v10207_v36  ;;  %v2082_v61 = vmul.f32 %v2047_v57, %v10210_v44 }
 0x3cc   : > { %2335 = vmatmul.bf16.gmra.mxu2 %v2315_v58  ;;  %2364 = vmatmul.bf16.gmra.mxu3 %v2315_v58  ;;  %v2066_v16 = vadd.f32 %v2058_v60, %v10212_v45  ;;  %v2090_v23 = vadd.f32 %v2082_v61, %v10215_v47 }
 0x3ce   : > { %v2074_v21 = vmul.f32 %v2066_v16, %v2018_v59 }
 0x3d0   : > { %v2098_v30 = vadd.f32 %v2090_v23, %v2074_v21 }
 0x3d1   : > { %v2049_v19 = vpop.f32.mrf.mxu3  ;;  %v2020_v26 = vpop.f32.mrf.mxu2 }
 0x3d2   : > { %v2059_v17 = vmul.f32 %v2049_v19, %v10207_v36  ;;  %v2083_v62 = vmul.f32 %v2049_v19, %v10210_v44  ;;  %v8169_v36 = vor.u32 %v9264_v40, %v8168_v39  ;;  %v8165_v44 = vor.u32 %v9261_v63, %v8162_v37 }
 0x3d4   : > { %v2067_v29 = vadd.f32 %v2059_v17, %v10212_v45  ;;  %v2091_v35 = vadd.f32 %v2083_v62, %v10215_v47  ;;  %2528 = vmatpush.bf16.msrb.mxu0 %v8169_v36  ;;  %2642 = vmatpush.bf16.msrb.mxu2 %v8169_v36  ;;  %v8160_v45 = vld [vmem:[#allocation2 + $0x3c0] sm:$0xf]  ;;  %v8154_v47 = vld [vmem:[#allocation2 + $0x3b8] sm:$0xf0] }
 0x3d5   : > { %2558 = vmatpush.bf16.msrb.mxu1 %v8165_v44  ;;  %2672 = vmatpush.bf16.msrb.mxu3 %v8165_v44  ;;  %v8161_v20 = vor.u32 %v9262_v32, %v8160_v45  ;;  %v8157_v0 = vor.u32 %v9259_v42, %v8154_v47 }
 0x3d6   : > { %v2075_v33 = vmul.f32 %v2067_v29, %v2020_v26 }
 0x3d8   : > { %v2099_v31 = vadd.f32 %v2091_v35, %v2075_v33  ;;  %2529 = vmatpush.bf16.msrb.mxu0 %v8161_v20  ;;  %2643 = vmatpush.bf16.msrb.mxu2 %v8161_v20 }
 0x3d9   : > { %2559 = vmatpush.bf16.msrb.mxu1 %v8157_v0  ;;  %2673 = vmatpush.bf16.msrb.mxu3 %v8157_v0 }
 0x3da   : > { %v2316_v24 = vpack.c.bf16 %v2099_v31, %v2098_v30 }
 0x3dc   : > { %2340 = vmatmul.bf16.gmra.mxu2 %v2316_v24  ;;  %2369 = vmatmul.bf16.gmra.mxu3 %v2316_v24 }
 0x3dd   : > { %2530 = vmatpush.bf16.msrb.mxu0 %v8153_v25  ;;  %2644 = vmatpush.bf16.msrb.mxu2 %v8153_v25 }
 0x3de   : > { %2560 = vmatpush.bf16.msrb.mxu1 %v8149_v4  ;;  %2674 = vmatpush.bf16.msrb.mxu3 %v8149_v4 }
 0x3e1   : > { %2531 = vmatpush.bf16.msrb.mxu0 %v8145_v8  ;;  %2645 = vmatpush.bf16.msrb.mxu2 %v8145_v8 }
 0x3e2   : > { %2561 = vmatpush.bf16.msrb.mxu1 %v8141_v10  ;;  %2675 = vmatpush.bf16.msrb.mxu3 %v8141_v10 }
 0x3e5   : > { %2532 = vmatpush.bf16.msrb.mxu0 %v8137_v14  ;;  %2646 = vmatpush.bf16.msrb.mxu2 %v8137_v14 }
 0x3e6   : > { %2562 = vmatpush.bf16.msrb.mxu1 %v8133_v18  ;;  %2676 = vmatpush.bf16.msrb.mxu3 %v8133_v18 }
 0x3e9   : > { %2533 = vmatpush.bf16.msrb.mxu0 %v8129_v34  ;;  %2647 = vmatpush.bf16.msrb.mxu2 %v8129_v34 }
 0x404   : > { %v2241_v43 = vpop.f32.mrf.mxu1  ;;  %v2212_v46 = vpop.f32.mrf.mxu0 }
 0x405   : > { %v2262_v48 = vmul.f32 %v10279_v41, %v2241_v43  ;;  %v2288_v51 = vmul.f32 %v10282_v49, %v2241_v43 }
 0x407   : > { %v2271_v53 = vadd.f32 %v10284_v50, %v2262_v48  ;;  %v2297_v56 = vadd.f32 %v10287_v52, %v2288_v51 }
 0x409   : > { %v2279_v57 = vmul.f32 %v2271_v53, %v2212_v46 }
 0x40b   : > { %v2305_v19 = vadd.f32 %v2297_v56, %v2279_v57 }
 0x40c   : > { %v2243_v54 = vpop.f32.mrf.mxu1  ;;  %v2214_v55 = vpop.f32.mrf.mxu0 }
 0x40d   : > { %v2263_v58 = vmul.f32 %v10279_v41, %v2243_v54  ;;  %v2289_v59 = vmul.f32 %v10282_v49, %v2243_v54 }
 0x40f   : > { %v2298_v60 = vadd.f32 %v10287_v52, %v2289_v59  ;;  %v2272_v16 = vadd.f32 %v10284_v50, %v2263_v58 }
 0x411   : > { %v2280_v61 = vmul.f32 %v2272_v16, %v2214_v55 }
 0x413   : > { %v2306_v17 = vadd.f32 %v2298_v60, %v2280_v61 }
 0x414   : > { %v2246_v62 = vpop.f32.mrf.mxu1  ;;  %v2217_v21 = vpop.f32.mrf.mxu0 }
 0x415   : > { %v2442_v29 = vpack.c.bf16 %v2306_v17, %v2305_v19  ;;  %v2264_v26 = vmul.f32 %v10279_v41, %v2246_v62  ;;  %v2290_v23 = vmul.f32 %v10282_v49, %v2246_v62 }
 0x417   : > { %2563 = vmatmul.bf16.vlgmr.msrb.gmra.mxu1 %v2442_v29  ;;  %2534 = vmatmul.bf16.vlgmr.msrb.gmra.mxu0 %v2442_v29  ;;  %v2273_v33 = vadd.f32 %v10284_v50, %v2264_v26  ;;  %v2299_v31 = vadd.f32 %v10287_v52, %v2290_v23 }
 0x419   : > { %v2281_v24 = vmul.f32 %v2273_v33, %v2217_v21 }
 0x41b   : > { %v2307_v37 = vadd.f32 %v2299_v31, %v2281_v24 }
 0x41c   : > { %v2248_v35 = vpop.f32.mrf.mxu1  ;;  %v2219_v30 = vpop.f32.mrf.mxu0 }
 0x41d   : > { %v2265_v39 = vmul.f32 %v10279_v41, %v2248_v35  ;;  %v2291_v40 = vmul.f32 %v10282_v49, %v2248_v35 }
 0x41f   : > { %v2300_v63 = vadd.f32 %v10287_v52, %v2291_v40  ;;  %v2274_v36 = vadd.f32 %v10284_v50, %v2265_v39 }
 0x421   : > { %v2282_v44 = vmul.f32 %v2274_v36, %v2219_v30 }
 0x423   : > { %v2308_v45 = vadd.f32 %v2300_v63, %v2282_v44 }
 0x424   : > { %v2251_v32 = vpop.f32.mrf.mxu1  ;;  %v2222_v42 = vpop.f32.mrf.mxu0 }
 0x425   : > { %v2266_v20 = vmul.f32 %v10279_v41, %v2251_v32  ;;  %v2443_v47 = vpack.c.bf16 %v2308_v45, %v2307_v37  ;;  %v2292_v0 = vmul.f32 %v10282_v49, %v2251_v32 }
 0x427   : > { %2568 = vmatmul.bf16.gmra.mxu1 %v2443_v47  ;;  %2539 = vmatmul.bf16.gmra.mxu0 %v2443_v47  ;;  %v2275_v27 = vadd.f32 %v10284_v50, %v2266_v20  ;;  %v2301_v25 = vadd.f32 %v10287_v52, %v2292_v0 }
 0x429   : > { %v2283_v3 = vmul.f32 %v2275_v27, %v2222_v42 }
 0x42b   : > { %v2309_v10 = vadd.f32 %v2301_v25, %v2283_v3 }
 0x42c   : > { %v2253_v1 = vpop.f32.mrf.mxu1  ;;  %v2224_v2 = vpop.f32.mrf.mxu0 }
 0x42d   : > { %v2267_v4 = vmul.f32 %v10279_v41, %v2253_v1  ;;  %v2293_v5 = vmul.f32 %v10282_v49, %v2253_v1 }
 0x42f   : > { %v2302_v6 = vadd.f32 %v10287_v52, %v2293_v5  ;;  %v2326_v7 = vpop.f32.mrf.mxu2  ;;  %v2355_v8 = vpop.f32.mrf.mxu3  ;;  %v2276_v9 = vadd.f32 %v10284_v50, %v2267_v4 }
 0x430   : > { %v2375_v12 = vmul.f32 %v2355_v8, %v10279_v41  ;;  %v2399_v43 = vmul.f32 %v2355_v8, %v10282_v49  ;;  %v8248_v8 = vld [vmem:[#allocation2 + $0x470] sm:$0xf] }
 0x431   : > { %v2284_v11 = vmul.f32 %v2276_v9, %v2224_v2 }
 0x432   : > { %v2383_v28 = vadd.f32 %v2375_v12, %v10284_v50  ;;  %v2407_v56 = vadd.f32 %v2399_v43, %v10287_v52  ;;  %v8242_v12 = vld [vmem:[#allocation2 + $0x468] sm:$0xf0] }
 0x433   : > { %v2310_v13 = vadd.f32 %v2302_v6, %v2284_v11  ;;  %v9283_v6 = vld [vmem:[#allocation2 + $0x474] sm:$0xf]  ;;  %v9281_v11 = vld [vmem:[#allocation2 + $0x464] sm:$0xf] }
 0x434   : > { %v2256_v14 = vpop.f32.mrf.mxu1  ;;  %v2227_v15 = vpop.f32.mrf.mxu0  ;;  %v2391_v54 = vmul.f32 %v2383_v28, %v2326_v7  ;;  %v8250_v7 = vld [vmem:[#allocation2 + $0x478] sm:$0xf0] }
 0x435   : > { %v2268_v18 = vmul.f32 %v10279_v41, %v2256_v14  ;;  %v2444_v22 = vpack.c.bf16 %v2310_v13, %v2309_v10  ;;  %v2294_v51 = vmul.f32 %v10282_v49, %v2256_v14  ;;  %v8253_v9 = vor.u32 %v9283_v6, %v8250_v7  ;;  %v9284_v10 = vld [vmem:[#allocation2 + $0x474] sm:$0xf0]  ;;  %v8240_v14 = vld [vmem:[#allocation2 + $0x460] sm:$0xf]  ;;  %v9274_v7 = vld [vmem:[#allocation2 + $0x424] sm:$0xf0] }
 0x436   : > { %v2415_v17 = vadd.f32 %v2407_v56, %v2391_v54  ;;  %v8249_v13 = vor.u32 %v9284_v10, %v8248_v8  ;;  %v8208_v6 = vld [vmem:[#allocation2 + $0x420] sm:$0xf]  ;;  %v9271_v8 = vld [vmem:[#allocation2 + $0x414] sm:$0xf]  ;;  %v8202_v10 = vld [vmem:[#allocation2 + $0x418] sm:$0xf0] }
 0x437   : > { %v2328_v34 = vpop.f32.mrf.mxu2  ;;  %v2357_v38 = vpop.f32.mrf.mxu3  ;;  %2573 = vmatmul.bf16.gmra.mxu1 %v2444_v22  ;;  %2544 = vmatmul.bf16.gmra.mxu0 %v2444_v22  ;;  %v2277_v53 = vadd.f32 %v10284_v50, %v2268_v18  ;;  %v2303_v60 = vadd.f32 %v10287_v52, %v2294_v51  ;;  %v8245_v18 = vor.u32 %v9281_v11, %v8242_v12  ;;  %v8200_v12 = vld [vmem:[#allocation2 + $0x410] sm:$0xf] }
 0x438   : > { %v2376_v46 = vmul.f32 %v2357_v38, %v10279_v41  ;;  %v2400_v48 = vmul.f32 %v2357_v38, %v10282_v49  ;;  %2878 = vmatpush.bf16.msra.mxu1 %v8253_v9  ;;  %2992 = vmatpush.bf16.msra.mxu3 %v8253_v9  ;;  %v8234_v38 = vld [vmem:[#allocation2 + $0x458] sm:$0xf0]  ;;  %v8209_v9 = vor.u32 %v9274_v7, %v8208_v6 }
 0x439   : > { %v2285_v16 = vmul.f32 %v2277_v53, %v2227_v15  ;;  %v9282_v15 = vld [vmem:[#allocation2 + $0x464] sm:$0xf0]  ;;  %2849 = vmatpush.bf16.msra.mxu0 %v8249_v13  ;;  %2963 = vmatpush.bf16.msra.mxu2 %v8249_v13  ;;  %v8205_v11 = vor.u32 %v9271_v8, %v8202_v10  ;;  %v9272_v13 = vld [vmem:[#allocation2 + $0x414] sm:$0xf0] }
 0x43a   : > { %v2384_v55 = vadd.f32 %v2376_v46, %v10284_v50  ;;  %v2408_v58 = vadd.f32 %v2400_v48, %v10287_v52  ;;  %v8241_v28 = vor.u32 %v9282_v15, %v8240_v14  ;;  %v9269_v14 = vld [vmem:[#allocation2 + $0x404] sm:$0xf]  ;;  %v8201_v15 = vor.u32 %v9272_v13, %v8200_v12 }
 0x43b   : > { %v2311_v30 = vadd.f32 %v2303_v60, %v2285_v16 }
 0x43c   : > { %v2392_v57 = vmul.f32 %v2384_v55, %v2328_v34  ;;  %v2258_v59 = vpop.f32.mrf.mxu1  ;;  %v2229_v21 = vpop.f32.mrf.mxu0  ;;  %v9279_v34 = vld [vmem:[#allocation2 + $0x454] sm:$0xf]  ;;  %2879 = vmatpush.bf16.msra.mxu1 %v8245_v18  ;;  %2993 = vmatpush.bf16.msra.mxu3 %v8245_v18  ;;  %v8194_v18 = vld [vmem:[#allocation2 + $0x408] sm:$0xf0] }
 0x43d   : > { %v2269_v19 = vmul.f32 %v10279_v41, %v2258_v59  ;;  %v2295_v61 = vmul.f32 %v10282_v49, %v2258_v59  ;;  %v8237_v54 = vor.u32 %v9279_v34, %v8234_v38  ;;  %2850 = vmatpush.bf16.msra.mxu0 %v8241_v28  ;;  %2964 = vmatpush.bf16.msra.mxu2 %v8241_v28  ;;  %v8192_v28 = vld [vmem:[#allocation2 + $0x400] sm:$0xf]  ;;  %v9270_v34 = vld [vmem:[#allocation2 + $0x404] sm:$0xf0] }
 0x43e   : > { %v2416_v62 = vadd.f32 %v2408_v58, %v2392_v57  ;;  %v8193_v38 = vor.u32 %v9270_v34, %v8192_v28 }
 0x43f   : > { %v2304_v29 = vadd.f32 %v10287_v52, %v2295_v61  ;;  %v2331_v26 = vpop.f32.mrf.mxu2  ;;  %v2360_v23 = vpop.f32.mrf.mxu3  ;;  %v2278_v33 = vadd.f32 %v10284_v50, %v2269_v19 }
 0x440   : > { %v2636_v35 = vpack.c.bf16 %v2416_v62, %v2415_v17  ;;  %v2377_v24 = vmul.f32 %v2360_v23, %v10279_v41  ;;  %v2401_v44 = vmul.f32 %v2360_v23, %v10282_v49  ;;  %2880 = vmatpush.bf16.msra.mxu1 %v8237_v54  ;;  %2994 = vmatpush.bf16.msra.mxu3 %v8237_v54 }
 0x441   : > { %v2286_v31 = vmul.f32 %v2278_v33, %v2229_v21 }
 0x442   : > { %2648 = vmatmul.bf16.vlgmr.msrb.gmra.mxu2 %v2636_v35  ;;  %2677 = vmatmul.bf16.vlgmr.msrb.gmra.mxu3 %v2636_v35  ;;  %v2385_v63 = vadd.f32 %v2377_v24, %v10284_v50  ;;  %v2409_v47 = vadd.f32 %v2401_v44, %v10287_v52  ;;  %v8232_v44 = vld [vmem:[#allocation2 + $0x450] sm:$0xf] }
 0x443   : > { %v2312_v39 = vadd.f32 %v2304_v29, %v2286_v31 }
 0x444   : > { %v2393_v42 = vmul.f32 %v2385_v63, %v2331_v26 }
 0x445   : > { %v2445_v40 = vpack.c.bf16 %v2312_v39, %v2311_v30 }
 0x446   : > { %v2417_v1 = vadd.f32 %v2409_v47, %v2393_v42  ;;  %v8226_v42 = vld [vmem:[#allocation2 + $0x448] sm:$0xf0]  ;;  %v9275_v47 = vld [vmem:[#allocation2 + $0x434] sm:$0xf] }
 0x447   : > { %v2333_v36 = vpop.f32.mrf.mxu2  ;;  %v2362_v37 = vpop.f32.mrf.mxu3  ;;  %2578 = vmatmul.bf16.gmra.mxu1 %v2445_v40  ;;  %2549 = vmatmul.bf16.gmra.mxu0 %v2445_v40 }
 0x448   : > { %v2378_v45 = vmul.f32 %v2362_v37, %v10279_v41  ;;  %v2402_v32 = vmul.f32 %v2362_v37, %v10282_v49 }
 0x44a   : > { %v2386_v20 = vadd.f32 %v2378_v45, %v10284_v50  ;;  %v2410_v27 = vadd.f32 %v2402_v32, %v10287_v52  ;;  %v9280_v45 = vld [vmem:[#allocation2 + $0x454] sm:$0xf0]  ;;  %v9277_v32 = vld [vmem:[#allocation2 + $0x444] sm:$0xf] }
 0x44c   : > { %v2394_v0 = vmul.f32 %v2386_v20, %v2333_v36  ;;  %v9278_v20 = vld [vmem:[#allocation2 + $0x444] sm:$0xf0] }
 0x44e   : > { %v2418_v2 = vadd.f32 %v2410_v27, %v2394_v0 }
 0x44f   : > { %v2336_v25 = vpop.f32.mrf.mxu2  ;;  %v2365_v3 = vpop.f32.mrf.mxu3 }
 0x450   : > { %v2637_v4 = vpack.c.bf16 %v2418_v2, %v2417_v1  ;;  %v2379_v5 = vmul.f32 %v2365_v3, %v10279_v41  ;;  %v2403_v48 = vmul.f32 %v2365_v3, %v10282_v49  ;;  %v8216_v1 = vld [vmem:[#allocation2 + $0x430] sm:$0xf]  ;;  %v9276_v2 = vld [vmem:[#allocation2 + $0x434] sm:$0xf0] }
 0x451   : > { %v8217_v3 = vor.u32 %v9276_v2, %v8216_v1 }
 0x452   : > { %2653 = vmatmul.bf16.gmra.mxu2 %v2637_v4  ;;  %2682 = vmatmul.bf16.gmra.mxu3 %v2637_v4  ;;  %v2387_v22 = vadd.f32 %v2379_v5, %v10284_v50  ;;  %v2411_v57 = vadd.f32 %v2403_v48, %v10287_v52  ;;  %v8210_v4 = vld [vmem:[#allocation2 + $0x428] sm:$0xf0] }
 0x454   : > { %v2395_v55 = vmul.f32 %v2387_v22, %v2336_v25  ;;  %v9273_v25 = vld [vmem:[#allocation2 + $0x424] sm:$0xf]  ;;  %v8197_v22 = vor.u32 %v9269_v14, %v8194_v18 }
 0x455   : > { %v8213_v5 = vor.u32 %v9273_v25, %v8210_v4 }
 0x456   : > { %v2419_v60 = vadd.f32 %v2411_v57, %v2395_v55 }
 0x457   : > { %v2338_v43 = vpop.f32.mrf.mxu2  ;;  %v2367_v46 = vpop.f32.mrf.mxu3 }
 0x458   : > { %v2380_v51 = vmul.f32 %v2367_v46, %v10279_v41  ;;  %v2404_v53 = vmul.f32 %v2367_v46, %v10282_v49 }
 0x45a   : > { %v2388_v56 = vadd.f32 %v2380_v51, %v10284_v50  ;;  %v2412_v59 = vadd.f32 %v2404_v53, %v10287_v52 }
 0x45c   : > { %v2396_v58 = vmul.f32 %v2388_v56, %v2338_v43  ;;  %v2441_v43 = vld [vmem:[#allocation5 + $0x1c] sm:$0xf] }
 0x45d   : > { %v10351_v46 = vperm.slane %v2441_v43, 3  ;;  %v10354_v54 = vperm.slane %v2441_v43, 2  ;;  %v10356_v55 = vperm.slane %v2441_v43, 1  ;;  %v10359_v57 = vperm.slane %v2441_v43, 0 }
 0x45e   : > { %v2420_v16 = vadd.f32 %v2412_v59, %v2396_v58 }
 0x45f   : > { %v2370_v19 = vpop.f32.mrf.mxu3  ;;  %v2341_v17 = vpop.f32.mrf.mxu2 }
 0x460   : > { %v2638_v61 = vpack.c.bf16 %v2420_v16, %v2419_v60  ;;  %v2381_v62 = vmul.f32 %v2370_v19, %v10279_v41  ;;  %v2405_v26 = vmul.f32 %v2370_v19, %v10282_v49 }
 0x462   : > { %2658 = vmatmul.bf16.gmra.mxu2 %v2638_v61  ;;  %2687 = vmatmul.bf16.gmra.mxu3 %v2638_v61  ;;  %v2389_v21 = vadd.f32 %v2381_v62, %v10284_v50  ;;  %v2413_v24 = vadd.f32 %v2405_v26, %v10287_v52 }
 0x464   : > { %v2397_v35 = vmul.f32 %v2389_v21, %v2341_v17 }
 0x466   : > { %v2421_v63 = vadd.f32 %v2413_v24, %v2397_v35 }
 0x467   : > { %v2372_v29 = vpop.f32.mrf.mxu3  ;;  %v2343_v31 = vpop.f32.mrf.mxu2 }
 0x468   : > { %v2382_v23 = vmul.f32 %v2372_v29, %v10279_v41  ;;  %v2406_v33 = vmul.f32 %v2372_v29, %v10282_v49  ;;  %v8233_v41 = vor.u32 %v9280_v45, %v8232_v44  ;;  %v8229_v49 = vor.u32 %v9277_v32, %v8226_v42 }
 0x46a   : > { %v2390_v30 = vadd.f32 %v2382_v23, %v10284_v50  ;;  %v2414_v40 = vadd.f32 %v2406_v33, %v10287_v52  ;;  %2851 = vmatpush.bf16.msra.mxu0 %v8233_v41  ;;  %2965 = vmatpush.bf16.msra.mxu2 %v8233_v41  ;;  %v8224_v50 = vld [vmem:[#allocation2 + $0x440] sm:$0xf]  ;;  %v8218_v52 = vld [vmem:[#allocation2 + $0x438] sm:$0xf0] }
 0x46b   : > { %2881 = vmatpush.bf16.msra.mxu1 %v8229_v49  ;;  %2995 = vmatpush.bf16.msra.mxu3 %v8229_v49  ;;  %v8225_v0 = vor.u32 %v9278_v20, %v8224_v50  ;;  %v8221_v27 = vor.u32 %v9275_v47, %v8218_v52 }
 0x46c   : > { %v2398_v39 = vmul.f32 %v2390_v30, %v2343_v31 }
 0x46e   : > { %v2422_v36 = vadd.f32 %v2414_v40, %v2398_v39  ;;  %2852 = vmatpush.bf16.msra.mxu0 %v8225_v0  ;;  %2966 = vmatpush.bf16.msra.mxu2 %v8225_v0 }
 0x46f   : > { %2882 = vmatpush.bf16.msra.mxu1 %v8221_v27  ;;  %2996 = vmatpush.bf16.msra.mxu3 %v8221_v27 }
 0x470   : > { %v2639_v37 = vpack.c.bf16 %v2422_v36, %v2421_v63 }
 0x472   : > { %2663 = vmatmul.bf16.gmra.mxu2 %v2639_v37  ;;  %2692 = vmatmul.bf16.gmra.mxu3 %v2639_v37 }
 0x473   : > { %2853 = vmatpush.bf16.msra.mxu0 %v8217_v3  ;;  %2967 = vmatpush.bf16.msra.mxu2 %v8217_v3 }
 0x474   : > { %2883 = vmatpush.bf16.msra.mxu1 %v8213_v5  ;;  %2997 = vmatpush.bf16.msra.mxu3 %v8213_v5 }
 0x477   : > { %2854 = vmatpush.bf16.msra.mxu0 %v8209_v9  ;;  %2968 = vmatpush.bf16.msra.mxu2 %v8209_v9 }
 0x478   : > { %2884 = vmatpush.bf16.msra.mxu1 %v8205_v11  ;;  %2998 = vmatpush.bf16.msra.mxu3 %v8205_v11 }
 0x47b   : > { %2855 = vmatpush.bf16.msra.mxu0 %v8201_v15  ;;  %2969 = vmatpush.bf16.msra.mxu2 %v8201_v15 }
 0x47c   : > { %2885 = vmatpush.bf16.msra.mxu1 %v8197_v22  ;;  %2999 = vmatpush.bf16.msra.mxu3 %v8197_v22 }
 0x47f   : > { %2856 = vmatpush.bf16.msra.mxu0 %v8193_v38  ;;  %2970 = vmatpush.bf16.msra.mxu2 %v8193_v38 }
 0x494   : > { %v2564_v48 = vpop.f32.mrf.mxu1  ;;  %v2535_v51 = vpop.f32.mrf.mxu0 }
 0x495   : > { %v2585_v53 = vmul.f32 %v10351_v46, %v2564_v48  ;;  %v2611_v56 = vmul.f32 %v10354_v54, %v2564_v48 }
 0x497   : > { %v2594_v58 = vadd.f32 %v10356_v55, %v2585_v53  ;;  %v2620_v16 = vadd.f32 %v10359_v57, %v2611_v56 }
 0x499   : > { %v2602_v19 = vmul.f32 %v2594_v58, %v2535_v51 }
 0x49b   : > { %v2628_v29 = vadd.f32 %v2620_v16, %v2602_v19 }
 0x49c   : > { %v2566_v59 = vpop.f32.mrf.mxu1  ;;  %v2537_v60 = vpop.f32.mrf.mxu0 }
 0x49d   : > { %v2586_v61 = vmul.f32 %v10351_v46, %v2566_v59  ;;  %v2612_v17 = vmul.f32 %v10354_v54, %v2566_v59 }
 0x49f   : > { %v2621_v62 = vadd.f32 %v10359_v57, %v2612_v17  ;;  %v2595_v21 = vadd.f32 %v10356_v55, %v2586_v61 }
 0x4a1   : > { %v2603_v26 = vmul.f32 %v2595_v21, %v2537_v60 }
 0x4a3   : > { %v2629_v23 = vadd.f32 %v2621_v62, %v2603_v26 }
 0x4a4   : > { %v2569_v33 = vpop.f32.mrf.mxu1  ;;  %v2540_v35 = vpop.f32.mrf.mxu0 }
 0x4a5   : > { %v2765_v30 = vpack.c.bf16 %v2629_v23, %v2628_v29  ;;  %v2587_v31 = vmul.f32 %v10351_v46, %v2569_v33  ;;  %v2613_v24 = vmul.f32 %v10354_v54, %v2569_v33 }
 0x4a7   : > { %2886 = vmatmul.bf16.vlgmr.msra.gmra.mxu1 %v2765_v30  ;;  %2857 = vmatmul.bf16.vlgmr.msra.gmra.mxu0 %v2765_v30  ;;  %v2596_v39 = vadd.f32 %v10356_v55, %v2587_v31  ;;  %v2622_v36 = vadd.f32 %v10359_v57, %v2613_v24 }
 0x4a9   : > { %v2604_v37 = vmul.f32 %v2596_v39, %v2540_v35 }
 0x4ab   : > { %v2630_v42 = vadd.f32 %v2622_v36, %v2604_v37 }
 0x4ac   : > { %v2571_v40 = vpop.f32.mrf.mxu1  ;;  %v2542_v63 = vpop.f32.mrf.mxu0 }
 0x4ad   : > { %v2588_v44 = vmul.f32 %v10351_v46, %v2571_v40  ;;  %v2614_v45 = vmul.f32 %v10354_v54, %v2571_v40 }
 0x4af   : > { %v2623_v32 = vadd.f32 %v10359_v57, %v2614_v45  ;;  %v2597_v41 = vadd.f32 %v10356_v55, %v2588_v44 }
 0x4b1   : > { %v2605_v49 = vmul.f32 %v2597_v41, %v2542_v63 }
 0x4b3   : > { %v2631_v50 = vadd.f32 %v2623_v32, %v2605_v49 }
 0x4b4   : > { %v2574_v20 = vpop.f32.mrf.mxu1  ;;  %v2545_v47 = vpop.f32.mrf.mxu0 }
 0x4b5   : > { %v2589_v0 = vmul.f32 %v10351_v46, %v2574_v20  ;;  %v2766_v52 = vpack.c.bf16 %v2631_v50, %v2630_v42  ;;  %v2615_v27 = vmul.f32 %v10354_v54, %v2574_v20 }
 0x4b7   : > { %2891 = vmatmul.bf16.gmra.mxu1 %v2766_v52  ;;  %2862 = vmatmul.bf16.gmra.mxu0 %v2766_v52  ;;  %v2598_v1 = vadd.f32 %v10356_v55, %v2589_v0  ;;  %v2624_v3 = vadd.f32 %v10359_v57, %v2615_v27 }
 0x4b9   : > { %v2606_v4 = vmul.f32 %v2598_v1, %v2545_v47 }
 0x4bb   : > { %v2632_v9 = vadd.f32 %v2624_v3, %v2606_v4 }
 0x4bc   : > { %v2576_v2 = vpop.f32.mrf.mxu1  ;;  %v2547_v25 = vpop.f32.mrf.mxu0 }
 0x4bd   : > { %v2590_v5 = vmul.f32 %v10351_v46, %v2576_v2  ;;  %v2616_v6 = vmul.f32 %v10354_v54, %v2576_v2 }
 0x4bf   : > { %v2625_v7 = vadd.f32 %v10359_v57, %v2616_v6  ;;  %v2599_v8 = vadd.f32 %v10356_v55, %v2590_v5 }
 0x4c1   : > { %v2607_v10 = vmul.f32 %v2599_v8, %v2547_v25  ;;  %v8314_v8 = vld [vmem:[#allocation2 + $0x4f8] sm:$0xf0] }
 0x4c3   : > { %v2633_v11 = vadd.f32 %v2625_v7, %v2607_v10  ;;  %v9299_v7 = vld [vmem:[#allocation2 + $0x4f4] sm:$0xf] }
 0x4c4   : > { %v2579_v12 = vpop.f32.mrf.mxu1  ;;  %v2550_v13 = vpop.f32.mrf.mxu0  ;;  %v8317_v10 = vor.u32 %v9299_v7, %v8314_v8  ;;  %v8272_v7 = vld [vmem:[#allocation2 + $0x4a0] sm:$0xf]  ;;  %v9290_v8 = vld [vmem:[#allocation2 + $0x4a4] sm:$0xf0] }
 0x4c5   : > { %v2591_v14 = vmul.f32 %v10351_v46, %v2579_v12  ;;  %v2649_v15 = vpop.f32.mrf.mxu2  ;;  %v2678_v18 = vpop.f32.mrf.mxu3  ;;  %v2767_v22 = vpack.c.bf16 %v2633_v11, %v2632_v9  ;;  %v2617_v34 = vmul.f32 %v10354_v54, %v2579_v12  ;;  %v8312_v9 = vld [vmem:[#allocation2 + $0x4f0] sm:$0xf]  ;;  %v9300_v11 = vld [vmem:[#allocation2 + $0x4f4] sm:$0xf0]  ;;  %v9297_v12 = vld [vmem:[#allocation2 + $0x4e4] sm:$0xf] }
 0x4c6   : > { %v2698_v28 = vmul.f32 %v2678_v18, %v10351_v46  ;;  %v2722_v16 = vmul.f32 %v2678_v18, %v10354_v54  ;;  %v9298_v18 = vld [vmem:[#allocation2 + $0x4e4] sm:$0xf0]  ;;  %3201 = vmatpush.bf16.msrb.mxu1 %v8317_v10  ;;  %3315 = vmatpush.bf16.msrb.mxu3 %v8317_v10  ;;  %v8273_v10 = vor.u32 %v9290_v8, %v8272_v7 }
 0x4c7   : > { %2896 = vmatmul.bf16.gmra.mxu1 %v2767_v22  ;;  %2867 = vmatmul.bf16.gmra.mxu0 %v2767_v22  ;;  %v2600_v38 = vadd.f32 %v10356_v55, %v2591_v14  ;;  %v2626_v51 = vadd.f32 %v10359_v57, %v2617_v34  ;;  %v8313_v14 = vor.u32 %v9300_v11, %v8312_v9  ;;  %v9287_v9 = vld [vmem:[#allocation2 + $0x494] sm:$0xf]  ;;  %v8266_v11 = vld [vmem:[#allocation2 + $0x498] sm:$0xf0] }
 0x4c8   : > { %v2706_v43 = vadd.f32 %v2698_v28, %v10356_v55  ;;  %v2730_v35 = vadd.f32 %v2722_v16, %v10359_v57 }
 0x4c9   : > { %v2608_v53 = vmul.f32 %v2600_v38, %v2550_v13  ;;  %v8306_v13 = vld [vmem:[#allocation2 + $0x4e8] sm:$0xf0]  ;;  %3172 = vmatpush.bf16.msrb.mxu0 %v8313_v14  ;;  %v9295_v38 = vld [vmem:[#allocation2 + $0x4d4] sm:$0xf]  ;;  %3286 = vmatpush.bf16.msrb.mxu2 %v8313_v14  ;;  %v9288_v14 = vld [vmem:[#allocation2 + $0x494] sm:$0xf0] }
 0x4ca   : > { %v2714_v29 = vmul.f32 %v2706_v43, %v2649_v15  ;;  %v8304_v15 = vld [vmem:[#allocation2 + $0x4e0] sm:$0xf]  ;;  %v8309_v22 = vor.u32 %v9297_v12, %v8306_v13  ;;  %v8298_v43 = vld [vmem:[#allocation2 + $0x4d8] sm:$0xf0]  ;;  %v8269_v12 = vor.u32 %v9287_v9, %v8266_v11  ;;  %v8264_v13 = vld [vmem:[#allocation2 + $0x490] sm:$0xf] }
 0x4cb   : > { %v2634_v23 = vadd.f32 %v2626_v51, %v2608_v53  ;;  %v8305_v34 = vor.u32 %v9298_v18, %v8304_v15  ;;  %v9285_v15 = vld [vmem:[#allocation2 + $0x484] sm:$0xf]  ;;  %v8265_v18 = vor.u32 %v9288_v14, %v8264_v13 }
 0x4cc   : > { %v2581_v48 = vpop.f32.mrf.mxu1  ;;  %v2552_v17 = vpop.f32.mrf.mxu0  ;;  %v2738_v39 = vadd.f32 %v2730_v35, %v2714_v29  ;;  %3202 = vmatpush.bf16.msrb.mxu1 %v8309_v22  ;;  %3316 = vmatpush.bf16.msrb.mxu3 %v8309_v22  ;;  %v8258_v22 = vld [vmem:[#allocation2 + $0x488] sm:$0xf0] }
 0x4cd   : > { %v2592_v56 = vmul.f32 %v10351_v46, %v2581_v48  ;;  %v2618_v58 = vmul.f32 %v10354_v54, %v2581_v48  ;;  %v2651_v59 = vpop.f32.mrf.mxu2  ;;  %v2680_v60 = vpop.f32.mrf.mxu3  ;;  %3173 = vmatpush.bf16.msrb.mxu0 %v8305_v34  ;;  %3287 = vmatpush.bf16.msrb.mxu2 %v8305_v34  ;;  %v8256_v34 = vld [vmem:[#allocation2 + $0x480] sm:$0xf] }
 0x4ce   : > { %v2699_v19 = vmul.f32 %v2680_v60, %v10351_v46  ;;  %v2723_v61 = vmul.f32 %v2680_v60, %v10354_v54 }
 0x4cf   : > { %v2627_v62 = vadd.f32 %v10359_v57, %v2618_v58  ;;  %v2601_v21 = vadd.f32 %v10356_v55, %v2592_v56 }
 0x4d0   : > { %v2707_v26 = vadd.f32 %v2699_v19, %v10356_v55  ;;  %v2731_v31 = vadd.f32 %v2723_v61, %v10359_v57 }
 0x4d1   : > { %v2609_v33 = vmul.f32 %v2601_v21, %v2552_v17 }
 0x4d2   : > { %v2715_v30 = vmul.f32 %v2707_v26, %v2651_v59  ;;  %v8301_v59 = vor.u32 %v9295_v38, %v8298_v43  ;;  %v9286_v38 = vld [vmem:[#allocation2 + $0x484] sm:$0xf0] }
 0x4d3   : > { %v2635_v24 = vadd.f32 %v2627_v62, %v2609_v33  ;;  %v8257_v43 = vor.u32 %v9286_v38, %v8256_v34 }
 0x4d4   : > { %v2739_v40 = vadd.f32 %v2731_v31, %v2715_v30  ;;  %3203 = vmatpush.bf16.msrb.mxu1 %v8301_v59  ;;  %3317 = vmatpush.bf16.msrb.mxu3 %v8301_v59 }
 0x4d5   : > { %v2654_v63 = vpop.f32.mrf.mxu2  ;;  %v2683_v36 = vpop.f32.mrf.mxu3  ;;  %v2768_v37 = vpack.c.bf16 %v2635_v24, %v2634_v23 }
 0x4d6   : > { %v2959_v44 = vpack.c.bf16 %v2739_v40, %v2738_v39  ;;  %v2700_v45 = vmul.f32 %v2683_v36, %v10351_v46  ;;  %v2724_v49 = vmul.f32 %v2683_v36, %v10354_v54 }
 0x4d7   : > { %2901 = vmatmul.bf16.gmra.mxu1 %v2768_v37  ;;  %2872 = vmatmul.bf16.gmra.mxu0 %v2768_v37 }
 0x4d8   : > { %2971 = vmatmul.bf16.vlgmr.msra.gmra.mxu2 %v2959_v44  ;;  %3000 = vmatmul.bf16.vlgmr.msra.gmra.mxu3 %v2959_v44  ;;  %v2708_v32 = vadd.f32 %v2700_v45, %v10356_v55  ;;  %v2732_v52 = vadd.f32 %v2724_v49, %v10359_v57 }
 0x4da   : > { %v2716_v47 = vmul.f32 %v2708_v32, %v2654_v63  ;;  %v8296_v32 = vld [vmem:[#allocation2 + $0x4d0] sm:$0xf] }
 0x4dc   : > { %v2740_v2 = vadd.f32 %v2732_v52, %v2716_v47  ;;  %v9291_v52 = vld [vmem:[#allocation2 + $0x4b4] sm:$0xf] }
 0x4dd   : > { %v2656_v41 = vpop.f32.mrf.mxu2  ;;  %v2685_v42 = vpop.f32.mrf.mxu3 }
 0x4de   : > { %v2701_v50 = vmul.f32 %v2685_v42, %v10351_v46  ;;  %v2725_v20 = vmul.f32 %v2685_v42, %v10354_v54  ;;  %v9293_v42 = vld [vmem:[#allocation2 + $0x4c4] sm:$0xf] }
 0x4e0   : > { %v2709_v0 = vadd.f32 %v2701_v50, %v10356_v55  ;;  %v2733_v1 = vadd.f32 %v2725_v20, %v10359_v57  ;;  %v8290_v50 = vld [vmem:[#allocation2 + $0x4c8] sm:$0xf0] }
 0x4e2   : > { %v2717_v27 = vmul.f32 %v2709_v0, %v2656_v41  ;;  %v9296_v41 = vld [vmem:[#allocation2 + $0x4d4] sm:$0xf0]  ;;  %v8293_v0 = vor.u32 %v9293_v42, %v8290_v50 }
 0x4e3   : > { %v8297_v49 = vor.u32 %v9296_v41, %v8296_v32 }
 0x4e4   : > { %v2741_v25 = vadd.f32 %v2733_v1, %v2717_v27  ;;  %3204 = vmatpush.bf16.msrb.mxu1 %v8293_v0  ;;  %3318 = vmatpush.bf16.msrb.mxu3 %v8293_v0  ;;  %v8282_v1 = vld [vmem:[#allocation2 + $0x4b8] sm:$0xf0] }
 0x4e5   : > { %v2659_v3 = vpop.f32.mrf.mxu2  ;;  %v2688_v4 = vpop.f32.mrf.mxu3  ;;  %3174 = vmatpush.bf16.msrb.mxu0 %v8297_v49  ;;  %3288 = vmatpush.bf16.msrb.mxu2 %v8297_v49 }
 0x4e6   : > { %v2960_v5 = vpack.c.bf16 %v2741_v25, %v2740_v2  ;;  %v2702_v6 = vmul.f32 %v2688_v4, %v10351_v46  ;;  %v2726_v53 = vmul.f32 %v2688_v4, %v10354_v54  ;;  %v8280_v2 = vld [vmem:[#allocation2 + $0x4b0] sm:$0xf]  ;;  %v9292_v25 = vld [vmem:[#allocation2 + $0x4b4] sm:$0xf0] }
 0x4e7   : > { %v8281_v4 = vor.u32 %v9292_v25, %v8280_v2 }
 0x4e8   : > { %2976 = vmatmul.bf16.gmra.mxu2 %v2960_v5  ;;  %3005 = vmatmul.bf16.gmra.mxu3 %v2960_v5  ;;  %v2710_v28 = vadd.f32 %v2702_v6, %v10356_v55  ;;  %v2734_v19 = vadd.f32 %v2726_v53, %v10359_v57  ;;  %v8274_v5 = vld [vmem:[#allocation2 + $0x4a8] sm:$0xf0] }
 0x4ea   : > { %v2718_v60 = vmul.f32 %v2710_v28, %v2659_v3  ;;  %v9289_v3 = vld [vmem:[#allocation2 + $0x4a4] sm:$0xf]  ;;  %v8261_v28 = vor.u32 %v9285_v15, %v8258_v22 }
 0x4eb   : > { %v8277_v6 = vor.u32 %v9289_v3, %v8274_v5 }
 0x4ec   : > { %v2742_v62 = vadd.f32 %v2734_v19, %v2718_v60 }
 0x4ed   : > { %v2661_v48 = vpop.f32.mrf.mxu2  ;;  %v2690_v51 = vpop.f32.mrf.mxu3 }
 0x4ee   : > { %v2703_v56 = vmul.f32 %v2690_v51, %v10351_v46  ;;  %v2727_v58 = vmul.f32 %v2690_v51, %v10354_v54 }
 0x4f0   : > { %v2711_v16 = vadd.f32 %v2703_v56, %v10356_v55  ;;  %v2735_v17 = vadd.f32 %v2727_v58, %v10359_v57 }
 0x4f2   : > { %v2719_v61 = vmul.f32 %v2711_v16, %v2661_v48  ;;  %v2764_v48 = vld [vmem:[#allocation5 + $0x20] sm:$0xf] }
 0x4f3   : > { %v10423_v51 = vperm.slane %v2764_v48, 3  ;;  %v10426_v59 = vperm.slane %v2764_v48, 2  ;;  %v10428_v60 = vperm.slane %v2764_v48, 1  ;;  %v10431_v19 = vperm.slane %v2764_v48, 0 }
 0x4f4   : > { %v2743_v21 = vadd.f32 %v2735_v17, %v2719_v61 }
 0x4f5   : > { %v2693_v29 = vpop.f32.mrf.mxu3  ;;  %v2664_v23 = vpop.f32.mrf.mxu2 }
 0x4f6   : > { %v2961_v26 = vpack.c.bf16 %v2743_v21, %v2742_v62  ;;  %v2704_v33 = vmul.f32 %v2693_v29, %v10351_v46  ;;  %v2728_v31 = vmul.f32 %v2693_v29, %v10354_v54 }
 0x4f8   : > { %2981 = vmatmul.bf16.gmra.mxu2 %v2961_v26  ;;  %3010 = vmatmul.bf16.gmra.mxu3 %v2961_v26  ;;  %v2712_v35 = vadd.f32 %v2704_v33, %v10356_v55  ;;  %v2736_v37 = vadd.f32 %v2728_v31, %v10359_v57 }
 0x4fa   : > { %v2720_v40 = vmul.f32 %v2712_v35, %v2664_v23 }
 0x4fc   : > { %v2744_v20 = vadd.f32 %v2736_v37, %v2720_v40 }
 0x4fd   : > { %v2695_v30 = vpop.f32.mrf.mxu3  ;;  %v2666_v36 = vpop.f32.mrf.mxu2 }
 0x4fe   : > { %v2705_v24 = vmul.f32 %v2695_v30, %v10351_v46  ;;  %v2729_v39 = vmul.f32 %v2695_v30, %v10354_v54  ;;  %v8288_v54 = vld [vmem:[#allocation2 + $0x4c0] sm:$0xf] }
 0x500   : > { %v2713_v63 = vadd.f32 %v2705_v24, %v10356_v55  ;;  %v2737_v45 = vadd.f32 %v2729_v39, %v10359_v57  ;;  %v9294_v55 = vld [vmem:[#allocation2 + $0x4c4] sm:$0xf0]  ;;  %v8285_v57 = vor.u32 %v9291_v52, %v8282_v1 }
 0x501   : > { %v8289_v27 = vor.u32 %v9294_v55, %v8288_v54 }
 0x502   : > { %v2721_v44 = vmul.f32 %v2713_v63, %v2666_v36  ;;  %3205 = vmatpush.bf16.msrb.mxu1 %v8285_v57  ;;  %3319 = vmatpush.bf16.msrb.mxu3 %v8285_v57 }
 0x503   : > { %3175 = vmatpush.bf16.msrb.mxu0 %v8289_v27  ;;  %3289 = vmatpush.bf16.msrb.mxu2 %v8289_v27 }
 0x504   : > { %v2745_v47 = vadd.f32 %v2737_v45, %v2721_v44 }
 0x506   : > { %v2962_v46 = vpack.c.bf16 %v2745_v47, %v2744_v20  ;;  %3206 = vmatpush.bf16.msrb.mxu1 %v8277_v6  ;;  %3320 = vmatpush.bf16.msrb.mxu3 %v8277_v6 }
 0x507   : > { %3176 = vmatpush.bf16.msrb.mxu0 %v8281_v4  ;;  %3290 = vmatpush.bf16.msrb.mxu2 %v8281_v4 }
 0x508   : > { %2986 = vmatmul.bf16.gmra.mxu2 %v2962_v46  ;;  %3015 = vmatmul.bf16.gmra.mxu3 %v2962_v46 }
 0x50a   : > { %3207 = vmatpush.bf16.msrb.mxu1 %v8269_v12  ;;  %3321 = vmatpush.bf16.msrb.mxu3 %v8269_v12 }
 0x50b   : > { %3177 = vmatpush.bf16.msrb.mxu0 %v8273_v10  ;;  %3291 = vmatpush.bf16.msrb.mxu2 %v8273_v10 }
 0x50e   : > { %3208 = vmatpush.bf16.msrb.mxu1 %v8261_v28  ;;  %3322 = vmatpush.bf16.msrb.mxu3 %v8261_v28 }
 0x50f   : > { %3178 = vmatpush.bf16.msrb.mxu0 %v8265_v18  ;;  %3292 = vmatpush.bf16.msrb.mxu2 %v8265_v18 }
 0x513   : > { %3179 = vmatpush.bf16.msrb.mxu0 %v8257_v43  ;;  %3293 = vmatpush.bf16.msrb.mxu2 %v8257_v43 }
 0x524   : > { %v2887_v53 = vpop.f32.mrf.mxu1  ;;  %v2858_v56 = vpop.f32.mrf.mxu0 }
 0x525   : > { %v2908_v58 = vmul.f32 %v10423_v51, %v2887_v53  ;;  %v2934_v16 = vmul.f32 %v10426_v59, %v2887_v53 }
 0x527   : > { %v2917_v61 = vadd.f32 %v10428_v60, %v2908_v58  ;;  %v2943_v21 = vadd.f32 %v10431_v19, %v2934_v16 }
 0x529   : > { %v2925_v29 = vmul.f32 %v2917_v61, %v2858_v56 }
 0x52b   : > { %v2951_v30 = vadd.f32 %v2943_v21, %v2925_v29 }
 0x52c   : > { %v2889_v17 = vpop.f32.mrf.mxu1  ;;  %v2860_v62 = vpop.f32.mrf.mxu0 }
 0x52d   : > { %v2909_v26 = vmul.f32 %v10423_v51, %v2889_v17  ;;  %v2935_v23 = vmul.f32 %v10426_v59, %v2889_v17 }
 0x52f   : > { %v2944_v33 = vadd.f32 %v10431_v19, %v2935_v23  ;;  %v2918_v35 = vadd.f32 %v10428_v60, %v2909_v26 }
 0x531   : > { %v2926_v31 = vmul.f32 %v2918_v35, %v2860_v62 }
 0x533   : > { %v2952_v24 = vadd.f32 %v2944_v33, %v2926_v31 }
 0x534   : > { %v2892_v39 = vpop.f32.mrf.mxu1  ;;  %v2863_v40 = vpop.f32.mrf.mxu0 }
 0x535   : > { %v3088_v63 = vpack.c.bf16 %v2952_v24, %v2951_v30  ;;  %v2910_v36 = vmul.f32 %v10423_v51, %v2892_v39  ;;  %v2936_v37 = vmul.f32 %v10426_v59, %v2892_v39 }
 0x537   : > { %3209 = vmatmul.bf16.vlgmr.msrb.gmra.mxu1 %v3088_v63  ;;  %3180 = vmatmul.bf16.vlgmr.msrb.gmra.mxu0 %v3088_v63  ;;  %v2919_v44 = vadd.f32 %v10428_v60, %v2910_v36  ;;  %v2945_v41 = vadd.f32 %v10431_v19, %v2936_v37 }
 0x539   : > { %v2927_v42 = vmul.f32 %v2919_v44, %v2863_v40 }
 0x53b   : > { %v2953_v0 = vadd.f32 %v2945_v41, %v2927_v42 }
 0x53c   : > { %v2894_v45 = vpop.f32.mrf.mxu1  ;;  %v2865_v32 = vpop.f32.mrf.mxu0 }
 0x53d   : > { %v2911_v49 = vmul.f32 %v10423_v51, %v2894_v45  ;;  %v2937_v50 = vmul.f32 %v10426_v59, %v2894_v45 }
 0x53f   : > { %v2946_v20 = vadd.f32 %v10431_v19, %v2937_v50  ;;  %v2920_v47 = vadd.f32 %v10428_v60, %v2911_v49 }
 0x541   : > { %v2928_v46 = vmul.f32 %v2920_v47, %v2865_v32 }
 0x543   : > { %v2954_v54 = vadd.f32 %v2946_v20, %v2928_v46 }
 0x544   : > { %v2897_v55 = vpop.f32.mrf.mxu1  ;;  %v2868_v52 = vpop.f32.mrf.mxu0 }
 0x545   : > { %v2912_v27 = vmul.f32 %v10423_v51, %v2897_v55  ;;  %v3089_v1 = vpack.c.bf16 %v2954_v54, %v2953_v0  ;;  %v2938_v57 = vmul.f32 %v10426_v59, %v2897_v55 }
 0x547   : > { %3214 = vmatmul.bf16.gmra.mxu1 %v3089_v1  ;;  %3185 = vmatmul.bf16.gmra.mxu0 %v3089_v1  ;;  %v2921_v2 = vadd.f32 %v10428_v60, %v2912_v27  ;;  %v2947_v4 = vadd.f32 %v10431_v19, %v2938_v57 }
 0x549   : > { %v2929_v5 = vmul.f32 %v2921_v2, %v2868_v52 }
 0x54b   : > { %v2955_v10 = vadd.f32 %v2947_v4, %v2929_v5 }
 0x54c   : > { %v2899_v25 = vpop.f32.mrf.mxu1  ;;  %v2870_v3 = vpop.f32.mrf.mxu0 }
 0x54d   : > { %v2913_v6 = vmul.f32 %v10423_v51, %v2899_v25  ;;  %v2939_v7 = vmul.f32 %v10426_v59, %v2899_v25 }
 0x54f   : > { %v2948_v8 = vadd.f32 %v10431_v19, %v2939_v7  ;;  %v2922_v9 = vadd.f32 %v10428_v60, %v2913_v6 }
 0x551   : > { %v2930_v11 = vmul.f32 %v2922_v9, %v2870_v3  ;;  %v8378_v9 = vld [vmem:[#allocation2 + $0x578] sm:$0xf0] }
 0x553   : > { %v2956_v12 = vadd.f32 %v2948_v8, %v2930_v11  ;;  %v9315_v8 = vld [vmem:[#allocation2 + $0x574] sm:$0xf] }
 0x554   : > { %v2902_v13 = vpop.f32.mrf.mxu1  ;;  %v2873_v14 = vpop.f32.mrf.mxu0  ;;  %v8381_v11 = vor.u32 %v9315_v8, %v8378_v9  ;;  %v8336_v9 = vld [vmem:[#allocation2 + $0x520] sm:$0xf] }
 0x555   : > { %v2914_v15 = vmul.f32 %v10423_v51, %v2902_v13  ;;  %v3090_v18 = vpack.c.bf16 %v2956_v12, %v2955_v10  ;;  %v2940_v22 = vmul.f32 %v10426_v59, %v2902_v13  ;;  %v8376_v10 = vld [vmem:[#allocation2 + $0x570] sm:$0xf]  ;;  %v9316_v12 = vld [vmem:[#allocation2 + $0x574] sm:$0xf0]  ;;  %v9313_v13 = vld [vmem:[#allocation2 + $0x564] sm:$0xf] }
 0x556   : > { %3524 = vmatpush.bf16.msra.mxu1 %v8381_v11  ;;  %3638 = vmatpush.bf16.msra.mxu3 %v8381_v11 }
 0x557   : > { %3219 = vmatmul.bf16.gmra.mxu1 %v3090_v18  ;;  %3190 = vmatmul.bf16.gmra.mxu0 %v3090_v18  ;;  %v2923_v28 = vadd.f32 %v10428_v60, %v2914_v15  ;;  %v2949_v48 = vadd.f32 %v10431_v19, %v2940_v22  ;;  %v8377_v15 = vor.u32 %v9316_v12, %v8376_v10  ;;  %v8368_v18 = vld [vmem:[#allocation2 + $0x560] sm:$0xf]  ;;  %v9314_v22 = vld [vmem:[#allocation2 + $0x564] sm:$0xf0]  ;;  %v9303_v10 = vld [vmem:[#allocation2 + $0x514] sm:$0xf] }
 0x558   : > { %v8330_v12 = vld [vmem:[#allocation2 + $0x518] sm:$0xf0] }
 0x559   : > { %v2931_v53 = vmul.f32 %v2923_v28, %v2873_v14  ;;  %v8370_v14 = vld [vmem:[#allocation2 + $0x568] sm:$0xf0]  ;;  %3495 = vmatpush.bf16.msra.mxu0 %v8377_v15  ;;  %3609 = vmatpush.bf16.msra.mxu2 %v8377_v15  ;;  %v9304_v15 = vld [vmem:[#allocation2 + $0x514] sm:$0xf0] }
 0x55a   : > { %v8373_v28 = vor.u32 %v9313_v13, %v8370_v14  ;;  %v8333_v13 = vor.u32 %v9303_v10, %v8330_v12  ;;  %v8328_v14 = vld [vmem:[#allocation2 + $0x510] sm:$0xf] }
 0x55b   : > { %v2972_v34 = vpop.f32.mrf.mxu2  ;;  %v3001_v38 = vpop.f32.mrf.mxu3  ;;  %v2957_v21 = vadd.f32 %v2949_v48, %v2931_v53  ;;  %v8362_v48 = vld [vmem:[#allocation2 + $0x558] sm:$0xf0] }
 0x55c   : > { %v2904_v43 = vpop.f32.mrf.mxu1  ;;  %v3021_v16 = vmul.f32 %v3001_v38, %v10423_v51  ;;  %v2875_v61 = vpop.f32.mrf.mxu0  ;;  %v3045_v30 = vmul.f32 %v3001_v38, %v10426_v59  ;;  %v8369_v38 = vor.u32 %v9314_v22, %v8368_v18  ;;  %3525 = vmatpush.bf16.msra.mxu1 %v8373_v28  ;;  %3639 = vmatpush.bf16.msra.mxu3 %v8373_v28  ;;  %v9301_v18 = vld [vmem:[#allocation2 + $0x504] sm:$0xf]  ;;  %v8322_v28 = vld [vmem:[#allocation2 + $0x508] sm:$0xf0] }
 0x55d   : > { %v2915_v56 = vmul.f32 %v10423_v51, %v2904_v43  ;;  %v2941_v58 = vmul.f32 %v10426_v59, %v2904_v43  ;;  %v9311_v43 = vld [vmem:[#allocation2 + $0x554] sm:$0xf]  ;;  %v8329_v22 = vor.u32 %v9304_v15, %v8328_v14 }
 0x55e   : > { %v3029_v26 = vadd.f32 %v3021_v16, %v10428_v60  ;;  %v3053_v36 = vadd.f32 %v3045_v30, %v10431_v19  ;;  %3496 = vmatpush.bf16.msra.mxu0 %v8369_v38  ;;  %3610 = vmatpush.bf16.msra.mxu2 %v8369_v38  ;;  %v8320_v38 = vld [vmem:[#allocation2 + $0x500] sm:$0xf] }
 0x55f   : > { %v2950_v17 = vadd.f32 %v10431_v19, %v2941_v58  ;;  %v2924_v62 = vadd.f32 %v10428_v60, %v2915_v56 }
 0x560   : > { %v3037_v40 = vmul.f32 %v3029_v26, %v2972_v34 }
 0x561   : > { %v2932_v29 = vmul.f32 %v2924_v62, %v2875_v61 }
 0x562   : > { %v3061_v45 = vadd.f32 %v3053_v36, %v3037_v40  ;;  %v9312_v36 = vld [vmem:[#allocation2 + $0x554] sm:$0xf0] }
 0x563   : > { %v2958_v23 = vadd.f32 %v2950_v17, %v2932_v29  ;;  %v2974_v33 = vpop.f32.mrf.mxu2  ;;  %v3003_v35 = vpop.f32.mrf.mxu3  ;;  %v8365_v17 = vor.u32 %v9311_v43, %v8362_v48  ;;  %v9302_v43 = vld [vmem:[#allocation2 + $0x504] sm:$0xf0] }
 0x564   : > { %v3022_v31 = vmul.f32 %v3003_v35, %v10423_v51  ;;  %v3046_v24 = vmul.f32 %v3003_v35, %v10426_v59  ;;  %v8321_v48 = vor.u32 %v9302_v43, %v8320_v38 }
 0x565   : > { %v3091_v39 = vpack.c.bf16 %v2958_v23, %v2957_v21  ;;  %3526 = vmatpush.bf16.msra.mxu1 %v8365_v17  ;;  %3640 = vmatpush.bf16.msra.mxu3 %v8365_v17 }
 0x566   : > { %v3030_v63 = vadd.f32 %v3022_v31, %v10428_v60  ;;  %v3054_v44 = vadd.f32 %v3046_v24, %v10431_v19 }
 0x567   : > { %3224 = vmatmul.bf16.gmra.mxu1 %v3091_v39  ;;  %3195 = vmatmul.bf16.gmra.mxu0 %v3091_v39 }
 0x568   : > { %v3038_v37 = vmul.f32 %v3030_v63, %v2974_v33  ;;  %v8360_v63 = vld [vmem:[#allocation2 + $0x550] sm:$0xf] }
 0x56a   : > { %v3062_v32 = vadd.f32 %v3054_v44, %v3038_v37  ;;  %v9309_v37 = vld [vmem:[#allocation2 + $0x544] sm:$0xf] }
 0x56b   : > { %v2977_v41 = vpop.f32.mrf.mxu2  ;;  %v3006_v42 = vpop.f32.mrf.mxu3 }
 0x56c   : > { %v3282_v49 = vpack.c.bf16 %v3062_v32, %v3061_v45  ;;  %v3023_v50 = vmul.f32 %v3006_v42, %v10423_v51  ;;  %v3047_v46 = vmul.f32 %v3006_v42, %v10426_v59  ;;  %v8361_v45 = vor.u32 %v9312_v36, %v8360_v63  ;;  %v8354_v32 = vld [vmem:[#allocation2 + $0x548] sm:$0xf0] }
 0x56e   : > { %3294 = vmatmul.bf16.vlgmr.msrb.gmra.mxu2 %v3282_v49  ;;  %3323 = vmatmul.bf16.vlgmr.msrb.gmra.mxu3 %v3282_v49  ;;  %v3031_v20 = vadd.f32 %v3023_v50, %v10428_v60  ;;  %v3055_v1 = vadd.f32 %v3047_v46, %v10431_v19  ;;  %v8357_v50 = vor.u32 %v9309_v37, %v8354_v32  ;;  %v9310_v46 = vld [vmem:[#allocation2 + $0x544] sm:$0xf0] }
 0x56f   : > { %3497 = vmatpush.bf16.msra.mxu0 %v8361_v45  ;;  %3611 = vmatpush.bf16.msra.mxu2 %v8361_v45 }
 0x570   : > { %v3039_v52 = vmul.f32 %v3031_v20, %v2977_v41  ;;  %3527 = vmatpush.bf16.msra.mxu1 %v8357_v50  ;;  %3641 = vmatpush.bf16.msra.mxu3 %v8357_v50 }
 0x572   : > { %v3063_v25 = vadd.f32 %v3055_v1, %v3039_v52 }
 0x573   : > { %v2979_v47 = vpop.f32.mrf.mxu2  ;;  %v3008_v0 = vpop.f32.mrf.mxu3 }
 0x574   : > { %v3024_v54 = vmul.f32 %v3008_v0, %v10423_v51  ;;  %v3048_v55 = vmul.f32 %v3008_v0, %v10426_v59  ;;  %v8352_v0 = vld [vmem:[#allocation2 + $0x540] sm:$0xf] }
 0x575   : > { %v8353_v52 = vor.u32 %v9310_v46, %v8352_v0 }
 0x576   : > { %v3032_v27 = vadd.f32 %v3024_v54, %v10428_v60  ;;  %v3056_v2 = vadd.f32 %v3048_v55, %v10431_v19  ;;  %v9307_v54 = vld [vmem:[#allocation2 + $0x534] sm:$0xf] }
 0x577   : > { %3498 = vmatpush.bf16.msra.mxu0 %v8353_v52  ;;  %3612 = vmatpush.bf16.msra.mxu2 %v8353_v52 }
 0x578   : > { %v3040_v57 = vmul.f32 %v3032_v27, %v2979_v47  ;;  %v8346_v27 = vld [vmem:[#allocation2 + $0x538] sm:$0xf0] }
 0x57a   : > { %v3064_v3 = vadd.f32 %v3056_v2, %v3040_v57 }
 0x57b   : > { %v2982_v4 = vpop.f32.mrf.mxu2  ;;  %v3011_v5 = vpop.f32.mrf.mxu3 }
 0x57c   : > { %v3283_v6 = vpack.c.bf16 %v3064_v3, %v3063_v25  ;;  %v3025_v7 = vmul.f32 %v3011_v5, %v10423_v51  ;;  %v3049_v58 = vmul.f32 %v3011_v5, %v10426_v59  ;;  %v9308_v3 = vld [vmem:[#allocation2 + $0x534] sm:$0xf0] }
 0x57e   : > { %3299 = vmatmul.bf16.gmra.mxu2 %v3283_v6  ;;  %3328 = vmatmul.bf16.gmra.mxu3 %v3283_v6  ;;  %v3033_v34 = vadd.f32 %v3025_v7, %v10428_v60  ;;  %v3057_v29 = vadd.f32 %v3049_v58, %v10431_v19  ;;  %v8338_v6 = vld [vmem:[#allocation2 + $0x528] sm:$0xf0] }
 0x580   : > { %v3041_v62 = vmul.f32 %v3033_v34, %v2982_v4  ;;  %v9305_v4 = vld [vmem:[#allocation2 + $0x524] sm:$0xf]  ;;  %v8325_v34 = vor.u32 %v9301_v18, %v8322_v28 }
 0x581   : > { %v8341_v8 = vor.u32 %v9305_v4, %v8338_v6 }
 0x582   : > { %v3065_v33 = vadd.f32 %v3057_v29, %v3041_v62 }
 0x583   : > { %v2984_v53 = vpop.f32.mrf.mxu2  ;;  %v3013_v56 = vpop.f32.mrf.mxu3 }
 0x584   : > { %v3026_v16 = vmul.f32 %v3013_v56, %v10423_v51  ;;  %v3050_v61 = vmul.f32 %v3013_v56, %v10426_v59 }
 0x586   : > { %v3034_v21 = vadd.f32 %v3026_v16, %v10428_v60  ;;  %v3058_v23 = vadd.f32 %v3050_v61, %v10431_v19 }
 0x588   : > { %v3042_v26 = vmul.f32 %v3034_v21, %v2984_v53  ;;  %v3087_v53 = vld [vmem:[#allocation5 + $0x24] sm:$0xf] }
 0x589   : > { %v10495_v56 = vperm.slane %v3087_v53, 3  ;;  %v10498_v17 = vperm.slane %v3087_v53, 2  ;;  %v10500_v62 = vperm.slane %v3087_v53, 1  ;;  %v10503_v29 = vperm.slane %v3087_v53, 0 }
 0x58a   : > { %v3066_v35 = vadd.f32 %v3058_v23, %v3042_v26 }
 0x58b   : > { %v3016_v30 = vpop.f32.mrf.mxu3  ;;  %v2987_v24 = vpop.f32.mrf.mxu2 }
 0x58c   : > { %v3284_v31 = vpack.c.bf16 %v3066_v35, %v3065_v33  ;;  %v3027_v39 = vmul.f32 %v3016_v30, %v10423_v51  ;;  %v3051_v41 = vmul.f32 %v3016_v30, %v10426_v59 }
 0x58e   : > { %3304 = vmatmul.bf16.gmra.mxu2 %v3284_v31  ;;  %3333 = vmatmul.bf16.gmra.mxu3 %v3284_v31  ;;  %v3035_v40 = vadd.f32 %v3027_v39, %v10428_v60  ;;  %v3059_v1 = vadd.f32 %v3051_v41, %v10431_v19 }
 0x590   : > { %v3043_v20 = vmul.f32 %v3035_v40, %v2987_v24 }
 0x592   : > { %v3067_v2 = vadd.f32 %v3059_v1, %v3043_v20 }
 0x593   : > { %v3018_v44 = vpop.f32.mrf.mxu3  ;;  %v2989_v55 = vpop.f32.mrf.mxu2 }
 0x594   : > { %v3028_v42 = vmul.f32 %v3018_v44, %v10423_v51  ;;  %v3052_v49 = vmul.f32 %v3018_v44, %v10426_v59  ;;  %v8349_v59 = vor.u32 %v9307_v54, %v8346_v27 }
 0x596   : > { %v3036_v47 = vadd.f32 %v3028_v42, %v10428_v60  ;;  %v3060_v51 = vadd.f32 %v3052_v49, %v10431_v19  ;;  %3528 = vmatpush.bf16.msra.mxu1 %v8349_v59  ;;  %v8344_v60 = vld [vmem:[#allocation2 + $0x530] sm:$0xf]  ;;  %3642 = vmatpush.bf16.msra.mxu3 %v8349_v59  ;;  %v9306_v19 = vld [vmem:[#allocation2 + $0x524] sm:$0xf0] }
 0x597   : > { %v8345_v5 = vor.u32 %v9308_v3, %v8344_v60  ;;  %v8337_v11 = vor.u32 %v9306_v19, %v8336_v9 }
 0x598   : > { %v3044_v57 = vmul.f32 %v3036_v47, %v2989_v55 }
 0x599   : > { %3499 = vmatpush.bf16.msra.mxu0 %v8345_v5  ;;  %3613 = vmatpush.bf16.msra.mxu2 %v8345_v5 }
 0x59a   : > { %v3068_v25 = vadd.f32 %v3060_v51, %v3044_v57  ;;  %3529 = vmatpush.bf16.msra.mxu1 %v8341_v8  ;;  %3643 = vmatpush.bf16.msra.mxu3 %v8341_v8 }
 0x59c   : > { %v3285_v7 = vpack.c.bf16 %v3068_v25, %v3067_v2 }
 0x59d   : > { %3500 = vmatpush.bf16.msra.mxu0 %v8337_v11  ;;  %3614 = vmatpush.bf16.msra.mxu2 %v8337_v11 }
 0x59e   : > { %3309 = vmatmul.bf16.gmra.mxu2 %v3285_v7  ;;  %3338 = vmatmul.bf16.gmra.mxu3 %v3285_v7 }
 0x59f   : > { %3530 = vmatpush.bf16.msra.mxu1 %v8333_v13  ;;  %3644 = vmatpush.bf16.msra.mxu3 %v8333_v13 }
 0x5a1   : > { %3501 = vmatpush.bf16.msra.mxu0 %v8329_v22  ;;  %3615 = vmatpush.bf16.msra.mxu2 %v8329_v22 }
 0x5a3   : > { %3531 = vmatpush.bf16.msra.mxu1 %v8325_v34  ;;  %3645 = vmatpush.bf16.msra.mxu3 %v8325_v34 }
 0x5a5   : > { %3502 = vmatpush.bf16.msra.mxu0 %v8321_v48  ;;  %3616 = vmatpush.bf16.msra.mxu2 %v8321_v48 }
 0x5b4   : > { %v3210_v58 = vpop.f32.mrf.mxu1  ;;  %v3181_v16 = vpop.f32.mrf.mxu0 }
 0x5b5   : > { %v3231_v61 = vmul.f32 %v10495_v56, %v3210_v58  ;;  %v3257_v21 = vmul.f32 %v10498_v17, %v3210_v58 }
 0x5b7   : > { %v3240_v26 = vadd.f32 %v10500_v62, %v3231_v61  ;;  %v3266_v35 = vadd.f32 %v10503_v29, %v3257_v21 }
 0x5b9   : > { %v3248_v30 = vmul.f32 %v3240_v26, %v3181_v16 }
 0x5bb   : > { %v3274_v63 = vadd.f32 %v3266_v35, %v3248_v30 }
 0x5bc   : > { %v3212_v23 = vpop.f32.mrf.mxu1  ;;  %v3183_v33 = vpop.f32.mrf.mxu0 }
 0x5bd   : > { %v3232_v31 = vmul.f32 %v10495_v56, %v3212_v23  ;;  %v3258_v24 = vmul.f32 %v10498_v17, %v3212_v23 }
 0x5bf   : > { %v3267_v39 = vadd.f32 %v10503_v29, %v3258_v24  ;;  %v3241_v40 = vadd.f32 %v10500_v62, %v3232_v31 }
 0x5c1   : > { %v3249_v36 = vmul.f32 %v3241_v40, %v3183_v33 }
 0x5c3   : > { %v3275_v37 = vadd.f32 %v3267_v39, %v3249_v36 }
 0x5c4   : > { %v3215_v44 = vpop.f32.mrf.mxu1  ;;  %v3186_v45 = vpop.f32.mrf.mxu0 }
 0x5c5   : > { %v3411_v32 = vpack.c.bf16 %v3275_v37, %v3274_v63  ;;  %v3233_v41 = vmul.f32 %v10495_v56, %v3215_v44  ;;  %v3259_v42 = vmul.f32 %v10498_v17, %v3215_v44 }
 0x5c7   : > { %3532 = vmatmul.bf16.vlgmr.msra.gmra.mxu1 %v3411_v32  ;;  %3503 = vmatmul.bf16.vlgmr.msra.gmra.mxu0 %v3411_v32  ;;  %v3242_v49 = vadd.f32 %v10500_v62, %v3233_v41  ;;  %v3268_v47 = vadd.f32 %v10503_v29, %v3259_v42 }
 0x5c9   : > { %v3250_v0 = vmul.f32 %v3242_v49, %v3186_v45 }
 0x5cb   : > { %v3276_v27 = vadd.f32 %v3268_v47, %v3250_v0 }
 0x5cc   : > { %v3217_v50 = vpop.f32.mrf.mxu1  ;;  %v3188_v20 = vpop.f32.mrf.mxu0 }
 0x5cd   : > { %v3234_v46 = vmul.f32 %v10495_v56, %v3217_v50  ;;  %v3260_v54 = vmul.f32 %v10498_v17, %v3217_v50 }
 0x5cf   : > { %v3269_v55 = vadd.f32 %v10503_v29, %v3260_v54  ;;  %v3243_v52 = vadd.f32 %v10500_v62, %v3234_v46 }
 0x5d1   : > { %v3251_v1 = vmul.f32 %v3243_v52, %v3188_v20 }
 0x5d3   : > { %v3277_v57 = vadd.f32 %v3269_v55, %v3251_v1 }
 0x5d4   : > { %v3220_v51 = vpop.f32.mrf.mxu1  ;;  %v3191_v59 = vpop.f32.mrf.mxu0 }
 0x5d5   : > { %v3235_v2 = vmul.f32 %v10495_v56, %v3220_v51  ;;  %v3412_v25 = vpack.c.bf16 %v3277_v57, %v3276_v27  ;;  %v3261_v60 = vmul.f32 %v10498_v17, %v3220_v51 }
 0x5d7   : > { %3537 = vmatmul.bf16.gmra.mxu1 %v3412_v25  ;;  %3508 = vmatmul.bf16.gmra.mxu0 %v3412_v25  ;;  %v3244_v3 = vadd.f32 %v10500_v62, %v3235_v2  ;;  %v3270_v6 = vadd.f32 %v10503_v29, %v3261_v60 }
 0x5d9   : > { %v3252_v7 = vmul.f32 %v3244_v3, %v3191_v59 }
 0x5db   : > { %v3278_v11 = vadd.f32 %v3270_v6, %v3252_v7 }
 0x5dc   : > { %v3222_v4 = vpop.f32.mrf.mxu1  ;;  %v3193_v5 = vpop.f32.mrf.mxu0 }
 0x5dd   : > { %v3236_v8 = vmul.f32 %v10495_v56, %v3222_v4  ;;  %v3262_v9 = vmul.f32 %v10498_v17, %v3222_v4 }
 0x5df   : > { %v3271_v19 = vadd.f32 %v10503_v29, %v3262_v9  ;;  %v3245_v10 = vadd.f32 %v10500_v62, %v3236_v8 }
 0x5e1   : > { %v3253_v12 = vmul.f32 %v3245_v10, %v3193_v5  ;;  %v9332_v10 = vld [vmem:[#allocation2 + $0x5f4] sm:$0xf0] }
 0x5e3   : > { %v3279_v13 = vadd.f32 %v3271_v19, %v3253_v12  ;;  %v8440_v19 = vld [vmem:[#allocation2 + $0x5f0] sm:$0xf] }
 0x5e4   : > { %v3225_v14 = vpop.f32.mrf.mxu1  ;;  %v3196_v15 = vpop.f32.mrf.mxu0  ;;  %v8441_v12 = vor.u32 %v9332_v10, %v8440_v19 }
 0x5e5   : > { %v3237_v18 = vmul.f32 %v10495_v56, %v3225_v14  ;;  %v3413_v22 = vpack.c.bf16 %v3279_v13, %v3278_v11  ;;  %v3263_v28 = vmul.f32 %v10498_v17, %v3225_v14  ;;  %v9331_v11 = vld [vmem:[#allocation2 + $0x5f4] sm:$0xf]  ;;  %v8442_v13 = vld [vmem:[#allocation2 + $0x5f8] sm:$0xf0]  ;;  %v8432_v14 = vld [vmem:[#allocation2 + $0x5e0] sm:$0xf] }
 0x5e6   : > { %3818 = vmatpush.bf16.msrb.mxu0 %v8441_v12  ;;  %3932 = vmatpush.bf16.msrb.mxu2 %v8441_v12  ;;  %v9320_v12 = vld [vmem:[#allocation2 + $0x594] sm:$0xf0] }
 0x5e7   : > { %3542 = vmatmul.bf16.gmra.mxu1 %v3413_v22  ;;  %3513 = vmatmul.bf16.gmra.mxu0 %v3413_v22  ;;  %v3246_v34 = vadd.f32 %v10500_v62, %v3237_v18  ;;  %v3272_v43 = vadd.f32 %v10503_v29, %v3263_v28  ;;  %v8445_v18 = vor.u32 %v9331_v11, %v8442_v13  ;;  %v9329_v22 = vld [vmem:[#allocation2 + $0x5e4] sm:$0xf]  ;;  %v8434_v28 = vld [vmem:[#allocation2 + $0x5e8] sm:$0xf0]  ;;  %v9319_v13 = vld [vmem:[#allocation2 + $0x594] sm:$0xf] }
 0x5e9   : > { %v3254_v48 = vmul.f32 %v3246_v34, %v3196_v15  ;;  %v9330_v15 = vld [vmem:[#allocation2 + $0x5e4] sm:$0xf0]  ;;  %3847 = vmatpush.bf16.msrb.mxu1 %v8445_v18  ;;  %3961 = vmatpush.bf16.msrb.mxu3 %v8445_v18 }
 0x5ea   : > { %v8433_v34 = vor.u32 %v9330_v15, %v8432_v14  ;;  %v8394_v15 = vld [vmem:[#allocation2 + $0x598] sm:$0xf0] }
 0x5eb   : > { %v3280_v26 = vadd.f32 %v3272_v43, %v3254_v48  ;;  %v8437_v43 = vor.u32 %v9329_v22, %v8434_v28  ;;  %v8424_v48 = vld [vmem:[#allocation2 + $0x5d0] sm:$0xf]  ;;  %v8397_v28 = vor.u32 %v9319_v13, %v8394_v15 }
 0x5ec   : > { %v3227_v38 = vpop.f32.mrf.mxu1  ;;  %v3198_v16 = vpop.f32.mrf.mxu0  ;;  %3819 = vmatpush.bf16.msrb.mxu0 %v8433_v34  ;;  %3933 = vmatpush.bf16.msrb.mxu2 %v8433_v34  ;;  %v8384_v34 = vld [vmem:[#allocation2 + $0x580] sm:$0xf] }
 0x5ed   : > { %v3238_v53 = vmul.f32 %v10495_v56, %v3227_v38  ;;  %v3264_v58 = vmul.f32 %v10498_v17, %v3227_v38  ;;  %3848 = vmatpush.bf16.msrb.mxu1 %v8437_v43  ;;  %3962 = vmatpush.bf16.msrb.mxu3 %v8437_v43  ;;  %v9317_v43 = vld [vmem:[#allocation2 + $0x584] sm:$0xf] }
 0x5ef   : > { %v3273_v61 = vadd.f32 %v10503_v29, %v3264_v58  ;;  %v3247_v21 = vadd.f32 %v10500_v62, %v3238_v53  ;;  %v9328_v53 = vld [vmem:[#allocation2 + $0x5d4] sm:$0xf0] }
 0x5f1   : > { %v3255_v23 = vmul.f32 %v3247_v21, %v3198_v16  ;;  %v3295_v33 = vpop.f32.mrf.mxu2  ;;  %v3324_v35 = vpop.f32.mrf.mxu3  ;;  %v8426_v21 = vld [vmem:[#allocation2 + $0x5d8] sm:$0xf0] }
 0x5f2   : > { %v3344_v31 = vmul.f32 %v3324_v35, %v10495_v56  ;;  %v3368_v36 = vmul.f32 %v3324_v35, %v10498_v17  ;;  %v8425_v35 = vor.u32 %v9328_v53, %v8424_v48 }
 0x5f3   : > { %v3281_v30 = vadd.f32 %v3273_v61, %v3255_v23  ;;  %v9327_v61 = vld [vmem:[#allocation2 + $0x5d4] sm:$0xf] }
 0x5f4   : > { %v3352_v39 = vadd.f32 %v3344_v31, %v10500_v62  ;;  %v3376_v41 = vadd.f32 %v3368_v36, %v10503_v29  ;;  %3820 = vmatpush.bf16.msrb.mxu0 %v8425_v35  ;;  %3934 = vmatpush.bf16.msrb.mxu2 %v8425_v35 }
 0x5f5   : > { %v3414_v24 = vpack.c.bf16 %v3281_v30, %v3280_v26 }
 0x5f6   : > { %v3360_v45 = vmul.f32 %v3352_v39, %v3295_v33 }
 0x5f7   : > { %3547 = vmatmul.bf16.gmra.mxu1 %v3414_v24  ;;  %3518 = vmatmul.bf16.gmra.mxu0 %v3414_v24  ;;  %v8429_v24 = vor.u32 %v9327_v61, %v8426_v21 }
 0x5f8   : > { %v3384_v50 = vadd.f32 %v3376_v41, %v3360_v45  ;;  %v9326_v41 = vld [vmem:[#allocation2 + $0x5c4] sm:$0xf0] }
 0x5f9   : > { %v3297_v40 = vpop.f32.mrf.mxu2  ;;  %v3326_v63 = vpop.f32.mrf.mxu3  ;;  %3849 = vmatpush.bf16.msrb.mxu1 %v8429_v24  ;;  %3963 = vmatpush.bf16.msrb.mxu3 %v8429_v24 }
 0x5fa   : > { %v3345_v37 = vmul.f32 %v3326_v63, %v10495_v56  ;;  %v3369_v44 = vmul.f32 %v3326_v63, %v10498_v17 }
 0x5fc   : > { %v3353_v32 = vadd.f32 %v3345_v37, %v10500_v62  ;;  %v3377_v49 = vadd.f32 %v3369_v44, %v10503_v29 }
 0x5fe   : > { %v3361_v42 = vmul.f32 %v3353_v32, %v3297_v40  ;;  %v8416_v32 = vld [vmem:[#allocation2 + $0x5c0] sm:$0xf] }
 0x600   : > { %v3385_v20 = vadd.f32 %v3377_v49, %v3361_v42  ;;  %v9325_v42 = vld [vmem:[#allocation2 + $0x5c4] sm:$0xf] }
 0x601   : > { %v3300_v47 = vpop.f32.mrf.mxu2  ;;  %v3329_v0 = vpop.f32.mrf.mxu3 }
 0x602   : > { %v3605_v46 = vpack.c.bf16 %v3385_v20, %v3384_v50  ;;  %v3346_v54 = vmul.f32 %v3329_v0, %v10495_v56  ;;  %v3370_v1 = vmul.f32 %v3329_v0, %v10498_v17  ;;  %v8417_v50 = vor.u32 %v9326_v41, %v8416_v32  ;;  %v8418_v20 = vld [vmem:[#allocation2 + $0x5c8] sm:$0xf0] }
 0x603   : > { %v8421_v0 = vor.u32 %v9325_v42, %v8418_v20 }
 0x604   : > { %3617 = vmatmul.bf16.vlgmr.msra.gmra.mxu2 %v3605_v46  ;;  %3646 = vmatmul.bf16.vlgmr.msra.gmra.mxu3 %v3605_v46  ;;  %v3354_v55 = vadd.f32 %v3346_v54, %v10500_v62  ;;  %v3378_v25 = vadd.f32 %v3370_v1, %v10503_v29  ;;  %v8408_v46 = vld [vmem:[#allocation2 + $0x5b0] sm:$0xf]  ;;  %v9324_v54 = vld [vmem:[#allocation2 + $0x5b4] sm:$0xf0] }
 0x605   : > { %3821 = vmatpush.bf16.msrb.mxu0 %v8417_v50  ;;  %3935 = vmatpush.bf16.msrb.mxu2 %v8417_v50 }
 0x606   : > { %v3362_v59 = vmul.f32 %v3354_v55, %v3300_v47  ;;  %3850 = vmatpush.bf16.msrb.mxu1 %v8421_v0  ;;  %v9323_v55 = vld [vmem:[#allocation2 + $0x5b4] sm:$0xf]  ;;  %3964 = vmatpush.bf16.msrb.mxu3 %v8421_v0 }
 0x608   : > { %v3386_v4 = vadd.f32 %v3378_v25, %v3362_v59 }
 0x609   : > { %v3302_v52 = vpop.f32.mrf.mxu2  ;;  %v3331_v27 = vpop.f32.mrf.mxu3 }
 0x60a   : > { %v3347_v57 = vmul.f32 %v3331_v27, %v10495_v56  ;;  %v3371_v51 = vmul.f32 %v3331_v27, %v10498_v17  ;;  %v8410_v27 = vld [vmem:[#allocation2 + $0x5b8] sm:$0xf0] }
 0x60c   : > { %v3355_v2 = vadd.f32 %v3347_v57, %v10500_v62  ;;  %v3379_v3 = vadd.f32 %v3371_v51, %v10503_v29  ;;  %v8413_v57 = vor.u32 %v9323_v55, %v8410_v27 }
 0x60e   : > { %v3363_v60 = vmul.f32 %v3355_v2, %v3302_v52  ;;  %v8409_v52 = vor.u32 %v9324_v54, %v8408_v46  ;;  %3851 = vmatpush.bf16.msrb.mxu1 %v8413_v57  ;;  %3965 = vmatpush.bf16.msrb.mxu3 %v8413_v57 }
 0x610   : > { %v3387_v5 = vadd.f32 %v3379_v3, %v3363_v60  ;;  %3822 = vmatpush.bf16.msrb.mxu0 %v8409_v52  ;;  %3936 = vmatpush.bf16.msrb.mxu2 %v8409_v52  ;;  %v8400_v60 = vld [vmem:[#allocation2 + $0x5a0] sm:$0xf]  ;;  %v9322_v3 = vld [vmem:[#allocation2 + $0x5a4] sm:$0xf0] }
 0x611   : > { %v3305_v6 = vpop.f32.mrf.mxu2  ;;  %v3334_v7 = vpop.f32.mrf.mxu3 }
 0x612   : > { %v3606_v8 = vpack.c.bf16 %v3387_v5, %v3386_v4  ;;  %v3348_v9 = vmul.f32 %v3334_v7, %v10495_v56  ;;  %v3372_v26 = vmul.f32 %v3334_v7, %v10498_v17  ;;  %v9321_v4 = vld [vmem:[#allocation2 + $0x5a4] sm:$0xf]  ;;  %v8401_v5 = vor.u32 %v9322_v3, %v8400_v60 }
 0x614   : > { %3622 = vmatmul.bf16.gmra.mxu2 %v3606_v8  ;;  %3651 = vmatmul.bf16.gmra.mxu3 %v3606_v8  ;;  %v3356_v38 = vadd.f32 %v3348_v9, %v10500_v62  ;;  %v3380_v39 = vadd.f32 %v3372_v26, %v10503_v29 }
 0x615   : > { %3823 = vmatpush.bf16.msrb.mxu0 %v8401_v5  ;;  %3937 = vmatpush.bf16.msrb.mxu2 %v8401_v5 }
 0x616   : > { %v3364_v30 = vmul.f32 %v3356_v38, %v3305_v6  ;;  %v8402_v6 = vld [vmem:[#allocation2 + $0x5a8] sm:$0xf0]  ;;  %v9318_v38 = vld [vmem:[#allocation2 + $0x584] sm:$0xf0] }
 0x617   : > { %v8405_v9 = vor.u32 %v9321_v4, %v8402_v6  ;;  %v8385_v48 = vor.u32 %v9318_v38, %v8384_v34 }
 0x618   : > { %v3388_v36 = vadd.f32 %v3380_v39, %v3364_v30 }
 0x619   : > { %v3307_v58 = vpop.f32.mrf.mxu2  ;;  %v3336_v16 = vpop.f32.mrf.mxu3  ;;  %3852 = vmatpush.bf16.msrb.mxu1 %v8405_v9  ;;  %3966 = vmatpush.bf16.msrb.mxu3 %v8405_v9 }
 0x61a   : > { %v3349_v23 = vmul.f32 %v3336_v16, %v10495_v56  ;;  %v3373_v33 = vmul.f32 %v3336_v16, %v10498_v17 }
 0x61c   : > { %v3357_v31 = vadd.f32 %v3349_v23, %v10500_v62  ;;  %v3381_v63 = vadd.f32 %v3373_v33, %v10503_v29 }
 0x61d   : > { %3853 = vmatpush.bf16.msrb.mxu1 %v8397_v28  ;;  %3967 = vmatpush.bf16.msrb.mxu3 %v8397_v28 }
 0x61e   : > { %v3365_v40 = vmul.f32 %v3357_v31, %v3307_v58  ;;  %v3410_v58 = vld [vmem:[#allocation5 + $0x28] sm:$0xf] }
 0x61f   : > { %v10567_v16 = vperm.slane %v3410_v58, 3  ;;  %v10570_v23 = vperm.slane %v3410_v58, 2  ;;  %v10572_v33 = vperm.slane %v3410_v58, 1  ;;  %v10575_v30 = vperm.slane %v3410_v58, 0 }
 0x620   : > { %v3389_v37 = vadd.f32 %v3381_v63, %v3365_v40 }
 0x621   : > { %v3339_v44 = vpop.f32.mrf.mxu3  ;;  %v3310_v49 = vpop.f32.mrf.mxu2 }
 0x622   : > { %v3607_v45 = vpack.c.bf16 %v3389_v37, %v3388_v36  ;;  %v3350_v47 = vmul.f32 %v3339_v44, %v10495_v56  ;;  %v3374_v59 = vmul.f32 %v3339_v44, %v10498_v17 }
 0x624   : > { %3627 = vmatmul.bf16.gmra.mxu2 %v3607_v45  ;;  %3656 = vmatmul.bf16.gmra.mxu3 %v3607_v45  ;;  %v3358_v1 = vadd.f32 %v3350_v47, %v10500_v62  ;;  %v3382_v10 = vadd.f32 %v3374_v59, %v10503_v29 }
 0x626   : > { %v3366_v7 = vmul.f32 %v3358_v1, %v3310_v49 }
 0x628   : > { %v3390_v18 = vadd.f32 %v3382_v10, %v3366_v7 }
 0x629   : > { %v3341_v51 = vpop.f32.mrf.mxu3  ;;  %v3312_v19 = vpop.f32.mrf.mxu2 }
 0x62a   : > { %v3351_v2 = vmul.f32 %v3341_v51, %v10495_v56  ;;  %v3375_v25 = vmul.f32 %v3341_v51, %v10498_v17  ;;  %v8392_v17 = vld [vmem:[#allocation2 + $0x590] sm:$0xf] }
 0x62b   : > { %v8393_v14 = vor.u32 %v9320_v12, %v8392_v17 }
 0x62c   : > { %v3359_v8 = vadd.f32 %v3351_v2, %v10500_v62  ;;  %v3383_v56 = vadd.f32 %v3375_v25, %v10503_v29  ;;  %v8386_v29 = vld [vmem:[#allocation2 + $0x588] sm:$0xf0] }
 0x62d   : > { %3824 = vmatpush.bf16.msrb.mxu0 %v8393_v14  ;;  %3938 = vmatpush.bf16.msrb.mxu2 %v8393_v14  ;;  %v8389_v53 = vor.u32 %v9317_v43, %v8386_v29 }
 0x62e   : > { %v3367_v11 = vmul.f32 %v3359_v8, %v3312_v19 }
 0x62f   : > { %3854 = vmatpush.bf16.msrb.mxu1 %v8389_v53  ;;  %3968 = vmatpush.bf16.msrb.mxu3 %v8389_v53 }
 0x630   : > { %v3391_v22 = vadd.f32 %v3383_v56, %v3367_v11 }
 0x631   : > { %3825 = vmatpush.bf16.msrb.mxu0 %v8385_v48  ;;  %3939 = vmatpush.bf16.msrb.mxu2 %v8385_v48 }
 0x632   : > { %v3608_v62 = vpack.c.bf16 %v3391_v22, %v3390_v18 }
 0x634   : > { %3632 = vmatmul.bf16.gmra.mxu2 %v3608_v62  ;;  %3661 = vmatmul.bf16.gmra.mxu3 %v3608_v62 }
 0x644   : > { %v3533_v61 = vpop.f32.mrf.mxu1  ;;  %v3504_v21 = vpop.f32.mrf.mxu0 }
 0x645   : > { %v3554_v26 = vmul.f32 %v10567_v16, %v3533_v61  ;;  %v3580_v35 = vmul.f32 %v10570_v23, %v3533_v61 }
 0x647   : > { %v3563_v31 = vadd.f32 %v10572_v33, %v3554_v26  ;;  %v3589_v40 = vadd.f32 %v10575_v30, %v3580_v35 }
 0x649   : > { %v3571_v63 = vmul.f32 %v3563_v31, %v3504_v21 }
 0x64b   : > { %v3597_v32 = vadd.f32 %v3589_v40, %v3571_v63 }
 0x64c   : > { %v3535_v24 = vpop.f32.mrf.mxu1  ;;  %v3506_v39 = vpop.f32.mrf.mxu0 }
 0x64d   : > { %v3555_v36 = vmul.f32 %v10567_v16, %v3535_v24  ;;  %v3581_v37 = vmul.f32 %v10570_v23, %v3535_v24 }
 0x64f   : > { %v3590_v44 = vadd.f32 %v10575_v30, %v3581_v37  ;;  %v3564_v45 = vadd.f32 %v10572_v33, %v3555_v36 }
 0x651   : > { %v3572_v41 = vmul.f32 %v3564_v45, %v3506_v39 }
 0x653   : > { %v3598_v42 = vadd.f32 %v3590_v44, %v3572_v41 }
 0x654   : > { %v3538_v49 = vpop.f32.mrf.mxu1  ;;  %v3509_v50 = vpop.f32.mrf.mxu0 }
 0x655   : > { %v3734_v20 = vpack.c.bf16 %v3598_v42, %v3597_v32  ;;  %v3556_v47 = vmul.f32 %v10567_v16, %v3538_v49  ;;  %v3582_v0 = vmul.f32 %v10570_v23, %v3538_v49 }
 0x657   : > { %3826 = vmatmul.bf16.vlgmr.msrb.gmra.mxu0 %v3734_v20  ;;  %3855 = vmatmul.bf16.vlgmr.msrb.gmra.mxu1 %v3734_v20  ;;  %v3565_v46 = vadd.f32 %v10572_v33, %v3556_v47  ;;  %v3591_v52 = vadd.f32 %v10575_v30, %v3582_v0 }
 0x659   : > { %v3573_v27 = vmul.f32 %v3565_v46, %v3509_v50 }
 0x65b   : > { %v3599_v2 = vadd.f32 %v3591_v52, %v3573_v27 }
 0x65c   : > { %v3540_v54 = vpop.f32.mrf.mxu1  ;;  %v3511_v55 = vpop.f32.mrf.mxu0 }
 0x65d   : > { %v3557_v1 = vmul.f32 %v10567_v16, %v3540_v54  ;;  %v3583_v57 = vmul.f32 %v10570_v23, %v3540_v54 }
 0x65f   : > { %v3592_v51 = vadd.f32 %v10575_v30, %v3583_v57  ;;  %v3566_v59 = vadd.f32 %v10572_v33, %v3557_v1 }
 0x661   : > { %v3574_v25 = vmul.f32 %v3566_v59, %v3511_v55 }
 0x663   : > { %v3600_v60 = vadd.f32 %v3592_v51, %v3574_v25 }
 0x664   : > { %v3543_v3 = vpop.f32.mrf.mxu1  ;;  %v3514_v4 = vpop.f32.mrf.mxu0 }
 0x665   : > { %v3558_v5 = vmul.f32 %v10567_v16, %v3543_v3  ;;  %v3735_v6 = vpack.c.bf16 %v3600_v60, %v3599_v2  ;;  %v3584_v7 = vmul.f32 %v10570_v23, %v3543_v3 }
 0x667   : > { %3831 = vmatmul.bf16.gmra.mxu0 %v3735_v6  ;;  %3860 = vmatmul.bf16.gmra.mxu1 %v3735_v6  ;;  %v3567_v8 = vadd.f32 %v10572_v33, %v3558_v5  ;;  %v3593_v10 = vadd.f32 %v10575_v30, %v3584_v7 }
 0x669   : > { %v3575_v11 = vmul.f32 %v3567_v8, %v3514_v4 }
 0x66b   : > { %v3601_v14 = vadd.f32 %v3593_v10, %v3575_v11  ;;  %v9347_v10 = vld [vmem:[#allocation2 + $0x674] sm:$0xf] }
 0x66c   : > { %v3545_v9 = vpop.f32.mrf.mxu1  ;;  %v3516_v19 = vpop.f32.mrf.mxu0 }
 0x66d   : > { %v3559_v56 = vmul.f32 %v10567_v16, %v3545_v9  ;;  %v3585_v17 = vmul.f32 %v10570_v23, %v3545_v9  ;;  %v8504_v9 = vld [vmem:[#allocation2 + $0x670] sm:$0xf] }
 0x66f   : > { %v3594_v12 = vadd.f32 %v10575_v30, %v3585_v17  ;;  %v3568_v13 = vadd.f32 %v10572_v33, %v3559_v56  ;;  %v8506_v56 = vld [vmem:[#allocation2 + $0x678] sm:$0xf0] }
 0x671   : > { %v3576_v15 = vmul.f32 %v3568_v13, %v3516_v19  ;;  %v9348_v19 = vld [vmem:[#allocation2 + $0x674] sm:$0xf0]  ;;  %v8509_v13 = vor.u32 %v9347_v10, %v8506_v56  ;;  %v9335_v10 = vld [vmem:[#allocation2 + $0x614] sm:$0xf] }
 0x672   : > { %v8505_v11 = vor.u32 %v9348_v19, %v8504_v9  ;;  %v8456_v9 = vld [vmem:[#allocation2 + $0x610] sm:$0xf]  ;;  %v9336_v19 = vld [vmem:[#allocation2 + $0x614] sm:$0xf0] }
 0x673   : > { %v3602_v18 = vadd.f32 %v3594_v12, %v3576_v15  ;;  %4170 = vmatpush.bf16.msra.mxu1 %v8509_v13  ;;  %4284 = vmatpush.bf16.msra.mxu3 %v8509_v13  ;;  %v8457_v56 = vor.u32 %v9336_v19, %v8456_v9 }
 0x674   : > { %v3548_v22 = vpop.f32.mrf.mxu1  ;;  %v3519_v28 = vpop.f32.mrf.mxu0  ;;  %4141 = vmatpush.bf16.msra.mxu0 %v8505_v11  ;;  %4255 = vmatpush.bf16.msra.mxu2 %v8505_v11 }
 0x675   : > { %v3560_v62 = vmul.f32 %v10567_v16, %v3548_v22  ;;  %v3736_v34 = vpack.c.bf16 %v3602_v18, %v3601_v14  ;;  %v3586_v38 = vmul.f32 %v10570_v23, %v3548_v22 }
 0x677   : > { %3836 = vmatmul.bf16.gmra.mxu0 %v3736_v34  ;;  %3865 = vmatmul.bf16.gmra.mxu1 %v3736_v34  ;;  %v3569_v43 = vadd.f32 %v10572_v33, %v3560_v62  ;;  %v3595_v29 = vadd.f32 %v10575_v30, %v3586_v38  ;;  %v9346_v62 = vld [vmem:[#allocation2 + $0x664] sm:$0xf0]  ;;  %v9345_v34 = vld [vmem:[#allocation2 + $0x664] sm:$0xf] }
 0x679   : > { %v3577_v53 = vmul.f32 %v3569_v43, %v3519_v28  ;;  %v8496_v28 = vld [vmem:[#allocation2 + $0x660] sm:$0xf]  ;;  %v8498_v43 = vld [vmem:[#allocation2 + $0x668] sm:$0xf0] }
 0x67a   : > { %v8497_v38 = vor.u32 %v9346_v62, %v8496_v28  ;;  %v8448_v28 = vld [vmem:[#allocation2 + $0x600] sm:$0xf]  ;;  %v9334_v62 = vld [vmem:[#allocation2 + $0x604] sm:$0xf0] }
 0x67b   : > { %v3603_v31 = vadd.f32 %v3595_v29, %v3577_v53  ;;  %v9344_v29 = vld [vmem:[#allocation2 + $0x654] sm:$0xf0]  ;;  %v8501_v53 = vor.u32 %v9345_v34, %v8498_v43  ;;  %v9333_v34 = vld [vmem:[#allocation2 + $0x604] sm:$0xf]  ;;  %v8449_v43 = vor.u32 %v9334_v62, %v8448_v28 }
 0x67c   : > { %v3550_v48 = vpop.f32.mrf.mxu1  ;;  %v3521_v21 = vpop.f32.mrf.mxu0  ;;  %4142 = vmatpush.bf16.msra.mxu0 %v8497_v38  ;;  %4256 = vmatpush.bf16.msra.mxu2 %v8497_v38 }
 0x67d   : > { %v3561_v58 = vmul.f32 %v10567_v16, %v3550_v48  ;;  %v3587_v61 = vmul.f32 %v10570_v23, %v3550_v48  ;;  %v8488_v48 = vld [vmem:[#allocation2 + $0x650] sm:$0xf]  ;;  %4171 = vmatpush.bf16.msra.mxu1 %v8501_v53  ;;  %4285 = vmatpush.bf16.msra.mxu3 %v8501_v53 }
 0x67f   : > { %v3596_v26 = vadd.f32 %v10575_v30, %v3587_v61  ;;  %v3570_v35 = vadd.f32 %v10572_v33, %v3561_v58  ;;  %v9343_v58 = vld [vmem:[#allocation2 + $0x654] sm:$0xf]  ;;  %v8490_v61 = vld [vmem:[#allocation2 + $0x658] sm:$0xf0] }
 0x681   : > { %v3578_v24 = vmul.f32 %v3570_v35, %v3521_v21  ;;  %v8489_v21 = vor.u32 %v9344_v29, %v8488_v48  ;;  %v8493_v35 = vor.u32 %v9343_v58, %v8490_v61  ;;  %v8450_v48 = vld [vmem:[#allocation2 + $0x608] sm:$0xf0] }
 0x683   : > { %v3604_v39 = vadd.f32 %v3596_v26, %v3578_v24  ;;  %4143 = vmatpush.bf16.msra.mxu0 %v8489_v21  ;;  %4257 = vmatpush.bf16.msra.mxu2 %v8489_v21  ;;  %v3733_v21 = vld [vmem:[#allocation5 + $0x2c] sm:$0xf] }
 0x684   : > { %4172 = vmatpush.bf16.msra.mxu1 %v8493_v35  ;;  %4286 = vmatpush.bf16.msra.mxu3 %v8493_v35 }
 0x685   : > { %v3737_v40 = vpack.c.bf16 %v3604_v39, %v3603_v31 }
 0x687   : > { %v3618_v63 = vpop.f32.mrf.mxu2  ;;  %v3647_v36 = vpop.f32.mrf.mxu3  ;;  %3841 = vmatmul.bf16.gmra.mxu0 %v3737_v40  ;;  %3870 = vmatmul.bf16.gmra.mxu1 %v3737_v40 }
 0x688   : > { %v3667_v37 = vmul.f32 %v3647_v36, %v10567_v16  ;;  %v3691_v41 = vmul.f32 %v3647_v36, %v10570_v23 }
 0x68a   : > { %v3675_v44 = vadd.f32 %v3667_v37, %v10572_v33  ;;  %v3699_v47 = vadd.f32 %v3691_v41, %v10575_v30 }
 0x68c   : > { %v3683_v50 = vmul.f32 %v3675_v44, %v3618_v63  ;;  %v8480_v44 = vld [vmem:[#allocation2 + $0x640] sm:$0xf] }
 0x68e   : > { %v3707_v54 = vadd.f32 %v3699_v47, %v3683_v50 }
 0x68f   : > { %v3620_v45 = vpop.f32.mrf.mxu2  ;;  %v3649_v32 = vpop.f32.mrf.mxu3 }
 0x690   : > { %v3668_v42 = vmul.f32 %v3649_v32, %v10567_v16  ;;  %v3692_v49 = vmul.f32 %v3649_v32, %v10570_v23  ;;  %v9341_v32 = vld [vmem:[#allocation2 + $0x644] sm:$0xf] }
 0x692   : > { %v3676_v20 = vadd.f32 %v3668_v42, %v10572_v33  ;;  %v3700_v46 = vadd.f32 %v3692_v49, %v10575_v30  ;;  %v8482_v42 = vld [vmem:[#allocation2 + $0x648] sm:$0xf0] }
 0x693   : > { %v8485_v47 = vor.u32 %v9341_v32, %v8482_v42 }
 0x694   : > { %v3684_v0 = vmul.f32 %v3676_v20, %v3620_v45  ;;  %v9342_v45 = vld [vmem:[#allocation2 + $0x644] sm:$0xf0] }
 0x695   : > { %v8481_v41 = vor.u32 %v9342_v45, %v8480_v44  ;;  %4173 = vmatpush.bf16.msra.mxu1 %v8485_v47  ;;  %4287 = vmatpush.bf16.msra.mxu3 %v8485_v47 }
 0x696   : > { %v3708_v55 = vadd.f32 %v3700_v46, %v3684_v0 }
 0x697   : > { %v3623_v52 = vpop.f32.mrf.mxu2  ;;  %v3652_v27 = vpop.f32.mrf.mxu3  ;;  %4144 = vmatpush.bf16.msra.mxu0 %v8481_v41  ;;  %4258 = vmatpush.bf16.msra.mxu2 %v8481_v41 }
 0x698   : > { %v3928_v1 = vpack.c.bf16 %v3708_v55, %v3707_v54  ;;  %v3669_v57 = vmul.f32 %v3652_v27, %v10567_v16  ;;  %v3693_v25 = vmul.f32 %v3652_v27, %v10570_v23  ;;  %v8472_v54 = vld [vmem:[#allocation2 + $0x630] sm:$0xf]  ;;  %v9340_v55 = vld [vmem:[#allocation2 + $0x634] sm:$0xf0] }
 0x69a   : > { %3940 = vmatmul.bf16.vlgmr.msrb.gmra.mxu2 %v3928_v1  ;;  %3969 = vmatmul.bf16.vlgmr.msrb.gmra.mxu3 %v3928_v1  ;;  %v3677_v51 = vadd.f32 %v3669_v57, %v10572_v33  ;;  %v3701_v6 = vadd.f32 %v3693_v25, %v10575_v30  ;;  %v8473_v1 = vor.u32 %v9340_v55, %v8472_v54  ;;  %v8474_v57 = vld [vmem:[#allocation2 + $0x638] sm:$0xf0] }
 0x69c   : > { %v3685_v4 = vmul.f32 %v3677_v51, %v3623_v52  ;;  %v9339_v52 = vld [vmem:[#allocation2 + $0x634] sm:$0xf]  ;;  %4145 = vmatpush.bf16.msra.mxu0 %v8473_v1  ;;  %4259 = vmatpush.bf16.msra.mxu2 %v8473_v1 }
 0x69e   : > { %v3709_v17 = vadd.f32 %v3701_v6, %v3685_v4  ;;  %v9337_v4 = vld [vmem:[#allocation2 + $0x624] sm:$0xf]  ;;  %v8466_v6 = vld [vmem:[#allocation2 + $0x628] sm:$0xf0] }
 0x69f   : > { %v3625_v59 = vpop.f32.mrf.mxu2  ;;  %v3654_v2 = vpop.f32.mrf.mxu3 }
 0x6a0   : > { %v3670_v60 = vmul.f32 %v3654_v2, %v10567_v16  ;;  %v3694_v3 = vmul.f32 %v3654_v2, %v10570_v23 }
 0x6a2   : > { %v3678_v5 = vadd.f32 %v3670_v60, %v10572_v33  ;;  %v3702_v8 = vadd.f32 %v3694_v3, %v10575_v30  ;;  %v8464_v60 = vld [vmem:[#allocation2 + $0x620] sm:$0xf]  ;;  %v9338_v3 = vld [vmem:[#allocation2 + $0x624] sm:$0xf0] }
 0x6a4   : > { %v3686_v7 = vmul.f32 %v3678_v5, %v3625_v59  ;;  %v8477_v59 = vor.u32 %v9339_v52, %v8474_v57  ;;  %v8465_v5 = vor.u32 %v9338_v3, %v8464_v60 }
 0x6a6   : > { %v3710_v12 = vadd.f32 %v3702_v8, %v3686_v7  ;;  %4174 = vmatpush.bf16.msra.mxu1 %v8477_v59  ;;  %4288 = vmatpush.bf16.msra.mxu3 %v8477_v59  ;;  %v8469_v7 = vor.u32 %v9337_v4, %v8466_v6 }
 0x6a7   : > { %v3628_v14 = vpop.f32.mrf.mxu2  ;;  %v3657_v15 = vpop.f32.mrf.mxu3  ;;  %4146 = vmatpush.bf16.msra.mxu0 %v8465_v5  ;;  %4260 = vmatpush.bf16.msra.mxu2 %v8465_v5 }
 0x6a8   : > { %v3929_v18 = vpack.c.bf16 %v3710_v12, %v3709_v17  ;;  %v3671_v22 = vmul.f32 %v3657_v15, %v10567_v16  ;;  %v3695_v39 = vmul.f32 %v3657_v15, %v10570_v23  ;;  %v8458_v17 = vld [vmem:[#allocation2 + $0x618] sm:$0xf0] }
 0x6a9   : > { %v8461_v15 = vor.u32 %v9335_v10, %v8458_v17 }
 0x6aa   : > { %3945 = vmatmul.bf16.gmra.mxu2 %v3929_v18  ;;  %3974 = vmatmul.bf16.gmra.mxu3 %v3929_v18  ;;  %v3679_v26 = vadd.f32 %v3671_v22, %v10572_v33  ;;  %v3703_v49 = vadd.f32 %v3695_v39, %v10575_v30  ;;  %v10642_v39 = vperm.slane %v3733_v21, 1 }
 0x6ab   : > { %4175 = vmatpush.bf16.msra.mxu1 %v8469_v7  ;;  %4289 = vmatpush.bf16.msra.mxu3 %v8469_v7 }
 0x6ac   : > { %v3687_v36 = vmul.f32 %v3679_v26, %v3628_v14  ;;  %4147 = vmatpush.bf16.msra.mxu0 %v8457_v56  ;;  %4261 = vmatpush.bf16.msra.mxu2 %v8457_v56  ;;  %v10639_v26 = vperm.slane %v3733_v21, 3 }
 0x6ae   : > { %v3711_v0 = vadd.f32 %v3703_v49, %v3687_v36  ;;  %v10648_v36 = vperm.slane %v3733_v21, 0 }
 0x6af   : > { %v3630_v31 = vpop.f32.mrf.mxu2  ;;  %v3659_v24 = vpop.f32.mrf.mxu3  ;;  %4176 = vmatpush.bf16.msra.mxu1 %v8461_v15  ;;  %4290 = vmatpush.bf16.msra.mxu3 %v8461_v15 }
 0x6b0   : > { %v3672_v40 = vmul.f32 %v3659_v24, %v10567_v16  ;;  %v3696_v63 = vmul.f32 %v3659_v24, %v10570_v23  ;;  %4148 = vmatpush.bf16.msra.mxu0 %v8449_v43  ;;  %4262 = vmatpush.bf16.msra.mxu2 %v8449_v43 }
 0x6b2   : > { %v3680_v37 = vadd.f32 %v3672_v40, %v10572_v33  ;;  %v3704_v20 = vadd.f32 %v3696_v63, %v10575_v30 }
 0x6b4   : > { %v3688_v50 = vmul.f32 %v3680_v37, %v3630_v31 }
 0x6b6   : > { %v3712_v46 = vadd.f32 %v3704_v20, %v3688_v50 }
 0x6b7   : > { %v3662_v27 = vpop.f32.mrf.mxu3  ;;  %v3633_v2 = vpop.f32.mrf.mxu2 }
 0x6b8   : > { %v3930_v51 = vpack.c.bf16 %v3712_v46, %v3711_v0  ;;  %v3673_v25 = vmul.f32 %v3662_v27, %v10567_v16  ;;  %v3697_v12 = vmul.f32 %v3662_v27, %v10570_v23 }
 0x6ba   : > { %3950 = vmatmul.bf16.gmra.mxu2 %v3930_v51  ;;  %3979 = vmatmul.bf16.gmra.mxu3 %v3930_v51  ;;  %v3681_v8 = vadd.f32 %v3673_v25, %v10572_v33  ;;  %v3705_v29 = vadd.f32 %v3697_v12, %v10575_v30 }
 0x6bc   : > { %v3689_v18 = vmul.f32 %v3681_v8, %v3633_v2 }
 0x6be   : > { %v3713_v58 = vadd.f32 %v3705_v29, %v3689_v18 }
 0x6bf   : > { %v3664_v11 = vpop.f32.mrf.mxu3  ;;  %v3635_v38 = vpop.f32.mrf.mxu2 }
 0x6c0   : > { %v3674_v13 = vmul.f32 %v3664_v11, %v10567_v16  ;;  %v3698_v14 = vmul.f32 %v3664_v11, %v10570_v23  ;;  %v8453_v23 = vor.u32 %v9333_v34, %v8450_v48 }
 0x6c2   : > { %v3682_v22 = vadd.f32 %v3674_v13, %v10572_v33  ;;  %v3706_v16 = vadd.f32 %v3698_v14, %v10575_v30  ;;  %4177 = vmatpush.bf16.msra.mxu1 %v8453_v23  ;;  %4291 = vmatpush.bf16.msra.mxu3 %v8453_v23  ;;  %v10644_v30 = vperm.slane %v3733_v21, 2 }
 0x6c4   : > { %v3690_v53 = vmul.f32 %v3682_v22, %v3635_v38 }
 0x6c6   : > { %v3714_v61 = vadd.f32 %v3706_v16, %v3690_v53 }
 0x6c8   : > { %v3931_v33 = vpack.c.bf16 %v3714_v61, %v3713_v58 }
 0x6ca   : > { %3955 = vmatmul.bf16.gmra.mxu2 %v3931_v33  ;;  %3984 = vmatmul.bf16.gmra.mxu3 %v3931_v33 }
 0x6d4   : > { %v3827_v35 = vpop.f32.mrf.mxu0  ;;  %v3856_v31 = vpop.f32.mrf.mxu1 }
 0x6d5   : > { %v3877_v24 = vmul.f32 %v10639_v26, %v3856_v31  ;;  %v3903_v63 = vmul.f32 %v10644_v30, %v3856_v31 }
 0x6d7   : > { %v3886_v40 = vadd.f32 %v10642_v39, %v3877_v24  ;;  %v3912_v42 = vadd.f32 %v10648_v36, %v3903_v63 }
 0x6d9   : > { %v3894_v41 = vmul.f32 %v3886_v40, %v3827_v35 }
 0x6db   : > { %v3920_v47 = vadd.f32 %v3912_v42, %v3894_v41 }
 0x6dc   : > { %v3829_v37 = vpop.f32.mrf.mxu0  ;;  %v3858_v44 = vpop.f32.mrf.mxu1 }
 0x6dd   : > { %v3878_v45 = vmul.f32 %v10639_v26, %v3858_v44  ;;  %v3904_v32 = vmul.f32 %v10644_v30, %v3858_v44 }
 0x6df   : > { %v3887_v49 = vadd.f32 %v10642_v39, %v3878_v45  ;;  %v3913_v20 = vadd.f32 %v10648_v36, %v3904_v32 }
 0x6e1   : > { %v3895_v50 = vmul.f32 %v3887_v49, %v3829_v37 }
 0x6e3   : > { %v3921_v0 = vadd.f32 %v3913_v20, %v3895_v50 }
 0x6e4   : > { %v3832_v46 = vpop.f32.mrf.mxu0  ;;  %v3861_v54 = vpop.f32.mrf.mxu1 }
 0x6e5   : > { %v4057_v55 = vpack.c.bf16 %v3921_v0, %v3920_v47  ;;  %v3879_v52 = vmul.f32 %v10639_v26, %v3861_v54  ;;  %v3905_v1 = vmul.f32 %v10644_v30, %v3861_v54 }
 0x6e7   : > { %4149 = vmatmul.bf16.vlgmr.msra.gmra.mxu0 %v4057_v55  ;;  %4178 = vmatmul.bf16.vlgmr.msra.gmra.mxu1 %v4057_v55  ;;  %v3888_v27 = vadd.f32 %v10642_v39, %v3879_v52  ;;  %v3914_v60 = vadd.f32 %v10648_v36, %v3905_v1 }
 0x6e9   : > { %v3896_v25 = vmul.f32 %v3888_v27, %v3832_v46 }
 0x6eb   : > { %v3922_v6 = vadd.f32 %v3914_v60, %v3896_v25 }
 0x6ec   : > { %v3834_v57 = vpop.f32.mrf.mxu0  ;;  %v3863_v51 = vpop.f32.mrf.mxu1 }
 0x6ed   : > { %v3880_v59 = vmul.f32 %v10639_v26, %v3863_v51  ;;  %v3906_v2 = vmul.f32 %v10644_v30, %v3863_v51 }
 0x6ef   : > { %v3889_v3 = vadd.f32 %v10642_v39, %v3880_v59  ;;  %v3915_v5 = vadd.f32 %v10648_v36, %v3906_v2 }
 0x6f1   : > { %v3897_v4 = vmul.f32 %v3889_v3, %v3834_v57 }
 0x6f3   : > { %v3923_v7 = vadd.f32 %v3915_v5, %v3897_v4 }
 0x6f4   : > { %v3837_v8 = vpop.f32.mrf.mxu0  ;;  %v3866_v9 = vpop.f32.mrf.mxu1 }
 0x6f5   : > { %v4058_v19 = vpack.c.bf16 %v3923_v7, %v3922_v6  ;;  %v3881_v10 = vmul.f32 %v10639_v26, %v3866_v9  ;;  %v3907_v56 = vmul.f32 %v10644_v30, %v3866_v9  ;;  %v8568_v9 = vld [vmem:[#allocation2 + $0x6f0] sm:$0xf] }
 0x6f7   : > { %4154 = vmatmul.bf16.gmra.mxu0 %v4058_v19  ;;  %4183 = vmatmul.bf16.gmra.mxu1 %v4058_v19  ;;  %v3890_v11 = vadd.f32 %v10642_v39, %v3881_v10  ;;  %v3916_v18 = vadd.f32 %v10648_v36, %v3907_v56  ;;  %v9364_v19 = vld [vmem:[#allocation2 + $0x6f4] sm:$0xf0]  ;;  %v9363_v10 = vld [vmem:[#allocation2 + $0x6f4] sm:$0xf]  ;;  %v8570_v56 = vld [vmem:[#allocation2 + $0x6f8] sm:$0xf0] }
 0x6f9   : > { %v3898_v15 = vmul.f32 %v3890_v11, %v3837_v8  ;;  %v8569_v11 = vor.u32 %v9364_v19, %v8568_v9 }
 0x6fb   : > { %v3924_v34 = vadd.f32 %v3916_v18, %v3898_v15  ;;  %4464 = vmatpush.bf16.msrb.mxu0 %v8569_v11  ;;  %4578 = vmatpush.bf16.msrb.mxu2 %v8569_v11  ;;  %v9352_v11 = vld [vmem:[#allocation2 + $0x694] sm:$0xf0] }
 0x6fc   : > { %v3839_v17 = vpop.f32.mrf.mxu0  ;;  %v3868_v12 = vpop.f32.mrf.mxu1 }
 0x6fd   : > { %v3882_v13 = vmul.f32 %v10639_v26, %v3868_v12  ;;  %v3908_v14 = vmul.f32 %v10644_v30, %v3868_v12 }
 0x6ff   : > { %v3891_v22 = vadd.f32 %v10642_v39, %v3882_v13  ;;  %v3917_v62 = vadd.f32 %v10648_v36, %v3908_v14  ;;  %v8573_v13 = vor.u32 %v9363_v10, %v8570_v56  ;;  %v8520_v10 = vld [vmem:[#allocation2 + $0x690] sm:$0xf]  ;;  %v9351_v56 = vld [vmem:[#allocation2 + $0x694] sm:$0xf] }
 0x701   : > { %v3899_v28 = vmul.f32 %v3891_v22, %v3839_v17  ;;  %4493 = vmatpush.bf16.msrb.mxu1 %v8573_v13  ;;  %v8560_v22 = vld [vmem:[#allocation2 + $0x6e0] sm:$0xf]  ;;  %4607 = vmatpush.bf16.msrb.mxu3 %v8573_v13  ;;  %v8522_v13 = vld [vmem:[#allocation2 + $0x698] sm:$0xf0] }
 0x703   : > { %v3925_v38 = vadd.f32 %v3917_v62, %v3899_v28  ;;  %v9362_v28 = vld [vmem:[#allocation2 + $0x6e4] sm:$0xf0]  ;;  %v9361_v62 = vld [vmem:[#allocation2 + $0x6e4] sm:$0xf] }
 0x704   : > { %v3871_v43 = vpop.f32.mrf.mxu1  ;;  %v3842_v29 = vpop.f32.mrf.mxu0 }
 0x705   : > { %v4059_v48 = vpack.c.bf16 %v3925_v38, %v3924_v34  ;;  %v3883_v53 = vmul.f32 %v10639_v26, %v3871_v43  ;;  %v3909_v23 = vmul.f32 %v10644_v30, %v3871_v43  ;;  %v8561_v34 = vor.u32 %v9362_v28, %v8560_v22  ;;  %v8562_v38 = vld [vmem:[#allocation2 + $0x6e8] sm:$0xf0]  ;;  %v9350_v22 = vld [vmem:[#allocation2 + $0x684] sm:$0xf0]  ;;  %v9349_v28 = vld [vmem:[#allocation2 + $0x684] sm:$0xf] }
 0x707   : > { %4159 = vmatmul.bf16.gmra.mxu0 %v4059_v48  ;;  %4188 = vmatmul.bf16.gmra.mxu1 %v4059_v48  ;;  %v3892_v16 = vadd.f32 %v10642_v39, %v3883_v53  ;;  %v3918_v35 = vadd.f32 %v10648_v36, %v3909_v23 }
 0x708   : > { %4465 = vmatpush.bf16.msrb.mxu0 %v8561_v34  ;;  %4579 = vmatpush.bf16.msrb.mxu2 %v8561_v34  ;;  %v8514_v34 = vld [vmem:[#allocation2 + $0x688] sm:$0xf0] }
 0x709   : > { %v3900_v21 = vmul.f32 %v3892_v16, %v3842_v29  ;;  %v8565_v29 = vor.u32 %v9361_v62, %v8562_v38 }
 0x70b   : > { %v3926_v37 = vadd.f32 %v3918_v35, %v3900_v21  ;;  %4494 = vmatpush.bf16.msrb.mxu1 %v8565_v29  ;;  %4608 = vmatpush.bf16.msrb.mxu3 %v8565_v29  ;;  %v8554_v35 = vld [vmem:[#allocation2 + $0x6d8] sm:$0xf0] }
 0x70c   : > { %v3873_v58 = vpop.f32.mrf.mxu1  ;;  %v3844_v24 = vpop.f32.mrf.mxu0 }
 0x70d   : > { %v3884_v61 = vmul.f32 %v10639_v26, %v3873_v58  ;;  %v3910_v33 = vmul.f32 %v10644_v30, %v3873_v58  ;;  %v8552_v58 = vld [vmem:[#allocation2 + $0x6d0] sm:$0xf] }
 0x70f   : > { %v3893_v31 = vadd.f32 %v10642_v39, %v3884_v61  ;;  %v3919_v63 = vadd.f32 %v10648_v36, %v3910_v33  ;;  %v9360_v61 = vld [vmem:[#allocation2 + $0x6d4] sm:$0xf0]  ;;  %v9359_v33 = vld [vmem:[#allocation2 + $0x6d4] sm:$0xf] }
 0x710   : > { %v8553_v21 = vor.u32 %v9360_v61, %v8552_v58 }
 0x711   : > { %v3901_v40 = vmul.f32 %v3893_v31, %v3844_v24  ;;  %v8557_v24 = vor.u32 %v9359_v33, %v8554_v35 }
 0x712   : > { %4466 = vmatpush.bf16.msrb.mxu0 %v8553_v21  ;;  %4580 = vmatpush.bf16.msrb.mxu2 %v8553_v21 }
 0x713   : > { %v3927_v44 = vadd.f32 %v3919_v63, %v3901_v40  ;;  %4495 = vmatpush.bf16.msrb.mxu1 %v8557_v24  ;;  %v8544_v40 = vld [vmem:[#allocation2 + $0x6c0] sm:$0xf]  ;;  %v9358_v63 = vld [vmem:[#allocation2 + $0x6c4] sm:$0xf0]  ;;  %4609 = vmatpush.bf16.msrb.mxu3 %v8557_v24 }
 0x715   : > { %v4060_v45 = vpack.c.bf16 %v3927_v44, %v3926_v37  ;;  %v9357_v37 = vld [vmem:[#allocation2 + $0x6c4] sm:$0xf]  ;;  %v8545_v44 = vor.u32 %v9358_v63, %v8544_v40  ;;  %v4056_v63 = vld [vmem:[#allocation5 + $0x30] sm:$0xf] }
 0x717   : > { %4164 = vmatmul.bf16.gmra.mxu0 %v4060_v45  ;;  %4193 = vmatmul.bf16.gmra.mxu1 %v4060_v45  ;;  %v8546_v45 = vld [vmem:[#allocation2 + $0x6c8] sm:$0xf0] }
 0x718   : > { %4467 = vmatpush.bf16.msrb.mxu0 %v8545_v44  ;;  %4581 = vmatpush.bf16.msrb.mxu2 %v8545_v44 }
 0x71d   : > { %v3941_v32 = vpop.f32.mrf.mxu2  ;;  %v3970_v41 = vpop.f32.mrf.mxu3 }
 0x71e   : > { %v3990_v42 = vmul.f32 %v3970_v41, %v10639_v26  ;;  %v4014_v47 = vmul.f32 %v3970_v41, %v10644_v30  ;;  %v8549_v41 = vor.u32 %v9357_v37, %v8546_v45  ;;  %v10714_v45 = vperm.slane %v4056_v63, 1 }
 0x720   : > { %v3998_v49 = vadd.f32 %v3990_v42, %v10642_v39  ;;  %v4022_v52 = vadd.f32 %v4014_v47, %v10648_v36  ;;  %4496 = vmatpush.bf16.msrb.mxu1 %v8549_v41  ;;  %4610 = vmatpush.bf16.msrb.mxu3 %v8549_v41 }
 0x722   : > { %v4006_v54 = vmul.f32 %v3998_v49, %v3941_v32 }
 0x724   : > { %v4030_v57 = vadd.f32 %v4022_v52, %v4006_v54  ;;  %v8538_v52 = vld [vmem:[#allocation2 + $0x6b8] sm:$0xf0] }
 0x725   : > { %v3943_v50 = vpop.f32.mrf.mxu2  ;;  %v3972_v20 = vpop.f32.mrf.mxu3 }
 0x726   : > { %v3991_v0 = vmul.f32 %v3972_v20, %v10639_v26  ;;  %v4015_v46 = vmul.f32 %v3972_v20, %v10644_v30 }
 0x728   : > { %v3999_v55 = vadd.f32 %v3991_v0, %v10642_v39  ;;  %v4023_v1 = vadd.f32 %v4015_v46, %v10648_v36  ;;  %v8536_v0 = vld [vmem:[#allocation2 + $0x6b0] sm:$0xf]  ;;  %v9356_v46 = vld [vmem:[#allocation2 + $0x6b4] sm:$0xf0] }
 0x729   : > { %v8537_v54 = vor.u32 %v9356_v46, %v8536_v0 }
 0x72a   : > { %v4007_v27 = vmul.f32 %v3999_v55, %v3943_v50  ;;  %v9355_v55 = vld [vmem:[#allocation2 + $0x6b4] sm:$0xf] }
 0x72b   : > { %4468 = vmatpush.bf16.msrb.mxu0 %v8537_v54  ;;  %4582 = vmatpush.bf16.msrb.mxu2 %v8537_v54 }
 0x72c   : > { %v4031_v51 = vadd.f32 %v4023_v1, %v4007_v27 }
 0x72d   : > { %v3946_v59 = vpop.f32.mrf.mxu2  ;;  %v3975_v2 = vpop.f32.mrf.mxu3 }
 0x72e   : > { %v4251_v25 = vpack.c.bf16 %v4031_v51, %v4030_v57  ;;  %v3992_v60 = vmul.f32 %v3975_v2, %v10639_v26  ;;  %v4016_v6 = vmul.f32 %v3975_v2, %v10644_v30  ;;  %v8541_v57 = vor.u32 %v9355_v55, %v8538_v52 }
 0x730   : > { %4263 = vmatmul.bf16.vlgmr.msra.gmra.mxu2 %v4251_v25  ;;  %4292 = vmatmul.bf16.vlgmr.msra.gmra.mxu3 %v4251_v25  ;;  %v4000_v3 = vadd.f32 %v3992_v60, %v10642_v39  ;;  %v4024_v14 = vadd.f32 %v4016_v6, %v10648_v36  ;;  %v8528_v25 = vld [vmem:[#allocation2 + $0x6a0] sm:$0xf]  ;;  %v9354_v60 = vld [vmem:[#allocation2 + $0x6a4] sm:$0xf0] }
 0x731   : > { %4497 = vmatpush.bf16.msrb.mxu1 %v8541_v57  ;;  %4611 = vmatpush.bf16.msrb.mxu3 %v8541_v57 }
 0x732   : > { %v4008_v17 = vmul.f32 %v4000_v3, %v3946_v59  ;;  %v9353_v3 = vld [vmem:[#allocation2 + $0x6a4] sm:$0xf] }
 0x734   : > { %v4032_v43 = vadd.f32 %v4024_v14, %v4008_v17 }
 0x735   : > { %v3948_v4 = vpop.f32.mrf.mxu2  ;;  %v3977_v5 = vpop.f32.mrf.mxu3 }
 0x736   : > { %v3993_v7 = vmul.f32 %v3977_v5, %v10639_v26  ;;  %v4017_v8 = vmul.f32 %v3977_v5, %v10644_v30  ;;  %v8530_v5 = vld [vmem:[#allocation2 + $0x6a8] sm:$0xf0] }
 0x738   : > { %v4001_v12 = vadd.f32 %v3993_v7, %v10642_v39  ;;  %v4025_v18 = vadd.f32 %v4017_v8, %v10648_v36  ;;  %v8533_v8 = vor.u32 %v9353_v3, %v8530_v5 }
 0x73a   : > { %v4009_v15 = vmul.f32 %v4001_v12, %v3948_v4  ;;  %v8529_v4 = vor.u32 %v9354_v60, %v8528_v25  ;;  %4498 = vmatpush.bf16.msrb.mxu1 %v8533_v8  ;;  %4612 = vmatpush.bf16.msrb.mxu3 %v8533_v8  ;;  %v8521_v12 = vor.u32 %v9352_v11, %v8520_v10 }
 0x73c   : > { %v4033_v48 = vadd.f32 %v4025_v18, %v4009_v15  ;;  %4469 = vmatpush.bf16.msrb.mxu0 %v8529_v4  ;;  %4583 = vmatpush.bf16.msrb.mxu2 %v8529_v4  ;;  %v8525_v15 = vor.u32 %v9351_v56, %v8522_v13  ;;  %v8512_v18 = vld [vmem:[#allocation2 + $0x680] sm:$0xf] }
 0x73d   : > { %v3951_v53 = vpop.f32.mrf.mxu2  ;;  %v3980_v16 = vpop.f32.mrf.mxu3  ;;  %v8513_v62 = vor.u32 %v9350_v22, %v8512_v18 }
 0x73e   : > { %v4252_v23 = vpack.c.bf16 %v4033_v48, %v4032_v43  ;;  %v3994_v31 = vmul.f32 %v3980_v16, %v10639_v26  ;;  %v4018_v50 = vmul.f32 %v3980_v16, %v10644_v30  ;;  %4499 = vmatpush.bf16.msrb.mxu1 %v8525_v15  ;;  %4613 = vmatpush.bf16.msrb.mxu3 %v8525_v15 }
 0x73f   : > { %v8517_v43 = vor.u32 %v9349_v28, %v8514_v34 }
 0x740   : > { %4268 = vmatmul.bf16.gmra.mxu2 %v4252_v23  ;;  %4297 = vmatmul.bf16.gmra.mxu3 %v4252_v23  ;;  %v4002_v32 = vadd.f32 %v3994_v31, %v10642_v39  ;;  %v4026_v51 = vadd.f32 %v4018_v50, %v10648_v36 }
 0x741   : > { %4470 = vmatpush.bf16.msrb.mxu0 %v8521_v12  ;;  %4584 = vmatpush.bf16.msrb.mxu2 %v8521_v12 }
 0x742   : > { %v4010_v27 = vmul.f32 %v4002_v32, %v3951_v53  ;;  %4500 = vmatpush.bf16.msrb.mxu1 %v8517_v43  ;;  %4614 = vmatpush.bf16.msrb.mxu3 %v8517_v43 }
 0x744   : > { %v4034_v6 = vadd.f32 %v4026_v51, %v4010_v27 }
 0x745   : > { %v3953_v42 = vpop.f32.mrf.mxu2  ;;  %v3982_v49 = vpop.f32.mrf.mxu3  ;;  %4471 = vmatpush.bf16.msrb.mxu0 %v8513_v62  ;;  %4585 = vmatpush.bf16.msrb.mxu2 %v8513_v62 }
 0x746   : > { %v3995_v20 = vmul.f32 %v3982_v49, %v10639_v26  ;;  %v4019_v47 = vmul.f32 %v3982_v49, %v10644_v30  ;;  %v10720_v49 = vperm.slane %v4056_v63, 0 }
 0x748   : > { %v4003_v1 = vadd.f32 %v3995_v20, %v10642_v39  ;;  %v4027_v2 = vadd.f32 %v4019_v47, %v10648_v36 }
 0x74a   : > { %v4011_v59 = vmul.f32 %v4003_v1, %v3953_v42 }
 0x74c   : > { %v4035_v7 = vadd.f32 %v4027_v2, %v4011_v59 }
 0x74d   : > { %v3985_v9 = vpop.f32.mrf.mxu3  ;;  %v3956_v17 = vpop.f32.mrf.mxu2 }
 0x74e   : > { %v4253_v19 = vpack.c.bf16 %v4035_v7, %v4034_v6  ;;  %v3996_v14 = vmul.f32 %v3985_v9, %v10639_v26  ;;  %v4020_v29 = vmul.f32 %v3985_v9, %v10644_v30 }
 0x750   : > { %4273 = vmatmul.bf16.gmra.mxu2 %v4253_v19  ;;  %4302 = vmatmul.bf16.gmra.mxu3 %v4253_v19  ;;  %v4004_v38 = vadd.f32 %v3996_v14, %v10642_v39  ;;  %v4028_v33 = vadd.f32 %v4020_v29, %v10648_v36 }
 0x752   : > { %v4012_v23 = vmul.f32 %v4004_v38, %v3956_v17 }
 0x754   : > { %v4036_v31 = vadd.f32 %v4028_v33, %v4012_v23 }
 0x755   : > { %v3987_v48 = vpop.f32.mrf.mxu3  ;;  %v3958_v61 = vpop.f32.mrf.mxu2 }
 0x756   : > { %v3997_v53 = vmul.f32 %v3987_v48, %v10639_v26  ;;  %v4021_v16 = vmul.f32 %v3987_v48, %v10644_v30  ;;  %v10711_v26 = vperm.slane %v4056_v63, 3 }
 0x758   : > { %v4005_v58 = vadd.f32 %v3997_v53, %v10642_v39  ;;  %v4029_v35 = vadd.f32 %v4021_v16, %v10648_v36  ;;  %v10716_v39 = vperm.slane %v4056_v63, 2 }
 0x75a   : > { %v4013_v21 = vmul.f32 %v4005_v58, %v3958_v61 }
 0x75c   : > { %v4037_v24 = vadd.f32 %v4029_v35, %v4013_v21 }
 0x75e   : > { %v4254_v40 = vpack.c.bf16 %v4037_v24, %v4036_v31 }
 0x760   : > { %4278 = vmatmul.bf16.gmra.mxu2 %v4254_v40  ;;  %4307 = vmatmul.bf16.gmra.mxu3 %v4254_v40 }
 0x764   : > { %v4150_v30 = vpop.f32.mrf.mxu0  ;;  %v4179_v37 = vpop.f32.mrf.mxu1 }
 0x765   : > { %v4200_v44 = vmul.f32 %v10711_v26, %v4179_v37  ;;  %v4226_v42 = vmul.f32 %v10716_v39, %v4179_v37 }
 0x767   : > { %v4209_v32 = vadd.f32 %v10714_v45, %v4200_v44  ;;  %v4235_v46 = vadd.f32 %v10720_v49, %v4226_v42 }
 0x769   : > { %v4217_v47 = vmul.f32 %v4209_v32, %v4150_v30 }
 0x76b   : > { %v4243_v52 = vadd.f32 %v4235_v46, %v4217_v47 }
 0x76c   : > { %v4152_v41 = vpop.f32.mrf.mxu0  ;;  %v4181_v36 = vpop.f32.mrf.mxu1 }
 0x76d   : > { %v4201_v50 = vmul.f32 %v10711_v26, %v4181_v36  ;;  %v4227_v20 = vmul.f32 %v10716_v39, %v4181_v36 }
 0x76f   : > { %v4210_v0 = vadd.f32 %v10714_v45, %v4201_v50  ;;  %v4236_v55 = vadd.f32 %v10720_v49, %v4227_v20 }
 0x771   : > { %v4218_v54 = vmul.f32 %v4210_v0, %v4152_v41 }
 0x773   : > { %v4244_v27 = vadd.f32 %v4236_v55, %v4218_v54 }
 0x774   : > { %v4155_v1 = vpop.f32.mrf.mxu0  ;;  %v4184_v57 = vpop.f32.mrf.mxu1 }
 0x775   : > { %v4380_v51 = vpack.c.bf16 %v4244_v27, %v4243_v52  ;;  %v4202_v59 = vmul.f32 %v10711_v26, %v4184_v57  ;;  %v4228_v3 = vmul.f32 %v10716_v39, %v4184_v57 }
 0x777   : > { %4472 = vmatmul.bf16.vlgmr.msrb.gmra.mxu0 %v4380_v51  ;;  %4501 = vmatmul.bf16.vlgmr.msrb.gmra.mxu1 %v4380_v51  ;;  %v4211_v2 = vadd.f32 %v10714_v45, %v4202_v59  ;;  %v4237_v8 = vadd.f32 %v10720_v49, %v4228_v3 }
 0x779   : > { %v4219_v6 = vmul.f32 %v4211_v2, %v4155_v1 }
 0x77b   : > { %v4245_v10 = vadd.f32 %v4237_v8, %v4219_v6  ;;  %v8632_v8 = vld [vmem:[#allocation2 + $0x770] sm:$0xf] }
 0x77c   : > { %v4157_v25 = vpop.f32.mrf.mxu0  ;;  %v4186_v60 = vpop.f32.mrf.mxu1 }
 0x77d   : > { %v4203_v4 = vmul.f32 %v10711_v26, %v4186_v60  ;;  %v4229_v5 = vmul.f32 %v10716_v39, %v4186_v60 }
 0x77f   : > { %v4212_v7 = vadd.f32 %v10714_v45, %v4203_v4  ;;  %v4238_v19 = vadd.f32 %v10720_v49, %v4229_v5 }
 0x781   : > { %v4220_v9 = vmul.f32 %v4212_v7, %v4157_v25 }
 0x783   : > { %v4246_v11 = vadd.f32 %v4238_v19, %v4220_v9  ;;  %v9380_v9 = vld [vmem:[#allocation2 + $0x774] sm:$0xf0]  ;;  %v9379_v19 = vld [vmem:[#allocation2 + $0x774] sm:$0xf] }
 0x784   : > { %v4160_v56 = vpop.f32.mrf.mxu0  ;;  %v4189_v17 = vpop.f32.mrf.mxu1 }
 0x785   : > { %v4381_v12 = vpack.c.bf16 %v4246_v11, %v4245_v10  ;;  %v4204_v13 = vmul.f32 %v10711_v26, %v4189_v17  ;;  %v4230_v22 = vmul.f32 %v10716_v39, %v4189_v17  ;;  %v8633_v10 = vor.u32 %v9380_v9, %v8632_v8  ;;  %v8634_v11 = vld [vmem:[#allocation2 + $0x778] sm:$0xf0]  ;;  %v8584_v9 = vld [vmem:[#allocation2 + $0x710] sm:$0xf] }
 0x787   : > { %4477 = vmatmul.bf16.gmra.mxu0 %v4381_v12  ;;  %4506 = vmatmul.bf16.gmra.mxu1 %v4381_v12  ;;  %v4213_v14 = vadd.f32 %v10714_v45, %v4204_v13  ;;  %v4239_v43 = vadd.f32 %v10720_v49, %v4230_v22  ;;  %v8624_v12 = vld [vmem:[#allocation2 + $0x760] sm:$0xf]  ;;  %v9378_v13 = vld [vmem:[#allocation2 + $0x764] sm:$0xf0] }
 0x788   : > { %4787 = vmatpush.bf16.msra.mxu0 %v8633_v10  ;;  %4901 = vmatpush.bf16.msra.mxu2 %v8633_v10  ;;  %v8625_v22 = vor.u32 %v9378_v13, %v8624_v12  ;;  %v9367_v10 = vld [vmem:[#allocation2 + $0x714] sm:$0xf] }
 0x789   : > { %v4221_v34 = vmul.f32 %v4213_v14, %v4160_v56  ;;  %v8637_v56 = vor.u32 %v9379_v19, %v8634_v11  ;;  %v9377_v14 = vld [vmem:[#allocation2 + $0x764] sm:$0xf]  ;;  %v9368_v19 = vld [vmem:[#allocation2 + $0x714] sm:$0xf0] }
 0x78a   : > { %v8585_v11 = vor.u32 %v9368_v19, %v8584_v9 }
 0x78b   : > { %v4247_v53 = vadd.f32 %v4239_v43, %v4221_v34  ;;  %4816 = vmatpush.bf16.msra.mxu1 %v8637_v56  ;;  %4930 = vmatpush.bf16.msra.mxu3 %v8637_v56  ;;  %v8586_v56 = vld [vmem:[#allocation2 + $0x718] sm:$0xf0] }
 0x78c   : > { %v4162_v15 = vpop.f32.mrf.mxu0  ;;  %v4191_v18 = vpop.f32.mrf.mxu1  ;;  %4788 = vmatpush.bf16.msra.mxu0 %v8625_v22  ;;  %4902 = vmatpush.bf16.msra.mxu2 %v8625_v22  ;;  %v8576_v22 = vld [vmem:[#allocation2 + $0x700] sm:$0xf] }
 0x78d   : > { %v4205_v28 = vmul.f32 %v10711_v26, %v4191_v18  ;;  %v4231_v62 = vmul.f32 %v10716_v39, %v4191_v18 }
 0x78f   : > { %v4214_v38 = vadd.f32 %v10714_v45, %v4205_v28  ;;  %v4240_v29 = vadd.f32 %v10720_v49, %v4231_v62  ;;  %v8626_v28 = vld [vmem:[#allocation2 + $0x768] sm:$0xf0] }
 0x790   : > { %v8629_v43 = vor.u32 %v9377_v14, %v8626_v28  ;;  %v8589_v14 = vor.u32 %v9367_v10, %v8586_v56  ;;  %v9366_v28 = vld [vmem:[#allocation2 + $0x704] sm:$0xf0] }
 0x791   : > { %v4222_v48 = vmul.f32 %v4214_v38, %v4162_v15 }
 0x792   : > { %4817 = vmatpush.bf16.msra.mxu1 %v8629_v43  ;;  %4931 = vmatpush.bf16.msra.mxu3 %v8629_v43  ;;  %v8578_v43 = vld [vmem:[#allocation2 + $0x708] sm:$0xf0] }
 0x793   : > { %v4248_v16 = vadd.f32 %v4240_v29, %v4222_v48 }
 0x794   : > { %v4194_v23 = vpop.f32.mrf.mxu1  ;;  %v4165_v61 = vpop.f32.mrf.mxu0 }
 0x795   : > { %v4382_v58 = vpack.c.bf16 %v4248_v16, %v4247_v53  ;;  %v4206_v33 = vmul.f32 %v10711_v26, %v4194_v23  ;;  %v4232_v31 = vmul.f32 %v10716_v39, %v4194_v23  ;;  %v8616_v53 = vld [vmem:[#allocation2 + $0x750] sm:$0xf]  ;;  %v9376_v16 = vld [vmem:[#allocation2 + $0x754] sm:$0xf0]  ;;  %v9375_v23 = vld [vmem:[#allocation2 + $0x754] sm:$0xf] }
 0x797   : > { %4482 = vmatmul.bf16.gmra.mxu0 %v4382_v58  ;;  %4511 = vmatmul.bf16.gmra.mxu1 %v4382_v58  ;;  %v4215_v21 = vadd.f32 %v10714_v45, %v4206_v33  ;;  %v4241_v44 = vadd.f32 %v10720_v49, %v4232_v31  ;;  %v8617_v58 = vor.u32 %v9376_v16, %v8616_v53 }
 0x799   : > { %v4223_v63 = vmul.f32 %v4215_v21, %v4165_v61  ;;  %v8618_v61 = vld [vmem:[#allocation2 + $0x758] sm:$0xf0]  ;;  %4789 = vmatpush.bf16.msra.mxu0 %v8617_v58  ;;  %4903 = vmatpush.bf16.msra.mxu2 %v8617_v58 }
 0x79a   : > { %v8621_v31 = vor.u32 %v9375_v23, %v8618_v61 }
 0x79b   : > { %v4249_v36 = vadd.f32 %v4241_v44, %v4223_v63  ;;  %v8608_v63 = vld [vmem:[#allocation2 + $0x740] sm:$0xf] }
 0x79c   : > { %v4196_v35 = vpop.f32.mrf.mxu1  ;;  %v4167_v37 = vpop.f32.mrf.mxu0  ;;  %4818 = vmatpush.bf16.msra.mxu1 %v8621_v31  ;;  %4932 = vmatpush.bf16.msra.mxu3 %v8621_v31 }
 0x79d   : > { %v4207_v24 = vmul.f32 %v10711_v26, %v4196_v35  ;;  %v4233_v40 = vmul.f32 %v10716_v39, %v4196_v35 }
 0x79f   : > { %v4216_v30 = vadd.f32 %v10714_v45, %v4207_v24  ;;  %v4242_v41 = vadd.f32 %v10720_v49, %v4233_v40 }
 0x7a1   : > { %v4224_v32 = vmul.f32 %v4216_v30, %v4167_v37  ;;  %v9374_v30 = vld [vmem:[#allocation2 + $0x744] sm:$0xf0]  ;;  %v9373_v37 = vld [vmem:[#allocation2 + $0x744] sm:$0xf] }
 0x7a3   : > { %v4250_v42 = vadd.f32 %v4242_v41, %v4224_v32  ;;  %v8609_v41 = vor.u32 %v9374_v30, %v8608_v63 }
 0x7a5   : > { %v4383_v50 = vpack.c.bf16 %v4250_v42, %v4249_v36  ;;  %v8610_v36 = vld [vmem:[#allocation2 + $0x748] sm:$0xf0]  ;;  %4790 = vmatpush.bf16.msra.mxu0 %v8609_v41  ;;  %4904 = vmatpush.bf16.msra.mxu2 %v8609_v41 }
 0x7a7   : > { %4487 = vmatmul.bf16.gmra.mxu0 %v4383_v50  ;;  %4516 = vmatmul.bf16.gmra.mxu1 %v4383_v50  ;;  %v8613_v50 = vor.u32 %v9373_v37, %v8610_v36  ;;  %v4379_v37 = vld [vmem:[#allocation5 + $0x34] sm:$0xf] }
 0x7a8   : > { %v10783_v41 = vperm.slane %v4379_v37, 3 }
 0x7a9   : > { %4819 = vmatpush.bf16.msra.mxu1 %v8613_v50  ;;  %4933 = vmatpush.bf16.msra.mxu3 %v8613_v50 }
 0x7b3   : > { %v4264_v20 = vpop.f32.mrf.mxu2  ;;  %v4293_v47 = vpop.f32.mrf.mxu3 }
 0x7b4   : > { %v4313_v0 = vmul.f32 %v4293_v47, %v10711_v26  ;;  %v4337_v52 = vmul.f32 %v4293_v47, %v10716_v39  ;;  %v8600_v47 = vld [vmem:[#allocation2 + $0x730] sm:$0xf] }
 0x7b6   : > { %v4321_v46 = vadd.f32 %v4313_v0, %v10714_v45  ;;  %v4345_v59 = vadd.f32 %v4337_v52, %v10720_v49  ;;  %v9372_v0 = vld [vmem:[#allocation2 + $0x734] sm:$0xf0] }
 0x7b8   : > { %v4329_v57 = vmul.f32 %v4321_v46, %v4264_v20  ;;  %v8601_v46 = vor.u32 %v9372_v0, %v8600_v47 }
 0x7ba   : > { %v4353_v60 = vadd.f32 %v4345_v59, %v4329_v57  ;;  %4791 = vmatpush.bf16.msra.mxu0 %v8601_v46  ;;  %4905 = vmatpush.bf16.msra.mxu2 %v8601_v46  ;;  %v9370_v57 = vld [vmem:[#allocation2 + $0x724] sm:$0xf0]  ;;  %v10792_v46 = vperm.slane %v4379_v37, 0 }
 0x7bb   : > { %v4266_v54 = vpop.f32.mrf.mxu2  ;;  %v4295_v55 = vpop.f32.mrf.mxu3 }
 0x7bc   : > { %v4314_v27 = vmul.f32 %v4295_v55, %v10711_v26  ;;  %v4338_v1 = vmul.f32 %v4295_v55, %v10716_v39  ;;  %v8602_v55 = vld [vmem:[#allocation2 + $0x738] sm:$0xf0] }
 0x7be   : > { %v4322_v51 = vadd.f32 %v4314_v27, %v10714_v45  ;;  %v4346_v25 = vadd.f32 %v4338_v1, %v10720_v49  ;;  %v8592_v1 = vld [vmem:[#allocation2 + $0x720] sm:$0xf] }
 0x7c0   : > { %v4330_v2 = vmul.f32 %v4322_v51, %v4266_v54  ;;  %v9371_v54 = vld [vmem:[#allocation2 + $0x734] sm:$0xf]  ;;  %v9369_v51 = vld [vmem:[#allocation2 + $0x724] sm:$0xf] }
 0x7c1   : > { %v8605_v52 = vor.u32 %v9371_v54, %v8602_v55 }
 0x7c2   : > { %v4354_v3 = vadd.f32 %v4346_v25, %v4330_v2  ;;  %v8593_v25 = vor.u32 %v9370_v57, %v8592_v1 }
 0x7c3   : > { %v4269_v4 = vpop.f32.mrf.mxu2  ;;  %v4298_v5 = vpop.f32.mrf.mxu3  ;;  %4820 = vmatpush.bf16.msra.mxu1 %v8605_v52  ;;  %4934 = vmatpush.bf16.msra.mxu3 %v8605_v52 }
 0x7c4   : > { %v4574_v6 = vpack.c.bf16 %v4354_v3, %v4353_v60  ;;  %v4315_v7 = vmul.f32 %v4298_v5, %v10711_v26  ;;  %v4339_v62 = vmul.f32 %v4298_v5, %v10716_v39  ;;  %v8594_v60 = vld [vmem:[#allocation2 + $0x728] sm:$0xf0]  ;;  %4792 = vmatpush.bf16.msra.mxu0 %v8593_v25  ;;  %4906 = vmatpush.bf16.msra.mxu2 %v8593_v25 }
 0x7c6   : > { %4586 = vmatmul.bf16.vlgmr.msrb.gmra.mxu2 %v4574_v6  ;;  %4615 = vmatmul.bf16.vlgmr.msrb.gmra.mxu3 %v4574_v6  ;;  %v4323_v17 = vadd.f32 %v4315_v7, %v10714_v45  ;;  %v4347_v33 = vadd.f32 %v4339_v62, %v10720_v49  ;;  %v8597_v6 = vor.u32 %v9369_v51, %v8594_v60  ;;  %v9365_v62 = vld [vmem:[#allocation2 + $0x704] sm:$0xf] }
 0x7c8   : > { %v4331_v48 = vmul.f32 %v4323_v17, %v4269_v4  ;;  %4821 = vmatpush.bf16.msra.mxu1 %v8597_v6  ;;  %4935 = vmatpush.bf16.msra.mxu3 %v8597_v6 }
 0x7c9   : > { %4793 = vmatpush.bf16.msra.mxu0 %v8585_v11  ;;  %4907 = vmatpush.bf16.msra.mxu2 %v8585_v11 }
 0x7ca   : > { %v4355_v24 = vadd.f32 %v4347_v33, %v4331_v48 }
 0x7cb   : > { %v4271_v15 = vpop.f32.mrf.mxu2  ;;  %v4300_v18 = vpop.f32.mrf.mxu3 }
 0x7cc   : > { %v4316_v34 = vmul.f32 %v4300_v18, %v10711_v26  ;;  %v4340_v38 = vmul.f32 %v4300_v18, %v10716_v39  ;;  %4822 = vmatpush.bf16.msra.mxu1 %v8589_v14  ;;  %4936 = vmatpush.bf16.msra.mxu3 %v8589_v14 }
 0x7ce   : > { %v4324_v29 = vadd.f32 %v4316_v34, %v10714_v45  ;;  %v4348_v35 = vadd.f32 %v4340_v38, %v10720_v49  ;;  %v8577_v38 = vor.u32 %v9366_v28, %v8576_v22 }
 0x7d0   : > { %v4332_v21 = vmul.f32 %v4324_v29, %v4271_v15  ;;  %v8581_v29 = vor.u32 %v9365_v62, %v8578_v43  ;;  %4794 = vmatpush.bf16.msra.mxu0 %v8577_v38  ;;  %4908 = vmatpush.bf16.msra.mxu2 %v8577_v38 }
 0x7d2   : > { %v4356_v40 = vadd.f32 %v4348_v35, %v4332_v21  ;;  %4823 = vmatpush.bf16.msra.mxu1 %v8581_v29  ;;  %4937 = vmatpush.bf16.msra.mxu3 %v8581_v29 }
 0x7d3   : > { %v4274_v44 = vpop.f32.mrf.mxu2  ;;  %v4303_v32 = vpop.f32.mrf.mxu3 }
 0x7d4   : > { %v4575_v42 = vpack.c.bf16 %v4356_v40, %v4355_v24  ;;  %v4317_v20 = vmul.f32 %v4303_v32, %v10711_v26  ;;  %v4341_v3 = vmul.f32 %v4303_v32, %v10716_v39 }
 0x7d6   : > { %4591 = vmatmul.bf16.gmra.mxu2 %v4575_v42  ;;  %4620 = vmatmul.bf16.gmra.mxu3 %v4575_v42  ;;  %v4325_v27 = vadd.f32 %v4317_v20, %v10714_v45  ;;  %v4349_v17 = vadd.f32 %v4341_v3, %v10720_v49 }
 0x7d8   : > { %v4333_v7 = vmul.f32 %v4325_v27, %v4274_v44 }
 0x7da   : > { %v4357_v15 = vadd.f32 %v4349_v17, %v4333_v7 }
 0x7db   : > { %v4276_v59 = vpop.f32.mrf.mxu2  ;;  %v4305_v2 = vpop.f32.mrf.mxu3 }
 0x7dc   : > { %v4318_v4 = vmul.f32 %v4305_v2, %v10711_v26  ;;  %v4342_v5 = vmul.f32 %v4305_v2, %v10716_v39 }
 0x7de   : > { %v4326_v8 = vadd.f32 %v4318_v4, %v10714_v45  ;;  %v4350_v13 = vadd.f32 %v4342_v5, %v10720_v49 }
 0x7e0   : > { %v4334_v12 = vmul.f32 %v4326_v8, %v4276_v59 }
 0x7e2   : > { %v4358_v18 = vadd.f32 %v4350_v13, %v4334_v12 }
 0x7e3   : > { %v4308_v34 = vpop.f32.mrf.mxu3  ;;  %v4279_v53 = vpop.f32.mrf.mxu2 }
 0x7e4   : > { %v4576_v48 = vpack.c.bf16 %v4358_v18, %v4357_v15  ;;  %v4319_v16 = vmul.f32 %v4308_v34, %v10711_v26  ;;  %v4343_v61 = vmul.f32 %v4308_v34, %v10716_v39 }
 0x7e6   : > { %4596 = vmatmul.bf16.gmra.mxu2 %v4576_v48  ;;  %4625 = vmatmul.bf16.gmra.mxu3 %v4576_v48  ;;  %v4327_v23 = vadd.f32 %v4319_v16, %v10714_v45  ;;  %v4351_v40 = vadd.f32 %v4343_v61, %v10720_v49 }
 0x7e8   : > { %v4335_v35 = vmul.f32 %v4327_v23, %v4279_v53 }
 0x7ea   : > { %v4359_v44 = vadd.f32 %v4351_v40, %v4335_v35 }
 0x7eb   : > { %v4310_v58 = vpop.f32.mrf.mxu3  ;;  %v4281_v24 = vpop.f32.mrf.mxu2 }
 0x7ec   : > { %v4320_v33 = vmul.f32 %v4310_v58, %v10711_v26  ;;  %v4344_v21 = vmul.f32 %v4310_v58, %v10716_v39  ;;  %v10786_v39 = vperm.slane %v4379_v37, 1 }
 0x7ee   : > { %v4328_v31 = vadd.f32 %v4320_v33, %v10714_v45  ;;  %v4352_v30 = vadd.f32 %v4344_v21, %v10720_v49  ;;  %v10788_v45 = vperm.slane %v4379_v37, 2 }
 0x7f0   : > { %v4336_v63 = vmul.f32 %v4328_v31, %v4281_v24 }
 0x7f2   : > { %v4360_v32 = vadd.f32 %v4352_v30, %v4336_v63 }
 0x7f4   : > { %v4473_v36 = vpop.f32.mrf.mxu0  ;;  %v4502_v42 = vpop.f32.mrf.mxu1  ;;  %v4577_v50 = vpack.c.bf16 %v4360_v32, %v4359_v44 }
 0x7f5   : > { %v4523_v26 = vmul.f32 %v10783_v41, %v4502_v42  ;;  %v4549_v0 = vmul.f32 %v10788_v45, %v4502_v42 }
 0x7f6   : > { %4601 = vmatmul.bf16.gmra.mxu2 %v4577_v50  ;;  %4630 = vmatmul.bf16.gmra.mxu3 %v4577_v50 }
 0x7f7   : > { %v4532_v20 = vadd.f32 %v10786_v39, %v4523_v26  ;;  %v4558_v1 = vadd.f32 %v10792_v46, %v4549_v0 }
 0x7f9   : > { %v4540_v52 = vmul.f32 %v4532_v20, %v4473_v36 }
 0x7fb   : > { %v4566_v59 = vadd.f32 %v4558_v1, %v4540_v52 }
 0x7fc   : > { %v4475_v47 = vpop.f32.mrf.mxu0  ;;  %v4504_v49 = vpop.f32.mrf.mxu1 }
 0x7fd   : > { %v4524_v54 = vmul.f32 %v10783_v41, %v4504_v49  ;;  %v4550_v55 = vmul.f32 %v10788_v45, %v4504_v49 }
 0x7ff   : > { %v4533_v27 = vadd.f32 %v10786_v39, %v4524_v54  ;;  %v4559_v51 = vadd.f32 %v10792_v46, %v4550_v55 }
 0x801   : > { %v4541_v57 = vmul.f32 %v4533_v27, %v4475_v47 }
 0x803   : > { %v4567_v2 = vadd.f32 %v4559_v51, %v4541_v57 }
 0x804   : > { %v4478_v25 = vpop.f32.mrf.mxu0  ;;  %v4507_v60 = vpop.f32.mrf.mxu1 }
 0x805   : > { %v4703_v3 = vpack.c.bf16 %v4567_v2, %v4566_v59  ;;  %v4525_v4 = vmul.f32 %v10783_v41, %v4507_v60  ;;  %v4551_v8 = vmul.f32 %v10788_v45, %v4507_v60 }
 0x807   : > { %4795 = vmatmul.bf16.vlgmr.msra.gmra.mxu0 %v4703_v3  ;;  %4824 = vmatmul.bf16.vlgmr.msra.gmra.mxu1 %v4703_v3  ;;  %v4534_v5 = vadd.f32 %v10786_v39, %v4525_v4  ;;  %v4560_v56 = vadd.f32 %v10792_v46, %v4551_v8  ;;  %v9396_v8 = vld [vmem:[#allocation2 + $0x7f4] sm:$0xf0] }
 0x809   : > { %v4542_v10 = vmul.f32 %v4534_v5, %v4478_v25 }
 0x80b   : > { %v4568_v13 = vadd.f32 %v4560_v56, %v4542_v10  ;;  %v8698_v10 = vld [vmem:[#allocation2 + $0x7f8] sm:$0xf0] }
 0x80c   : > { %v4480_v6 = vpop.f32.mrf.mxu0  ;;  %v4509_v7 = vpop.f32.mrf.mxu1 }
 0x80d   : > { %v4526_v9 = vmul.f32 %v10783_v41, %v4509_v7  ;;  %v4552_v19 = vmul.f32 %v10788_v45, %v4509_v7  ;;  %v8696_v7 = vld [vmem:[#allocation2 + $0x7f0] sm:$0xf] }
 0x80f   : > { %v4535_v11 = vadd.f32 %v10786_v39, %v4526_v9  ;;  %v4561_v12 = vadd.f32 %v10792_v46, %v4552_v19  ;;  %v9395_v9 = vld [vmem:[#allocation2 + $0x7f4] sm:$0xf]  ;;  %v8697_v19 = vor.u32 %v9396_v8, %v8696_v7  ;;  %v9384_v7 = vld [vmem:[#allocation2 + $0x794] sm:$0xf0] }
 0x810   : > { %v9383_v8 = vld [vmem:[#allocation2 + $0x794] sm:$0xf] }
 0x811   : > { %v4543_v17 = vmul.f32 %v4535_v11, %v4480_v6  ;;  %5110 = vmatpush.bf16.msrb.mxu0 %v8697_v19  ;;  %5224 = vmatpush.bf16.msrb.mxu2 %v8697_v19  ;;  %v8650_v19 = vld [vmem:[#allocation2 + $0x798] sm:$0xf0] }
 0x813   : > { %v4569_v14 = vadd.f32 %v4561_v12, %v4543_v17  ;;  %v8701_v17 = vor.u32 %v9395_v9, %v8698_v10 }
 0x814   : > { %v4483_v15 = vpop.f32.mrf.mxu0  ;;  %v4512_v18 = vpop.f32.mrf.mxu1 }
 0x815   : > { %v4704_v22 = vpack.c.bf16 %v4569_v14, %v4568_v13  ;;  %v4527_v28 = vmul.f32 %v10783_v41, %v4512_v18  ;;  %v4553_v43 = vmul.f32 %v10788_v45, %v4512_v18  ;;  %5139 = vmatpush.bf16.msrb.mxu1 %v8701_v17  ;;  %v9394_v18 = vld [vmem:[#allocation2 + $0x7e4] sm:$0xf0]  ;;  %5253 = vmatpush.bf16.msrb.mxu3 %v8701_v17 }
 0x817   : > { %4800 = vmatmul.bf16.gmra.mxu0 %v4704_v22  ;;  %4829 = vmatmul.bf16.gmra.mxu1 %v4704_v22  ;;  %v4536_v62 = vadd.f32 %v10786_v39, %v4527_v28  ;;  %v4562_v23 = vadd.f32 %v10792_v46, %v4553_v43  ;;  %v9393_v22 = vld [vmem:[#allocation2 + $0x7e4] sm:$0xf]  ;;  %v8680_v43 = vld [vmem:[#allocation2 + $0x7d0] sm:$0xf] }
 0x819   : > { %v4544_v53 = vmul.f32 %v4536_v62, %v4483_v15  ;;  %v8688_v15 = vld [vmem:[#allocation2 + $0x7e0] sm:$0xf]  ;;  %v8690_v62 = vld [vmem:[#allocation2 + $0x7e8] sm:$0xf0] }
 0x81a   : > { %v8689_v28 = vor.u32 %v9394_v18, %v8688_v15  ;;  %v8640_v15 = vld [vmem:[#allocation2 + $0x780] sm:$0xf]  ;;  %v9382_v18 = vld [vmem:[#allocation2 + $0x784] sm:$0xf0] }
 0x81b   : > { %v4570_v33 = vadd.f32 %v4562_v23, %v4544_v53 }
 0x81c   : > { %v4485_v34 = vpop.f32.mrf.mxu0  ;;  %v4514_v38 = vpop.f32.mrf.mxu1  ;;  %5111 = vmatpush.bf16.msrb.mxu0 %v8689_v28  ;;  %5225 = vmatpush.bf16.msrb.mxu2 %v8689_v28  ;;  %v8641_v28 = vor.u32 %v9382_v18, %v8640_v15 }
 0x81d   : > { %v4528_v48 = vmul.f32 %v10783_v41, %v4514_v38  ;;  %v4554_v29 = vmul.f32 %v10788_v45, %v4514_v38  ;;  %v8693_v38 = vor.u32 %v9393_v22, %v8690_v62  ;;  %v9381_v22 = vld [vmem:[#allocation2 + $0x784] sm:$0xf]  ;;  %v8642_v62 = vld [vmem:[#allocation2 + $0x788] sm:$0xf0] }
 0x81f   : > { %v4537_v16 = vadd.f32 %v10786_v39, %v4528_v48  ;;  %v4563_v61 = vadd.f32 %v10792_v46, %v4554_v29  ;;  %5140 = vmatpush.bf16.msrb.mxu1 %v8693_v38  ;;  %v9392_v48 = vld [vmem:[#allocation2 + $0x7d4] sm:$0xf0]  ;;  %v9391_v29 = vld [vmem:[#allocation2 + $0x7d4] sm:$0xf]  ;;  %5254 = vmatpush.bf16.msrb.mxu3 %v8693_v38 }
 0x820   : > { %v8681_v53 = vor.u32 %v9392_v48, %v8680_v43  ;;  %v8645_v43 = vor.u32 %v9381_v22, %v8642_v62 }
 0x821   : > { %v4545_v58 = vmul.f32 %v4537_v16, %v4485_v34  ;;  %v8682_v16 = vld [vmem:[#allocation2 + $0x7d8] sm:$0xf0] }
 0x822   : > { %5112 = vmatpush.bf16.msrb.mxu0 %v8681_v53  ;;  %5226 = vmatpush.bf16.msrb.mxu2 %v8681_v53 }
 0x823   : > { %v4571_v21 = vadd.f32 %v4563_v61, %v4545_v58  ;;  %v8685_v58 = vor.u32 %v9391_v29, %v8682_v16 }
 0x824   : > { %v4517_v35 = vpop.f32.mrf.mxu1  ;;  %v4488_v24 = vpop.f32.mrf.mxu0 }
 0x825   : > { %v4705_v31 = vpack.c.bf16 %v4571_v21, %v4570_v33  ;;  %v4529_v40 = vmul.f32 %v10783_v41, %v4517_v35  ;;  %v4555_v37 = vmul.f32 %v10788_v45, %v4517_v35  ;;  %5141 = vmatpush.bf16.msrb.mxu1 %v8685_v58  ;;  %5255 = vmatpush.bf16.msrb.mxu3 %v8685_v58 }
 0x827   : > { %4805 = vmatmul.bf16.gmra.mxu0 %v4705_v31  ;;  %4834 = vmatmul.bf16.gmra.mxu1 %v4705_v31  ;;  %v4538_v63 = vadd.f32 %v10786_v39, %v4529_v40  ;;  %v4564_v26 = vadd.f32 %v10792_v46, %v4555_v37  ;;  %v9390_v40 = vld [vmem:[#allocation2 + $0x7c4] sm:$0xf0]  ;;  %v8674_v37 = vld [vmem:[#allocation2 + $0x7c8] sm:$0xf0] }
 0x829   : > { %v4546_v36 = vmul.f32 %v4538_v63, %v4488_v24  ;;  %v8672_v24 = vld [vmem:[#allocation2 + $0x7c0] sm:$0xf]  ;;  %v9389_v63 = vld [vmem:[#allocation2 + $0x7c4] sm:$0xf] }
 0x82b   : > { %v4572_v49 = vadd.f32 %v4564_v26, %v4546_v36  ;;  %v8677_v36 = vor.u32 %v9389_v63, %v8674_v37 }
 0x82c   : > { %v4519_v30 = vpop.f32.mrf.mxu1  ;;  %v4490_v50 = vpop.f32.mrf.mxu0 }
 0x82d   : > { %v4530_v44 = vmul.f32 %v10783_v41, %v4519_v30  ;;  %v4556_v32 = vmul.f32 %v10788_v45, %v4519_v30  ;;  %v8673_v30 = vor.u32 %v9390_v40, %v8672_v24  ;;  %5142 = vmatpush.bf16.msrb.mxu1 %v8677_v36  ;;  %5256 = vmatpush.bf16.msrb.mxu3 %v8677_v36 }
 0x82f   : > { %v4539_v42 = vadd.f32 %v10786_v39, %v4530_v44  ;;  %v4565_v47 = vadd.f32 %v10792_v46, %v4556_v32  ;;  %5113 = vmatpush.bf16.msrb.mxu0 %v8673_v30  ;;  %5227 = vmatpush.bf16.msrb.mxu2 %v8673_v30 }
 0x831   : > { %v4547_v20 = vmul.f32 %v4539_v42, %v4490_v50 }
 0x833   : > { %v4573_v0 = vadd.f32 %v4565_v47, %v4547_v20  ;;  %v8664_v20 = vld [vmem:[#allocation2 + $0x7b0] sm:$0xf]  ;;  %v9388_v47 = vld [vmem:[#allocation2 + $0x7b4] sm:$0xf0] }
 0x835   : > { %v4706_v54 = vpack.c.bf16 %v4573_v0, %v4572_v49  ;;  %v8665_v49 = vor.u32 %v9388_v47, %v8664_v20  ;;  %v9387_v0 = vld [vmem:[#allocation2 + $0x7b4] sm:$0xf] }
 0x837   : > { %4810 = vmatmul.bf16.gmra.mxu0 %v4706_v54  ;;  %4839 = vmatmul.bf16.gmra.mxu1 %v4706_v54  ;;  %v8666_v54 = vld [vmem:[#allocation2 + $0x7b8] sm:$0xf0] }
 0x838   : > { %5114 = vmatpush.bf16.msrb.mxu0 %v8665_v49  ;;  %5228 = vmatpush.bf16.msrb.mxu2 %v8665_v49 }
 0x849   : > { %v4587_v55 = vpop.f32.mrf.mxu2  ;;  %v4616_v52 = vpop.f32.mrf.mxu3 }
 0x84a   : > { %v4636_v27 = vmul.f32 %v4616_v52, %v10783_v41  ;;  %v4660_v59 = vmul.f32 %v4616_v52, %v10788_v45 }
 0x84c   : > { %v4644_v1 = vadd.f32 %v4636_v27, %v10786_v39  ;;  %v4668_v4 = vadd.f32 %v4660_v59, %v10792_v46  ;;  %v8669_v27 = vor.u32 %v9387_v0, %v8666_v54  ;;  %v8656_v59 = vld [vmem:[#allocation2 + $0x7a0] sm:$0xf] }
 0x84e   : > { %v4652_v60 = vmul.f32 %v4644_v1, %v4587_v55  ;;  %5143 = vmatpush.bf16.msrb.mxu1 %v8669_v27  ;;  %5257 = vmatpush.bf16.msrb.mxu3 %v8669_v27 }
 0x850   : > { %v4676_v11 = vadd.f32 %v4668_v4, %v4652_v60 }
 0x851   : > { %v4589_v57 = vpop.f32.mrf.mxu2  ;;  %v4618_v51 = vpop.f32.mrf.mxu3 }
 0x852   : > { %v4637_v2 = vmul.f32 %v4618_v51, %v10783_v41  ;;  %v4661_v25 = vmul.f32 %v4618_v51, %v10788_v45 }
 0x854   : > { %v4645_v3 = vadd.f32 %v4637_v2, %v10786_v39  ;;  %v4669_v6 = vadd.f32 %v4661_v25, %v10792_v46  ;;  %v9386_v2 = vld [vmem:[#allocation2 + $0x7a4] sm:$0xf0]  ;;  %v9385_v25 = vld [vmem:[#allocation2 + $0x7a4] sm:$0xf] }
 0x855   : > { %v8657_v60 = vor.u32 %v9386_v2, %v8656_v59 }
 0x856   : > { %v4653_v5 = vmul.f32 %v4645_v3, %v4589_v57  ;;  %v8658_v3 = vld [vmem:[#allocation2 + $0x7a8] sm:$0xf0] }
 0x857   : > { %5115 = vmatpush.bf16.msrb.mxu0 %v8657_v60  ;;  %5229 = vmatpush.bf16.msrb.mxu2 %v8657_v60 }
 0x858   : > { %v4677_v56 = vadd.f32 %v4669_v6, %v4653_v5  ;;  %v8661_v5 = vor.u32 %v9385_v25, %v8658_v3  ;;  %v8648_v6 = vld [vmem:[#allocation2 + $0x790] sm:$0xf] }
 0x859   : > { %v4592_v12 = vpop.f32.mrf.mxu2  ;;  %v4621_v13 = vpop.f32.mrf.mxu3  ;;  %v8649_v9 = vor.u32 %v9384_v7, %v8648_v6 }
 0x85a   : > { %v4897_v14 = vpack.c.bf16 %v4677_v56, %v4676_v11  ;;  %v4638_v34 = vmul.f32 %v4621_v13, %v10783_v41  ;;  %v4662_v21 = vmul.f32 %v4621_v13, %v10788_v45  ;;  %5144 = vmatpush.bf16.msrb.mxu1 %v8661_v5  ;;  %5258 = vmatpush.bf16.msrb.mxu3 %v8661_v5 }
 0x85b   : > { %v8653_v11 = vor.u32 %v9383_v8, %v8650_v19  ;;  %5116 = vmatpush.bf16.msrb.mxu0 %v8649_v9  ;;  %5230 = vmatpush.bf16.msrb.mxu2 %v8649_v9 }
 0x85c   : > { %4909 = vmatmul.bf16.vlgmr.msra.gmra.mxu2 %v4897_v14  ;;  %4938 = vmatmul.bf16.vlgmr.msra.gmra.mxu3 %v4897_v14  ;;  %v4646_v23 = vadd.f32 %v4638_v34, %v10786_v39  ;;  %v4670_v42 = vadd.f32 %v4662_v21, %v10792_v46 }
 0x85e   : > { %v4654_v44 = vmul.f32 %v4646_v23, %v4592_v12  ;;  %5145 = vmatpush.bf16.msrb.mxu1 %v8653_v11  ;;  %5259 = vmatpush.bf16.msrb.mxu3 %v8653_v11 }
 0x85f   : > { %5117 = vmatpush.bf16.msrb.mxu0 %v8641_v28  ;;  %5231 = vmatpush.bf16.msrb.mxu2 %v8641_v28 }
 0x860   : > { %v4678_v55 = vadd.f32 %v4670_v42, %v4654_v44 }
 0x861   : > { %v4594_v61 = vpop.f32.mrf.mxu2  ;;  %v4623_v33 = vpop.f32.mrf.mxu3 }
 0x862   : > { %v4639_v35 = vmul.f32 %v4623_v33, %v10783_v41  ;;  %v4663_v31 = vmul.f32 %v4623_v33, %v10788_v45  ;;  %5146 = vmatpush.bf16.msrb.mxu1 %v8645_v43  ;;  %5260 = vmatpush.bf16.msrb.mxu3 %v8645_v43 }
 0x864   : > { %v4647_v32 = vadd.f32 %v4639_v35, %v10786_v39  ;;  %v4671_v26 = vadd.f32 %v4663_v31, %v10792_v46  ;;  %v4702_v31 = vld [vmem:[#allocation5 + $0x38] sm:$0xf] }
 0x865   : > { %v10852_v37 = vperm.slane %v4702_v31, 3  ;;  %v10858_v0 = vperm.slane %v4702_v31, 1 }
 0x866   : > { %v4655_v50 = vmul.f32 %v4647_v32, %v4594_v61 }
 0x868   : > { %v4679_v52 = vadd.f32 %v4671_v26, %v4655_v50 }
 0x869   : > { %v4597_v1 = vpop.f32.mrf.mxu2  ;;  %v4626_v57 = vpop.f32.mrf.mxu3 }
 0x86a   : > { %v4898_v51 = vpack.c.bf16 %v4679_v52, %v4678_v55  ;;  %v4640_v4 = vmul.f32 %v4626_v57, %v10783_v41  ;;  %v4664_v12 = vmul.f32 %v4626_v57, %v10788_v45  ;;  %v10864_v57 = vperm.slane %v4702_v31, 0 }
 0x86c   : > { %4914 = vmatmul.bf16.gmra.mxu2 %v4898_v51  ;;  %4943 = vmatmul.bf16.gmra.mxu3 %v4898_v51  ;;  %v4648_v10 = vadd.f32 %v4640_v4, %v10786_v39  ;;  %v4672_v48 = vadd.f32 %v4664_v12, %v10792_v46 }
 0x86e   : > { %v4656_v34 = vmul.f32 %v4648_v10, %v4597_v1 }
 0x870   : > { %v4680_v16 = vadd.f32 %v4672_v48, %v4656_v34 }
 0x871   : > { %v4599_v56 = vpop.f32.mrf.mxu2  ;;  %v4628_v17 = vpop.f32.mrf.mxu3 }
 0x872   : > { %v4641_v13 = vmul.f32 %v4628_v17, %v10783_v41  ;;  %v4665_v14 = vmul.f32 %v4628_v17, %v10788_v45 }
 0x874   : > { %v4649_v38 = vadd.f32 %v4641_v13, %v10786_v39  ;;  %v4673_v53 = vadd.f32 %v4665_v14, %v10792_v46 }
 0x876   : > { %v4657_v29 = vmul.f32 %v4649_v38, %v4599_v56 }
 0x878   : > { %v4681_v23 = vadd.f32 %v4673_v53, %v4657_v29 }
 0x879   : > { %v4631_v58 = vpop.f32.mrf.mxu3  ;;  %v4602_v33 = vpop.f32.mrf.mxu2 }
 0x87a   : > { %v4899_v61 = vpack.c.bf16 %v4681_v23, %v4680_v16  ;;  %v4642_v21 = vmul.f32 %v4631_v58, %v10783_v41  ;;  %v4666_v40 = vmul.f32 %v4631_v58, %v10788_v45 }
 0x87c   : > { %4919 = vmatmul.bf16.gmra.mxu2 %v4899_v61  ;;  %4948 = vmatmul.bf16.gmra.mxu3 %v4899_v61  ;;  %v4650_v35 = vadd.f32 %v4642_v21, %v10786_v39  ;;  %v4674_v26 = vadd.f32 %v4666_v40, %v10792_v46 }
 0x87e   : > { %v4658_v44 = vmul.f32 %v4650_v35, %v4602_v33 }
 0x881   : > { %v4633_v24 = vpop.f32.mrf.mxu3  ;;  %v4604_v50 = vpop.f32.mrf.mxu2 }
 0x882   : > { %v4643_v63 = vmul.f32 %v4633_v24, %v10783_v41  ;;  %v4667_v30 = vmul.f32 %v4633_v24, %v10788_v45  ;;  %v4682_v41 = vadd.f32 %v4674_v26, %v4658_v44  ;;  %v10860_v45 = vperm.slane %v4702_v31, 2 }
 0x884   : > { %v4651_v32 = vadd.f32 %v4643_v63, %v10786_v39  ;;  %v4796_v36 = vpop.f32.mrf.mxu0  ;;  %v4825_v42 = vpop.f32.mrf.mxu1  ;;  %v4675_v47 = vadd.f32 %v4667_v30, %v10792_v46 }
 0x885   : > { %v4846_v49 = vmul.f32 %v10852_v37, %v4825_v42  ;;  %v4872_v1 = vmul.f32 %v10860_v45, %v4825_v42 }
 0x886   : > { %v4659_v20 = vmul.f32 %v4651_v32, %v4604_v50 }
 0x887   : > { %v4855_v52 = vadd.f32 %v10858_v0, %v4846_v49  ;;  %v4881_v25 = vadd.f32 %v10864_v57, %v4872_v1 }
 0x888   : > { %v4683_v54 = vadd.f32 %v4675_v47, %v4659_v20 }
 0x889   : > { %v4863_v59 = vmul.f32 %v4855_v52, %v4796_v36 }
 0x88a   : > { %v4900_v55 = vpack.c.bf16 %v4683_v54, %v4682_v41 }
 0x88b   : > { %v4889_v4 = vadd.f32 %v4881_v25, %v4863_v59 }
 0x88c   : > { %4924 = vmatmul.bf16.gmra.mxu2 %v4900_v55  ;;  %4953 = vmatmul.bf16.gmra.mxu3 %v4900_v55  ;;  %v4798_v39 = vpop.f32.mrf.mxu0  ;;  %v4827_v27 = vpop.f32.mrf.mxu1 }
 0x88d   : > { %v4847_v46 = vmul.f32 %v10852_v37, %v4827_v27  ;;  %v4873_v51 = vmul.f32 %v10860_v45, %v4827_v27 }
 0x88f   : > { %v4856_v2 = vadd.f32 %v10858_v0, %v4847_v46  ;;  %v4882_v3 = vadd.f32 %v10864_v57, %v4873_v51 }
 0x891   : > { %v4864_v60 = vmul.f32 %v4856_v2, %v4798_v39 }
 0x893   : > { %v4890_v5 = vadd.f32 %v4882_v3, %v4864_v60  ;;  %v8760_v60 = vld [vmem:[#allocation2 + $0x870] sm:$0xf]  ;;  %v9412_v3 = vld [vmem:[#allocation2 + $0x874] sm:$0xf0] }
 0x894   : > { %v4801_v6 = vpop.f32.mrf.mxu0  ;;  %v4830_v7 = vpop.f32.mrf.mxu1 }
 0x895   : > { %v5026_v8 = vpack.c.bf16 %v4890_v5, %v4889_v4  ;;  %v4848_v9 = vmul.f32 %v10852_v37, %v4830_v7  ;;  %v4874_v56 = vmul.f32 %v10860_v45, %v4830_v7  ;;  %v9411_v4 = vld [vmem:[#allocation2 + $0x874] sm:$0xf]  ;;  %v8761_v7 = vor.u32 %v9412_v3, %v8760_v60 }
 0x897   : > { %5118 = vmatmul.bf16.vlgmr.msrb.gmra.mxu0 %v5026_v8  ;;  %5147 = vmatmul.bf16.vlgmr.msrb.gmra.mxu1 %v5026_v8  ;;  %v4857_v19 = vadd.f32 %v10858_v0, %v4848_v9  ;;  %v4883_v15 = vadd.f32 %v10864_v57, %v4874_v56  ;;  %v8762_v8 = vld [vmem:[#allocation2 + $0x878] sm:$0xf0] }
 0x898   : > { %5433 = vmatpush.bf16.msra.mxu0 %v8761_v7  ;;  %5547 = vmatpush.bf16.msra.mxu2 %v8761_v7  ;;  %v8712_v7 = vld [vmem:[#allocation2 + $0x810] sm:$0xf] }
 0x899   : > { %v4865_v13 = vmul.f32 %v4857_v19, %v4801_v6 }
 0x89b   : > { %v4891_v28 = vadd.f32 %v4883_v15, %v4865_v13  ;;  %v9410_v13 = vld [vmem:[#allocation2 + $0x864] sm:$0xf0] }
 0x89c   : > { %v4803_v10 = vpop.f32.mrf.mxu0  ;;  %v4832_v11 = vpop.f32.mrf.mxu1 }
 0x89d   : > { %v4849_v17 = vmul.f32 %v10852_v37, %v4832_v11  ;;  %v4875_v12 = vmul.f32 %v10860_v45, %v4832_v11  ;;  %v8765_v11 = vor.u32 %v9411_v4, %v8762_v8  ;;  %v9400_v8 = vld [vmem:[#allocation2 + $0x814] sm:$0xf0] }
 0x89f   : > { %v4858_v14 = vadd.f32 %v10858_v0, %v4849_v17  ;;  %v4884_v22 = vadd.f32 %v10864_v57, %v4875_v12  ;;  %5462 = vmatpush.bf16.msra.mxu1 %v8765_v11  ;;  %v8752_v12 = vld [vmem:[#allocation2 + $0x860] sm:$0xf]  ;;  %5576 = vmatpush.bf16.msra.mxu3 %v8765_v11  ;;  %v8713_v11 = vor.u32 %v9400_v8, %v8712_v7 }
 0x8a0   : > { %v8753_v15 = vor.u32 %v9410_v13, %v8752_v12 }
 0x8a1   : > { %v4866_v18 = vmul.f32 %v4858_v14, %v4803_v10  ;;  %v9409_v14 = vld [vmem:[#allocation2 + $0x864] sm:$0xf] }
 0x8a2   : > { %5434 = vmatpush.bf16.msra.mxu0 %v8753_v15  ;;  %5548 = vmatpush.bf16.msra.mxu2 %v8753_v15  ;;  %v9398_v15 = vld [vmem:[#allocation2 + $0x804] sm:$0xf0] }
 0x8a3   : > { %v4892_v62 = vadd.f32 %v4884_v22, %v4866_v18  ;;  %v8754_v18 = vld [vmem:[#allocation2 + $0x868] sm:$0xf0] }
 0x8a4   : > { %v4806_v34 = vpop.f32.mrf.mxu0  ;;  %v4835_v38 = vpop.f32.mrf.mxu1 }
 0x8a5   : > { %v5027_v43 = vpack.c.bf16 %v4892_v62, %v4891_v28  ;;  %v4850_v48 = vmul.f32 %v10852_v37, %v4835_v38  ;;  %v4876_v23 = vmul.f32 %v10860_v45, %v4835_v38 }
 0x8a7   : > { %5123 = vmatmul.bf16.gmra.mxu0 %v5027_v43  ;;  %5152 = vmatmul.bf16.gmra.mxu1 %v5027_v43  ;;  %v4859_v29 = vadd.f32 %v10858_v0, %v4850_v48  ;;  %v4885_v35 = vadd.f32 %v10864_v57, %v4876_v23  ;;  %v8744_v48 = vld [vmem:[#allocation2 + $0x850] sm:$0xf] }
 0x8a9   : > { %v4867_v33 = vmul.f32 %v4859_v29, %v4806_v34  ;;  %v8757_v34 = vor.u32 %v9409_v14, %v8754_v18  ;;  %v9408_v29 = vld [vmem:[#allocation2 + $0x854] sm:$0xf0]  ;;  %v8704_v14 = vld [vmem:[#allocation2 + $0x800] sm:$0xf]  ;;  %v9397_v18 = vld [vmem:[#allocation2 + $0x804] sm:$0xf] }
 0x8ab   : > { %v4893_v40 = vadd.f32 %v4885_v35, %v4867_v33  ;;  %5463 = vmatpush.bf16.msra.mxu1 %v8757_v34  ;;  %5577 = vmatpush.bf16.msra.mxu3 %v8757_v34 }
 0x8ac   : > { %v4808_v53 = vpop.f32.mrf.mxu0  ;;  %v4837_v16 = vpop.f32.mrf.mxu1 }
 0x8ad   : > { %v4851_v58 = vmul.f32 %v10852_v37, %v4837_v16  ;;  %v4877_v61 = vmul.f32 %v10860_v45, %v4837_v16 }
 0x8af   : > { %v4860_v21 = vadd.f32 %v10858_v0, %v4851_v58  ;;  %v4886_v24 = vadd.f32 %v10864_v57, %v4877_v61  ;;  %v8745_v58 = vor.u32 %v9408_v29, %v8744_v48  ;;  %v8746_v61 = vld [vmem:[#allocation2 + $0x858] sm:$0xf0] }
 0x8b1   : > { %v4868_v31 = vmul.f32 %v4860_v21, %v4808_v53  ;;  %v9407_v53 = vld [vmem:[#allocation2 + $0x854] sm:$0xf]  ;;  %5435 = vmatpush.bf16.msra.mxu0 %v8745_v58  ;;  %5549 = vmatpush.bf16.msra.mxu2 %v8745_v58 }
 0x8b2   : > { %v8749_v21 = vor.u32 %v9407_v53, %v8746_v61 }
 0x8b3   : > { %v4894_v63 = vadd.f32 %v4886_v24, %v4868_v31  ;;  %v8736_v31 = vld [vmem:[#allocation2 + $0x840] sm:$0xf]  ;;  %v9406_v24 = vld [vmem:[#allocation2 + $0x844] sm:$0xf0] }
 0x8b4   : > { %v4840_v30 = vpop.f32.mrf.mxu1  ;;  %v4811_v32 = vpop.f32.mrf.mxu0  ;;  %5464 = vmatpush.bf16.msra.mxu1 %v8749_v21  ;;  %5578 = vmatpush.bf16.msra.mxu3 %v8749_v21 }
 0x8b5   : > { %v5028_v44 = vpack.c.bf16 %v4894_v63, %v4893_v40  ;;  %v4852_v36 = vmul.f32 %v10852_v37, %v4840_v30  ;;  %v4878_v26 = vmul.f32 %v10860_v45, %v4840_v30  ;;  %v9405_v40 = vld [vmem:[#allocation2 + $0x844] sm:$0xf]  ;;  %v8737_v63 = vor.u32 %v9406_v24, %v8736_v31  ;;  %v8738_v30 = vld [vmem:[#allocation2 + $0x848] sm:$0xf0] }
 0x8b7   : > { %5128 = vmatmul.bf16.gmra.mxu0 %v5028_v44  ;;  %5157 = vmatmul.bf16.gmra.mxu1 %v5028_v44  ;;  %v4861_v42 = vadd.f32 %v10858_v0, %v4852_v36  ;;  %v4887_v55 = vadd.f32 %v10864_v57, %v4878_v26  ;;  %v8741_v44 = vor.u32 %v9405_v40, %v8738_v30  ;;  %v8728_v36 = vld [vmem:[#allocation2 + $0x830] sm:$0xf]  ;;  %v5025_v40 = vld [vmem:[#allocation5 + $0x3c] sm:$0xf] }
 0x8b8   : > { %5436 = vmatpush.bf16.msra.mxu0 %v8737_v63  ;;  %5550 = vmatpush.bf16.msra.mxu2 %v8737_v63 }
 0x8b9   : > { %v4869_v49 = vmul.f32 %v4861_v42, %v4811_v32  ;;  %v9404_v42 = vld [vmem:[#allocation2 + $0x834] sm:$0xf0]  ;;  %5465 = vmatpush.bf16.msra.mxu1 %v8741_v44  ;;  %5579 = vmatpush.bf16.msra.mxu3 %v8741_v44  ;;  %v10920_v44 = vperm.slane %v5025_v40, 3 }
 0x8bb   : > { %v4895_v27 = vadd.f32 %v4887_v55, %v4869_v49  ;;  %v8730_v49 = vld [vmem:[#allocation2 + $0x838] sm:$0xf0] }
 0x8bc   : > { %v4842_v50 = vpop.f32.mrf.mxu1  ;;  %v4813_v54 = vpop.f32.mrf.mxu0 }
 0x8bd   : > { %v4853_v20 = vmul.f32 %v10852_v37, %v4842_v50  ;;  %v4879_v47 = vmul.f32 %v10860_v45, %v4842_v50 }
 0x8bf   : > { %v4862_v41 = vadd.f32 %v10858_v0, %v4853_v20  ;;  %v4888_v39 = vadd.f32 %v10864_v57, %v4879_v47  ;;  %v8729_v20 = vor.u32 %v9404_v42, %v8728_v36  ;;  %v9403_v47 = vld [vmem:[#allocation2 + $0x834] sm:$0xf] }
 0x8c1   : > { %v4870_v52 = vmul.f32 %v4862_v41, %v4813_v54  ;;  %5437 = vmatpush.bf16.msra.mxu0 %v8729_v20  ;;  %5551 = vmatpush.bf16.msra.mxu2 %v8729_v20 }
 0x8c3   : > { %v4896_v1 = vadd.f32 %v4888_v39, %v4870_v52  ;;  %v8733_v52 = vor.u32 %v9403_v47, %v8730_v49 }
 0x8c5   : > { %v5029_v46 = vpack.c.bf16 %v4896_v1, %v4895_v27  ;;  %v8720_v1 = vld [vmem:[#allocation2 + $0x820] sm:$0xf]  ;;  %5466 = vmatpush.bf16.msra.mxu1 %v8733_v52  ;;  %5580 = vmatpush.bf16.msra.mxu3 %v8733_v52 }
 0x8c7   : > { %5133 = vmatmul.bf16.gmra.mxu0 %v5029_v46  ;;  %5162 = vmatmul.bf16.gmra.mxu1 %v5029_v46  ;;  %v9402_v46 = vld [vmem:[#allocation2 + $0x824] sm:$0xf0] }
 0x8df   : > { %v4910_v51 = vpop.f32.mrf.mxu2  ;;  %v4939_v59 = vpop.f32.mrf.mxu3 }
 0x8e0   : > { %v4959_v2 = vmul.f32 %v4939_v59, %v10852_v37  ;;  %v4983_v9 = vmul.f32 %v4939_v59, %v10860_v45  ;;  %v8721_v59 = vor.u32 %v9402_v46, %v8720_v1 }
 0x8e2   : > { %v4967_v25 = vadd.f32 %v4959_v2, %v10858_v0  ;;  %v4991_v22 = vadd.f32 %v4983_v9, %v10864_v57  ;;  %v8722_v2 = vld [vmem:[#allocation2 + $0x828] sm:$0xf0]  ;;  %5438 = vmatpush.bf16.msra.mxu0 %v8721_v59  ;;  %5552 = vmatpush.bf16.msra.mxu2 %v8721_v59  ;;  %v9399_v9 = vld [vmem:[#allocation2 + $0x814] sm:$0xf] }
 0x8e4   : > { %v4975_v56 = vmul.f32 %v4967_v25, %v4910_v51  ;;  %v9401_v51 = vld [vmem:[#allocation2 + $0x824] sm:$0xf] }
 0x8e5   : > { %v8725_v4 = vor.u32 %v9401_v51, %v8722_v2 }
 0x8e6   : > { %v4999_v38 = vadd.f32 %v4991_v22, %v4975_v56  ;;  %v8714_v56 = vld [vmem:[#allocation2 + $0x818] sm:$0xf0]  ;;  %5439 = vmatpush.bf16.msra.mxu0 %v8713_v11  ;;  %5553 = vmatpush.bf16.msra.mxu2 %v8713_v11  ;;  %v8705_v22 = vor.u32 %v9398_v15, %v8704_v14 }
 0x8e7   : > { %v4912_v5 = vpop.f32.mrf.mxu2  ;;  %v4941_v6 = vpop.f32.mrf.mxu3  ;;  %5467 = vmatpush.bf16.msra.mxu1 %v8725_v4  ;;  %5581 = vmatpush.bf16.msra.mxu3 %v8725_v4  ;;  %v8717_v12 = vor.u32 %v9399_v9, %v8714_v56 }
 0x8e8   : > { %v4960_v19 = vmul.f32 %v4941_v6, %v10852_v37  ;;  %v4984_v10 = vmul.f32 %v4941_v6, %v10860_v45 }
 0x8ea   : > { %v4968_v17 = vadd.f32 %v4960_v19, %v10858_v0  ;;  %v4992_v62 = vadd.f32 %v4984_v10, %v10864_v57  ;;  %5440 = vmatpush.bf16.msra.mxu0 %v8705_v22  ;;  %5554 = vmatpush.bf16.msra.mxu2 %v8705_v22 }
 0x8eb   : > { %5468 = vmatpush.bf16.msra.mxu1 %v8717_v12  ;;  %5582 = vmatpush.bf16.msra.mxu3 %v8717_v12 }
 0x8ec   : > { %v4976_v28 = vmul.f32 %v4968_v17, %v4912_v5 }
 0x8ee   : > { %v5000_v43 = vadd.f32 %v4992_v62, %v4976_v28  ;;  %v8706_v28 = vld [vmem:[#allocation2 + $0x808] sm:$0xf0] }
 0x8ef   : > { %v4915_v16 = vpop.f32.mrf.mxu2  ;;  %v4944_v23 = vpop.f32.mrf.mxu3  ;;  %v8709_v62 = vor.u32 %v9397_v18, %v8706_v28 }
 0x8f0   : > { %v5220_v33 = vpack.c.bf16 %v5000_v43, %v4999_v38  ;;  %v4961_v35 = vmul.f32 %v4944_v23, %v10852_v37  ;;  %v4985_v41 = vmul.f32 %v4944_v23, %v10860_v45 }
 0x8f1   : > { %5469 = vmatpush.bf16.msra.mxu1 %v8709_v62  ;;  %5583 = vmatpush.bf16.msra.mxu3 %v8709_v62 }
 0x8f2   : > { %5232 = vmatmul.bf16.vlgmr.msrb.gmra.mxu2 %v5220_v33  ;;  %5261 = vmatmul.bf16.vlgmr.msrb.gmra.mxu3 %v5220_v33  ;;  %v4969_v32 = vadd.f32 %v4961_v35, %v10858_v0  ;;  %v4993_v25 = vadd.f32 %v4985_v41, %v10864_v57 }
 0x8f4   : > { %v4977_v39 = vmul.f32 %v4969_v32, %v4915_v16 }
 0x8f6   : > { %v5001_v5 = vadd.f32 %v4993_v25, %v4977_v39 }
 0x8f7   : > { %v4917_v50 = vpop.f32.mrf.mxu2  ;;  %v4946_v26 = vpop.f32.mrf.mxu3 }
 0x8f8   : > { %v4962_v54 = vmul.f32 %v4946_v26, %v10852_v37  ;;  %v4986_v55 = vmul.f32 %v4946_v26, %v10860_v45  ;;  %v10924_v26 = vperm.slane %v5025_v40, 1 }
 0x8fa   : > { %v4970_v27 = vadd.f32 %v4962_v54, %v10858_v0  ;;  %v4994_v3 = vadd.f32 %v4986_v55, %v10864_v57  ;;  %v10929_v54 = vperm.slane %v5025_v40, 2 }
 0x8fc   : > { %v4978_v60 = vmul.f32 %v4970_v27, %v4917_v50 }
 0x8fe   : > { %v5002_v6 = vadd.f32 %v4994_v3, %v4978_v60 }
 0x8ff   : > { %v4920_v19 = vpop.f32.mrf.mxu2  ;;  %v4949_v10 = vpop.f32.mrf.mxu3 }
 0x900   : > { %v5221_v17 = vpack.c.bf16 %v5002_v6, %v5001_v5  ;;  %v4963_v13 = vmul.f32 %v4949_v10, %v10852_v37  ;;  %v4987_v48 = vmul.f32 %v4949_v10, %v10860_v45 }
 0x902   : > { %5237 = vmatmul.bf16.gmra.mxu2 %v5221_v17  ;;  %5266 = vmatmul.bf16.gmra.mxu3 %v5221_v17  ;;  %v4971_v34 = vadd.f32 %v4963_v13, %v10858_v0  ;;  %v4995_v58 = vadd.f32 %v4987_v48, %v10864_v57 }
 0x904   : > { %v4979_v16 = vmul.f32 %v4971_v34, %v4920_v19 }
 0x906   : > { %v5003_v21 = vadd.f32 %v4995_v58, %v4979_v16 }
 0x907   : > { %v4922_v38 = vpop.f32.mrf.mxu2  ;;  %v4951_v43 = vpop.f32.mrf.mxu3 }
 0x908   : > { %v4964_v29 = vmul.f32 %v4951_v43, %v10852_v37  ;;  %v4988_v53 = vmul.f32 %v4951_v43, %v10860_v45 }
 0x90a   : > { %v4972_v23 = vadd.f32 %v4964_v29, %v10858_v0  ;;  %v4996_v33 = vadd.f32 %v4988_v53, %v10864_v57 }
 0x90c   : > { %v4980_v61 = vmul.f32 %v4972_v23, %v4922_v38 }
 0x90e   : > { %v5004_v35 = vadd.f32 %v4996_v33, %v4980_v61 }
 0x90f   : > { %v4954_v31 = vpop.f32.mrf.mxu3  ;;  %v4925_v63 = vpop.f32.mrf.mxu2 }
 0x910   : > { %v5222_v24 = vpack.c.bf16 %v5004_v35, %v5003_v21  ;;  %v4965_v30 = vmul.f32 %v4954_v31, %v10852_v37  ;;  %v4989_v47 = vmul.f32 %v4954_v31, %v10860_v45 }
 0x912   : > { %5242 = vmatmul.bf16.gmra.mxu2 %v5222_v24  ;;  %5271 = vmatmul.bf16.gmra.mxu3 %v5222_v24  ;;  %v4973_v42 = vadd.f32 %v4965_v30, %v10858_v0  ;;  %v4997_v1 = vadd.f32 %v4989_v47, %v10864_v57 }
 0x914   : > { %v5119_v32 = vpop.f32.mrf.mxu0  ;;  %v5148_v36 = vpop.f32.mrf.mxu1  ;;  %v4981_v55 = vmul.f32 %v4973_v42, %v4925_v63 }
 0x915   : > { %v5169_v50 = vmul.f32 %v10920_v44, %v5148_v36  ;;  %v5195_v25 = vmul.f32 %v10929_v54, %v5148_v36 }
 0x916   : > { %v5005_v3 = vadd.f32 %v4997_v1, %v4981_v55 }
 0x917   : > { %v4956_v20 = vpop.f32.mrf.mxu3  ;;  %v5178_v39 = vadd.f32 %v10924_v26, %v5169_v50  ;;  %v4927_v27 = vpop.f32.mrf.mxu2 }
 0x918   : > { %v4966_v49 = vmul.f32 %v4956_v20, %v10852_v37  ;;  %v4990_v41 = vmul.f32 %v4956_v20, %v10860_v45  ;;  %v10936_v37 = vperm.slane %v5025_v40, 0 }
 0x919   : > { %v5186_v4 = vmul.f32 %v5178_v39, %v5119_v32 }
 0x91a   : > { %v4974_v52 = vadd.f32 %v4966_v49, %v10858_v0  ;;  %v4998_v51 = vadd.f32 %v4990_v41, %v10864_v57  ;;  %v5204_v7 = vadd.f32 %v10936_v37, %v5195_v25 }
 0x91c   : > { %v4982_v46 = vmul.f32 %v4974_v52, %v4927_v27  ;;  %v5121_v59 = vpop.f32.mrf.mxu0  ;;  %v5150_v2 = vpop.f32.mrf.mxu1  ;;  %v5212_v9 = vadd.f32 %v5204_v7, %v5186_v4  ;;  %v9428_v7 = vld [vmem:[#allocation2 + $0x8f4] sm:$0xf0] }
 0x91d   : > { %v5170_v45 = vmul.f32 %v10920_v44, %v5150_v2  ;;  %v5196_v60 = vmul.f32 %v10929_v54, %v5150_v2 }
 0x91e   : > { %v5006_v0 = vadd.f32 %v4998_v51, %v4982_v46 }
 0x91f   : > { %v5179_v5 = vadd.f32 %v10924_v26, %v5170_v45  ;;  %v5205_v57 = vadd.f32 %v10936_v37, %v5196_v60 }
 0x920   : > { %v5223_v6 = vpack.c.bf16 %v5006_v0, %v5005_v3 }
 0x921   : > { %v5187_v8 = vmul.f32 %v5179_v5, %v5121_v59 }
 0x922   : > { %5247 = vmatmul.bf16.gmra.mxu2 %v5223_v6  ;;  %5276 = vmatmul.bf16.gmra.mxu3 %v5223_v6  ;;  %v8824_v6 = vld [vmem:[#allocation2 + $0x8f0] sm:$0xf] }
 0x923   : > { %v5213_v19 = vadd.f32 %v5205_v57, %v5187_v8  ;;  %v9427_v8 = vld [vmem:[#allocation2 + $0x8f4] sm:$0xf]  ;;  %v8825_v57 = vor.u32 %v9428_v7, %v8824_v6  ;;  %v8776_v6 = vld [vmem:[#allocation2 + $0x890] sm:$0xf]  ;;  %v9416_v7 = vld [vmem:[#allocation2 + $0x894] sm:$0xf0] }
 0x924   : > { %v5124_v10 = vpop.f32.mrf.mxu0  ;;  %v5153_v11 = vpop.f32.mrf.mxu1 }
 0x925   : > { %v5349_v56 = vpack.c.bf16 %v5213_v19, %v5212_v9  ;;  %v5171_v17 = vmul.f32 %v10920_v44, %v5153_v11  ;;  %v5197_v15 = vmul.f32 %v10929_v54, %v5153_v11  ;;  %v8826_v9 = vld [vmem:[#allocation2 + $0x8f8] sm:$0xf0]  ;;  %5756 = vmatpush.bf16.msrb.mxu0 %v8825_v57  ;;  %5870 = vmatpush.bf16.msrb.mxu2 %v8825_v57  ;;  %v8816_v11 = vld [vmem:[#allocation2 + $0x8e0] sm:$0xf] }
 0x926   : > { %v8777_v57 = vor.u32 %v9416_v7, %v8776_v6 }
 0x927   : > { %5441 = vmatmul.bf16.vlgmr.msra.gmra.mxu0 %v5349_v56  ;;  %5470 = vmatmul.bf16.vlgmr.msra.gmra.mxu1 %v5349_v56  ;;  %v5180_v12 = vadd.f32 %v10924_v26, %v5171_v17  ;;  %v5206_v34 = vadd.f32 %v10936_v37, %v5197_v15  ;;  %v9426_v56 = vld [vmem:[#allocation2 + $0x8e4] sm:$0xf0]  ;;  %v9425_v17 = vld [vmem:[#allocation2 + $0x8e4] sm:$0xf] }
 0x929   : > { %v5188_v28 = vmul.f32 %v5180_v12, %v5124_v10  ;;  %v8829_v10 = vor.u32 %v9427_v8, %v8826_v9  ;;  %v8817_v12 = vor.u32 %v9426_v56, %v8816_v11  ;;  %v9415_v8 = vld [vmem:[#allocation2 + $0x894] sm:$0xf]  ;;  %v8778_v9 = vld [vmem:[#allocation2 + $0x898] sm:$0xf0] }
 0x92a   : > { %v8781_v11 = vor.u32 %v9415_v8, %v8778_v9 }
 0x92b   : > { %v5214_v48 = vadd.f32 %v5206_v34, %v5188_v28  ;;  %5785 = vmatpush.bf16.msrb.mxu1 %v8829_v10  ;;  %5899 = vmatpush.bf16.msrb.mxu3 %v8829_v10 }
 0x92c   : > { %v5126_v13 = vpop.f32.mrf.mxu0  ;;  %v5155_v14 = vpop.f32.mrf.mxu1  ;;  %5757 = vmatpush.bf16.msrb.mxu0 %v8817_v12  ;;  %5871 = vmatpush.bf16.msrb.mxu2 %v8817_v12 }
 0x92d   : > { %v5172_v18 = vmul.f32 %v10920_v44, %v5155_v14  ;;  %v5198_v22 = vmul.f32 %v10929_v54, %v5155_v14 }
 0x92f   : > { %v5181_v62 = vadd.f32 %v10924_v26, %v5172_v18  ;;  %v5207_v43 = vadd.f32 %v10936_v37, %v5198_v22 }
 0x931   : > { %v5189_v38 = vmul.f32 %v5181_v62, %v5126_v13  ;;  %v8818_v13 = vld [vmem:[#allocation2 + $0x8e8] sm:$0xf0] }
 0x932   : > { %v8821_v15 = vor.u32 %v9425_v17, %v8818_v13  ;;  %v8768_v13 = vld [vmem:[#allocation2 + $0x880] sm:$0xf] }
 0x933   : > { %v5215_v29 = vadd.f32 %v5207_v43, %v5189_v38  ;;  %v8808_v38 = vld [vmem:[#allocation2 + $0x8d0] sm:$0xf]  ;;  %v9424_v43 = vld [vmem:[#allocation2 + $0x8d4] sm:$0xf0] }
 0x934   : > { %v5129_v53 = vpop.f32.mrf.mxu0  ;;  %v5158_v16 = vpop.f32.mrf.mxu1  ;;  %5786 = vmatpush.bf16.msrb.mxu1 %v8821_v15  ;;  %5900 = vmatpush.bf16.msrb.mxu3 %v8821_v15  ;;  %v9413_v15 = vld [vmem:[#allocation2 + $0x884] sm:$0xf] }
 0x935   : > { %v5350_v23 = vpack.c.bf16 %v5215_v29, %v5214_v48  ;;  %v5173_v58 = vmul.f32 %v10920_v44, %v5158_v16  ;;  %v5199_v35 = vmul.f32 %v10929_v54, %v5158_v16  ;;  %v9423_v48 = vld [vmem:[#allocation2 + $0x8d4] sm:$0xf]  ;;  %v8809_v29 = vor.u32 %v9424_v43, %v8808_v38 }
 0x937   : > { %5446 = vmatmul.bf16.gmra.mxu0 %v5350_v23  ;;  %5475 = vmatmul.bf16.gmra.mxu1 %v5350_v23  ;;  %v5182_v61 = vadd.f32 %v10924_v26, %v5173_v58  ;;  %v5208_v30 = vadd.f32 %v10936_v37, %v5199_v35  ;;  %v8800_v35 = vld [vmem:[#allocation2 + $0x8c0] sm:$0xf] }
 0x938   : > { %5758 = vmatpush.bf16.msrb.mxu0 %v8809_v29  ;;  %5872 = vmatpush.bf16.msrb.mxu2 %v8809_v29 }
 0x939   : > { %v5190_v40 = vmul.f32 %v5182_v61, %v5129_v53  ;;  %v8810_v53 = vld [vmem:[#allocation2 + $0x8d8] sm:$0xf0] }
 0x93a   : > { %v8813_v58 = vor.u32 %v9423_v48, %v8810_v53 }
 0x93b   : > { %v5216_v42 = vadd.f32 %v5208_v30, %v5190_v40 }
 0x93c   : > { %v5131_v33 = vpop.f32.mrf.mxu0  ;;  %v5160_v21 = vpop.f32.mrf.mxu1  ;;  %5787 = vmatpush.bf16.msrb.mxu1 %v8813_v58  ;;  %5901 = vmatpush.bf16.msrb.mxu3 %v8813_v58 }
 0x93d   : > { %v5174_v31 = vmul.f32 %v10920_v44, %v5160_v21  ;;  %v5200_v24 = vmul.f32 %v10929_v54, %v5160_v21 }
 0x93f   : > { %v5183_v63 = vadd.f32 %v10924_v26, %v5174_v31  ;;  %v5209_v36 = vadd.f32 %v10936_v37, %v5200_v24  ;;  %v9422_v31 = vld [vmem:[#allocation2 + $0x8c4] sm:$0xf0]  ;;  %v9421_v24 = vld [vmem:[#allocation2 + $0x8c4] sm:$0xf] }
 0x940   : > { %v8801_v40 = vor.u32 %v9422_v31, %v8800_v35  ;;  %v5348_v31 = vld [vmem:[#allocation5 + $0x40] sm:$0xf] }
 0x941   : > { %v5191_v32 = vmul.f32 %v5183_v63, %v5131_v33  ;;  %v8802_v63 = vld [vmem:[#allocation2 + $0x8c8] sm:$0xf0] }
 0x942   : > { %5759 = vmatpush.bf16.msrb.mxu0 %v8801_v40  ;;  %5873 = vmatpush.bf16.msrb.mxu2 %v8801_v40 }
 0x943   : > { %v5217_v50 = vadd.f32 %v5209_v36, %v5191_v32  ;;  %v8805_v36 = vor.u32 %v9421_v24, %v8802_v63 }
 0x944   : > { %v5163_v20 = vpop.f32.mrf.mxu1  ;;  %v5134_v49 = vpop.f32.mrf.mxu0 }
 0x945   : > { %v5351_v47 = vpack.c.bf16 %v5217_v50, %v5216_v42  ;;  %v5175_v41 = vmul.f32 %v10920_v44, %v5163_v20  ;;  %v5201_v39 = vmul.f32 %v10929_v54, %v5163_v20  ;;  %5788 = vmatpush.bf16.msrb.mxu1 %v8805_v36  ;;  %5902 = vmatpush.bf16.msrb.mxu3 %v8805_v36 }
 0x947   : > { %5451 = vmatmul.bf16.gmra.mxu0 %v5351_v47  ;;  %5480 = vmatmul.bf16.gmra.mxu1 %v5351_v47  ;;  %v5184_v55 = vadd.f32 %v10924_v26, %v5175_v41  ;;  %v5210_v2 = vadd.f32 %v10936_v37, %v5201_v39  ;;  %v8792_v47 = vld [vmem:[#allocation2 + $0x8b0] sm:$0xf] }
 0x949   : > { %v5192_v46 = vmul.f32 %v5184_v55, %v5134_v49  ;;  %v9420_v49 = vld [vmem:[#allocation2 + $0x8b4] sm:$0xf0]  ;;  %v9419_v55 = vld [vmem:[#allocation2 + $0x8b4] sm:$0xf] }
 0x94a   : > { %v8793_v41 = vor.u32 %v9420_v49, %v8792_v47 }
 0x94b   : > { %v5218_v60 = vadd.f32 %v5210_v2, %v5192_v46  ;;  %v9418_v46 = vld [vmem:[#allocation2 + $0x8a4] sm:$0xf0]  ;;  %v8786_v2 = vld [vmem:[#allocation2 + $0x8a8] sm:$0xf0] }
 0x94c   : > { %v5165_v52 = vpop.f32.mrf.mxu1  ;;  %v5136_v59 = vpop.f32.mrf.mxu0  ;;  %5760 = vmatpush.bf16.msrb.mxu0 %v8793_v41  ;;  %5874 = vmatpush.bf16.msrb.mxu2 %v8793_v41 }
 0x94d   : > { %v5176_v27 = vmul.f32 %v10920_v44, %v5165_v52  ;;  %v5202_v1 = vmul.f32 %v10929_v54, %v5165_v52  ;;  %v8794_v52 = vld [vmem:[#allocation2 + $0x8b8] sm:$0xf0] }
 0x94f   : > { %v5185_v51 = vadd.f32 %v10924_v26, %v5176_v27  ;;  %v5211_v45 = vadd.f32 %v10936_v37, %v5202_v1  ;;  %v8797_v27 = vor.u32 %v9419_v55, %v8794_v52  ;;  %v8784_v1 = vld [vmem:[#allocation2 + $0x8a0] sm:$0xf]  ;;  %v10994_v55 = vperm.slane %v5348_v31, 1 }
 0x951   : > { %v5193_v25 = vmul.f32 %v5185_v51, %v5136_v59  ;;  %5789 = vmatpush.bf16.msrb.mxu1 %v8797_v27  ;;  %v9417_v51 = vld [vmem:[#allocation2 + $0x8a4] sm:$0xf]  ;;  %5903 = vmatpush.bf16.msrb.mxu3 %v8797_v27  ;;  %v8785_v59 = vor.u32 %v9418_v46, %v8784_v1 }
 0x953   : > { %v5219_v3 = vadd.f32 %v5211_v45, %v5193_v25  ;;  %v8789_v45 = vor.u32 %v9417_v51, %v8786_v2  ;;  %5761 = vmatpush.bf16.msrb.mxu0 %v8785_v59  ;;  %5875 = vmatpush.bf16.msrb.mxu2 %v8785_v59  ;;  %v11002_v2 = vperm.slane %v5348_v31, 0 }
 0x955   : > { %v5352_v0 = vpack.c.bf16 %v5219_v3, %v5218_v60  ;;  %5790 = vmatpush.bf16.msrb.mxu1 %v8789_v45  ;;  %5904 = vmatpush.bf16.msrb.mxu3 %v8789_v45 }
 0x957   : > { %5456 = vmatmul.bf16.gmra.mxu0 %v5352_v0  ;;  %5485 = vmatmul.bf16.gmra.mxu1 %v5352_v0 }
 0x958   : > { %5762 = vmatpush.bf16.msrb.mxu0 %v8777_v57  ;;  %5876 = vmatpush.bf16.msrb.mxu2 %v8777_v57 }
 0x959   : > { %5791 = vmatpush.bf16.msrb.mxu1 %v8781_v11  ;;  %5905 = vmatpush.bf16.msrb.mxu3 %v8781_v11 }
 0x975   : > { %v5233_v4 = vpop.f32.mrf.mxu2  ;;  %v5262_v5 = vpop.f32.mrf.mxu3 }
 0x976   : > { %v5282_v19 = vmul.f32 %v5262_v5, %v10920_v44  ;;  %v5306_v28 = vmul.f32 %v5262_v5, %v10929_v54 }
 0x978   : > { %v5290_v14 = vadd.f32 %v5282_v19, %v10924_v26  ;;  %v5314_v61 = vadd.f32 %v5306_v28, %v10936_v37 }
 0x97a   : > { %v5298_v16 = vmul.f32 %v5290_v14, %v5233_v4  ;;  %v9414_v14 = vld [vmem:[#allocation2 + $0x884] sm:$0xf0] }
 0x97c   : > { %v5322_v30 = vadd.f32 %v5314_v61, %v5298_v16 }
 0x97d   : > { %v5235_v18 = vpop.f32.mrf.mxu2  ;;  %v5264_v22 = vpop.f32.mrf.mxu3 }
 0x97e   : > { %v5283_v62 = vmul.f32 %v5264_v22, %v10920_v44  ;;  %v5307_v34 = vmul.f32 %v5264_v22, %v10929_v54  ;;  %v8770_v22 = vld [vmem:[#allocation2 + $0x888] sm:$0xf0] }
 0x980   : > { %v5291_v23 = vadd.f32 %v5283_v62, %v10924_v26  ;;  %v5315_v21 = vadd.f32 %v5307_v34, %v10936_v37  ;;  %v8773_v34 = vor.u32 %v9413_v15, %v8770_v22 }
 0x982   : > { %v5299_v33 = vmul.f32 %v5291_v23, %v5235_v18  ;;  %v8769_v18 = vor.u32 %v9414_v14, %v8768_v13  ;;  %5792 = vmatpush.bf16.msrb.mxu1 %v8773_v34  ;;  %5906 = vmatpush.bf16.msrb.mxu3 %v8773_v34 }
 0x984   : > { %v5323_v32 = vadd.f32 %v5315_v21, %v5299_v33  ;;  %5763 = vmatpush.bf16.msrb.mxu0 %v8769_v18  ;;  %5877 = vmatpush.bf16.msrb.mxu2 %v8769_v18 }
 0x985   : > { %v5238_v42 = vpop.f32.mrf.mxu2  ;;  %v5267_v50 = vpop.f32.mrf.mxu3 }
 0x986   : > { %v5543_v20 = vpack.c.bf16 %v5323_v32, %v5322_v30  ;;  %v5284_v39 = vmul.f32 %v5267_v50, %v10920_v44  ;;  %v5308_v0 = vmul.f32 %v5267_v50, %v10929_v54  ;;  %v10991_v30 = vperm.slane %v5348_v31, 3 }
 0x988   : > { %5555 = vmatmul.bf16.vlgmr.msra.gmra.mxu2 %v5543_v20  ;;  %5584 = vmatmul.bf16.vlgmr.msra.gmra.mxu3 %v5543_v20  ;;  %v5292_v25 = vadd.f32 %v5284_v39, %v10924_v26  ;;  %v5316_v56 = vadd.f32 %v5308_v0, %v10936_v37  ;;  %v10997_v39 = vperm.slane %v5348_v31, 2 }
 0x98a   : > { %v5300_v19 = vmul.f32 %v5292_v25, %v5238_v42 }
 0x98c   : > { %v5324_v28 = vadd.f32 %v5316_v56, %v5300_v19 }
 0x98d   : > { %v5240_v60 = vpop.f32.mrf.mxu2  ;;  %v5269_v3 = vpop.f32.mrf.mxu3 }
 0x98e   : > { %v5285_v4 = vmul.f32 %v5269_v3, %v10920_v44  ;;  %v5309_v5 = vmul.f32 %v5269_v3, %v10929_v54 }
 0x990   : > { %v5293_v10 = vadd.f32 %v5285_v4, %v10924_v26  ;;  %v5317_v12 = vadd.f32 %v5309_v5, %v10936_v37 }
 0x992   : > { %v5301_v17 = vmul.f32 %v5293_v10, %v5240_v60 }
 0x994   : > { %v5325_v62 = vadd.f32 %v5317_v12, %v5301_v17 }
 0x995   : > { %v5243_v38 = vpop.f32.mrf.mxu2  ;;  %v5272_v43 = vpop.f32.mrf.mxu3 }
 0x996   : > { %v5544_v48 = vpack.c.bf16 %v5325_v62, %v5324_v28  ;;  %v5286_v29 = vmul.f32 %v5272_v43, %v10920_v44  ;;  %v5310_v58 = vmul.f32 %v5272_v43, %v10929_v54 }
 0x998   : > { %5560 = vmatmul.bf16.gmra.mxu2 %v5544_v48  ;;  %5589 = vmatmul.bf16.gmra.mxu3 %v5544_v48  ;;  %v5294_v53 = vadd.f32 %v5286_v29, %v10924_v26  ;;  %v5318_v24 = vadd.f32 %v5310_v58, %v10936_v37 }
 0x99a   : > { %v5302_v21 = vmul.f32 %v5294_v53, %v5243_v38 }
 0x99c   : > { %v5326_v32 = vadd.f32 %v5318_v24, %v5302_v21 }
 0x99d   : > { %v5245_v16 = vpop.f32.mrf.mxu2  ;;  %v5274_v23 = vpop.f32.mrf.mxu3 }
 0x99e   : > { %v5287_v61 = vmul.f32 %v5274_v23, %v10920_v44  ;;  %v5311_v33 = vmul.f32 %v5274_v23, %v10929_v54 }
 0x9a0   : > { %v5295_v35 = vadd.f32 %v5287_v61, %v10924_v26  ;;  %v5319_v63 = vadd.f32 %v5311_v33, %v10936_v37 }
 0x9a2   : > { %v5303_v40 = vmul.f32 %v5295_v35, %v5245_v16 }
 0x9a4   : > { %v5442_v36 = vpop.f32.mrf.mxu0  ;;  %v5471_v42 = vpop.f32.mrf.mxu1  ;;  %v5327_v50 = vadd.f32 %v5319_v63, %v5303_v40 }
 0x9a5   : > { %v5277_v20 = vpop.f32.mrf.mxu3  ;;  %v5248_v49 = vpop.f32.mrf.mxu2  ;;  %v5492_v41 = vmul.f32 %v10991_v30, %v5471_v42  ;;  %v5518_v59 = vmul.f32 %v10997_v39, %v5471_v42 }
 0x9a6   : > { %v5545_v47 = vpack.c.bf16 %v5327_v50, %v5326_v32  ;;  %v5288_v52 = vmul.f32 %v5277_v20, %v10920_v44  ;;  %v5312_v3 = vmul.f32 %v5277_v20, %v10929_v54 }
 0x9a7   : > { %v5501_v27 = vadd.f32 %v10994_v55, %v5492_v41  ;;  %v5527_v57 = vadd.f32 %v11002_v2, %v5518_v59 }
 0x9a8   : > { %5565 = vmatmul.bf16.gmra.mxu2 %v5545_v47  ;;  %5594 = vmatmul.bf16.gmra.mxu3 %v5545_v47  ;;  %v5296_v1 = vadd.f32 %v5288_v52, %v10924_v26  ;;  %v5320_v11 = vadd.f32 %v5312_v3, %v10936_v37 }
 0x9a9   : > { %v5509_v5 = vmul.f32 %v5501_v27, %v5442_v36 }
 0x9aa   : > { %v5304_v7 = vmul.f32 %v5296_v1, %v5248_v49 }
 0x9ac   : > { %v5444_v46 = vpop.f32.mrf.mxu0  ;;  %v5473_v51 = vpop.f32.mrf.mxu1 }
 0x9ad   : > { %v5279_v25 = vpop.f32.mrf.mxu3  ;;  %v5493_v45 = vmul.f32 %v10991_v30, %v5473_v51  ;;  %v5519_v60 = vmul.f32 %v10997_v39, %v5473_v51  ;;  %v5250_v9 = vpop.f32.mrf.mxu2 }
 0x9ae   : > { %v5289_v0 = vmul.f32 %v5279_v25, %v10920_v44  ;;  %v5313_v4 = vmul.f32 %v5279_v25, %v10929_v54  ;;  %v5535_v44 = vadd.f32 %v5527_v57, %v5509_v5  ;;  %v5328_v54 = vadd.f32 %v5320_v11, %v5304_v7  ;;  %v8888_v11 = vld [vmem:[#allocation2 + $0x970] sm:$0xf] }
 0x9af   : > { %v5502_v6 = vadd.f32 %v10994_v55, %v5493_v45  ;;  %v5528_v10 = vadd.f32 %v11002_v2, %v5519_v60 }
 0x9b0   : > { %v5297_v8 = vadd.f32 %v5289_v0, %v10924_v26  ;;  %v5321_v17 = vadd.f32 %v5313_v4, %v10936_v37 }
 0x9b1   : > { %v5510_v19 = vmul.f32 %v5502_v6, %v5444_v46 }
 0x9b2   : > { %v5305_v56 = vmul.f32 %v5297_v8, %v5250_v9 }
 0x9b3   : > { %v5536_v12 = vadd.f32 %v5528_v10, %v5510_v19 }
 0x9b4   : > { %v5447_v13 = vpop.f32.mrf.mxu0  ;;  %v5476_v14 = vpop.f32.mrf.mxu1  ;;  %v5329_v15 = vadd.f32 %v5321_v17, %v5305_v56  ;;  %v9444_v56 = vld [vmem:[#allocation2 + $0x974] sm:$0xf0]  ;;  %v9443_v17 = vld [vmem:[#allocation2 + $0x974] sm:$0xf] }
 0x9b5   : > { %v5672_v18 = vpack.c.bf16 %v5536_v12, %v5535_v44  ;;  %v5494_v26 = vmul.f32 %v10991_v30, %v5476_v14  ;;  %v5520_v37 = vmul.f32 %v10997_v39, %v5476_v14  ;;  %v8889_v44 = vor.u32 %v9444_v56, %v8888_v11  ;;  %v8890_v12 = vld [vmem:[#allocation2 + $0x978] sm:$0xf0]  ;;  %v9442_v14 = vld [vmem:[#allocation2 + $0x964] sm:$0xf0] }
 0x9b6   : > { %v5546_v22 = vpack.c.bf16 %v5329_v15, %v5328_v54  ;;  %v8893_v54 = vor.u32 %v9443_v17, %v8890_v12  ;;  %v9441_v15 = vld [vmem:[#allocation2 + $0x964] sm:$0xf]  ;;  %v8842_v11 = vld [vmem:[#allocation2 + $0x918] sm:$0xf0]  ;;  %v9430_v12 = vld [vmem:[#allocation2 + $0x904] sm:$0xf0] }
 0x9b7   : > { %5764 = vmatmul.bf16.vlgmr.msrb.gmra.mxu0 %v5672_v18  ;;  %5793 = vmatmul.bf16.vlgmr.msrb.gmra.mxu1 %v5672_v18  ;;  %v5503_v28 = vadd.f32 %v10994_v55, %v5494_v26  ;;  %v5529_v53 = vadd.f32 %v11002_v2, %v5520_v37  ;;  %v8872_v37 = vld [vmem:[#allocation2 + $0x950] sm:$0xf] }
 0x9b8   : > { %5570 = vmatmul.bf16.gmra.mxu2 %v5546_v22  ;;  %5599 = vmatmul.bf16.gmra.mxu3 %v5546_v22 }
 0x9b9   : > { %v5511_v48 = vmul.f32 %v5503_v28, %v5447_v13  ;;  %6079 = vmatpush.bf16.msra.mxu0 %v8889_v44  ;;  %6193 = vmatpush.bf16.msra.mxu2 %v8889_v44  ;;  %v8880_v13 = vld [vmem:[#allocation2 + $0x960] sm:$0xf]  ;;  %v8882_v28 = vld [vmem:[#allocation2 + $0x968] sm:$0xf0] }
 0x9ba   : > { %6108 = vmatpush.bf16.msra.mxu1 %v8893_v54  ;;  %6222 = vmatpush.bf16.msra.mxu3 %v8893_v54  ;;  %v8881_v26 = vor.u32 %v9442_v14, %v8880_v13  ;;  %v8832_v44 = vld [vmem:[#allocation2 + $0x900] sm:$0xf]  ;;  %v9429_v54 = vld [vmem:[#allocation2 + $0x904] sm:$0xf] }
 0x9bb   : > { %v5537_v58 = vadd.f32 %v5529_v53, %v5511_v48 }
 0x9bc   : > { %v5449_v62 = vpop.f32.mrf.mxu0  ;;  %v5478_v34 = vpop.f32.mrf.mxu1 }
 0x9bd   : > { %v5495_v38 = vmul.f32 %v10991_v30, %v5478_v34  ;;  %v5521_v43 = vmul.f32 %v10997_v39, %v5478_v34  ;;  %6080 = vmatpush.bf16.msra.mxu0 %v8881_v26  ;;  %6194 = vmatpush.bf16.msra.mxu2 %v8881_v26 }
 0x9bf   : > { %v5504_v29 = vadd.f32 %v10994_v55, %v5495_v38  ;;  %v5530_v23 = vadd.f32 %v11002_v2, %v5521_v43  ;;  %v9440_v38 = vld [vmem:[#allocation2 + $0x954] sm:$0xf0]  ;;  %v9439_v43 = vld [vmem:[#allocation2 + $0x954] sm:$0xf] }
 0x9c0   : > { %v8873_v48 = vor.u32 %v9440_v38, %v8872_v37 }
 0x9c1   : > { %v5512_v16 = vmul.f32 %v5504_v29, %v5449_v62  ;;  %v8885_v62 = vor.u32 %v9441_v15, %v8882_v28  ;;  %v8874_v29 = vld [vmem:[#allocation2 + $0x958] sm:$0xf0]  ;;  %v8833_v15 = vor.u32 %v9430_v12, %v8832_v44 }
 0x9c2   : > { %v8877_v53 = vor.u32 %v9439_v43, %v8874_v29  ;;  %6081 = vmatpush.bf16.msra.mxu0 %v8873_v48  ;;  %6195 = vmatpush.bf16.msra.mxu2 %v8873_v48 }
 0x9c3   : > { %v5538_v61 = vadd.f32 %v5530_v23, %v5512_v16  ;;  %6109 = vmatpush.bf16.msra.mxu1 %v8885_v62  ;;  %6223 = vmatpush.bf16.msra.mxu3 %v8885_v62  ;;  %v8864_v23 = vld [vmem:[#allocation2 + $0x940] sm:$0xf] }
 0x9c4   : > { %v5452_v33 = vpop.f32.mrf.mxu0  ;;  %v5481_v21 = vpop.f32.mrf.mxu1 }
 0x9c5   : > { %v5673_v35 = vpack.c.bf16 %v5538_v61, %v5537_v58  ;;  %v5496_v31 = vmul.f32 %v10991_v30, %v5481_v21  ;;  %v5522_v32 = vmul.f32 %v10997_v39, %v5481_v21  ;;  %v9438_v58 = vld [vmem:[#allocation2 + $0x944] sm:$0xf0]  ;;  %v9437_v61 = vld [vmem:[#allocation2 + $0x944] sm:$0xf] }
 0x9c7   : > { %5769 = vmatmul.bf16.gmra.mxu0 %v5673_v35  ;;  %5798 = vmatmul.bf16.gmra.mxu1 %v5673_v35  ;;  %v5505_v24 = vadd.f32 %v10994_v55, %v5496_v31  ;;  %v5531_v47 = vadd.f32 %v11002_v2, %v5522_v32  ;;  %v8865_v35 = vor.u32 %v9438_v58, %v8864_v23  ;;  %v8866_v31 = vld [vmem:[#allocation2 + $0x948] sm:$0xf0] }
 0x9c8   : > { %6110 = vmatpush.bf16.msra.mxu1 %v8877_v53  ;;  %6224 = vmatpush.bf16.msra.mxu3 %v8877_v53  ;;  %v8869_v32 = vor.u32 %v9437_v61, %v8866_v31 }
 0x9c9   : > { %v5513_v50 = vmul.f32 %v5505_v24, %v5452_v33  ;;  %6082 = vmatpush.bf16.msra.mxu0 %v8865_v35  ;;  %6196 = vmatpush.bf16.msra.mxu2 %v8865_v35 }
 0x9cb   : > { %v5539_v52 = vadd.f32 %v5531_v47, %v5513_v50  ;;  %v8856_v50 = vld [vmem:[#allocation2 + $0x930] sm:$0xf] }
 0x9cc   : > { %v5454_v40 = vpop.f32.mrf.mxu0  ;;  %v5483_v63 = vpop.f32.mrf.mxu1  ;;  %6111 = vmatpush.bf16.msra.mxu1 %v8869_v32  ;;  %6225 = vmatpush.bf16.msra.mxu3 %v8869_v32 }
 0x9cd   : > { %v5497_v36 = vmul.f32 %v10991_v30, %v5483_v63  ;;  %v5523_v42 = vmul.f32 %v10997_v39, %v5483_v63 }
 0x9cf   : > { %v5506_v20 = vadd.f32 %v10994_v55, %v5497_v36  ;;  %v5532_v41 = vadd.f32 %v11002_v2, %v5523_v42 }
 0x9d1   : > { %v5514_v49 = vmul.f32 %v5506_v20, %v5454_v40  ;;  %v9436_v20 = vld [vmem:[#allocation2 + $0x934] sm:$0xf0] }
 0x9d2   : > { %v8857_v47 = vor.u32 %v9436_v20, %v8856_v50 }
 0x9d3   : > { %v5540_v27 = vadd.f32 %v5532_v41, %v5514_v49  ;;  %v9435_v49 = vld [vmem:[#allocation2 + $0x934] sm:$0xf]  ;;  %v8858_v41 = vld [vmem:[#allocation2 + $0x938] sm:$0xf0] }
 0x9d4   : > { %v5486_v1 = vpop.f32.mrf.mxu1  ;;  %v5457_v51 = vpop.f32.mrf.mxu0  ;;  %6083 = vmatpush.bf16.msra.mxu0 %v8857_v47  ;;  %6197 = vmatpush.bf16.msra.mxu2 %v8857_v47 }
 0x9d5   : > { %v5674_v46 = vpack.c.bf16 %v5540_v27, %v5539_v52  ;;  %v5498_v59 = vmul.f32 %v10991_v30, %v5486_v1  ;;  %v5524_v60 = vmul.f32 %v10997_v39, %v5486_v1 }
 0x9d7   : > { %5774 = vmatmul.bf16.gmra.mxu0 %v5674_v46  ;;  %5803 = vmatmul.bf16.gmra.mxu1 %v5674_v46  ;;  %v5507_v25 = vadd.f32 %v10994_v55, %v5498_v59  ;;  %v5533_v7 = vadd.f32 %v11002_v2, %v5524_v60  ;;  %v8861_v46 = vor.u32 %v9435_v49, %v8858_v41  ;;  %v9433_v60 = vld [vmem:[#allocation2 + $0x924] sm:$0xf] }
 0x9d9   : > { %v5515_v4 = vmul.f32 %v5507_v25, %v5457_v51  ;;  %v8848_v25 = vld [vmem:[#allocation2 + $0x920] sm:$0xf]  ;;  %6112 = vmatpush.bf16.msra.mxu1 %v8861_v46  ;;  %6226 = vmatpush.bf16.msra.mxu3 %v8861_v46 }
 0x9db   : > { %v5541_v9 = vadd.f32 %v5533_v7, %v5515_v4 }
 0x9dc   : > { %v5488_v45 = vpop.f32.mrf.mxu1  ;;  %v5459_v6 = vpop.f32.mrf.mxu0 }
 0x9dd   : > { %v5499_v3 = vmul.f32 %v10991_v30, %v5488_v45  ;;  %v5525_v0 = vmul.f32 %v10997_v39, %v5488_v45  ;;  %v9434_v45 = vld [vmem:[#allocation2 + $0x924] sm:$0xf0] }
 0x9de   : > { %v8849_v4 = vor.u32 %v9434_v45, %v8848_v25 }
 0x9df   : > { %v5508_v5 = vadd.f32 %v10994_v55, %v5499_v3  ;;  %v5534_v57 = vadd.f32 %v11002_v2, %v5525_v0 }
 0x9e0   : > { %6084 = vmatpush.bf16.msra.mxu0 %v8849_v4  ;;  %6198 = vmatpush.bf16.msra.mxu2 %v8849_v4 }
 0x9e1   : > { %v5516_v8 = vmul.f32 %v5508_v5, %v5459_v6  ;;  %v8850_v5 = vld [vmem:[#allocation2 + $0x928] sm:$0xf0] }
 0x9e2   : > { %v8853_v7 = vor.u32 %v9433_v60, %v8850_v5 }
 0x9e3   : > { %v5542_v19 = vadd.f32 %v5534_v57, %v5516_v8  ;;  %v8840_v57 = vld [vmem:[#allocation2 + $0x910] sm:$0xf] }
 0x9e4   : > { %6113 = vmatpush.bf16.msra.mxu1 %v8853_v7  ;;  %6227 = vmatpush.bf16.msra.mxu3 %v8853_v7 }
 0x9e5   : > { %v5675_v10 = vpack.c.bf16 %v5542_v19, %v5541_v9  ;;  %v9432_v9 = vld [vmem:[#allocation2 + $0x914] sm:$0xf0]  ;;  %v9431_v19 = vld [vmem:[#allocation2 + $0x914] sm:$0xf] }
 0x9e6   : > { %v8845_v56 = vor.u32 %v9431_v19, %v8842_v11 }
 0x9e7   : > { %5779 = vmatmul.bf16.gmra.mxu0 %v5675_v10  ;;  %5808 = vmatmul.bf16.gmra.mxu1 %v5675_v10  ;;  %v8841_v10 = vor.u32 %v9432_v9, %v8840_v57 }
 0x9e8   : > { %6114 = vmatpush.bf16.msra.mxu1 %v8845_v56  ;;  %6228 = vmatpush.bf16.msra.mxu3 %v8845_v56 }
 0x9e9   : > { %6085 = vmatpush.bf16.msra.mxu0 %v8841_v10  ;;  %6199 = vmatpush.bf16.msra.mxu2 %v8841_v10 }
 0x9ed   : > { %6086 = vmatpush.bf16.msra.mxu0 %v8833_v15  ;;  %6200 = vmatpush.bf16.msra.mxu2 %v8833_v15 }
 0xa0b   : > { %v5556_v18 = vpop.f32.mrf.mxu2  ;;  %v5585_v22 = vpop.f32.mrf.mxu3 }
 0xa0c   : > { %v5605_v34 = vmul.f32 %v5585_v22, %v10991_v30  ;;  %v5629_v24 = vmul.f32 %v5585_v22, %v10997_v39 }
 0xa0e   : > { %v5613_v16 = vadd.f32 %v5605_v34, %v10994_v55  ;;  %v5637_v52 = vadd.f32 %v5629_v24, %v11002_v2 }
 0xa10   : > { %v5621_v36 = vmul.f32 %v5613_v16, %v5556_v18  ;;  %v8834_v18 = vld [vmem:[#allocation2 + $0x908] sm:$0xf0] }
 0xa11   : > { %v8837_v62 = vor.u32 %v9429_v54, %v8834_v18 }
 0xa12   : > { %v5645_v51 = vadd.f32 %v5637_v52, %v5621_v36 }
 0xa13   : > { %v5558_v33 = vpop.f32.mrf.mxu2  ;;  %v5587_v21 = vpop.f32.mrf.mxu3  ;;  %6115 = vmatpush.bf16.msra.mxu1 %v8837_v62  ;;  %6229 = vmatpush.bf16.msra.mxu3 %v8837_v62 }
 0xa14   : > { %v5606_v40 = vmul.f32 %v5587_v21, %v10991_v30  ;;  %v5630_v63 = vmul.f32 %v5587_v21, %v10997_v39 }
 0xa16   : > { %v5614_v42 = vadd.f32 %v5606_v40, %v10994_v55  ;;  %v5638_v1 = vadd.f32 %v5630_v63, %v11002_v2 }
 0xa18   : > { %v5622_v27 = vmul.f32 %v5614_v42, %v5558_v33  ;;  %v5671_v33 = vld [vmem:[#allocation5 + $0x44] sm:$0xf] }
 0xa19   : > { %v11057_v24 = vperm.slane %v5671_v33, 3  ;;  %v11064_v49 = vperm.slane %v5671_v33, 1  ;;  %v11072_v4 = vperm.slane %v5671_v33, 0 }
 0xa1a   : > { %v5646_v59 = vadd.f32 %v5638_v1, %v5622_v27  ;;  %v11068_v1 = vperm.slane %v5671_v33, 2 }
 0xa1b   : > { %v5561_v3 = vpop.f32.mrf.mxu2  ;;  %v5590_v0 = vpop.f32.mrf.mxu3 }
 0xa1c   : > { %v5866_v6 = vpack.c.bf16 %v5646_v59, %v5645_v51  ;;  %v5607_v8 = vmul.f32 %v5590_v0, %v10991_v30  ;;  %v5631_v22 = vmul.f32 %v5590_v0, %v10997_v39 }
 0xa1e   : > { %5878 = vmatmul.bf16.vlgmr.msrb.gmra.mxu2 %v5866_v6  ;;  %5907 = vmatmul.bf16.vlgmr.msrb.gmra.mxu3 %v5866_v6  ;;  %v5615_v17 = vadd.f32 %v5607_v8, %v10994_v55  ;;  %v5639_v38 = vadd.f32 %v5631_v22, %v11002_v2 }
 0xa20   : > { %v5623_v34 = vmul.f32 %v5615_v17, %v5561_v3 }
 0xa22   : > { %v5647_v29 = vadd.f32 %v5639_v38, %v5623_v34 }
 0xa23   : > { %v5563_v13 = vpop.f32.mrf.mxu2  ;;  %v5592_v14 = vpop.f32.mrf.mxu3 }
 0xa24   : > { %v5608_v26 = vmul.f32 %v5592_v14, %v10991_v30  ;;  %v5632_v28 = vmul.f32 %v5592_v14, %v10997_v39 }
 0xa26   : > { %v5616_v37 = vadd.f32 %v5608_v26, %v10994_v55  ;;  %v5640_v48 = vadd.f32 %v5632_v28, %v11002_v2 }
 0xa28   : > { %v5624_v43 = vmul.f32 %v5616_v37, %v5563_v13 }
 0xa2a   : > { %v5648_v53 = vadd.f32 %v5640_v48, %v5624_v43 }
 0xa2b   : > { %v5566_v16 = vpop.f32.mrf.mxu2  ;;  %v5595_v23 = vpop.f32.mrf.mxu3 }
 0xa2c   : > { %v5867_v58 = vpack.c.bf16 %v5648_v53, %v5647_v29  ;;  %v5609_v61 = vmul.f32 %v5595_v23, %v10991_v30  ;;  %v5633_v40 = vmul.f32 %v5595_v23, %v10997_v39 }
 0xa2e   : > { %5883 = vmatmul.bf16.gmra.mxu2 %v5867_v58  ;;  %5912 = vmatmul.bf16.gmra.mxu3 %v5867_v58  ;;  %v5617_v21 = vadd.f32 %v5609_v61, %v10994_v55  ;;  %v5641_v41 = vadd.f32 %v5633_v40, %v11002_v2 }
 0xa30   : > { %v5625_v50 = vmul.f32 %v5617_v21, %v5566_v16 }
 0xa32   : > { %v5649_v46 = vadd.f32 %v5641_v41, %v5625_v50 }
 0xa33   : > { %v5568_v35 = vpop.f32.mrf.mxu2  ;;  %v5597_v31 = vpop.f32.mrf.mxu3 }
 0xa34   : > { %v5610_v63 = vmul.f32 %v5597_v31, %v10991_v30  ;;  %v5634_v32 = vmul.f32 %v5597_v31, %v10997_v39  ;;  %v5765_v36 = vpop.f32.mrf.mxu0  ;;  %v5794_v42 = vpop.f32.mrf.mxu1 }
 0xa35   : > { %v5815_v47 = vmul.f32 %v11057_v24, %v5794_v42  ;;  %v5841_v0 = vmul.f32 %v11068_v1, %v5794_v42 }
 0xa36   : > { %v5618_v20 = vadd.f32 %v5610_v63, %v10994_v55  ;;  %v5642_v27 = vadd.f32 %v5634_v32, %v11002_v2 }
 0xa37   : > { %v5824_v59 = vadd.f32 %v11064_v49, %v5815_v47  ;;  %v5850_v19 = vadd.f32 %v11072_v4, %v5841_v0 }
 0xa38   : > { %v5626_v52 = vmul.f32 %v5618_v20, %v5568_v35 }
 0xa39   : > { %v5832_v57 = vmul.f32 %v5824_v59, %v5765_v36 }
 0xa3a   : > { %v5650_v51 = vadd.f32 %v5642_v27, %v5626_v52 }
 0xa3b   : > { %v5600_v25 = vpop.f32.mrf.mxu3  ;;  %v5571_v5 = vpop.f32.mrf.mxu2  ;;  %v5858_v17 = vadd.f32 %v5850_v19, %v5832_v57 }
 0xa3c   : > { %v5767_v45 = vpop.f32.mrf.mxu0  ;;  %v5796_v60 = vpop.f32.mrf.mxu1  ;;  %v5868_v3 = vpack.c.bf16 %v5650_v51, %v5649_v46  ;;  %v5611_v8 = vmul.f32 %v5600_v25, %v10991_v30  ;;  %v5635_v54 = vmul.f32 %v5600_v25, %v10997_v39 }
 0xa3d   : > { %v5816_v6 = vmul.f32 %v11057_v24, %v5796_v60  ;;  %v5842_v7 = vmul.f32 %v11068_v1, %v5796_v60 }
 0xa3e   : > { %5888 = vmatmul.bf16.gmra.mxu2 %v5868_v3  ;;  %5917 = vmatmul.bf16.gmra.mxu3 %v5868_v3  ;;  %v5619_v56 = vadd.f32 %v5611_v8, %v10994_v55  ;;  %v5643_v37 = vadd.f32 %v5635_v54, %v11002_v2 }
 0xa3f   : > { %v5825_v9 = vadd.f32 %v11064_v49, %v5816_v6  ;;  %v5851_v11 = vadd.f32 %v11072_v4, %v5842_v7 }
 0xa40   : > { %v5627_v26 = vmul.f32 %v5619_v56, %v5571_v5 }
 0xa41   : > { %v5833_v10 = vmul.f32 %v5825_v9, %v5767_v45 }
 0xa42   : > { %v5651_v48 = vadd.f32 %v5643_v37, %v5627_v26  ;;  %v9459_v26 = vld [vmem:[#allocation2 + $0x9f4] sm:$0xf]  ;;  %v8944_v37 = vld [vmem:[#allocation2 + $0x9e0] sm:$0xf] }
 0xa43   : > { %v5859_v44 = vadd.f32 %v5851_v11, %v5833_v10  ;;  %v5602_v12 = vpop.f32.mrf.mxu3  ;;  %v5573_v62 = vpop.f32.mrf.mxu2 }
 0xa44   : > { %v5612_v13 = vmul.f32 %v5602_v12, %v10991_v30  ;;  %v5636_v14 = vmul.f32 %v5602_v12, %v10997_v39  ;;  %v5770_v15 = vpop.f32.mrf.mxu0  ;;  %v5799_v18 = vpop.f32.mrf.mxu1 }
 0xa45   : > { %v5995_v22 = vpack.c.bf16 %v5859_v44, %v5858_v17  ;;  %v5817_v34 = vmul.f32 %v11057_v24, %v5799_v18  ;;  %v5843_v23 = vmul.f32 %v11068_v1, %v5799_v18  ;;  %v8952_v18 = vld [vmem:[#allocation2 + $0x9f0] sm:$0xf] }
 0xa46   : > { %v5620_v28 = vadd.f32 %v5612_v13, %v10994_v55  ;;  %v5644_v43 = vadd.f32 %v5636_v14, %v11002_v2 }
 0xa47   : > { %6087 = vmatmul.bf16.vlgmr.msra.gmra.mxu0 %v5995_v22  ;;  %6116 = vmatmul.bf16.vlgmr.msra.gmra.mxu1 %v5995_v22  ;;  %v5826_v39 = vadd.f32 %v11064_v49, %v5817_v34  ;;  %v5852_v2 = vadd.f32 %v11072_v4, %v5843_v23  ;;  %v9460_v22 = vld [vmem:[#allocation2 + $0x9f4] sm:$0xf0] }
 0xa48   : > { %v5628_v38 = vmul.f32 %v5620_v28, %v5573_v62  ;;  %v8953_v28 = vor.u32 %v9460_v22, %v8952_v18  ;;  %v8954_v62 = vld [vmem:[#allocation2 + $0x9f8] sm:$0xf0]  ;;  %v8896_v22 = vld [vmem:[#allocation2 + $0x980] sm:$0xf] }
 0xa49   : > { %v5834_v61 = vmul.f32 %v5826_v39, %v5770_v15  ;;  %v8957_v34 = vor.u32 %v9459_v26, %v8954_v62  ;;  %v9446_v26 = vld [vmem:[#allocation2 + $0x984] sm:$0xf0] }
 0xa4a   : > { %v5652_v30 = vadd.f32 %v5644_v43, %v5628_v38  ;;  %6402 = vmatpush.bf16.msrb.mxu0 %v8953_v28  ;;  %6516 = vmatpush.bf16.msrb.mxu2 %v8953_v28  ;;  %v9458_v38 = vld [vmem:[#allocation2 + $0x9e4] sm:$0xf0]  ;;  %v9457_v43 = vld [vmem:[#allocation2 + $0x9e4] sm:$0xf]  ;;  %v8897_v62 = vor.u32 %v9446_v26, %v8896_v22 }
 0xa4b   : > { %v5860_v31 = vadd.f32 %v5852_v2, %v5834_v61  ;;  %6431 = vmatpush.bf16.msrb.mxu1 %v8957_v34  ;;  %6545 = vmatpush.bf16.msrb.mxu3 %v8957_v34  ;;  %v8928_v2 = vld [vmem:[#allocation2 + $0x9c0] sm:$0xf]  ;;  %v9445_v28 = vld [vmem:[#allocation2 + $0x984] sm:$0xf]  ;;  %v8898_v34 = vld [vmem:[#allocation2 + $0x988] sm:$0xf0] }
 0xa4c   : > { %v5772_v29 = vpop.f32.mrf.mxu0  ;;  %v5801_v53 = vpop.f32.mrf.mxu1  ;;  %v5869_v16 = vpack.c.bf16 %v5652_v30, %v5651_v48  ;;  %v8945_v48 = vor.u32 %v9458_v38, %v8944_v37  ;;  %v8946_v30 = vld [vmem:[#allocation2 + $0x9e8] sm:$0xf0]  ;;  %v8901_v38 = vor.u32 %v9445_v28, %v8898_v34 }
 0xa4d   : > { %v5818_v55 = vmul.f32 %v11057_v24, %v5801_v53  ;;  %v5844_v58 = vmul.f32 %v11068_v1, %v5801_v53  ;;  %v8949_v39 = vor.u32 %v9457_v43, %v8946_v30  ;;  %v9456_v53 = vld [vmem:[#allocation2 + $0x9d4] sm:$0xf0] }
 0xa4e   : > { %5893 = vmatmul.bf16.gmra.mxu2 %v5869_v16  ;;  %5922 = vmatmul.bf16.gmra.mxu3 %v5869_v16  ;;  %v9455_v16 = vld [vmem:[#allocation2 + $0x9d4] sm:$0xf] }
 0xa4f   : > { %v5827_v33 = vadd.f32 %v11064_v49, %v5818_v55  ;;  %v5853_v35 = vadd.f32 %v11072_v4, %v5844_v58  ;;  %6403 = vmatpush.bf16.msrb.mxu0 %v8945_v48  ;;  %6517 = vmatpush.bf16.msrb.mxu2 %v8945_v48  ;;  %v8938_v55 = vld [vmem:[#allocation2 + $0x9d8] sm:$0xf0] }
 0xa50   : > { %6432 = vmatpush.bf16.msrb.mxu1 %v8949_v39  ;;  %6546 = vmatpush.bf16.msrb.mxu3 %v8949_v39  ;;  %v8941_v58 = vor.u32 %v9455_v16, %v8938_v55 }
 0xa51   : > { %v5835_v21 = vmul.f32 %v5827_v33, %v5772_v29  ;;  %v8936_v29 = vld [vmem:[#allocation2 + $0x9d0] sm:$0xf] }
 0xa52   : > { %v8937_v23 = vor.u32 %v9456_v53, %v8936_v29 }
 0xa53   : > { %v5861_v40 = vadd.f32 %v5853_v35, %v5835_v21  ;;  %v9454_v21 = vld [vmem:[#allocation2 + $0x9c4] sm:$0xf0]  ;;  %v9453_v35 = vld [vmem:[#allocation2 + $0x9c4] sm:$0xf] }
 0xa54   : > { %v5775_v63 = vpop.f32.mrf.mxu0  ;;  %v5804_v32 = vpop.f32.mrf.mxu1  ;;  %6404 = vmatpush.bf16.msrb.mxu0 %v8937_v23  ;;  %6518 = vmatpush.bf16.msrb.mxu2 %v8937_v23 }
 0xa55   : > { %v5996_v36 = vpack.c.bf16 %v5861_v40, %v5860_v31  ;;  %v5819_v42 = vmul.f32 %v11057_v24, %v5804_v32  ;;  %v5845_v41 = vmul.f32 %v11068_v1, %v5804_v32  ;;  %6433 = vmatpush.bf16.msrb.mxu1 %v8941_v58  ;;  %6547 = vmatpush.bf16.msrb.mxu3 %v8941_v58  ;;  %v8930_v40 = vld [vmem:[#allocation2 + $0x9c8] sm:$0xf0] }
 0xa56   : > { %v8929_v31 = vor.u32 %v9454_v21, %v8928_v2  ;;  %v8933_v32 = vor.u32 %v9453_v35, %v8930_v40  ;;  %v5994_v21 = vld [vmem:[#allocation5 + $0x48] sm:$0xf] }
 0xa57   : > { %6092 = vmatmul.bf16.gmra.mxu0 %v5996_v36  ;;  %6121 = vmatmul.bf16.gmra.mxu1 %v5996_v36  ;;  %v5828_v50 = vadd.f32 %v11064_v49, %v5819_v42  ;;  %v5854_v59 = vadd.f32 %v11072_v4, %v5845_v41  ;;  %v8920_v36 = vld [vmem:[#allocation2 + $0x9b0] sm:$0xf]  ;;  %v9452_v42 = vld [vmem:[#allocation2 + $0x9b4] sm:$0xf0] }
 0xa58   : > { %6405 = vmatpush.bf16.msrb.mxu0 %v8929_v31  ;;  %6519 = vmatpush.bf16.msrb.mxu2 %v8929_v31 }
 0xa59   : > { %v5836_v46 = vmul.f32 %v5828_v50, %v5775_v63  ;;  %6434 = vmatpush.bf16.msrb.mxu1 %v8933_v32  ;;  %v8921_v50 = vor.u32 %v9452_v42, %v8920_v36  ;;  %6548 = vmatpush.bf16.msrb.mxu3 %v8933_v32 }
 0xa5b   : > { %v5862_v60 = vadd.f32 %v5854_v59, %v5836_v46 }
 0xa5c   : > { %v5777_v20 = vpop.f32.mrf.mxu0  ;;  %v5806_v47 = vpop.f32.mrf.mxu1  ;;  %6406 = vmatpush.bf16.msrb.mxu0 %v8921_v50  ;;  %6520 = vmatpush.bf16.msrb.mxu2 %v8921_v50 }
 0xa5d   : > { %v5820_v52 = vmul.f32 %v11057_v24, %v5806_v47  ;;  %v5846_v27 = vmul.f32 %v11068_v1, %v5806_v47  ;;  %v8922_v47 = vld [vmem:[#allocation2 + $0x9b8] sm:$0xf0] }
 0xa5f   : > { %v5829_v51 = vadd.f32 %v11064_v49, %v5820_v52  ;;  %v5855_v45 = vadd.f32 %v11072_v4, %v5846_v27 }
 0xa61   : > { %v5837_v25 = vmul.f32 %v5829_v51, %v5777_v20  ;;  %v9451_v20 = vld [vmem:[#allocation2 + $0x9b4] sm:$0xf] }
 0xa62   : > { %v8925_v52 = vor.u32 %v9451_v20, %v8922_v47  ;;  %v11131_v20 = vperm.slane %v5994_v21, 1 }
 0xa63   : > { %v5863_v3 = vadd.f32 %v5855_v45, %v5837_v25  ;;  %v8912_v45 = vld [vmem:[#allocation2 + $0x9a0] sm:$0xf] }
 0xa64   : > { %v5809_v0 = vpop.f32.mrf.mxu1  ;;  %v5780_v6 = vpop.f32.mrf.mxu0  ;;  %6435 = vmatpush.bf16.msrb.mxu1 %v8925_v52  ;;  %6549 = vmatpush.bf16.msrb.mxu3 %v8925_v52 }
 0xa65   : > { %v5997_v5 = vpack.c.bf16 %v5863_v3, %v5862_v60  ;;  %v5821_v7 = vmul.f32 %v11057_v24, %v5809_v0  ;;  %v5847_v9 = vmul.f32 %v11068_v1, %v5809_v0  ;;  %v9450_v60 = vld [vmem:[#allocation2 + $0x9a4] sm:$0xf0]  ;;  %v9449_v3 = vld [vmem:[#allocation2 + $0x9a4] sm:$0xf] }
 0xa66   : > { %v8913_v0 = vor.u32 %v9450_v60, %v8912_v45 }
 0xa67   : > { %6097 = vmatmul.bf16.gmra.mxu0 %v5997_v5  ;;  %6126 = vmatmul.bf16.gmra.mxu1 %v5997_v5  ;;  %v5830_v8 = vadd.f32 %v11064_v49, %v5821_v7  ;;  %v5856_v44 = vadd.f32 %v11072_v4, %v5847_v9  ;;  %v8914_v5 = vld [vmem:[#allocation2 + $0x9a8] sm:$0xf0] }
 0xa68   : > { %6407 = vmatpush.bf16.msrb.mxu0 %v8913_v0  ;;  %6521 = vmatpush.bf16.msrb.mxu2 %v8913_v0 }
 0xa69   : > { %v5838_v11 = vmul.f32 %v5830_v8, %v5780_v6  ;;  %v8917_v8 = vor.u32 %v9449_v3, %v8914_v5 }
 0xa6b   : > { %v5864_v13 = vadd.f32 %v5856_v44, %v5838_v11  ;;  %v9448_v11 = vld [vmem:[#allocation2 + $0x994] sm:$0xf0]  ;;  %6436 = vmatpush.bf16.msrb.mxu1 %v8917_v8  ;;  %v8906_v44 = vld [vmem:[#allocation2 + $0x998] sm:$0xf0]  ;;  %6550 = vmatpush.bf16.msrb.mxu3 %v8917_v8 }
 0xa6c   : > { %v5811_v57 = vpop.f32.mrf.mxu1  ;;  %v5782_v17 = vpop.f32.mrf.mxu0 }
 0xa6d   : > { %v5822_v19 = vmul.f32 %v11057_v24, %v5811_v57  ;;  %v5848_v10 = vmul.f32 %v11068_v1, %v5811_v57 }
 0xa6f   : > { %v5831_v56 = vadd.f32 %v11064_v49, %v5822_v19  ;;  %v5857_v54 = vadd.f32 %v11072_v4, %v5848_v10  ;;  %v8904_v10 = vld [vmem:[#allocation2 + $0x990] sm:$0xf] }
 0xa71   : > { %v5839_v12 = vmul.f32 %v5831_v56, %v5782_v17  ;;  %v9447_v56 = vld [vmem:[#allocation2 + $0x994] sm:$0xf]  ;;  %v8905_v17 = vor.u32 %v9448_v11, %v8904_v10 }
 0xa73   : > { %v5865_v14 = vadd.f32 %v5857_v54, %v5839_v12  ;;  %6408 = vmatpush.bf16.msrb.mxu0 %v8905_v17  ;;  %6522 = vmatpush.bf16.msrb.mxu2 %v8905_v17 }
 0xa75   : > { %v5998_v15 = vpack.c.bf16 %v5865_v14, %v5864_v13  ;;  %v8909_v13 = vor.u32 %v9447_v56, %v8906_v44 }
 0xa77   : > { %6102 = vmatmul.bf16.gmra.mxu0 %v5998_v15  ;;  %6131 = vmatmul.bf16.gmra.mxu1 %v5998_v15 }
 0xa78   : > { %6437 = vmatpush.bf16.msrb.mxu1 %v8909_v13  ;;  %6551 = vmatpush.bf16.msrb.mxu3 %v8909_v13 }
 0xa79   : > { %6409 = vmatpush.bf16.msrb.mxu0 %v8897_v62  ;;  %6523 = vmatpush.bf16.msrb.mxu2 %v8897_v62 }
 0xa7c   : > { %6438 = vmatpush.bf16.msrb.mxu1 %v8901_v38  ;;  %6552 = vmatpush.bf16.msrb.mxu3 %v8901_v38 }
 0xaa1   : > { %v5879_v61 = vpop.f32.mrf.mxu2  ;;  %v5908_v33 = vpop.f32.mrf.mxu3 }
 0xaa2   : > { %v5928_v63 = vmul.f32 %v5908_v33, %v11057_v24  ;;  %v5952_v51 = vmul.f32 %v5908_v33, %v11068_v1 }
 0xaa4   : > { %v5936_v41 = vadd.f32 %v5928_v63, %v11064_v49  ;;  %v5960_v57 = vadd.f32 %v5952_v51, %v11072_v4  ;;  %v11127_v63 = vperm.slane %v5994_v21, 3 }
 0xaa6   : > { %v5944_v6 = vmul.f32 %v5936_v41, %v5879_v61  ;;  %v11134_v41 = vperm.slane %v5994_v21, 2 }
 0xaa8   : > { %v5968_v12 = vadd.f32 %v5960_v57, %v5944_v6  ;;  %v11142_v6 = vperm.slane %v5994_v21, 0 }
 0xaa9   : > { %v5881_v27 = vpop.f32.mrf.mxu2  ;;  %v5910_v46 = vpop.f32.mrf.mxu3 }
 0xaaa   : > { %v5929_v59 = vmul.f32 %v5910_v46, %v11057_v24  ;;  %v5953_v25 = vmul.f32 %v5910_v46, %v11068_v1 }
 0xaac   : > { %v5937_v7 = vadd.f32 %v5929_v59, %v11064_v49  ;;  %v5961_v19 = vadd.f32 %v5953_v25, %v11072_v4 }
 0xaae   : > { %v5945_v9 = vmul.f32 %v5937_v7, %v5881_v27 }
 0xab0   : > { %v5969_v54 = vadd.f32 %v5961_v19, %v5945_v9 }
 0xab1   : > { %v5884_v14 = vpop.f32.mrf.mxu2  ;;  %v5913_v15 = vpop.f32.mrf.mxu3 }
 0xab2   : > { %v6189_v18 = vpack.c.bf16 %v5969_v54, %v5968_v12  ;;  %v5930_v37 = vmul.f32 %v5913_v15, %v11057_v24  ;;  %v5954_v39 = vmul.f32 %v5913_v15, %v11068_v1 }
 0xab4   : > { %6201 = vmatmul.bf16.vlgmr.msra.gmra.mxu2 %v6189_v18  ;;  %6230 = vmatmul.bf16.vlgmr.msra.gmra.mxu3 %v6189_v18  ;;  %v5938_v43 = vadd.f32 %v5930_v37, %v11064_v49  ;;  %v5962_v55 = vadd.f32 %v5954_v39, %v11072_v4 }
 0xab6   : > { %v5946_v16 = vmul.f32 %v5938_v43, %v5884_v14 }
 0xab8   : > { %v5970_v33 = vadd.f32 %v5962_v55, %v5946_v16 }
 0xab9   : > { %v5886_v48 = vpop.f32.mrf.mxu2  ;;  %v5915_v30 = vpop.f32.mrf.mxu3 }
 0xaba   : > { %v5931_v29 = vmul.f32 %v5915_v30, %v11057_v24  ;;  %v5955_v53 = vmul.f32 %v5915_v30, %v11068_v1 }
 0xabc   : > { %v5939_v23 = vadd.f32 %v5931_v29, %v11064_v49  ;;  %v5963_v61 = vadd.f32 %v5955_v53, %v11072_v4 }
 0xabe   : > { %v5947_v58 = vmul.f32 %v5939_v23, %v5886_v48 }
 0xac0   : > { %v5971_v2 = vadd.f32 %v5963_v61, %v5947_v58 }
 0xac1   : > { %v5889_v35 = vpop.f32.mrf.mxu2  ;;  %v5918_v31 = vpop.f32.mrf.mxu3 }
 0xac2   : > { %v6190_v40 = vpack.c.bf16 %v5971_v2, %v5970_v33  ;;  %v5932_v32 = vmul.f32 %v5918_v31, %v11057_v24  ;;  %v5956_v46 = vmul.f32 %v5918_v31, %v11068_v1 }
 0xac4   : > { %6206 = vmatmul.bf16.gmra.mxu2 %v6190_v40  ;;  %6235 = vmatmul.bf16.gmra.mxu3 %v6190_v40  ;;  %v6088_v36 = vpop.f32.mrf.mxu0  ;;  %v6117_v42 = vpop.f32.mrf.mxu1  ;;  %v5940_v47 = vadd.f32 %v5932_v32, %v11064_v49  ;;  %v5964_v57 = vadd.f32 %v5956_v46, %v11072_v4 }
 0xac5   : > { %v6138_v50 = vmul.f32 %v11127_v63, %v6117_v42  ;;  %v6164_v5 = vmul.f32 %v11134_v41, %v6117_v42 }
 0xac6   : > { %v5948_v45 = vmul.f32 %v5940_v47, %v5889_v35 }
 0xac7   : > { %v6147_v25 = vadd.f32 %v11131_v20, %v6138_v50  ;;  %v6173_v44 = vadd.f32 %v11142_v6, %v6164_v5 }
 0xac8   : > { %v5972_v56 = vadd.f32 %v5964_v57, %v5948_v45 }
 0xac9   : > { %v5891_v52 = vpop.f32.mrf.mxu2  ;;  %v5920_v27 = vpop.f32.mrf.mxu3  ;;  %v6155_v10 = vmul.f32 %v6147_v25, %v6088_v36 }
 0xaca   : > { %v5933_v51 = vmul.f32 %v5920_v27, %v11057_v24  ;;  %v5957_v59 = vmul.f32 %v5920_v27, %v11068_v1 }
 0xacb   : > { %v6181_v15 = vadd.f32 %v6173_v44, %v6155_v10 }
 0xacc   : > { %v5941_v60 = vadd.f32 %v5933_v51, %v11064_v49  ;;  %v6090_v3 = vpop.f32.mrf.mxu0  ;;  %v6119_v0 = vpop.f32.mrf.mxu1  ;;  %v5965_v19 = vadd.f32 %v5957_v59, %v11072_v4 }
 0xacd   : > { %v6139_v7 = vmul.f32 %v11127_v63, %v6119_v0  ;;  %v6165_v8 = vmul.f32 %v11134_v41, %v6119_v0 }
 0xace   : > { %v5949_v9 = vmul.f32 %v5941_v60, %v5891_v52 }
 0xacf   : > { %v6148_v11 = vadd.f32 %v11131_v20, %v6139_v7  ;;  %v6174_v54 = vadd.f32 %v11142_v6, %v6165_v8 }
 0xad0   : > { %v5973_v17 = vadd.f32 %v5965_v19, %v5949_v9 }
 0xad1   : > { %v6156_v12 = vmul.f32 %v6148_v11, %v6090_v3  ;;  %v5923_v13 = vpop.f32.mrf.mxu3  ;;  %v5894_v22 = vpop.f32.mrf.mxu2 }
 0xad2   : > { %v6191_v14 = vpack.c.bf16 %v5973_v17, %v5972_v56  ;;  %v5934_v26 = vmul.f32 %v5923_v13, %v11057_v24  ;;  %v5958_v48 = vmul.f32 %v5923_v13, %v11068_v1 }
 0xad3   : > { %v6182_v18 = vadd.f32 %v6174_v54, %v6156_v12 }
 0xad4   : > { %6211 = vmatmul.bf16.gmra.mxu2 %v6191_v14  ;;  %6240 = vmatmul.bf16.gmra.mxu3 %v6191_v14  ;;  %v6093_v28 = vpop.f32.mrf.mxu0  ;;  %v6122_v62 = vpop.f32.mrf.mxu1  ;;  %v5942_v38 = vadd.f32 %v5934_v26, %v11064_v49  ;;  %v5966_v21 = vadd.f32 %v5958_v48, %v11072_v4  ;;  %v9016_v48 = vld [vmem:[#allocation2 + $0xa70] sm:$0xf] }
 0xad5   : > { %v6318_v34 = vpack.c.bf16 %v6182_v18, %v6181_v15  ;;  %v6140_v37 = vmul.f32 %v11127_v63, %v6122_v62  ;;  %v6166_v58 = vmul.f32 %v11134_v41, %v6122_v62 }
 0xad6   : > { %v5950_v53 = vmul.f32 %v5942_v38, %v5894_v22 }
 0xad7   : > { %6410 = vmatmul.bf16.vlgmr.msrb.gmra.mxu0 %v6318_v34  ;;  %6439 = vmatmul.bf16.vlgmr.msrb.gmra.mxu1 %v6318_v34  ;;  %v6149_v29 = vadd.f32 %v11131_v20, %v6140_v37 }
 0xad8   : > { %v5974_v40 = vadd.f32 %v5966_v21, %v5950_v53  ;;  %v9018_v53 = vld [vmem:[#allocation2 + $0xa78] sm:$0xf0]  ;;  %v9000_v21 = vld [vmem:[#allocation2 + $0xa50] sm:$0xf] }
 0xad9   : > { %v5925_v43 = vpop.f32.mrf.mxu3  ;;  %v5896_v61 = vpop.f32.mrf.mxu2 }
 0xada   : > { %v5935_v30 = vmul.f32 %v5925_v43, %v11057_v24  ;;  %v5959_v39 = vmul.f32 %v5925_v43, %v11068_v1  ;;  %v6157_v1 = vmul.f32 %v6149_v29, %v6093_v28 }
 0xadc   : > { %v5943_v16 = vadd.f32 %v5935_v30, %v11064_v49  ;;  %v6095_v23 = vpop.f32.mrf.mxu0  ;;  %v6124_v55 = vpop.f32.mrf.mxu1  ;;  %v5967_v24 = vadd.f32 %v5959_v39, %v11072_v4  ;;  %v6175_v49 = vadd.f32 %v11142_v6, %v6166_v58  ;;  %v9476_v30 = vld [vmem:[#allocation2 + $0xa74] sm:$0xf0]  ;;  %v9475_v39 = vld [vmem:[#allocation2 + $0xa74] sm:$0xf]  ;;  %v9473_v58 = vld [vmem:[#allocation2 + $0xa64] sm:$0xf] }
 0xadd   : > { %v6141_v33 = vmul.f32 %v11127_v63, %v6124_v55  ;;  %v6167_v2 = vmul.f32 %v11134_v41, %v6124_v55  ;;  %v9017_v29 = vor.u32 %v9476_v30, %v9016_v48  ;;  %v9474_v55 = vld [vmem:[#allocation2 + $0xa64] sm:$0xf0] }
 0xade   : > { %v5951_v35 = vmul.f32 %v5943_v16, %v5896_v61  ;;  %v6183_v47 = vadd.f32 %v6175_v49, %v6157_v1  ;;  %v9021_v16 = vor.u32 %v9475_v39, %v9018_v53  ;;  %v9470_v49 = vld [vmem:[#allocation2 + $0xa44] sm:$0xf0] }
 0xadf   : > { %v6150_v31 = vadd.f32 %v11131_v20, %v6141_v33  ;;  %v6176_v42 = vadd.f32 %v11142_v6, %v6167_v2  ;;  %6725 = vmatpush.bf16.msra.mxu0 %v9017_v29  ;;  %6839 = vmatpush.bf16.msra.mxu2 %v9017_v29  ;;  %v9010_v33 = vld [vmem:[#allocation2 + $0xa68] sm:$0xf0] }
 0xae0   : > { %v5975_v32 = vadd.f32 %v5967_v24, %v5951_v35  ;;  %6754 = vmatpush.bf16.msra.mxu1 %v9021_v16  ;;  %6868 = vmatpush.bf16.msra.mxu3 %v9021_v16  ;;  %v9013_v2 = vor.u32 %v9473_v58, %v9010_v33  ;;  %v9472_v35 = vld [vmem:[#allocation2 + $0xa54] sm:$0xf0]  ;;  %v9471_v24 = vld [vmem:[#allocation2 + $0xa54] sm:$0xf] }
 0xae1   : > { %v6158_v36 = vmul.f32 %v6150_v31, %v6095_v23  ;;  %v9008_v23 = vld [vmem:[#allocation2 + $0xa60] sm:$0xf]  ;;  %v9001_v1 = vor.u32 %v9472_v35, %v9000_v21  ;;  %v9002_v31 = vld [vmem:[#allocation2 + $0xa58] sm:$0xf0] }
 0xae2   : > { %v6192_v50 = vpack.c.bf16 %v5975_v32, %v5974_v40  ;;  %v9009_v61 = vor.u32 %v9474_v55, %v9008_v23  ;;  %v9005_v40 = vor.u32 %v9471_v24, %v9002_v31  ;;  %v8992_v32 = vld [vmem:[#allocation2 + $0xa40] sm:$0xf]  ;;  %v6317_v24 = vld [vmem:[#allocation5 + $0x4c] sm:$0xf] }
 0xae3   : > { %v6184_v52 = vadd.f32 %v6176_v42, %v6158_v36  ;;  %v9469_v36 = vld [vmem:[#allocation2 + $0xa44] sm:$0xf]  ;;  %v8993_v42 = vor.u32 %v9470_v49, %v8992_v32 }
 0xae4   : > { %6216 = vmatmul.bf16.gmra.mxu2 %v6192_v50  ;;  %6245 = vmatmul.bf16.gmra.mxu3 %v6192_v50  ;;  %v6098_v27 = vpop.f32.mrf.mxu0  ;;  %v6127_v46 = vpop.f32.mrf.mxu1  ;;  %v8994_v50 = vld [vmem:[#allocation2 + $0xa48] sm:$0xf0] }
 0xae5   : > { %v6319_v51 = vpack.c.bf16 %v6184_v52, %v6183_v47  ;;  %v6142_v4 = vmul.f32 %v11127_v63, %v6127_v46  ;;  %v6168_v60 = vmul.f32 %v11134_v41, %v6127_v46  ;;  %6726 = vmatpush.bf16.msra.mxu0 %v9009_v61  ;;  %6840 = vmatpush.bf16.msra.mxu2 %v9009_v61  ;;  %v8984_v52 = vld [vmem:[#allocation2 + $0xa30] sm:$0xf] }
 0xae6   : > { %6755 = vmatpush.bf16.msra.mxu1 %v9013_v2  ;;  %6869 = vmatpush.bf16.msra.mxu3 %v9013_v2  ;;  %v8997_v47 = vor.u32 %v9469_v36, %v8994_v50 }
 0xae7   : > { %6415 = vmatmul.bf16.gmra.mxu0 %v6319_v51  ;;  %6444 = vmatmul.bf16.gmra.mxu1 %v6319_v51  ;;  %v6151_v59 = vadd.f32 %v11131_v20, %v6142_v4  ;;  %v6177_v8 = vadd.f32 %v11142_v6, %v6168_v60 }
 0xae9   : > { %v6159_v5 = vmul.f32 %v6151_v59, %v6098_v27  ;;  %6727 = vmatpush.bf16.msra.mxu0 %v9001_v1  ;;  %6841 = vmatpush.bf16.msra.mxu2 %v9001_v1  ;;  %v9468_v27 = vld [vmem:[#allocation2 + $0xa34] sm:$0xf0]  ;;  %v9467_v59 = vld [vmem:[#allocation2 + $0xa34] sm:$0xf] }
 0xaea   : > { %6756 = vmatpush.bf16.msra.mxu1 %v9005_v40  ;;  %6870 = vmatpush.bf16.msra.mxu3 %v9005_v40  ;;  %v8985_v4 = vor.u32 %v9468_v27, %v8984_v52  ;;  %v11197_v40 = vperm.slane %v6317_v24, 3 }
 0xaeb   : > { %v6185_v19 = vadd.f32 %v6177_v8, %v6159_v5  ;;  %v9465_v5 = vld [vmem:[#allocation2 + $0xa24] sm:$0xf]  ;;  %v8978_v8 = vld [vmem:[#allocation2 + $0xa28] sm:$0xf0] }
 0xaec   : > { %v6100_v25 = vpop.f32.mrf.mxu0  ;;  %v6129_v45 = vpop.f32.mrf.mxu1 }
 0xaed   : > { %v6143_v3 = vmul.f32 %v11127_v63, %v6129_v45  ;;  %v6169_v0 = vmul.f32 %v11134_v41, %v6129_v45  ;;  %6728 = vmatpush.bf16.msra.mxu0 %v8993_v42  ;;  %6842 = vmatpush.bf16.msra.mxu2 %v8993_v42 }
 0xaee   : > { %6757 = vmatpush.bf16.msra.mxu1 %v8997_v47  ;;  %6871 = vmatpush.bf16.msra.mxu3 %v8997_v47 }
 0xaef   : > { %v6152_v7 = vadd.f32 %v11131_v20, %v6143_v3  ;;  %v6178_v9 = vadd.f32 %v11142_v6, %v6169_v0  ;;  %v8976_v3 = vld [vmem:[#allocation2 + $0xa20] sm:$0xf]  ;;  %v9466_v0 = vld [vmem:[#allocation2 + $0xa24] sm:$0xf0] }
 0xaf1   : > { %v6160_v57 = vmul.f32 %v6152_v7, %v6100_v25  ;;  %v8986_v25 = vld [vmem:[#allocation2 + $0xa38] sm:$0xf0]  ;;  %6729 = vmatpush.bf16.msra.mxu0 %v8985_v4  ;;  %6843 = vmatpush.bf16.msra.mxu2 %v8985_v4  ;;  %v8977_v7 = vor.u32 %v9466_v0, %v8976_v3 }
 0xaf2   : > { %v8989_v45 = vor.u32 %v9467_v59, %v8986_v25  ;;  %v11204_v25 = vperm.slane %v6317_v24, 2 }
 0xaf3   : > { %v6186_v10 = vadd.f32 %v6178_v9, %v6160_v57  ;;  %v8981_v57 = vor.u32 %v9465_v5, %v8978_v8 }
 0xaf4   : > { %v6132_v11 = vpop.f32.mrf.mxu1  ;;  %v6103_v17 = vpop.f32.mrf.mxu0  ;;  %6758 = vmatpush.bf16.msra.mxu1 %v8989_v45  ;;  %6872 = vmatpush.bf16.msra.mxu3 %v8989_v45 }
 0xaf5   : > { %v6320_v56 = vpack.c.bf16 %v6186_v10, %v6185_v19  ;;  %v6144_v44 = vmul.f32 %v11127_v63, %v6132_v11  ;;  %v6170_v13 = vmul.f32 %v11134_v41, %v6132_v11  ;;  %6730 = vmatpush.bf16.msra.mxu0 %v8977_v7  ;;  %6844 = vmatpush.bf16.msra.mxu2 %v8977_v7  ;;  %v8968_v19 = vld [vmem:[#allocation2 + $0xa10] sm:$0xf]  ;;  %v9464_v10 = vld [vmem:[#allocation2 + $0xa14] sm:$0xf0]  ;;  %v9463_v11 = vld [vmem:[#allocation2 + $0xa14] sm:$0xf] }
 0xaf6   : > { %v11209_v7 = vperm.slane %v6317_v24, 0 }
 0xaf7   : > { %6420 = vmatmul.bf16.gmra.mxu0 %v6320_v56  ;;  %6449 = vmatmul.bf16.gmra.mxu1 %v6320_v56  ;;  %v6153_v12 = vadd.f32 %v11131_v20, %v6144_v44  ;;  %v6179_v28 = vadd.f32 %v11142_v6, %v6170_v13  ;;  %v8969_v44 = vor.u32 %v9464_v10, %v8968_v19 }
 0xaf8   : > { %6759 = vmatpush.bf16.msra.mxu1 %v8981_v57  ;;  %6873 = vmatpush.bf16.msra.mxu3 %v8981_v57 }
 0xaf9   : > { %v6161_v18 = vmul.f32 %v6153_v12, %v6103_v17  ;;  %v8970_v12 = vld [vmem:[#allocation2 + $0xa18] sm:$0xf0]  ;;  %6731 = vmatpush.bf16.msra.mxu0 %v8969_v44  ;;  %6845 = vmatpush.bf16.msra.mxu2 %v8969_v44 }
 0xafb   : > { %v6187_v37 = vadd.f32 %v6179_v28, %v6161_v18  ;;  %v9462_v28 = vld [vmem:[#allocation2 + $0xa04] sm:$0xf0] }
 0xafc   : > { %v6134_v54 = vpop.f32.mrf.mxu1  ;;  %v6105_v26 = vpop.f32.mrf.mxu0 }
 0xafd   : > { %v6145_v14 = vmul.f32 %v11127_v63, %v6134_v54  ;;  %v6171_v15 = vmul.f32 %v11134_v41, %v6134_v54 }
 0xaff   : > { %v6154_v22 = vadd.f32 %v11131_v20, %v6145_v14  ;;  %v6180_v34 = vadd.f32 %v11142_v6, %v6171_v15  ;;  %v8973_v15 = vor.u32 %v9463_v11, %v8970_v12 }
 0xb01   : > { %v6162_v62 = vmul.f32 %v6154_v22, %v6105_v26  ;;  %6760 = vmatpush.bf16.msra.mxu1 %v8973_v15  ;;  %v8960_v26 = vld [vmem:[#allocation2 + $0xa00] sm:$0xf]  ;;  %6874 = vmatpush.bf16.msra.mxu3 %v8973_v15 }
 0xb03   : > { %v6188_v38 = vadd.f32 %v6180_v34, %v6162_v62  ;;  %v9461_v62 = vld [vmem:[#allocation2 + $0xa04] sm:$0xf]  ;;  %v8961_v34 = vor.u32 %v9462_v28, %v8960_v26 }
 0xb05   : > { %v6321_v43 = vpack.c.bf16 %v6188_v38, %v6187_v37  ;;  %v8962_v37 = vld [vmem:[#allocation2 + $0xa08] sm:$0xf0]  ;;  %6732 = vmatpush.bf16.msra.mxu0 %v8961_v34  ;;  %6846 = vmatpush.bf16.msra.mxu2 %v8961_v34 }
 0xb06   : > { %v8965_v30 = vor.u32 %v9461_v62, %v8962_v37 }
 0xb07   : > { %6425 = vmatmul.bf16.gmra.mxu0 %v6321_v43  ;;  %6454 = vmatmul.bf16.gmra.mxu1 %v6321_v43 }
 0xb08   : > { %6761 = vmatpush.bf16.msra.mxu1 %v8965_v30  ;;  %6875 = vmatpush.bf16.msra.mxu3 %v8965_v30 }
 0xb37   : > { %v6202_v46 = vpop.f32.mrf.mxu2  ;;  %v6231_v51 = vpop.f32.mrf.mxu3 }
 0xb38   : > { %v6251_v60 = vmul.f32 %v6231_v51, %v11127_v63  ;;  %v6275_v54 = vmul.f32 %v6231_v51, %v11134_v41 }
 0xb3a   : > { %v6259_v9 = vadd.f32 %v6251_v60, %v11131_v20  ;;  %v6283_v38 = vadd.f32 %v6275_v54, %v11142_v6 }
 0xb3c   : > { %v6267_v18 = vmul.f32 %v6259_v9, %v6202_v46  ;;  %v11202_v46 = vperm.slane %v6317_v24, 1 }
 0xb3e   : > { %v6291_v39 = vadd.f32 %v6283_v38, %v6267_v18 }
 0xb3f   : > { %v6204_v56 = vpop.f32.mrf.mxu2  ;;  %v6233_v17 = vpop.f32.mrf.mxu3 }
 0xb40   : > { %v6252_v13 = vmul.f32 %v6233_v17, %v11127_v63  ;;  %v6276_v14 = vmul.f32 %v6233_v17, %v11134_v41 }
 0xb42   : > { %v6260_v22 = vadd.f32 %v6252_v13, %v11131_v20  ;;  %v6284_v48 = vadd.f32 %v6276_v14, %v11142_v6 }
 0xb44   : > { %v6268_v43 = vmul.f32 %v6260_v22, %v6204_v56 }
 0xb46   : > { %v6292_v29 = vadd.f32 %v6284_v48, %v6268_v43 }
 0xb47   : > { %v6207_v53 = vpop.f32.mrf.mxu2  ;;  %v6236_v16 = vpop.f32.mrf.mxu3 }
 0xb48   : > { %v6512_v23 = vpack.c.bf16 %v6292_v29, %v6291_v39  ;;  %v6253_v55 = vmul.f32 %v6236_v16, %v11127_v63  ;;  %v6277_v2 = vmul.f32 %v6236_v16, %v11134_v41 }
 0xb4a   : > { %6524 = vmatmul.bf16.vlgmr.msrb.gmra.mxu2 %v6512_v23  ;;  %6553 = vmatmul.bf16.vlgmr.msrb.gmra.mxu3 %v6512_v23  ;;  %v6261_v58 = vadd.f32 %v6253_v55, %v11131_v20  ;;  %v6285_v32 = vadd.f32 %v6277_v2, %v11142_v6 }
 0xb4c   : > { %v6269_v1 = vmul.f32 %v6261_v58, %v6207_v53 }
 0xb4e   : > { %v6293_v47 = vadd.f32 %v6285_v32, %v6269_v1 }
 0xb4f   : > { %v6209_v61 = vpop.f32.mrf.mxu2  ;;  %v6238_v33 = vpop.f32.mrf.mxu3 }
 0xb50   : > { %v6254_v21 = vmul.f32 %v6238_v33, %v11127_v63  ;;  %v6278_v35 = vmul.f32 %v6238_v33, %v11134_v41 }
 0xb52   : > { %v6262_v31 = vadd.f32 %v6254_v21, %v11131_v20  ;;  %v6286_v36 = vadd.f32 %v6278_v35, %v11142_v6 }
 0xb54   : > { %v6270_v49 = vmul.f32 %v6262_v31, %v6209_v61  ;;  %v6411_v42 = vpop.f32.mrf.mxu0  ;;  %v6440_v50 = vpop.f32.mrf.mxu1 }
 0xb55   : > { %v6461_v27 = vmul.f32 %v11197_v40, %v6440_v50  ;;  %v6487_v5 = vmul.f32 %v11204_v25, %v6440_v50 }
 0xb56   : > { %v6294_v52 = vadd.f32 %v6286_v36, %v6270_v49 }
 0xb57   : > { %v6212_v51 = vpop.f32.mrf.mxu2  ;;  %v6241_v4 = vpop.f32.mrf.mxu3  ;;  %v6470_v60 = vadd.f32 %v11202_v46, %v6461_v27  ;;  %v6496_v54 = vadd.f32 %v11209_v7, %v6487_v5 }
 0xb58   : > { %v6513_v59 = vpack.c.bf16 %v6294_v52, %v6293_v47  ;;  %v6255_v45 = vmul.f32 %v6241_v4, %v11127_v63  ;;  %v6279_v17 = vmul.f32 %v6241_v4, %v11134_v41 }
 0xb59   : > { %v6478_v19 = vmul.f32 %v6470_v60, %v6411_v42 }
 0xb5a   : > { %6529 = vmatmul.bf16.gmra.mxu2 %v6513_v59  ;;  %6558 = vmatmul.bf16.gmra.mxu3 %v6513_v59  ;;  %v6263_v9 = vadd.f32 %v6255_v45, %v11131_v20  ;;  %v6287_v28 = vadd.f32 %v6279_v17, %v11142_v6 }
 0xb5b   : > { %v6504_v22 = vadd.f32 %v6496_v54, %v6478_v19 }
 0xb5c   : > { %v6413_v3 = vpop.f32.mrf.mxu0  ;;  %v6442_v0 = vpop.f32.mrf.mxu1  ;;  %v6271_v15 = vmul.f32 %v6263_v9, %v6212_v51 }
 0xb5d   : > { %v6462_v8 = vmul.f32 %v11197_v40, %v6442_v0  ;;  %v6488_v57 = vmul.f32 %v11204_v25, %v6442_v0 }
 0xb5e   : > { %v6295_v48 = vadd.f32 %v6287_v28, %v6271_v15 }
 0xb5f   : > { %v6471_v10 = vadd.f32 %v11202_v46, %v6462_v8  ;;  %v6214_v11 = vpop.f32.mrf.mxu2  ;;  %v6243_v56 = vpop.f32.mrf.mxu3  ;;  %v6497_v14 = vadd.f32 %v11209_v7, %v6488_v57 }
 0xb60   : > { %v6256_v44 = vmul.f32 %v6243_v56, %v11127_v63  ;;  %v6280_v12 = vmul.f32 %v6243_v56, %v11134_v41 }
 0xb61   : > { %v6479_v13 = vmul.f32 %v6471_v10, %v6413_v3 }
 0xb62   : > { %v6264_v18 = vadd.f32 %v6256_v44, %v11131_v20  ;;  %v6288_v34 = vadd.f32 %v6280_v12, %v11142_v6 }
 0xb63   : > { %v6505_v26 = vadd.f32 %v6497_v14, %v6479_v13 }
 0xb64   : > { %v6272_v62 = vmul.f32 %v6264_v18, %v6214_v11  ;;  %v6416_v37 = vpop.f32.mrf.mxu0  ;;  %v6445_v38 = vpop.f32.mrf.mxu1 }
 0xb65   : > { %v6641_v43 = vpack.c.bf16 %v6505_v26, %v6504_v22  ;;  %v6463_v39 = vmul.f32 %v11197_v40, %v6445_v38  ;;  %v6489_v33 = vmul.f32 %v11204_v25, %v6445_v38 }
 0xb66   : > { %v6296_v30 = vadd.f32 %v6288_v34, %v6272_v62 }
 0xb67   : > { %v6246_v29 = vpop.f32.mrf.mxu3  ;;  %6733 = vmatmul.bf16.vlgmr.msra.gmra.mxu0 %v6641_v43  ;;  %6762 = vmatmul.bf16.vlgmr.msra.gmra.mxu1 %v6641_v43  ;;  %v6217_v16 = vpop.f32.mrf.mxu2  ;;  %v6472_v55 = vadd.f32 %v11202_v46, %v6463_v39  ;;  %v6498_v42 = vadd.f32 %v11209_v7, %v6489_v33  ;;  %v9492_v33 = vld [vmem:[#allocation2 + $0xaf4] sm:$0xf0] }
 0xb68   : > { %v6514_v53 = vpack.c.bf16 %v6296_v30, %v6295_v48  ;;  %v6257_v23 = vmul.f32 %v6246_v29, %v11127_v63  ;;  %v6281_v32 = vmul.f32 %v6246_v29, %v11134_v41 }
 0xb69   : > { %v6480_v24 = vmul.f32 %v6472_v55, %v6416_v37 }
 0xb6a   : > { %6534 = vmatmul.bf16.gmra.mxu2 %v6514_v53  ;;  %6563 = vmatmul.bf16.gmra.mxu3 %v6514_v53  ;;  %v6265_v35 = vadd.f32 %v6257_v23, %v11131_v20  ;;  %v6289_v45 = vadd.f32 %v6281_v32, %v11142_v6  ;;  %v9489_v32 = vld [vmem:[#allocation2 + $0xae4] sm:$0xf] }
 0xb6b   : > { %v6506_v51 = vadd.f32 %v6498_v42, %v6480_v24 }
 0xb6c   : > { %v6418_v58 = vpop.f32.mrf.mxu0  ;;  %v6447_v61 = vpop.f32.mrf.mxu1  ;;  %v6273_v52 = vmul.f32 %v6265_v35, %v6217_v16  ;;  %v9082_v35 = vld [vmem:[#allocation2 + $0xaf8] sm:$0xf0] }
 0xb6d   : > { %v6464_v2 = vmul.f32 %v11197_v40, %v6447_v61  ;;  %v6490_v21 = vmul.f32 %v11204_v25, %v6447_v61  ;;  %v9080_v61 = vld [vmem:[#allocation2 + $0xaf0] sm:$0xf] }
 0xb6f   : > { %v6473_v1 = vadd.f32 %v11202_v46, %v6464_v2  ;;  %v6248_v31 = vpop.f32.mrf.mxu3  ;;  %v6499_v47 = vadd.f32 %v11209_v7, %v6490_v21  ;;  %v6219_v4 = vpop.f32.mrf.mxu2  ;;  %v9491_v2 = vld [vmem:[#allocation2 + $0xaf4] sm:$0xf]  ;;  %v9081_v21 = vor.u32 %v9492_v33, %v9080_v61 }
 0xb70   : > { %v6258_v49 = vmul.f32 %v6248_v31, %v11127_v63  ;;  %v6282_v36 = vmul.f32 %v6248_v31, %v11134_v41  ;;  %v6297_v41 = vadd.f32 %v6289_v45, %v6273_v52  ;;  %v9085_v24 = vor.u32 %v9491_v2, %v9082_v35  ;;  %v9490_v31 = vld [vmem:[#allocation2 + $0xae4] sm:$0xf0]  ;;  %v9487_v52 = vld [vmem:[#allocation2 + $0xad4] sm:$0xf] }
 0xb71   : > { %v6481_v50 = vmul.f32 %v6473_v1, %v6418_v58  ;;  %7048 = vmatpush.bf16.msrb.mxu0 %v9081_v21  ;;  %7162 = vmatpush.bf16.msrb.mxu2 %v9081_v21  ;;  %v9072_v1 = vld [vmem:[#allocation2 + $0xae0] sm:$0xf]  ;;  %v9486_v45 = vld [vmem:[#allocation2 + $0xac4] sm:$0xf0] }
 0xb72   : > { %v6266_v27 = vadd.f32 %v6258_v49, %v11131_v20  ;;  %v6290_v3 = vadd.f32 %v6282_v36, %v11142_v6  ;;  %7077 = vmatpush.bf16.msrb.mxu1 %v9085_v24  ;;  %7191 = vmatpush.bf16.msrb.mxu3 %v9085_v24  ;;  %v9073_v49 = vor.u32 %v9490_v31, %v9072_v1  ;;  %v9074_v36 = vld [vmem:[#allocation2 + $0xae8] sm:$0xf0] }
 0xb73   : > { %v6507_v59 = vadd.f32 %v6499_v47, %v6481_v50  ;;  %v9077_v42 = vor.u32 %v9489_v32, %v9074_v36  ;;  %v9064_v50 = vld [vmem:[#allocation2 + $0xad0] sm:$0xf]  ;;  %v9488_v47 = vld [vmem:[#allocation2 + $0xad4] sm:$0xf0] }
 0xb74   : > { %v6274_v60 = vmul.f32 %v6266_v27, %v6219_v4  ;;  %v6421_v0 = vpop.f32.mrf.mxu0  ;;  %v6450_v63 = vpop.f32.mrf.mxu1  ;;  %v9065_v27 = vor.u32 %v9488_v47, %v9064_v50  ;;  %v6640_v32 = vld [vmem:[#allocation5 + $0x50] sm:$0xf] }
 0xb75   : > { %v6642_v5 = vpack.c.bf16 %v6507_v59, %v6506_v51  ;;  %v6465_v57 = vmul.f32 %v11197_v40, %v6450_v63  ;;  %v6491_v11 = vmul.f32 %v11204_v25, %v6450_v63  ;;  %7049 = vmatpush.bf16.msrb.mxu0 %v9073_v49  ;;  %7163 = vmatpush.bf16.msrb.mxu2 %v9073_v49  ;;  %v9066_v51 = vld [vmem:[#allocation2 + $0xad8] sm:$0xf0]  ;;  %v9056_v59 = vld [vmem:[#allocation2 + $0xac0] sm:$0xf]  ;;  %v11264_v49 = vperm.slane %v6640_v32, 3 }
 0xb76   : > { %v6298_v8 = vadd.f32 %v6290_v3, %v6274_v60  ;;  %7078 = vmatpush.bf16.msrb.mxu1 %v9077_v42  ;;  %7192 = vmatpush.bf16.msrb.mxu3 %v9077_v42  ;;  %v9069_v4 = vor.u32 %v9487_v52, %v9066_v51  ;;  %v9485_v60 = vld [vmem:[#allocation2 + $0xac4] sm:$0xf]  ;;  %v9057_v3 = vor.u32 %v9486_v45, %v9056_v59  ;;  %v11271_v45 = vperm.slane %v6640_v32, 1 }
 0xb77   : > { %6738 = vmatmul.bf16.gmra.mxu0 %v6642_v5  ;;  %6767 = vmatmul.bf16.gmra.mxu1 %v6642_v5  ;;  %v6474_v20 = vadd.f32 %v11202_v46, %v6465_v57  ;;  %v6500_v12 = vadd.f32 %v11209_v7, %v6491_v11  ;;  %v9048_v5 = vld [vmem:[#allocation2 + $0xab0] sm:$0xf]  ;;  %v9483_v57 = vld [vmem:[#allocation2 + $0xab4] sm:$0xf]  ;;  %v9481_v11 = vld [vmem:[#allocation2 + $0xaa4] sm:$0xf] }
 0xb78   : > { %v6515_v9 = vpack.c.bf16 %v6298_v8, %v6297_v41  ;;  %v9484_v41 = vld [vmem:[#allocation2 + $0xab4] sm:$0xf0] }
 0xb79   : > { %v6482_v17 = vmul.f32 %v6474_v20, %v6421_v0  ;;  %7050 = vmatpush.bf16.msrb.mxu0 %v9065_v27  ;;  %7164 = vmatpush.bf16.msrb.mxu2 %v9065_v27  ;;  %v9058_v0 = vld [vmem:[#allocation2 + $0xac8] sm:$0xf0]  ;;  %v9049_v8 = vor.u32 %v9484_v41, %v9048_v5 }
 0xb7a   : > { %6539 = vmatmul.bf16.gmra.mxu2 %v6515_v9  ;;  %6568 = vmatmul.bf16.gmra.mxu3 %v6515_v9  ;;  %v9061_v63 = vor.u32 %v9485_v60, %v9058_v0  ;;  %v9050_v9 = vld [vmem:[#allocation2 + $0xab8] sm:$0xf0]  ;;  %v11274_v0 = vperm.slane %v6640_v32, 2 }
 0xb7b   : > { %v6508_v14 = vadd.f32 %v6500_v12, %v6482_v17  ;;  %7079 = vmatpush.bf16.msrb.mxu1 %v9069_v4  ;;  %7193 = vmatpush.bf16.msrb.mxu3 %v9069_v4  ;;  %v9053_v20 = vor.u32 %v9483_v57, %v9050_v9 }
 0xb7c   : > { %v6423_v19 = vpop.f32.mrf.mxu0  ;;  %v6452_v10 = vpop.f32.mrf.mxu1 }
 0xb7d   : > { %v6466_v6 = vmul.f32 %v11197_v40, %v6452_v10  ;;  %v6492_v56 = vmul.f32 %v11204_v25, %v6452_v10  ;;  %7051 = vmatpush.bf16.msrb.mxu0 %v9057_v3  ;;  %7165 = vmatpush.bf16.msrb.mxu2 %v9057_v3  ;;  %v9482_v10 = vld [vmem:[#allocation2 + $0xaa4] sm:$0xf0] }
 0xb7f   : > { %v6475_v44 = vadd.f32 %v11202_v46, %v6466_v6  ;;  %v6501_v13 = vadd.f32 %v11209_v7, %v6492_v56  ;;  %7080 = vmatpush.bf16.msrb.mxu1 %v9061_v63  ;;  %7194 = vmatpush.bf16.msrb.mxu3 %v9061_v63  ;;  %v9042_v56 = vld [vmem:[#allocation2 + $0xaa8] sm:$0xf0] }
 0xb80   : > { %v9045_v17 = vor.u32 %v9481_v11, %v9042_v56  ;;  %v11280_v11 = vperm.slane %v6640_v32, 0 }
 0xb81   : > { %v6483_v54 = vmul.f32 %v6475_v44, %v6423_v19  ;;  %7052 = vmatpush.bf16.msrb.mxu0 %v9049_v8  ;;  %7166 = vmatpush.bf16.msrb.mxu2 %v9049_v8  ;;  %v9040_v19 = vld [vmem:[#allocation2 + $0xaa0] sm:$0xf] }
 0xb82   : > { %v9041_v6 = vor.u32 %v9482_v10, %v9040_v19 }
 0xb83   : > { %v6509_v15 = vadd.f32 %v6501_v13, %v6483_v54  ;;  %7081 = vmatpush.bf16.msrb.mxu1 %v9053_v20  ;;  %7195 = vmatpush.bf16.msrb.mxu3 %v9053_v20  ;;  %v9032_v54 = vld [vmem:[#allocation2 + $0xa90] sm:$0xf]  ;;  %v9480_v13 = vld [vmem:[#allocation2 + $0xa94] sm:$0xf0] }
 0xb84   : > { %v6455_v18 = vpop.f32.mrf.mxu1  ;;  %v6426_v26 = vpop.f32.mrf.mxu0 }
 0xb85   : > { %v6643_v22 = vpack.c.bf16 %v6509_v15, %v6508_v14  ;;  %v6467_v28 = vmul.f32 %v11197_v40, %v6455_v18  ;;  %v6493_v37 = vmul.f32 %v11204_v25, %v6455_v18  ;;  %7053 = vmatpush.bf16.msrb.mxu0 %v9041_v6  ;;  %7167 = vmatpush.bf16.msrb.mxu2 %v9041_v6  ;;  %v9479_v14 = vld [vmem:[#allocation2 + $0xa94] sm:$0xf]  ;;  %v9034_v18 = vld [vmem:[#allocation2 + $0xa98] sm:$0xf0] }
 0xb86   : > { %v9033_v15 = vor.u32 %v9480_v13, %v9032_v54 }
 0xb87   : > { %6743 = vmatmul.bf16.gmra.mxu0 %v6643_v22  ;;  %6772 = vmatmul.bf16.gmra.mxu1 %v6643_v22  ;;  %v6476_v62 = vadd.f32 %v11202_v46, %v6467_v28  ;;  %v6502_v29 = vadd.f32 %v11209_v7, %v6493_v37  ;;  %v9024_v28 = vld [vmem:[#allocation2 + $0xa80] sm:$0xf] }
 0xb88   : > { %7082 = vmatpush.bf16.msrb.mxu1 %v9045_v17  ;;  %7196 = vmatpush.bf16.msrb.mxu3 %v9045_v17 }
 0xb89   : > { %v6484_v48 = vmul.f32 %v6476_v62, %v6426_v26  ;;  %v9037_v26 = vor.u32 %v9479_v14, %v9034_v18  ;;  %7054 = vmatpush.bf16.msrb.mxu0 %v9033_v15  ;;  %7168 = vmatpush.bf16.msrb.mxu2 %v9033_v15  ;;  %v9478_v62 = vld [vmem:[#allocation2 + $0xa84] sm:$0xf0] }
 0xb8a   : > { %v9025_v37 = vor.u32 %v9478_v62, %v9024_v28 }
 0xb8b   : > { %v6510_v23 = vadd.f32 %v6502_v29, %v6484_v48 }
 0xb8c   : > { %v6457_v34 = vpop.f32.mrf.mxu1  ;;  %v6428_v39 = vpop.f32.mrf.mxu0  ;;  %7083 = vmatpush.bf16.msrb.mxu1 %v9037_v26  ;;  %7197 = vmatpush.bf16.msrb.mxu3 %v9037_v26 }
 0xb8d   : > { %v6468_v38 = vmul.f32 %v11197_v40, %v6457_v34  ;;  %v6494_v43 = vmul.f32 %v11204_v25, %v6457_v34  ;;  %v9477_v34 = vld [vmem:[#allocation2 + $0xa84] sm:$0xf]  ;;  %7055 = vmatpush.bf16.msrb.mxu0 %v9025_v37  ;;  %7169 = vmatpush.bf16.msrb.mxu2 %v9025_v37 }
 0xb8f   : > { %v6477_v30 = vadd.f32 %v11202_v46, %v6468_v38  ;;  %v6503_v16 = vadd.f32 %v11209_v7, %v6494_v43  ;;  %v9026_v38 = vld [vmem:[#allocation2 + $0xa88] sm:$0xf0] }
 0xb90   : > { %v9029_v48 = vor.u32 %v9477_v34, %v9026_v38 }
 0xb91   : > { %v6485_v53 = vmul.f32 %v6477_v30, %v6428_v39 }
 0xb92   : > { %7084 = vmatpush.bf16.msrb.mxu1 %v9029_v48  ;;  %7198 = vmatpush.bf16.msrb.mxu3 %v9029_v48 }
 0xb93   : > { %v6511_v55 = vadd.f32 %v6503_v16, %v6485_v53 }
 0xb95   : > { %v6644_v58 = vpack.c.bf16 %v6511_v55, %v6510_v23 }
 0xb97   : > { %6748 = vmatmul.bf16.gmra.mxu0 %v6644_v58  ;;  %6777 = vmatmul.bf16.gmra.mxu1 %v6644_v58 }
 0xbcd   : > { %v6525_v44 = vpop.f32.mrf.mxu2  ;;  %v6554_v12 = vpop.f32.mrf.mxu3 }
 0xbce   : > { %v6574_v22 = vmul.f32 %v6554_v12, %v11197_v40  ;;  %v6598_v29 = vmul.f32 %v6554_v12, %v11204_v25 }
 0xbd0   : > { %v6582_v43 = vadd.f32 %v6574_v22, %v11202_v46  ;;  %v6606_v58 = vadd.f32 %v6598_v29, %v11209_v7 }
 0xbd2   : > { %v6590_v23 = vmul.f32 %v6582_v43, %v6525_v44 }
 0xbd4   : > { %v6614_v2 = vadd.f32 %v6606_v58, %v6590_v23 }
 0xbd5   : > { %v6527_v30 = vpop.f32.mrf.mxu2  ;;  %v6556_v39 = vpop.f32.mrf.mxu3 }
 0xbd6   : > { %v6575_v53 = vmul.f32 %v6556_v39, %v11197_v40  ;;  %v6599_v16 = vmul.f32 %v6556_v39, %v11204_v25 }
 0xbd8   : > { %v6583_v55 = vadd.f32 %v6575_v53, %v11202_v46  ;;  %v6607_v33 = vadd.f32 %v6599_v16, %v11209_v7 }
 0xbda   : > { %v6591_v61 = vmul.f32 %v6583_v55, %v6527_v30 }
 0xbdc   : > { %v6615_v21 = vadd.f32 %v6607_v33, %v6591_v61 }
 0xbdd   : > { %v6530_v35 = vpop.f32.mrf.mxu2  ;;  %v6559_v24 = vpop.f32.mrf.mxu3 }
 0xbde   : > { %v6835_v1 = vpack.c.bf16 %v6615_v21, %v6614_v2  ;;  %v6576_v31 = vmul.f32 %v6559_v24, %v11197_v40  ;;  %v6600_v27 = vmul.f32 %v6559_v24, %v11204_v25 }
 0xbe0   : > { %6847 = vmatmul.bf16.vlgmr.msra.gmra.mxu2 %v6835_v1  ;;  %6876 = vmatmul.bf16.vlgmr.msra.gmra.mxu3 %v6835_v1  ;;  %v6584_v36 = vadd.f32 %v6576_v31, %v11202_v46  ;;  %v6608_v63 = vadd.f32 %v6600_v27, %v11209_v7 }
 0xbe2   : > { %v6592_v60 = vmul.f32 %v6584_v36, %v6530_v35 }
 0xbe4   : > { %v6734_v42 = vpop.f32.mrf.mxu0  ;;  %v6763_v50 = vpop.f32.mrf.mxu1  ;;  %v6616_v57 = vadd.f32 %v6608_v63, %v6592_v60 }
 0xbe5   : > { %v6532_v47 = vpop.f32.mrf.mxu2  ;;  %v6561_v52 = vpop.f32.mrf.mxu3  ;;  %v6784_v59 = vmul.f32 %v11264_v49, %v6763_v50  ;;  %v6810_v10 = vmul.f32 %v11274_v0, %v6763_v50 }
 0xbe6   : > { %v6577_v51 = vmul.f32 %v6561_v52, %v11197_v40  ;;  %v6601_v4 = vmul.f32 %v6561_v52, %v11204_v25 }
 0xbe7   : > { %v6793_v8 = vadd.f32 %v11271_v45, %v6784_v59  ;;  %v6819_v15 = vadd.f32 %v11280_v11, %v6810_v10 }
 0xbe8   : > { %v6585_v3 = vadd.f32 %v6577_v51, %v11202_v46  ;;  %v6609_v41 = vadd.f32 %v6601_v4, %v11209_v7 }
 0xbe9   : > { %v6801_v54 = vmul.f32 %v6793_v8, %v6734_v42 }
 0xbea   : > { %v6593_v5 = vmul.f32 %v6585_v3, %v6532_v47 }
 0xbeb   : > { %v6827_v26 = vadd.f32 %v6819_v15, %v6801_v54 }
 0xbec   : > { %v6736_v9 = vpop.f32.mrf.mxu0  ;;  %v6765_v20 = vpop.f32.mrf.mxu1  ;;  %v6617_v19 = vadd.f32 %v6609_v41, %v6593_v5 }
 0xbed   : > { %v6535_v6 = vpop.f32.mrf.mxu2  ;;  %v6564_v56 = vpop.f32.mrf.mxu3  ;;  %v6785_v17 = vmul.f32 %v11264_v49, %v6765_v20  ;;  %v6811_v44 = vmul.f32 %v11274_v0, %v6765_v20 }
 0xbee   : > { %v6836_v12 = vpack.c.bf16 %v6617_v19, %v6616_v57  ;;  %v6578_v14 = vmul.f32 %v6564_v56, %v11197_v40  ;;  %v6602_v30 = vmul.f32 %v6564_v56, %v11204_v25 }
 0xbef   : > { %v6794_v13 = vadd.f32 %v11271_v45, %v6785_v17  ;;  %v6820_v22 = vadd.f32 %v11280_v11, %v6811_v44 }
 0xbf0   : > { %6852 = vmatmul.bf16.gmra.mxu2 %v6836_v12  ;;  %6881 = vmatmul.bf16.gmra.mxu3 %v6836_v12  ;;  %v6586_v62 = vadd.f32 %v6578_v14, %v11202_v46  ;;  %v6610_v55 = vadd.f32 %v6602_v30, %v11209_v7 }
 0xbf1   : > { %v6802_v18 = vmul.f32 %v6794_v13, %v6736_v9 }
 0xbf2   : > { %v6594_v16 = vmul.f32 %v6586_v62, %v6535_v6 }
 0xbf3   : > { %v6828_v28 = vadd.f32 %v6820_v22, %v6802_v18 }
 0xbf4   : > { %v6739_v34 = vpop.f32.mrf.mxu0  ;;  %v6768_v37 = vpop.f32.mrf.mxu1  ;;  %v6618_v2 = vadd.f32 %v6610_v55, %v6594_v16 }
 0xbf5   : > { %v6964_v38 = vpack.c.bf16 %v6828_v28, %v6827_v26  ;;  %v6537_v43 = vpop.f32.mrf.mxu2  ;;  %v6566_v48 = vpop.f32.mrf.mxu3  ;;  %v6786_v53 = vmul.f32 %v11264_v49, %v6768_v37  ;;  %v6812_v1 = vmul.f32 %v11274_v0, %v6768_v37 }
 0xbf6   : > { %v6579_v39 = vmul.f32 %v6566_v48, %v11197_v40  ;;  %v6603_v29 = vmul.f32 %v6566_v48, %v11204_v25 }
 0xbf7   : > { %7056 = vmatmul.bf16.vlgmr.msrb.gmra.mxu0 %v6964_v38  ;;  %7085 = vmatmul.bf16.vlgmr.msrb.gmra.mxu1 %v6964_v38  ;;  %v6795_v33 = vadd.f32 %v11271_v45, %v6786_v53  ;;  %v6821_v51 = vadd.f32 %v11280_v11, %v6812_v1 }
 0xbf8   : > { %v6587_v23 = vadd.f32 %v6579_v39, %v11202_v46  ;;  %v6611_v61 = vadd.f32 %v6603_v29, %v11209_v7 }
 0xbf9   : > { %v6803_v50 = vmul.f32 %v6795_v33, %v6739_v34 }
 0xbfa   : > { %v6595_v58 = vmul.f32 %v6587_v23, %v6537_v43 }
 0xbfb   : > { %v6829_v60 = vadd.f32 %v6821_v51, %v6803_v50  ;;  %v9507_v50 = vld [vmem:[#allocation2 + $0xb74] sm:$0xf]  ;;  %v9136_v51 = vld [vmem:[#allocation2 + $0xb60] sm:$0xf] }
 0xbfc   : > { %v6741_v21 = vpop.f32.mrf.mxu0  ;;  %v6770_v35 = vpop.f32.mrf.mxu1  ;;  %v6619_v24 = vadd.f32 %v6611_v61, %v6595_v58 }
 0xbfd   : > { %v6569_v31 = vpop.f32.mrf.mxu3  ;;  %v6787_v32 = vmul.f32 %v11264_v49, %v6770_v35  ;;  %v6813_v36 = vmul.f32 %v11274_v0, %v6770_v35  ;;  %v6540_v47 = vpop.f32.mrf.mxu2 }
 0xbfe   : > { %v6837_v42 = vpack.c.bf16 %v6619_v24, %v6618_v2  ;;  %v6580_v27 = vmul.f32 %v6569_v31, %v11197_v40  ;;  %v6604_v9 = vmul.f32 %v6569_v31, %v11204_v25 }
 0xbff   : > { %v6796_v52 = vadd.f32 %v11271_v45, %v6787_v32  ;;  %v6822_v59 = vadd.f32 %v11280_v11, %v6813_v36  ;;  %v9144_v36 = vld [vmem:[#allocation2 + $0xb70] sm:$0xf] }
 0xc00   : > { %6857 = vmatmul.bf16.gmra.mxu2 %v6837_v42  ;;  %6886 = vmatmul.bf16.gmra.mxu3 %v6837_v42  ;;  %v6588_v63 = vadd.f32 %v6580_v27, %v11202_v46  ;;  %v6612_v44 = vadd.f32 %v6604_v9, %v11209_v7  ;;  %v9508_v42 = vld [vmem:[#allocation2 + $0xb74] sm:$0xf0]  ;;  %v9130_v9 = vld [vmem:[#allocation2 + $0xb58] sm:$0xf0] }
 0xc01   : > { %v6804_v4 = vmul.f32 %v6796_v52, %v6741_v21  ;;  %v9146_v52 = vld [vmem:[#allocation2 + $0xb78] sm:$0xf0] }
 0xc02   : > { %v6596_v6 = vmul.f32 %v6588_v63, %v6540_v47  ;;  %v9145_v47 = vor.u32 %v9508_v42, %v9144_v36  ;;  %v9149_v27 = vor.u32 %v9507_v50, %v9146_v52  ;;  %v6963_v50 = vld [vmem:[#allocation5 + $0x54] sm:$0xf] }
 0xc03   : > { %v6830_v3 = vadd.f32 %v6822_v59, %v6804_v4  ;;  %v9506_v4 = vld [vmem:[#allocation2 + $0xb64] sm:$0xf0]  ;;  %v9505_v59 = vld [vmem:[#allocation2 + $0xb64] sm:$0xf] }
 0xc04   : > { %v6744_v5 = vpop.f32.mrf.mxu0  ;;  %v6773_v41 = vpop.f32.mrf.mxu1  ;;  %v6620_v14 = vadd.f32 %v6612_v44, %v6596_v6  ;;  %7371 = vmatpush.bf16.msra.mxu0 %v9145_v47  ;;  %7485 = vmatpush.bf16.msra.mxu2 %v9145_v47  ;;  %v9501_v6 = vld [vmem:[#allocation2 + $0xb44] sm:$0xf] }
 0xc05   : > { %v6571_v8 = vpop.f32.mrf.mxu3  ;;  %v6965_v57 = vpack.c.bf16 %v6830_v3, %v6829_v60  ;;  %v6788_v10 = vmul.f32 %v11264_v49, %v6773_v41  ;;  %v6542_v17 = vpop.f32.mrf.mxu2  ;;  %7400 = vmatpush.bf16.msra.mxu1 %v9149_v27  ;;  %7514 = vmatpush.bf16.msra.mxu3 %v9149_v27  ;;  %v9137_v60 = vor.u32 %v9506_v4, %v9136_v51  ;;  %v9138_v3 = vld [vmem:[#allocation2 + $0xb68] sm:$0xf0]  ;;  %v11335_v4 = vperm.slane %v6963_v50, 3 }
 0xc06   : > { %v6581_v20 = vmul.f32 %v6571_v8, %v11197_v40  ;;  %v6605_v19 = vmul.f32 %v6571_v8, %v11204_v25  ;;  %v6814_v25 = vmul.f32 %v11274_v0, %v6773_v41  ;;  %v9141_v63 = vor.u32 %v9505_v59, %v9138_v3  ;;  %v9504_v41 = vld [vmem:[#allocation2 + $0xb54] sm:$0xf0]  ;;  %v9503_v8 = vld [vmem:[#allocation2 + $0xb54] sm:$0xf] }
 0xc07   : > { %7061 = vmatmul.bf16.gmra.mxu0 %v6965_v57  ;;  %7090 = vmatmul.bf16.gmra.mxu1 %v6965_v57  ;;  %v6797_v13 = vadd.f32 %v11271_v45, %v6788_v10  ;;  %v9502_v10 = vld [vmem:[#allocation2 + $0xb44] sm:$0xf0] }
 0xc08   : > { %v6589_v56 = vadd.f32 %v6581_v20, %v11202_v46  ;;  %v6613_v54 = vadd.f32 %v6605_v19, %v11209_v7  ;;  %v6823_v7 = vadd.f32 %v11280_v11, %v6814_v25  ;;  %7372 = vmatpush.bf16.msra.mxu0 %v9137_v60  ;;  %7486 = vmatpush.bf16.msra.mxu2 %v9137_v60  ;;  %v9120_v19 = vld [vmem:[#allocation2 + $0xb40] sm:$0xf]  ;;  %v9498_v25 = vld [vmem:[#allocation2 + $0xb24] sm:$0xf0] }
 0xc09   : > { %v6805_v46 = vmul.f32 %v6797_v13, %v6744_v5  ;;  %7401 = vmatpush.bf16.msra.mxu1 %v9141_v63  ;;  %v9128_v5 = vld [vmem:[#allocation2 + $0xb50] sm:$0xf]  ;;  %7515 = vmatpush.bf16.msra.mxu3 %v9141_v63  ;;  %v9133_v20 = vor.u32 %v9503_v8, %v9130_v9  ;;  %v11341_v8 = vperm.slane %v6963_v50, 2 }
 0xc0a   : > { %v6597_v12 = vmul.f32 %v6589_v56, %v6542_v17  ;;  %v9129_v57 = vor.u32 %v9504_v41, %v9128_v5  ;;  %v9121_v56 = vor.u32 %v9502_v10, %v9120_v19  ;;  %v9122_v17 = vld [vmem:[#allocation2 + $0xb48] sm:$0xf0]  ;;  %v11339_v41 = vperm.slane %v6963_v50, 1 }
 0xc0b   : > { %v6831_v38 = vadd.f32 %v6823_v7, %v6805_v46  ;;  %v9125_v44 = vor.u32 %v9501_v6, %v9122_v17  ;;  %v9496_v7 = vld [vmem:[#allocation2 + $0xb14] sm:$0xf0] }
 0xc0c   : > { %v6746_v15 = vpop.f32.mrf.mxu0  ;;  %v6775_v40 = vpop.f32.mrf.mxu1  ;;  %v6621_v18 = vadd.f32 %v6613_v54, %v6597_v12  ;;  %7373 = vmatpush.bf16.msra.mxu0 %v9129_v57  ;;  %7487 = vmatpush.bf16.msra.mxu2 %v9129_v57  ;;  %v9112_v12 = vld [vmem:[#allocation2 + $0xb30] sm:$0xf]  ;;  %v9500_v54 = vld [vmem:[#allocation2 + $0xb34] sm:$0xf0] }
 0xc0d   : > { %v6789_v22 = vmul.f32 %v11264_v49, %v6775_v40  ;;  %v6815_v26 = vmul.f32 %v11274_v0, %v6775_v40  ;;  %7402 = vmatpush.bf16.msra.mxu1 %v9133_v20  ;;  %7516 = vmatpush.bf16.msra.mxu3 %v9133_v20  ;;  %v9113_v13 = vor.u32 %v9500_v54, %v9112_v12  ;;  %v11349_v54 = vperm.slane %v6963_v50, 0 }
 0xc0e   : > { %v6838_v28 = vpack.c.bf16 %v6621_v18, %v6620_v14  ;;  %v9499_v14 = vld [vmem:[#allocation2 + $0xb34] sm:$0xf]  ;;  %v9104_v18 = vld [vmem:[#allocation2 + $0xb20] sm:$0xf] }
 0xc0f   : > { %v6798_v62 = vadd.f32 %v11271_v45, %v6789_v22  ;;  %v6824_v37 = vadd.f32 %v11280_v11, %v6815_v26  ;;  %v9497_v22 = vld [vmem:[#allocation2 + $0xb24] sm:$0xf]  ;;  %v9105_v26 = vor.u32 %v9498_v25, %v9104_v18 }
 0xc10   : > { %6862 = vmatmul.bf16.gmra.mxu2 %v6838_v28  ;;  %6891 = vmatmul.bf16.gmra.mxu3 %v6838_v28  ;;  %v9106_v28 = vld [vmem:[#allocation2 + $0xb28] sm:$0xf0] }
 0xc11   : > { %v6806_v34 = vmul.f32 %v6798_v62, %v6746_v15  ;;  %7374 = vmatpush.bf16.msra.mxu0 %v9121_v56  ;;  %7488 = vmatpush.bf16.msra.mxu2 %v9121_v56  ;;  %v9114_v15 = vld [vmem:[#allocation2 + $0xb38] sm:$0xf0]  ;;  %v9109_v46 = vor.u32 %v9497_v22, %v9106_v28  ;;  %v9096_v62 = vld [vmem:[#allocation2 + $0xb10] sm:$0xf] }
 0xc12   : > { %7403 = vmatpush.bf16.msra.mxu1 %v9125_v44  ;;  %7517 = vmatpush.bf16.msra.mxu3 %v9125_v44  ;;  %v9117_v40 = vor.u32 %v9499_v14, %v9114_v15 }
 0xc13   : > { %v6832_v43 = vadd.f32 %v6824_v37, %v6806_v34  ;;  %v9495_v34 = vld [vmem:[#allocation2 + $0xb14] sm:$0xf]  ;;  %v9097_v37 = vor.u32 %v9496_v7, %v9096_v62 }
 0xc14   : > { %v6778_v48 = vpop.f32.mrf.mxu1  ;;  %v6749_v39 = vpop.f32.mrf.mxu0 }
 0xc15   : > { %v6966_v30 = vpack.c.bf16 %v6832_v43, %v6831_v38  ;;  %v6790_v29 = vmul.f32 %v11264_v49, %v6778_v48  ;;  %v6816_v23 = vmul.f32 %v11274_v0, %v6778_v48  ;;  %7375 = vmatpush.bf16.msra.mxu0 %v9113_v13  ;;  %7489 = vmatpush.bf16.msra.mxu2 %v9113_v13  ;;  %v9098_v38 = vld [vmem:[#allocation2 + $0xb18] sm:$0xf0]  ;;  %v9088_v48 = vld [vmem:[#allocation2 + $0xb00] sm:$0xf] }
 0xc16   : > { %7404 = vmatpush.bf16.msra.mxu1 %v9117_v40  ;;  %7518 = vmatpush.bf16.msra.mxu3 %v9117_v40  ;;  %v9101_v43 = vor.u32 %v9495_v34, %v9098_v38 }
 0xc17   : > { %7066 = vmatmul.bf16.gmra.mxu0 %v6966_v30  ;;  %7095 = vmatmul.bf16.gmra.mxu1 %v6966_v30  ;;  %v6799_v53 = vadd.f32 %v11271_v45, %v6790_v29  ;;  %v6825_v21 = vadd.f32 %v11280_v11, %v6816_v23  ;;  %v9494_v30 = vld [vmem:[#allocation2 + $0xb04] sm:$0xf0]  ;;  %v9090_v23 = vld [vmem:[#allocation2 + $0xb08] sm:$0xf0] }
 0xc19   : > { %v6807_v61 = vmul.f32 %v6799_v53, %v6749_v39  ;;  %7376 = vmatpush.bf16.msra.mxu0 %v9105_v26  ;;  %7490 = vmatpush.bf16.msra.mxu2 %v9105_v26  ;;  %v9493_v39 = vld [vmem:[#allocation2 + $0xb04] sm:$0xf] }
 0xc1a   : > { %7405 = vmatpush.bf16.msra.mxu1 %v9109_v46  ;;  %7519 = vmatpush.bf16.msra.mxu3 %v9109_v46 }
 0xc1b   : > { %v6833_v1 = vadd.f32 %v6825_v21, %v6807_v61 }
 0xc1c   : > { %v6780_v16 = vpop.f32.mrf.mxu1  ;;  %v6751_v2 = vpop.f32.mrf.mxu0 }
 0xc1d   : > { %v6791_v55 = vmul.f32 %v11264_v49, %v6780_v16  ;;  %v6817_v58 = vmul.f32 %v11274_v0, %v6780_v16  ;;  %7377 = vmatpush.bf16.msra.mxu0 %v9097_v37  ;;  %7491 = vmatpush.bf16.msra.mxu2 %v9097_v37  ;;  %v9089_v16 = vor.u32 %v9494_v30, %v9088_v48 }
 0xc1e   : > { %7406 = vmatpush.bf16.msra.mxu1 %v9101_v43  ;;  %7520 = vmatpush.bf16.msra.mxu3 %v9101_v43 }
 0xc1f   : > { %v6800_v33 = vadd.f32 %v11271_v45, %v6791_v55  ;;  %v6826_v24 = vadd.f32 %v11280_v11, %v6817_v58  ;;  %v9093_v55 = vor.u32 %v9493_v39, %v9090_v23 }
 0xc21   : > { %v6808_v35 = vmul.f32 %v6800_v33, %v6751_v2  ;;  %7378 = vmatpush.bf16.msra.mxu0 %v9089_v16  ;;  %7492 = vmatpush.bf16.msra.mxu2 %v9089_v16 }
 0xc22   : > { %7407 = vmatpush.bf16.msra.mxu1 %v9093_v55  ;;  %7521 = vmatpush.bf16.msra.mxu3 %v9093_v55 }
 0xc23   : > { %v6834_v31 = vadd.f32 %v6826_v24, %v6808_v35 }
 0xc25   : > { %v6967_v32 = vpack.c.bf16 %v6834_v31, %v6833_v1 }
 0xc27   : > { %7071 = vmatmul.bf16.gmra.mxu0 %v6967_v32  ;;  %7100 = vmatmul.bf16.gmra.mxu1 %v6967_v32 }
 0xc63   : > { %v6848_v29 = vpop.f32.mrf.mxu2  ;;  %v6877_v53 = vpop.f32.mrf.mxu3 }
 0xc64   : > { %v6897_v58 = vmul.f32 %v6877_v53, %v11264_v49  ;;  %v6921_v21 = vmul.f32 %v6877_v53, %v11274_v0 }
 0xc66   : > { %v6905_v61 = vadd.f32 %v6897_v58, %v11271_v45  ;;  %v6929_v32 = vadd.f32 %v6921_v21, %v11280_v11 }
 0xc68   : > { %v6913_v1 = vmul.f32 %v6905_v61, %v6848_v29 }
 0xc6a   : > { %v6937_v47 = vadd.f32 %v6929_v32, %v6913_v1 }
 0xc6b   : > { %v6850_v33 = vpop.f32.mrf.mxu2  ;;  %v6879_v2 = vpop.f32.mrf.mxu3 }
 0xc6c   : > { %v6898_v35 = vmul.f32 %v6879_v2, %v11264_v49  ;;  %v6922_v24 = vmul.f32 %v6879_v2, %v11274_v0 }
 0xc6e   : > { %v6906_v31 = vadd.f32 %v6898_v35, %v11271_v45  ;;  %v6930_v42 = vadd.f32 %v6922_v24, %v11280_v11 }
 0xc70   : > { %v6914_v36 = vmul.f32 %v6906_v31, %v6850_v33 }
 0xc72   : > { %v6938_v52 = vadd.f32 %v6930_v42, %v6914_v36 }
 0xc73   : > { %v6853_v27 = vpop.f32.mrf.mxu2  ;;  %v6882_v51 = vpop.f32.mrf.mxu3 }
 0xc74   : > { %v7158_v59 = vpack.c.bf16 %v6938_v52, %v6937_v47  ;;  %v7057_v60 = vpop.f32.mrf.mxu0  ;;  %v7086_v3 = vpop.f32.mrf.mxu1  ;;  %v6899_v63 = vmul.f32 %v6882_v51, %v11264_v49  ;;  %v6923_v10 = vmul.f32 %v6882_v51, %v11274_v0 }
 0xc75   : > { %v7107_v5 = vmul.f32 %v11335_v4, %v7086_v3  ;;  %v7133_v12 = vmul.f32 %v11341_v8, %v7086_v3 }
 0xc76   : > { %7170 = vmatmul.bf16.vlgmr.msrb.gmra.mxu2 %v7158_v59  ;;  %7199 = vmatmul.bf16.vlgmr.msrb.gmra.mxu3 %v7158_v59  ;;  %v6907_v57 = vadd.f32 %v6899_v63, %v11271_v45  ;;  %v6931_v22 = vadd.f32 %v6923_v10, %v11280_v11 }
 0xc77   : > { %v7116_v9 = vadd.f32 %v11339_v41, %v7107_v5  ;;  %v7142_v46 = vadd.f32 %v11349_v54, %v7133_v12 }
 0xc78   : > { %v6915_v15 = vmul.f32 %v6907_v57, %v6853_v27 }
 0xc79   : > { %v7124_v18 = vmul.f32 %v7116_v9, %v7057_v60 }
 0xc7a   : > { %v6939_v34 = vadd.f32 %v6931_v22, %v6915_v15 }
 0xc7b   : > { %v6855_v20 = vpop.f32.mrf.mxu2  ;;  %v6884_v19 = vpop.f32.mrf.mxu3  ;;  %v7150_v38 = vadd.f32 %v7142_v46, %v7124_v18 }
 0xc7c   : > { %v6900_v6 = vmul.f32 %v6884_v19, %v11264_v49  ;;  %v6924_v56 = vmul.f32 %v6884_v19, %v11274_v0  ;;  %v7059_v17 = vpop.f32.mrf.mxu0  ;;  %v7088_v44 = vpop.f32.mrf.mxu1 }
 0xc7d   : > { %v7108_v13 = vmul.f32 %v11335_v4, %v7088_v44  ;;  %v7134_v14 = vmul.f32 %v11341_v8, %v7088_v44 }
 0xc7e   : > { %v6908_v40 = vadd.f32 %v6900_v6, %v11271_v45  ;;  %v6932_v28 = vadd.f32 %v6924_v56, %v11280_v11 }
 0xc7f   : > { %v7117_v25 = vadd.f32 %v11339_v41, %v7108_v13  ;;  %v7143_v7 = vadd.f32 %v11349_v54, %v7134_v14 }
 0xc80   : > { %v6916_v26 = vmul.f32 %v6908_v40, %v6855_v20 }
 0xc81   : > { %v7125_v62 = vmul.f32 %v7117_v25, %v7059_v17 }
 0xc82   : > { %v6940_v37 = vadd.f32 %v6932_v28, %v6916_v26 }
 0xc83   : > { %v7151_v43 = vadd.f32 %v7143_v7, %v7125_v62  ;;  %v6858_v48 = vpop.f32.mrf.mxu2  ;;  %v6887_v30 = vpop.f32.mrf.mxu3 }
 0xc84   : > { %v7062_v39 = vpop.f32.mrf.mxu0  ;;  %v7091_v29 = vpop.f32.mrf.mxu1  ;;  %v7159_v53 = vpack.c.bf16 %v6940_v37, %v6939_v34  ;;  %v6901_v23 = vmul.f32 %v6887_v30, %v11264_v49  ;;  %v6925_v21 = vmul.f32 %v6887_v30, %v11274_v0 }
 0xc85   : > { %v7287_v16 = vpack.c.bf16 %v7151_v43, %v7150_v38  ;;  %v7109_v55 = vmul.f32 %v11335_v4, %v7091_v29  ;;  %v7135_v32 = vmul.f32 %v11341_v8, %v7091_v29 }
 0xc86   : > { %7175 = vmatmul.bf16.gmra.mxu2 %v7159_v53  ;;  %7204 = vmatmul.bf16.gmra.mxu3 %v7159_v53  ;;  %v6909_v58 = vadd.f32 %v6901_v23, %v11271_v45  ;;  %v6933_v51 = vadd.f32 %v6925_v21, %v11280_v11 }
 0xc87   : > { %7379 = vmatmul.bf16.vlgmr.msra.gmra.mxu0 %v7287_v16  ;;  %7408 = vmatmul.bf16.vlgmr.msra.gmra.mxu1 %v7287_v16  ;;  %v7118_v61 = vadd.f32 %v11339_v41, %v7109_v55  ;;  %v7144_v3 = vadd.f32 %v11349_v54, %v7135_v32 }
 0xc88   : > { %v6917_v50 = vmul.f32 %v6909_v58, %v6858_v48 }
 0xc89   : > { %v7126_v52 = vmul.f32 %v7118_v61, %v7062_v39 }
 0xc8a   : > { %v6941_v57 = vadd.f32 %v6933_v51, %v6917_v50 }
 0xc8b   : > { %v6860_v33 = vpop.f32.mrf.mxu2  ;;  %v6889_v2 = vpop.f32.mrf.mxu3  ;;  %v7152_v20 = vadd.f32 %v7144_v3, %v7126_v52 }
 0xc8c   : > { %v6902_v35 = vmul.f32 %v6889_v2, %v11264_v49  ;;  %v6926_v24 = vmul.f32 %v6889_v2, %v11274_v0  ;;  %v7064_v1 = vpop.f32.mrf.mxu0  ;;  %v7093_v31 = vpop.f32.mrf.mxu1 }
 0xc8d   : > { %v7110_v36 = vmul.f32 %v11335_v4, %v7093_v31  ;;  %v7136_v42 = vmul.f32 %v11341_v8, %v7093_v31 }
 0xc8e   : > { %v6910_v47 = vadd.f32 %v6902_v35, %v11271_v45  ;;  %v6934_v60 = vadd.f32 %v6926_v24, %v11280_v11 }
 0xc8f   : > { %v7119_v27 = vadd.f32 %v11339_v41, %v7110_v36  ;;  %v7145_v5 = vadd.f32 %v11349_v54, %v7136_v42 }
 0xc90   : > { %v6918_v59 = vmul.f32 %v6910_v47, %v6860_v33 }
 0xc91   : > { %v7127_v63 = vmul.f32 %v7119_v27, %v7064_v1 }
 0xc92   : > { %v6942_v9 = vadd.f32 %v6934_v60, %v6918_v59 }
 0xc93   : > { %v7153_v19 = vadd.f32 %v7145_v5, %v7127_v63  ;;  %v6892_v10 = vpop.f32.mrf.mxu3  ;;  %v6863_v44 = vpop.f32.mrf.mxu2 }
 0xc94   : > { %v7067_v6 = vpop.f32.mrf.mxu0  ;;  %v7096_v56 = vpop.f32.mrf.mxu1  ;;  %v7160_v17 = vpack.c.bf16 %v6942_v9, %v6941_v57  ;;  %v6903_v13 = vmul.f32 %v6892_v10, %v11264_v49  ;;  %v6927_v25 = vmul.f32 %v6892_v10, %v11274_v0  ;;  %v7286_v57 = vld [vmem:[#allocation5 + $0x58] sm:$0xf] }
 0xc95   : > { %v7288_v12 = vpack.c.bf16 %v7153_v19, %v7152_v20  ;;  %v7111_v14 = vmul.f32 %v11335_v4, %v7096_v56  ;;  %v7137_v62 = vmul.f32 %v11341_v8, %v7096_v56  ;;  %v11401_v10 = vperm.slane %v7286_v57, 3 }
 0xc96   : > { %7180 = vmatmul.bf16.gmra.mxu2 %v7160_v17  ;;  %7209 = vmatmul.bf16.gmra.mxu3 %v7160_v17  ;;  %v6911_v15 = vadd.f32 %v6903_v13, %v11271_v45  ;;  %v6935_v39 = vadd.f32 %v6927_v25, %v11280_v11 }
 0xc97   : > { %7384 = vmatmul.bf16.gmra.mxu0 %v7288_v12  ;;  %7413 = vmatmul.bf16.gmra.mxu1 %v7288_v12  ;;  %v7120_v40 = vadd.f32 %v11339_v41, %v7111_v14  ;;  %v7146_v29 = vadd.f32 %v11349_v54, %v7137_v62  ;;  %v11408_v12 = vperm.slane %v7286_v57, 1 }
 0xc98   : > { %v6919_v37 = vmul.f32 %v6911_v15, %v6863_v44 }
 0xc99   : > { %v7128_v43 = vmul.f32 %v7120_v40, %v7067_v6  ;;  %v11403_v6 = vperm.slane %v7286_v57, 2 }
 0xc9a   : > { %v6943_v23 = vadd.f32 %v6935_v39, %v6919_v37 }
 0xc9b   : > { %v6894_v18 = vpop.f32.mrf.mxu3  ;;  %v6865_v48 = vpop.f32.mrf.mxu2  ;;  %v7154_v58 = vadd.f32 %v7146_v29, %v7128_v43 }
 0xc9c   : > { %v6904_v22 = vmul.f32 %v6894_v18, %v11264_v49  ;;  %v6928_v26 = vmul.f32 %v6894_v18, %v11274_v0  ;;  %v7069_v28 = vpop.f32.mrf.mxu0  ;;  %v7098_v46 = vpop.f32.mrf.mxu1 }
 0xc9d   : > { %v7112_v7 = vmul.f32 %v11335_v4, %v7098_v46  ;;  %v7138_v34 = vmul.f32 %v11341_v8, %v7098_v46 }
 0xc9e   : > { %v6912_v38 = vadd.f32 %v6904_v22, %v11271_v45  ;;  %v6936_v0 = vadd.f32 %v6928_v26, %v11280_v11  ;;  %v11414_v22 = vperm.slane %v7286_v57, 0 }
 0xc9f   : > { %v7121_v30 = vadd.f32 %v11339_v41, %v7112_v7  ;;  %v7147_v16 = vadd.f32 %v11349_v54, %v7138_v34 }
 0xca0   : > { %v6920_v49 = vmul.f32 %v6912_v38, %v6865_v48 }
 0xca1   : > { %v7129_v53 = vmul.f32 %v7121_v30, %v7069_v28 }
 0xca2   : > { %v6944_v55 = vadd.f32 %v6936_v0, %v6920_v49 }
 0xca3   : > { %v7155_v61 = vadd.f32 %v7147_v16, %v7129_v53 }
 0xca4   : > { %v7101_v33 = vpop.f32.mrf.mxu1  ;;  %v7161_v45 = vpack.c.bf16 %v6944_v55, %v6943_v23  ;;  %v7072_v21 = vpop.f32.mrf.mxu0 }
 0xca5   : > { %v7289_v2 = vpack.c.bf16 %v7155_v61, %v7154_v58  ;;  %v7113_v35 = vmul.f32 %v11335_v4, %v7101_v33  ;;  %v7139_v1 = vmul.f32 %v11341_v8, %v7101_v33 }
 0xca6   : > { %7185 = vmatmul.bf16.gmra.mxu2 %v7161_v45  ;;  %7214 = vmatmul.bf16.gmra.mxu3 %v7161_v45 }
 0xca7   : > { %7389 = vmatmul.bf16.gmra.mxu0 %v7289_v2  ;;  %7418 = vmatmul.bf16.gmra.mxu1 %v7289_v2  ;;  %v7122_v11 = vadd.f32 %v11339_v41, %v7113_v35  ;;  %v7148_v47 = vadd.f32 %v11349_v54, %v7139_v1 }
 0xca9   : > { %v7130_v36 = vmul.f32 %v7122_v11, %v7072_v21 }
 0xcab   : > { %v7156_v51 = vadd.f32 %v7148_v47, %v7130_v36 }
 0xcac   : > { %v7103_v24 = vpop.f32.mrf.mxu1  ;;  %v7074_v50 = vpop.f32.mrf.mxu0 }
 0xcad   : > { %v7114_v31 = vmul.f32 %v11335_v4, %v7103_v24  ;;  %v7140_v32 = vmul.f32 %v11341_v8, %v7103_v24 }
 0xcaf   : > { %v7123_v42 = vadd.f32 %v11339_v41, %v7114_v31  ;;  %v7149_v27 = vadd.f32 %v11349_v54, %v7140_v32 }
 0xcb1   : > { %v7131_v52 = vmul.f32 %v7123_v42, %v7074_v50 }
 0xcb3   : > { %v7157_v59 = vadd.f32 %v7149_v27, %v7131_v52 }
 0xcb5   : > { %v7290_v60 = vpack.c.bf16 %v7157_v59, %v7156_v51 }
 0xcb7   : > { %7394 = vmatmul.bf16.gmra.mxu0 %v7290_v60  ;;  %7423 = vmatmul.bf16.gmra.mxu1 %v7290_v60 }
 0xcf9   : > { %v7171_v3 = vpop.f32.mrf.mxu2  ;;  %v7200_v63 = vpop.f32.mrf.mxu3 }
 0xcfa   : > { %v7220_v5 = vmul.f32 %v7200_v63, %v11335_v4  ;;  %v7244_v56 = vmul.f32 %v7200_v63, %v11341_v8 }
 0xcfc   : > { %v7228_v9 = vadd.f32 %v7220_v5, %v11339_v41  ;;  %v7252_v26 = vadd.f32 %v7244_v56, %v11349_v54 }
 0xcfe   : > { %v7236_v13 = vmul.f32 %v7228_v9, %v7171_v3 }
 0xd00   : > { %v7260_v7 = vadd.f32 %v7252_v26, %v7236_v13 }
 0xd01   : > { %v7173_v20 = vpop.f32.mrf.mxu2  ;;  %v7202_v19 = vpop.f32.mrf.mxu3 }
 0xd02   : > { %v7221_v17 = vmul.f32 %v7202_v19, %v11335_v4  ;;  %v7245_v44 = vmul.f32 %v7202_v19, %v11341_v8 }
 0xd04   : > { %v7229_v14 = vadd.f32 %v7221_v17, %v11339_v41  ;;  %v7380_v15 = vpop.f32.mrf.mxu0  ;;  %v7409_v40 = vpop.f32.mrf.mxu1  ;;  %v7253_v46 = vadd.f32 %v7245_v44, %v11349_v54 }
 0xd05   : > { %v7430_v18 = vmul.f32 %v11401_v10, %v7409_v40  ;;  %v7456_v25 = vmul.f32 %v11403_v6, %v7409_v40 }
 0xd06   : > { %v7237_v28 = vmul.f32 %v7229_v14, %v7173_v20 }
 0xd07   : > { %v7439_v62 = vadd.f32 %v11408_v12, %v7430_v18  ;;  %v7465_v38 = vadd.f32 %v11414_v22, %v7456_v25 }
 0xd08   : > { %v7261_v34 = vadd.f32 %v7253_v46, %v7237_v28 }
 0xd09   : > { %v7447_v37 = vmul.f32 %v7439_v62, %v7380_v15  ;;  %v7176_v43 = vpop.f32.mrf.mxu2  ;;  %v7205_v48 = vpop.f32.mrf.mxu3 }
 0xd0a   : > { %v7481_v30 = vpack.c.bf16 %v7261_v34, %v7260_v7  ;;  %v7222_v49 = vmul.f32 %v7205_v48, %v11335_v4  ;;  %v7246_v2 = vmul.f32 %v7205_v48, %v11341_v8 }
 0xd0b   : > { %v7473_v39 = vadd.f32 %v7465_v38, %v7447_v37 }
 0xd0c   : > { %7493 = vmatmul.bf16.vlgmr.msra.gmra.mxu2 %v7481_v30  ;;  %7522 = vmatmul.bf16.vlgmr.msra.gmra.mxu3 %v7481_v30  ;;  %v7382_v0 = vpop.f32.mrf.mxu0  ;;  %v7411_v29 = vpop.f32.mrf.mxu1  ;;  %v7230_v55 = vadd.f32 %v7222_v49, %v11339_v41  ;;  %v7254_v50 = vadd.f32 %v7246_v2, %v11349_v54 }
 0xd0d   : > { %7591 = vst [vmem:[%s11423_s28] sm:$0xff] %v7473_v39  ;;  %v7431_v53 = vmul.f32 %v11401_v10, %v7411_v29  ;;  %v7457_v16 = vmul.f32 %v11403_v6, %v7411_v29 }
 0xd0e   : > { %v7238_v24 = vmul.f32 %v7230_v55, %v7176_v43 }
 0xd0f   : > { %v7440_v23 = vadd.f32 %v11408_v12, %v7431_v53  ;;  %v7466_v61 = vadd.f32 %v11414_v22, %v7457_v16 }
 0xd10   : > { %v7262_v51 = vadd.f32 %v7254_v50, %v7238_v24 }
 0xd11   : > { %v7448_v58 = vmul.f32 %v7440_v23, %v7382_v0  ;;  %v7178_v33 = vpop.f32.mrf.mxu2  ;;  %v7207_v45 = vpop.f32.mrf.mxu3 }
 0xd12   : > { %v7223_v21 = vmul.f32 %v7207_v45, %v11335_v4  ;;  %v7247_v35 = vmul.f32 %v7207_v45, %v11341_v8 }
 0xd13   : > { %v7474_v11 = vadd.f32 %v7466_v61, %v7448_v58 }
 0xd14   : > { %v7231_v1 = vadd.f32 %v7223_v21, %v11339_v41  ;;  %v7385_v31 = vpop.f32.mrf.mxu0  ;;  %v7414_v32 = vpop.f32.mrf.mxu1  ;;  %v7255_v52 = vadd.f32 %v7247_v35, %v11349_v54 }
 0xd15   : > { %7592 = vst [vmem:[%s11423_s28 + $0x8] sm:$0xff] %v7474_v11  ;;  %v7432_v36 = vmul.f32 %v11401_v10, %v7414_v32  ;;  %v7458_v42 = vmul.f32 %v11403_v6, %v7414_v32 }
 0xd16   : > { %v7239_v47 = vmul.f32 %v7231_v1, %v7178_v33 }
 0xd17   : > { %v7441_v27 = vadd.f32 %v11408_v12, %v7432_v36  ;;  %v7467_v3 = vadd.f32 %v11414_v22, %v7458_v42 }
 0xd18   : > { %v7263_v59 = vadd.f32 %v7255_v52, %v7239_v47 }
 0xd19   : > { %v7449_v60 = vmul.f32 %v7441_v27, %v7385_v31  ;;  %v7181_v63 = vpop.f32.mrf.mxu2  ;;  %v7210_v5 = vpop.f32.mrf.mxu3 }
 0xd1a   : > { %v7482_v57 = vpack.c.bf16 %v7263_v59, %v7262_v51  ;;  %v7224_v20 = vmul.f32 %v7210_v5, %v11335_v4  ;;  %v7248_v26 = vmul.f32 %v7210_v5, %v11341_v8 }
 0xd1b   : > { %v7475_v9 = vadd.f32 %v7467_v3, %v7449_v60 }
 0xd1c   : > { %7498 = vmatmul.bf16.gmra.mxu2 %v7482_v57  ;;  %7527 = vmatmul.bf16.gmra.mxu3 %v7482_v57  ;;  %v7387_v19 = vpop.f32.mrf.mxu0  ;;  %v7416_v56 = vpop.f32.mrf.mxu1  ;;  %v7232_v14 = vadd.f32 %v7224_v20, %v11339_v41  ;;  %v7256_v30 = vadd.f32 %v7248_v26, %v11349_v54 }
 0xd1d   : > { %7593 = vst [vmem:[%s11423_s28 + $0x10] sm:$0xff] %v7475_v9  ;;  %v7433_v17 = vmul.f32 %v11401_v10, %v7416_v56  ;;  %v7459_v44 = vmul.f32 %v11403_v6, %v7416_v56 }
 0xd1e   : > { %v7240_v7 = vmul.f32 %v7232_v14, %v7181_v63 }
 0xd1f   : > { %v7442_v13 = vadd.f32 %v11408_v12, %v7433_v17  ;;  %v7468_v40 = vadd.f32 %v11414_v22, %v7459_v44 }
 0xd20   : > { %v7264_v29 = vadd.f32 %v7256_v30, %v7240_v7 }
 0xd21   : > { %v7450_v15 = vmul.f32 %v7442_v13, %v7387_v19  ;;  %v7183_v18 = vpop.f32.mrf.mxu2  ;;  %v7212_v25 = vpop.f32.mrf.mxu3 }
 0xd22   : > { %v7225_v28 = vmul.f32 %v7212_v25, %v11335_v4  ;;  %v7249_v46 = vmul.f32 %v7212_v25, %v11341_v8 }
 0xd23   : > { %v7476_v62 = vadd.f32 %v7468_v40, %v7450_v15 }
 0xd24   : > { %v7233_v34 = vadd.f32 %v7225_v28, %v11339_v41  ;;  %v7390_v37 = vpop.f32.mrf.mxu0  ;;  %v7419_v38 = vpop.f32.mrf.mxu1  ;;  %v7257_v49 = vadd.f32 %v7249_v46, %v11349_v54 }
 0xd25   : > { %7594 = vst [vmem:[%s11423_s28 + $0x18] sm:$0xff] %v7476_v62  ;;  %v7434_v43 = vmul.f32 %v11401_v10, %v7419_v38  ;;  %v7460_v48 = vmul.f32 %v11403_v6, %v7419_v38 }
 0xd26   : > { %v7241_v39 = vmul.f32 %v7233_v34, %v7183_v18 }
 0xd27   : > { %v7443_v0 = vadd.f32 %v11408_v12, %v7434_v43  ;;  %v7469_v23 = vadd.f32 %v11414_v22, %v7460_v48 }
 0xd28   : > { %v7265_v53 = vadd.f32 %v7257_v49, %v7241_v39 }
 0xd29   : > { %v7451_v16 = vmul.f32 %v7443_v0, %v7390_v37  ;;  %v7215_v55 = vpop.f32.mrf.mxu3  ;;  %v7186_v33 = vpop.f32.mrf.mxu2 }
 0xd2a   : > { %v7483_v58 = vpack.c.bf16 %v7265_v53, %v7264_v29  ;;  %v7226_v45 = vmul.f32 %v7215_v55, %v11335_v4  ;;  %v7250_v42 = vmul.f32 %v7215_v55, %v11341_v8 }
 0xd2b   : > { %v7477_v61 = vadd.f32 %v7469_v23, %v7451_v16 }
 0xd2c   : > { %7503 = vmatmul.bf16.gmra.mxu2 %v7483_v58  ;;  %7532 = vmatmul.bf16.gmra.mxu3 %v7483_v58  ;;  %v7392_v2 = vpop.f32.mrf.mxu0  ;;  %v7421_v21 = vpop.f32.mrf.mxu1  ;;  %v7234_v1 = vadd.f32 %v7226_v45, %v11339_v41  ;;  %v7258_v5 = vadd.f32 %v7250_v42, %v11349_v54 }
 0xd2d   : > { %7595 = vst [vmem:[%s11423_s28 + $0x20] sm:$0xff] %v7477_v61  ;;  %v7435_v35 = vmul.f32 %v11401_v10, %v7421_v21  ;;  %v7461_v11 = vmul.f32 %v11403_v6, %v7421_v21 }
 0xd2e   : > { %v7242_v27 = vmul.f32 %v7234_v1, %v7186_v33 }
 0xd2f   : > { %v7444_v24 = vadd.f32 %v11408_v12, %v7435_v35  ;;  %v7470_v32 = vadd.f32 %v11414_v22, %v7461_v11 }
 0xd30   : > { %v7266_v20 = vadd.f32 %v7258_v5, %v7242_v27 }
 0xd31   : > { %v7452_v31 = vmul.f32 %v7444_v24, %v7392_v2  ;;  %v7217_v36 = vpop.f32.mrf.mxu3  ;;  %v7188_v60 = vpop.f32.mrf.mxu2 }
 0xd32   : > { %v7227_v50 = vmul.f32 %v7217_v36, %v11335_v4  ;;  %v7251_v47 = vmul.f32 %v7217_v36, %v11341_v8 }
 0xd33   : > { %v7478_v52 = vadd.f32 %v7470_v32, %v7452_v31 }
 0xd34   : > { %v7235_v51 = vadd.f32 %v7227_v50, %v11339_v41  ;;  %v7424_v59 = vpop.f32.mrf.mxu1  ;;  %v7259_v9 = vadd.f32 %v7251_v47, %v11349_v54  ;;  %v7395_v4 = vpop.f32.mrf.mxu0 }
 0xd35   : > { %7596 = vst [vmem:[%s11423_s28 + $0x28] sm:$0xff] %v7478_v52  ;;  %v7436_v3 = vmul.f32 %v11401_v10, %v7424_v59  ;;  %v7462_v63 = vmul.f32 %v11403_v6, %v7424_v59 }
 0xd36   : > { %v7243_v57 = vmul.f32 %v7235_v51, %v7188_v60 }
 0xd37   : > { %v7445_v8 = vadd.f32 %v11408_v12, %v7436_v3  ;;  %v7471_v56 = vadd.f32 %v11414_v22, %v7462_v63 }
 0xd38   : > { %v7267_v19 = vadd.f32 %v7259_v9, %v7243_v57 }
 0xd39   : > { %v7453_v41 = vmul.f32 %v7445_v8, %v7395_v4 }
 0xd3a   : > { %v7484_v17 = vpack.c.bf16 %v7267_v19, %v7266_v20 }
 0xd3b   : > { %v7479_v44 = vadd.f32 %v7471_v56, %v7453_v41 }
 0xd3c   : > { %7508 = vmatmul.bf16.gmra.mxu2 %v7484_v17  ;;  %7537 = vmatmul.bf16.gmra.mxu3 %v7484_v17  ;;  %v7426_v13 = vpop.f32.mrf.mxu1  ;;  %v7397_v40 = vpop.f32.mrf.mxu0 }
 0xd3d   : > { %7597 = vst [vmem:[%s11423_s28 + $0x30] sm:$0xff] %v7479_v44  ;;  %v7437_v14 = vmul.f32 %v11401_v10, %v7426_v13  ;;  %v7463_v15 = vmul.f32 %v11403_v6, %v7426_v13 }
 0xd3f   : > { %v7446_v54 = vadd.f32 %v11408_v12, %v7437_v14  ;;  %v7472_v25 = vadd.f32 %v11414_v22, %v7463_v15 }
 0xd41   : > { %v7454_v18 = vmul.f32 %v7446_v54, %v7397_v40 }
 0xd43   : > { %v7480_v26 = vadd.f32 %v7472_v25, %v7454_v18 }
 0xd45   : > { %7598 = vst [vmem:[%s11423_s28 + $0x38] sm:$0xff] %v7480_v26 }
 0xd8f   : > { %v7494_v28 = vpop.f32.mrf.mxu2  ;;  %v7523_v46 = vpop.f32.mrf.mxu3 }
 0xd90   : > { %v7543_v62 = vmul.f32 %v7523_v46, %v11401_v10  ;;  %v7567_v7 = vmul.f32 %v7523_v46, %v11403_v6 }
 0xd92   : > { %v7551_v34 = vadd.f32 %v7543_v62, %v11408_v12  ;;  %v7575_v38 = vadd.f32 %v7567_v7, %v11414_v22 }
 0xd94   : > { %v7559_v37 = vmul.f32 %v7551_v34, %v7494_v28 }
 0xd96   : > { %v7583_v43 = vadd.f32 %v7575_v38, %v7559_v37 }
 0xd97   : > { %v7496_v48 = vpop.f32.mrf.mxu2  ;;  %v7525_v30 = vpop.f32.mrf.mxu3 }
 0xd98   : > { %7599 = vst [vmem:[%s11423_s28 + $0x40] sm:$0xff] %v7583_v43  ;;  %v7544_v39 = vmul.f32 %v7525_v30, %v11401_v10  ;;  %v7568_v49 = vmul.f32 %v7525_v30, %v11403_v6 }
 0xd9a   : > { %v7552_v0 = vadd.f32 %v7544_v39, %v11408_v12  ;;  %v7576_v53 = vadd.f32 %v7568_v49, %v11414_v22 }
 0xd9c   : > { %v7560_v29 = vmul.f32 %v7552_v0, %v7496_v48 }
 0xd9e   : > { %v7584_v16 = vadd.f32 %v7576_v53, %v7560_v29 }
 0xd9f   : > { %v7499_v23 = vpop.f32.mrf.mxu2  ;;  %v7528_v55 = vpop.f32.mrf.mxu3 }
 0xda0   : > { %7600 = vst [vmem:[%s11423_s28 + $0x48] sm:$0xff] %v7584_v16  ;;  %v7545_v58 = vmul.f32 %v7528_v55, %v11401_v10  ;;  %v7569_v61 = vmul.f32 %v7528_v55, %v11403_v6 }
 0xda2   : > { %v7553_v33 = vadd.f32 %v7545_v58, %v11408_v12  ;;  %v7577_v2 = vadd.f32 %v7569_v61, %v11414_v22 }
 0xda4   : > { %v7561_v45 = vmul.f32 %v7553_v33, %v7499_v23 }
 0xda6   : > { %v7585_v21 = vadd.f32 %v7577_v2, %v7561_v45 }
 0xda7   : > { %v7501_v35 = vpop.f32.mrf.mxu2  ;;  %v7530_v11 = vpop.f32.mrf.mxu3 }
 0xda8   : > { %7601 = vst [vmem:[%s11423_s28 + $0x50] sm:$0xff] %v7585_v21  ;;  %v7546_v24 = vmul.f32 %v7530_v11, %v11401_v10  ;;  %v7570_v1 = vmul.f32 %v7530_v11, %v11403_v6 }
 0xdaa   : > { %v7554_v31 = vadd.f32 %v7546_v24, %v11408_v12  ;;  %v7578_v36 = vadd.f32 %v7570_v1, %v11414_v22 }
 0xdac   : > { %v7562_v32 = vmul.f32 %v7554_v31, %v7501_v35 }
 0xdae   : > { %v7586_v42 = vadd.f32 %v7578_v36, %v7562_v32 }
 0xdaf   : > { %v7504_v50 = vpop.f32.mrf.mxu2  ;;  %v7533_v47 = vpop.f32.mrf.mxu3 }
 0xdb0   : > { %7602 = vst [vmem:[%s11423_s28 + $0x58] sm:$0xff] %v7586_v42  ;;  %v7547_v52 = vmul.f32 %v7533_v47, %v11401_v10  ;;  %v7571_v27 = vmul.f32 %v7533_v47, %v11403_v6 }
 0xdb2   : > { %v7555_v51 = vadd.f32 %v7547_v52, %v11408_v12  ;;  %v7579_v60 = vadd.f32 %v7571_v27, %v11414_v22 }
 0xdb4   : > { %v7563_v59 = vmul.f32 %v7555_v51, %v7504_v50 }
 0xdb6   : > { %v7587_v3 = vadd.f32 %v7579_v60, %v7563_v59 }
 0xdb7   : > { %v7506_v63 = vpop.f32.mrf.mxu2  ;;  %v7535_v5 = vpop.f32.mrf.mxu3 }
 0xdb8   : > { %7603 = vst [vmem:[%s11423_s28 + $0x60] sm:$0xff] %v7587_v3  ;;  %v7548_v57 = vmul.f32 %v7535_v5, %v11401_v10  ;;  %v7572_v9 = vmul.f32 %v7535_v5, %v11403_v6 }
 0xdba   : > { %v7556_v4 = vadd.f32 %v7548_v57, %v11408_v12  ;;  %v7580_v20 = vadd.f32 %v7572_v9, %v11414_v22 }
 0xdbc   : > { %v7564_v8 = vmul.f32 %v7556_v4, %v7506_v63 }
 0xdbe   : > { %v7588_v19 = vadd.f32 %v7580_v20, %v7564_v8 }
 0xdbf   : > { %v7538_v41 = vpop.f32.mrf.mxu3  ;;  %v7509_v44 = vpop.f32.mrf.mxu2 }
 0xdc0   : > { %7604 = vst [vmem:[%s11423_s28 + $0x68] sm:$0xff] %v7588_v19  ;;  %v7549_v56 = vmul.f32 %v7538_v41, %v11401_v10  ;;  %v7573_v17 = vmul.f32 %v7538_v41, %v11403_v6 }
 0xdc2   : > { %v7557_v13 = vadd.f32 %v7549_v56, %v11408_v12  ;;  %v7581_v15 = vadd.f32 %v7573_v17, %v11414_v22 }
 0xdc4   : > { %v7565_v14 = vmul.f32 %v7557_v13, %v7509_v44 }
 0xdc6   : > { %v7589_v54 = vadd.f32 %v7581_v15, %v7565_v14 }
 0xdc7   : > { %v7540_v40 = vpop.f32.mrf.mxu3  ;;  %v7511_v28 = vpop.f32.mrf.mxu2 }
 0xdc8   : > { %7605 = vst [vmem:[%s11423_s28 + $0x70] sm:$0xff] %v7589_v54  ;;  %v7550_v18 = vmul.f32 %v7540_v40, %v11401_v10  ;;  %v7574_v25 = vmul.f32 %v7540_v40, %v11403_v6 }
 0xdca   : > { %v7558_v26 = vadd.f32 %v7550_v18, %v11408_v12  ;;  %v7582_v62 = vadd.f32 %v7574_v25, %v11414_v22 }
 0xdcc   : > { %v7566_v46 = vmul.f32 %v7558_v26, %v7511_v28 }
 0xdce   : > { %v7590_v7 = vadd.f32 %v7582_v62, %v7566_v46 }
 0xdd0   : > { %7606 = vst [vmem:[%s11423_s28 + $0x78] sm:$0xff] %v7590_v7 }
 0xdd1   : > { %9663 = shalt.err (!%p9660_p8)
}
 0xdd2   : > { %s9714_s24 = smov 128   ;;  %s9715_s25 = smov 8  }
 0xdd3   : > { %9518 = dma.vmem_to_hbm [thread:$0]  (%p9774_p5), %s7621_s6, 2048, %s7623_s7, %s7608_s16, %s9714_s24, %s9714_s24, %s9715_s25  }
 0xdd4 PF: > { %p9535_p9 = scmp.ge.s32.totalorder %s9706_s15, 2  ;;  %s7637_s26 = sand.u32 1, %s9694_s12  }
 0xdd5   : > { %s7638_s27 = scalar_lea.sflag [#allocation4], %s7637_s26 }
 0xdd6   : > { %p9528_p10 = pnand %p9535_p9, %p9778_p6 }
 0xdd8   : > { %p9529_p11 = pneg %p9528_p10 }
 0xdda   : > { %9689 = dma.done.wait (%p9529_p11), %s7638_s27, 2048  }
 0xddb   : > { %9691 = vsyncadd (%p9529_p11), %s7638_s27, 4294965248  ;;  %p15_p12 = scmp.ge.s32.totalorder %s9761_s18, 4   ;;  %s11565_s12 = smov %s9698_s13 }
 0xddc   : > { %s11566_s13 = smov %s9702_s14  ;;  %s11567_s14 = smov %s9772_s21 }
 0xddd   : > { %s11568_s15 = smov %s9761_s18  ;;  %17 = sbr.rel (!%p15_p12) target bundleno = 5 (0x5), region = 120 }
 0xde2   :  { %7644 = vsyncpa [#allocation3], 1 }
 0xde3   :  { %7646 = vsyncpa [#allocation3 + $0x1], 1 }
 0xde4   :  { %7647 = vsyncpa [#allocation6], 1 }
 0xde5   :  { %7648 = vsyncpa [#allocation4], 1 }
 0xde6   :  { %7650 = vsyncpa [#allocation4 + $0x1], 1 }

</bundles_post_ra>
